<compile_context>
chip_gen: v7x
topology: tpu7x:2x2x1
jax: 0.10.0
libtpu: 0.0.40
codegen_flags: <defaults>
</compile_context>

<pallas_src>
import jax
import jax.numpy as jnp
from jax import lax
from jax.experimental import pallas as pl
from jax.experimental.pallas import tpu as pltpu

IN_DIM = 28 * 28      # 784 (= 49 * 16, so layer-1 K needs no padding)
H1 = 200
H2 = 200
OUT_DIM = 10

KC = 16               # k's per packed weight chunk (lane extent of the weight layout)
H_PAD = 208           # 200 -> 208: multiple of 8 (sublanes) and of KC (13 chunks)
OUT_PAD = 16          # 10  -> 16 : multiple of 8 (sublanes); sliced back to 10
TB = 128              # batch tile: always lane-dense
NEG = -1.0e30         # "minus infinity" for max-plus padding (finite => no inf/nan)
N_SPLIT_H = 2         # hidden N sub-tiled into 104-sublane halves (low vreg pressure)


def _round_up(n, m):
    return (n + m - 1) // m * m


def _maxplus_layer(a_ref, w_ref, out_ref, *, n_split):
    """Tropical (max-plus) layer: out[n, b] = max_k ( a[k, b] + w[k, n] ).

    a_ref  : (K, B)          activations, feature-major (K on sublanes, batch on lanes)
    w_ref  : (K//KC, N, KC)  packed weights, w_ref[c, n, j] == W[c*KC + j, n]
    out_ref: (N, B)
    Per K-chunk: one sublane slice of activations, one leading-dim chunk load of
    weights, then KC statically-unrolled per-k accumulations (lane-broadcast of the
    weight column + sublane-broadcast of the activation row -> add -> max).
    """
    n_chunks, n_pad, kc = w_ref.shape
    b = a_ref.shape[1]
    n_sub = n_pad // n_split

    for s in range(n_split):                      # N sub-tiles, each written to the ref
        lo = s * n_sub

        def body(c, acc, lo=lo):
            k0 = pl.multiple_of(c * kc, kc)
            ab = a_ref[pl.ds(k0, kc), :]          # (KC, B)     sublane slice
            wb = w_ref[c, lo:lo + n_sub, :]       # (n_sub, KC) dynamic leading index
            for k in range(kc):                   # static unroll, per-k accumulation
                acc = jnp.maximum(acc, wb[:, k:k + 1] + ab[k:k + 1, :])
            return acc

        acc0 = jnp.full((n_sub, b), NEG, dtype=jnp.float32)
        out_ref[lo:lo + n_sub, :] = lax.fori_loop(0, n_chunks, body, acc0)


def morph_mlp_kernel(xT_ref, w1_ref, w2_ref, w3_ref, outT_ref, h1_ref, h2_ref):
    _maxplus_layer(xT_ref, w1_ref, h1_ref, n_split=N_SPLIT_H)    # 784 -> 208
    _maxplus_layer(h1_ref, w2_ref, h2_ref, n_split=N_SPLIT_H)    # 208 -> 208
    _maxplus_layer(h2_ref, w3_ref, outT_ref, n_split=1)          # 208 -> 16


def _pack_weight(w, k_pad, n_pad):
    """(K, N) -> (k_pad//KC, n_pad, KC) with out[c, n, j] = W[c*KC + j, n].

    Padding value is NEG ("minus infinity") so padded K rows / N columns can never
    win the max.
    """
    k, n = w.shape
    wp = jnp.full((k_pad, n_pad), NEG, jnp.float32).at[:k, :n].set(w.astype(jnp.float32))
    return wp.T.reshape(n_pad, k_pad // KC, KC).transpose(1, 0, 2)


@jax.jit
def morphological_network(x_nchw, w1, w2, w3):
    """x_nchw: (B, 1, 28, 28) float32 -> logits (B, 10) float32."""
    B = x_nchw.shape[0]
    x_flat = x_nchw.reshape(B, -1).astype(jnp.float32)            # nn.Flatten
    assert x_flat.shape[1] == IN_DIM

    b_pad = _round_up(B, TB)                                       # lane-dense batch tiles
    # Feature-major activations; padded batch columns are zero (finite, sliced off).
    xT = jnp.zeros((IN_DIM, b_pad), jnp.float32).at[:, :B].set(x_flat.T)

    w1p = _pack_weight(w1, IN_DIM, H_PAD)     # (49, 208, 16)
    w2p = _pack_weight(w2, H_PAD, H_PAD)      # (13, 208, 16)
    w3p = _pack_weight(w3, H_PAD, OUT_PAD)    # (13, 16, 16)

    outT = pl.pallas_call(
        morph_mlp_kernel,
        out_shape=jax.ShapeDtypeStruct((OUT_PAD, b_pad), jnp.float32),
        grid_spec=pltpu.PrefetchScalarGridSpec(
            num_scalar_prefetch=0,
            grid=(b_pad // TB,),
            in_specs=[
                pl.BlockSpec((IN_DIM, TB), lambda i: (0, i)),               # x, batch-tiled
                pl.BlockSpec((IN_DIM // KC, H_PAD, KC), lambda i: (0, 0, 0)),  # VMEM-resident
                pl.BlockSpec((H_PAD // KC, H_PAD, KC), lambda i: (0, 0, 0)),
                pl.BlockSpec((H_PAD // KC, OUT_PAD, KC), lambda i: (0, 0, 0)),
            ],
            out_specs=pl.BlockSpec((OUT_PAD, TB), lambda i: (0, i)),
            scratch_shapes=[
                pltpu.VMEM((H_PAD, TB), jnp.float32),    # h1 (feature-major)
                pltpu.VMEM((H_PAD, TB), jnp.float32),    # h2 (feature-major)
            ],
        ),
        compiler_params=pltpu.CompilerParams(
            dimension_semantics=("parallel",),   # batches >= 256 use both TCs on v7x
            vmem_limit_bytes=32 << 20,
        ),
    )(xT, w1p, w2p, w3p)

    return outT[:OUT_DIM, :B].T                                     # (B, 10)


def _init_params(key):
    k1, k2, k3 = jax.random.split(key, 3)
    # Deterministic small-scale init (synthetic weights, not a checkpoint).
    w1 = jax.random.normal(k1, (IN_DIM, H1), jnp.float32) * 0.05
    w2 = jax.random.normal(k2, (H1, H2), jnp.float32) * 0.05
    w3 = jax.random.normal(k3, (H2, OUT_DIM), jnp.float32) * 0.05
    return w1, w2, w3


def _reference(x_nchw, w1, w2, w3):
    # Pure-JAX reference of the same max-plus semantics.
    x = x_nchw.reshape(x_nchw.shape[0], -1)
    h1 = jnp.max(x[:, :, None] + w1[None], axis=1)
    h2 = jnp.max(h1[:, :, None] + w2[None], axis=1)
    return jnp.max(h2[:, :, None] + w3[None], axis=1)


if __name__ == "__main__":
    key = jax.random.PRNGKey(0)
    kx, kw = jax.random.split(key)

    # Small batch; 28x28 single-channel input implied by the 28*28 flatten.
    x = jax.random.normal(kx, (2, 1, 28, 28), jnp.float32)
    w1, w2, w3 = _init_params(kw)

    logits = jax.block_until_ready(morphological_network(x, w1, w2, w3))
    ref = _reference(x, w1, w2, w3)
    assert logits.shape == (2, 10)
    assert jnp.allclose(logits, ref, atol=1e-5, rtol=1e-5)

    # Exercise multi-tile batch grid (grid = 2) + batch padding.
    x2 = jax.random.normal(jax.random.PRNGKey(1), (130, 1, 28, 28), jnp.float32)
    logits2 = jax.block_until_ready(morphological_network(x2, w1, w2, w3))
    assert logits2.shape == (130, 10)
    assert jnp.allclose(logits2, _reference(x2, w1, w2, w3), atol=1e-5, rtol=1e-5)

    # TODO(synk): `MorphologicalMax` is not defined in the provided source; it is
    # interpreted here as 3 stacked max-plus (dilation) layers 784->200->200->10.
    print("KERNEL_OK")
</pallas_src>

<mosaic_0001>
module attributes {stable_mosaic.version = 11 : i64} {
  func.func @morph_mlp_kernel(%arg0: i32, %arg1: memref<784x128xf32, #tpu.memory_space<vmem>>, %arg2: memref<49x208x16xf32, #tpu.memory_space<vmem>>, %arg3: memref<13x208x16xf32, #tpu.memory_space<vmem>>, %arg4: memref<13x16x16xf32, #tpu.memory_space<vmem>>, %arg5: memref<16x128xf32, #tpu.memory_space<vmem>>, %arg6: memref<208x128xf32, #tpu.memory_space<vmem>>, %arg7: memref<208x128xf32, #tpu.memory_space<vmem>>) attributes {dimension_semantics = [#tpu.dimension_semantics<parallel>], iteration_bounds = array<i64: 1>, scalar_prefetch = 0 : i64, scratch_operands = 2 : i64, tpu.core_type = #tpu.core_type<tc>, window_params = [{transform_indices = @transform_0, window_bounds = array<i64: 784, 128>}, {pipeline_mode = #tpu.pipeline_mode<synchronous>, transform_indices = @transform_1, window_bounds = array<i64: 49, 208, 16>}, {pipeline_mode = #tpu.pipeline_mode<synchronous>, transform_indices = @transform_2, window_bounds = array<i64: 13, 208, 16>}, {pipeline_mode = #tpu.pipeline_mode<synchronous>, transform_indices = @transform_3, window_bounds = array<i64: 13, 16, 16>}, {transform_indices = @transform_4, window_bounds = array<i64: 16, 128>}]} {
    %cst = arith.constant -1.000000e+30 : f32
    %0 = vector.broadcast %cst : f32 to vector<104x128xf32>
    %c0_i32 = arith.constant 0 : i32
    %c49_i32 = arith.constant 49 : i32
    %1 = arith.addi %c0_i32, %c49_i32 : i32
    %c1_i32 = arith.constant 1 : i32
    %2 = scf.for %arg8 = %c0_i32 to %1 step %c1_i32 iter_args(%arg9 = %0) -> (vector<104x128xf32>)  : i32 {
      %c16_i32 = arith.constant 16 : i32
      %20 = arith.muli %arg8, %c16_i32 : i32
      %21 = tpu.assume_multiple %20, 16 : i32
      %22 = arith.index_cast %21 : i32 to index
      %c0_28 = arith.constant 0 : index
      %23 = vector.load %arg1[%22, %c0_28] : memref<784x128xf32, #tpu.memory_space<vmem>>, vector<16x128xf32>
      %24 = arith.index_cast %arg8 : i32 to index
      %c0_29 = arith.constant 0 : index
      %c0_30 = arith.constant 0 : index
      %25 = vector.load %arg2[%24, %c0_29, %c0_30] : memref<49x208x16xf32, #tpu.memory_space<vmem>>, vector<1x104x16xf32>
      %26 = vector.shape_cast %25 : vector<1x104x16xf32> to vector<104x16xf32>
      %27 = vector.extract_strided_slice %26 {offsets = [0, 0], sizes = [104, 1], strides = [1, 1]} : vector<104x16xf32> to vector<104x1xf32>
      %28 = vector.extract_strided_slice %23 {offsets = [0, 0], sizes = [1, 128], strides = [1, 1]} : vector<16x128xf32> to vector<1x128xf32>
      %29 = vector.broadcast %27 : vector<104x1xf32> to vector<104x128xf32>
      %30 = vector.broadcast %28 : vector<1x128xf32> to vector<104x128xf32>
      %31 = arith.addf %29, %30 : vector<104x128xf32>
      %32 = arith.maximumf %arg9, %31 : vector<104x128xf32>
      %33 = vector.extract_strided_slice %26 {offsets = [0, 1], sizes = [104, 1], strides = [1, 1]} : vector<104x16xf32> to vector<104x1xf32>
      %34 = vector.extract_strided_slice %23 {offsets = [1, 0], sizes = [1, 128], strides = [1, 1]} : vector<16x128xf32> to vector<1x128xf32>
      %35 = vector.broadcast %33 : vector<104x1xf32> to vector<104x128xf32>
      %36 = vector.broadcast %34 : vector<1x128xf32> to vector<104x128xf32>
      %37 = arith.addf %35, %36 : vector<104x128xf32>
      %38 = arith.maximumf %32, %37 : vector<104x128xf32>
      %39 = vector.extract_strided_slice %26 {offsets = [0, 2], sizes = [104, 1], strides = [1, 1]} : vector<104x16xf32> to vector<104x1xf32>
      %40 = vector.extract_strided_slice %23 {offsets = [2, 0], sizes = [1, 128], strides = [1, 1]} : vector<16x128xf32> to vector<1x128xf32>
      %41 = vector.broadcast %39 : vector<104x1xf32> to vector<104x128xf32>
      %42 = vector.broadcast %40 : vector<1x128xf32> to vector<104x128xf32>
      %43 = arith.addf %41, %42 : vector<104x128xf32>
      %44 = arith.maximumf %38, %43 : vector<104x128xf32>
      %45 = vector.extract_strided_slice %26 {offsets = [0, 3], sizes = [104, 1], strides = [1, 1]} : vector<104x16xf32> to vector<104x1xf32>
      %46 = vector.extract_strided_slice %23 {offsets = [3, 0], sizes = [1, 128], strides = [1, 1]} : vector<16x128xf32> to vector<1x128xf32>
      %47 = vector.broadcast %45 : vector<104x1xf32> to vector<104x128xf32>
      %48 = vector.broadcast %46 : vector<1x128xf32> to vector<104x128xf32>
      %49 = arith.addf %47, %48 : vector<104x128xf32>
      %50 = arith.maximumf %44, %49 : vector<104x128xf32>
      %51 = vector.extract_strided_slice %26 {offsets = [0, 4], sizes = [104, 1], strides = [1, 1]} : vector<104x16xf32> to vector<104x1xf32>
      %52 = vector.extract_strided_slice %23 {offsets = [4, 0], sizes = [1, 128], strides = [1, 1]} : vector<16x128xf32> to vector<1x128xf32>
      %53 = vector.broadcast %51 : vector<104x1xf32> to vector<104x128xf32>
      %54 = vector.broadcast %52 : vector<1x128xf32> to vector<104x128xf32>
      %55 = arith.addf %53, %54 : vector<104x128xf32>
      %56 = arith.maximumf %50, %55 : vector<104x128xf32>
      %57 = vector.extract_strided_slice %26 {offsets = [0, 5], sizes = [104, 1], strides = [1, 1]} : vector<104x16xf32> to vector<104x1xf32>
      %58 = vector.extract_strided_slice %23 {offsets = [5, 0], sizes = [1, 128], strides = [1, 1]} : vector<16x128xf32> to vector<1x128xf32>
      %59 = vector.broadcast %57 : vector<104x1xf32> to vector<104x128xf32>
      %60 = vector.broadcast %58 : vector<1x128xf32> to vector<104x128xf32>
      %61 = arith.addf %59, %60 : vector<104x128xf32>
      %62 = arith.maximumf %56, %61 : vector<104x128xf32>
      %63 = vector.extract_strided_slice %26 {offsets = [0, 6], sizes = [104, 1], strides = [1, 1]} : vector<104x16xf32> to vector<104x1xf32>
      %64 = vector.extract_strided_slice %23 {offsets = [6, 0], sizes = [1, 128], strides = [1, 1]} : vector<16x128xf32> to vector<1x128xf32>
      %65 = vector.broadcast %63 : vector<104x1xf32> to vector<104x128xf32>
      %66 = vector.broadcast %64 : vector<1x128xf32> to vector<104x128xf32>
      %67 = arith.addf %65, %66 : vector<104x128xf32>
      %68 = arith.maximumf %62, %67 : vector<104x128xf32>
      %69 = vector.extract_strided_slice %26 {offsets = [0, 7], sizes = [104, 1], strides = [1, 1]} : vector<104x16xf32> to vector<104x1xf32>
      %70 = vector.extract_strided_slice %23 {offsets = [7, 0], sizes = [1, 128], strides = [1, 1]} : vector<16x128xf32> to vector<1x128xf32>
      %71 = vector.broadcast %69 : vector<104x1xf32> to vector<104x128xf32>
      %72 = vector.broadcast %70 : vector<1x128xf32> to vector<104x128xf32>
      %73 = arith.addf %71, %72 : vector<104x128xf32>
      %74 = arith.maximumf %68, %73 : vector<104x128xf32>
      %75 = vector.extract_strided_slice %26 {offsets = [0, 8], sizes = [104, 1], strides = [1, 1]} : vector<104x16xf32> to vector<104x1xf32>
      %76 = vector.extract_strided_slice %23 {offsets = [8, 0], sizes = [1, 128], strides = [1, 1]} : vector<16x128xf32> to vector<1x128xf32>
      %77 = vector.broadcast %75 : vector<104x1xf32> to vector<104x128xf32>
      %78 = vector.broadcast %76 : vector<1x128xf32> to vector<104x128xf32>
      %79 = arith.addf %77, %78 : vector<104x128xf32>
      %80 = arith.maximumf %74, %79 : vector<104x128xf32>
      %81 = vector.extract_strided_slice %26 {offsets = [0, 9], sizes = [104, 1], strides = [1, 1]} : vector<104x16xf32> to vector<104x1xf32>
      %82 = vector.extract_strided_slice %23 {offsets = [9, 0], sizes = [1, 128], strides = [1, 1]} : vector<16x128xf32> to vector<1x128xf32>
      %83 = vector.broadcast %81 : vector<104x1xf32> to vector<104x128xf32>
      %84 = vector.broadcast %82 : vector<1x128xf32> to vector<104x128xf32>
      %85 = arith.addf %83, %84 : vector<104x128xf32>
      %86 = arith.maximumf %80, %85 : vector<104x128xf32>
      %87 = vector.extract_strided_slice %26 {offsets = [0, 10], sizes = [104, 1], strides = [1, 1]} : vector<104x16xf32> to vector<104x1xf32>
      %88 = vector.extract_strided_slice %23 {offsets = [10, 0], sizes = [1, 128], strides = [1, 1]} : vector<16x128xf32> to vector<1x128xf32>
      %89 = vector.broadcast %87 : vector<104x1xf32> to vector<104x128xf32>
      %90 = vector.broadcast %88 : vector<1x128xf32> to vector<104x128xf32>
      %91 = arith.addf %89, %90 : vector<104x128xf32>
      %92 = arith.maximumf %86, %91 : vector<104x128xf32>
      %93 = vector.extract_strided_slice %26 {offsets = [0, 11], sizes = [104, 1], strides = [1, 1]} : vector<104x16xf32> to vector<104x1xf32>
      %94 = vector.extract_strided_slice %23 {offsets = [11, 0], sizes = [1, 128], strides = [1, 1]} : vector<16x128xf32> to vector<1x128xf32>
      %95 = vector.broadcast %93 : vector<104x1xf32> to vector<104x128xf32>
      %96 = vector.broadcast %94 : vector<1x128xf32> to vector<104x128xf32>
      %97 = arith.addf %95, %96 : vector<104x128xf32>
      %98 = arith.maximumf %92, %97 : vector<104x128xf32>
      %99 = vector.extract_strided_slice %26 {offsets = [0, 12], sizes = [104, 1], strides = [1, 1]} : vector<104x16xf32> to vector<104x1xf32>
      %100 = vector.extract_strided_slice %23 {offsets = [12, 0], sizes = [1, 128], strides = [1, 1]} : vector<16x128xf32> to vector<1x128xf32>
      %101 = vector.broadcast %99 : vector<104x1xf32> to vector<104x128xf32>
      %102 = vector.broadcast %100 : vector<1x128xf32> to vector<104x128xf32>
      %103 = arith.addf %101, %102 : vector<104x128xf32>
      %104 = arith.maximumf %98, %103 : vector<104x128xf32>
      %105 = vector.extract_strided_slice %26 {offsets = [0, 13], sizes = [104, 1], strides = [1, 1]} : vector<104x16xf32> to vector<104x1xf32>
      %106 = vector.extract_strided_slice %23 {offsets = [13, 0], sizes = [1, 128], strides = [1, 1]} : vector<16x128xf32> to vector<1x128xf32>
      %107 = vector.broadcast %105 : vector<104x1xf32> to vector<104x128xf32>
      %108 = vector.broadcast %106 : vector<1x128xf32> to vector<104x128xf32>
      %109 = arith.addf %107, %108 : vector<104x128xf32>
      %110 = arith.maximumf %104, %109 : vector<104x128xf32>
      %111 = vector.extract_strided_slice %26 {offsets = [0, 14], sizes = [104, 1], strides = [1, 1]} : vector<104x16xf32> to vector<104x1xf32>
      %112 = vector.extract_strided_slice %23 {offsets = [14, 0], sizes = [1, 128], strides = [1, 1]} : vector<16x128xf32> to vector<1x128xf32>
      %113 = vector.broadcast %111 : vector<104x1xf32> to vector<104x128xf32>
      %114 = vector.broadcast %112 : vector<1x128xf32> to vector<104x128xf32>
      %115 = arith.addf %113, %114 : vector<104x128xf32>
      %116 = arith.maximumf %110, %115 : vector<104x128xf32>
      %117 = vector.extract_strided_slice %26 {offsets = [0, 15], sizes = [104, 1], strides = [1, 1]} : vector<104x16xf32> to vector<104x1xf32>
      %118 = vector.extract_strided_slice %23 {offsets = [15, 0], sizes = [1, 128], strides = [1, 1]} : vector<16x128xf32> to vector<1x128xf32>
      %119 = vector.broadcast %117 : vector<104x1xf32> to vector<104x128xf32>
      %120 = vector.broadcast %118 : vector<1x128xf32> to vector<104x128xf32>
      %121 = arith.addf %119, %120 : vector<104x128xf32>
      %122 = arith.maximumf %116, %121 : vector<104x128xf32>
      scf.yield %122 : vector<104x128xf32>
    }
    %c49_i32_0 = arith.constant 49 : i32
    %c0 = arith.constant 0 : index
    %c0_1 = arith.constant 0 : index
    %3 = vector.load %arg6[%c0, %c0_1] : memref<208x128xf32, #tpu.memory_space<vmem>>, vector<104x128xf32>
    tpu.vector_store %arg6[%c0, %c0_1], %2 {strides = array<i32>} : memref<208x128xf32, #tpu.memory_space<vmem>>, vector<104x128xf32>,
    %cst_2 = arith.constant -1.000000e+30 : f32
    %4 = vector.broadcast %cst_2 : f32 to vector<104x128xf32>
    %c0_i32_3 = arith.constant 0 : i32
    %c49_i32_4 = arith.constant 49 : i32
    %5 = arith.addi %c0_i32_3, %c49_i32_4 : i32
    %c1_i32_5 = arith.constant 1 : i32
    %6 = scf.for %arg8 = %c0_i32_3 to %5 step %c1_i32_5 iter_args(%arg9 = %4) -> (vector<104x128xf32>)  : i32 {
      %c16_i32 = arith.constant 16 : i32
      %20 = arith.muli %arg8, %c16_i32 : i32
      %21 = tpu.assume_multiple %20, 16 : i32
      %22 = arith.index_cast %21 : i32 to index
      %c0_28 = arith.constant 0 : index
      %23 = vector.load %arg1[%22, %c0_28] : memref<784x128xf32, #tpu.memory_space<vmem>>, vector<16x128xf32>
      %24 = arith.index_cast %arg8 : i32 to index
      %c104_29 = arith.constant 104 : index
      %c0_30 = arith.constant 0 : index
      %25 = vector.load %arg2[%24, %c104_29, %c0_30] : memref<49x208x16xf32, #tpu.memory_space<vmem>>, vector<1x104x16xf32>
      %26 = vector.shape_cast %25 : vector<1x104x16xf32> to vector<104x16xf32>
      %27 = vector.extract_strided_slice %26 {offsets = [0, 0], sizes = [104, 1], strides = [1, 1]} : vector<104x16xf32> to vector<104x1xf32>
      %28 = vector.extract_strided_slice %23 {offsets = [0, 0], sizes = [1, 128], strides = [1, 1]} : vector<16x128xf32> to vector<1x128xf32>
      %29 = vector.broadcast %27 : vector<104x1xf32> to vector<104x128xf32>
      %30 = vector.broadcast %28 : vector<1x128xf32> to vector<104x128xf32>
      %31 = arith.addf %29, %30 : vector<104x128xf32>
      %32 = arith.maximumf %arg9, %31 : vector<104x128xf32>
      %33 = vector.extract_strided_slice %26 {offsets = [0, 1], sizes = [104, 1], strides = [1, 1]} : vector<104x16xf32> to vector<104x1xf32>
      %34 = vector.extract_strided_slice %23 {offsets = [1, 0], sizes = [1, 128], strides = [1, 1]} : vector<16x128xf32> to vector<1x128xf32>
      %35 = vector.broadcast %33 : vector<104x1xf32> to vector<104x128xf32>
      %36 = vector.broadcast %34 : vector<1x128xf32> to vector<104x128xf32>
      %37 = arith.addf %35, %36 : vector<104x128xf32>
      %38 = arith.maximumf %32, %37 : vector<104x128xf32>
      %39 = vector.extract_strided_slice %26 {offsets = [0, 2], sizes = [104, 1], strides = [1, 1]} : vector<104x16xf32> to vector<104x1xf32>
      %40 = vector.extract_strided_slice %23 {offsets = [2, 0], sizes = [1, 128], strides = [1, 1]} : vector<16x128xf32> to vector<1x128xf32>
      %41 = vector.broadcast %39 : vector<104x1xf32> to vector<104x128xf32>
      %42 = vector.broadcast %40 : vector<1x128xf32> to vector<104x128xf32>
      %43 = arith.addf %41, %42 : vector<104x128xf32>
      %44 = arith.maximumf %38, %43 : vector<104x128xf32>
      %45 = vector.extract_strided_slice %26 {offsets = [0, 3], sizes = [104, 1], strides = [1, 1]} : vector<104x16xf32> to vector<104x1xf32>
      %46 = vector.extract_strided_slice %23 {offsets = [3, 0], sizes = [1, 128], strides = [1, 1]} : vector<16x128xf32> to vector<1x128xf32>
      %47 = vector.broadcast %45 : vector<104x1xf32> to vector<104x128xf32>
      %48 = vector.broadcast %46 : vector<1x128xf32> to vector<104x128xf32>
      %49 = arith.addf %47, %48 : vector<104x128xf32>
      %50 = arith.maximumf %44, %49 : vector<104x128xf32>
      %51 = vector.extract_strided_slice %26 {offsets = [0, 4], sizes = [104, 1], strides = [1, 1]} : vector<104x16xf32> to vector<104x1xf32>
      %52 = vector.extract_strided_slice %23 {offsets = [4, 0], sizes = [1, 128], strides = [1, 1]} : vector<16x128xf32> to vector<1x128xf32>
      %53 = vector.broadcast %51 : vector<104x1xf32> to vector<104x128xf32>
      %54 = vector.broadcast %52 : vector<1x128xf32> to vector<104x128xf32>
      %55 = arith.addf %53, %54 : vector<104x128xf32>
      %56 = arith.maximumf %50, %55 : vector<104x128xf32>
      %57 = vector.extract_strided_slice %26 {offsets = [0, 5], sizes = [104, 1], strides = [1, 1]} : vector<104x16xf32> to vector<104x1xf32>
      %58 = vector.extract_strided_slice %23 {offsets = [5, 0], sizes = [1, 128], strides = [1, 1]} : vector<16x128xf32> to vector<1x128xf32>
      %59 = vector.broadcast %57 : vector<104x1xf32> to vector<104x128xf32>
      %60 = vector.broadcast %58 : vector<1x128xf32> to vector<104x128xf32>
      %61 = arith.addf %59, %60 : vector<104x128xf32>
      %62 = arith.maximumf %56, %61 : vector<104x128xf32>
      %63 = vector.extract_strided_slice %26 {offsets = [0, 6], sizes = [104, 1], strides = [1, 1]} : vector<104x16xf32> to vector<104x1xf32>
      %64 = vector.extract_strided_slice %23 {offsets = [6, 0], sizes = [1, 128], strides = [1, 1]} : vector<16x128xf32> to vector<1x128xf32>
      %65 = vector.broadcast %63 : vector<104x1xf32> to vector<104x128xf32>
      %66 = vector.broadcast %64 : vector<1x128xf32> to vector<104x128xf32>
      %67 = arith.addf %65, %66 : vector<104x128xf32>
      %68 = arith.maximumf %62, %67 : vector<104x128xf32>
      %69 = vector.extract_strided_slice %26 {offsets = [0, 7], sizes = [104, 1], strides = [1, 1]} : vector<104x16xf32> to vector<104x1xf32>
      %70 = vector.extract_strided_slice %23 {offsets = [7, 0], sizes = [1, 128], strides = [1, 1]} : vector<16x128xf32> to vector<1x128xf32>
      %71 = vector.broadcast %69 : vector<104x1xf32> to vector<104x128xf32>
      %72 = vector.broadcast %70 : vector<1x128xf32> to vector<104x128xf32>
      %73 = arith.addf %71, %72 : vector<104x128xf32>
      %74 = arith.maximumf %68, %73 : vector<104x128xf32>
      %75 = vector.extract_strided_slice %26 {offsets = [0, 8], sizes = [104, 1], strides = [1, 1]} : vector<104x16xf32> to vector<104x1xf32>
      %76 = vector.extract_strided_slice %23 {offsets = [8, 0], sizes = [1, 128], strides = [1, 1]} : vector<16x128xf32> to vector<1x128xf32>
      %77 = vector.broadcast %75 : vector<104x1xf32> to vector<104x128xf32>
      %78 = vector.broadcast %76 : vector<1x128xf32> to vector<104x128xf32>
      %79 = arith.addf %77, %78 : vector<104x128xf32>
      %80 = arith.maximumf %74, %79 : vector<104x128xf32>
      %81 = vector.extract_strided_slice %26 {offsets = [0, 9], sizes = [104, 1], strides = [1, 1]} : vector<104x16xf32> to vector<104x1xf32>
      %82 = vector.extract_strided_slice %23 {offsets = [9, 0], sizes = [1, 128], strides = [1, 1]} : vector<16x128xf32> to vector<1x128xf32>
      %83 = vector.broadcast %81 : vector<104x1xf32> to vector<104x128xf32>
      %84 = vector.broadcast %82 : vector<1x128xf32> to vector<104x128xf32>
      %85 = arith.addf %83, %84 : vector<104x128xf32>
      %86 = arith.maximumf %80, %85 : vector<104x128xf32>
      %87 = vector.extract_strided_slice %26 {offsets = [0, 10], sizes = [104, 1], strides = [1, 1]} : vector<104x16xf32> to vector<104x1xf32>
      %88 = vector.extract_strided_slice %23 {offsets = [10, 0], sizes = [1, 128], strides = [1, 1]} : vector<16x128xf32> to vector<1x128xf32>
      %89 = vector.broadcast %87 : vector<104x1xf32> to vector<104x128xf32>
      %90 = vector.broadcast %88 : vector<1x128xf32> to vector<104x128xf32>
      %91 = arith.addf %89, %90 : vector<104x128xf32>
      %92 = arith.maximumf %86, %91 : vector<104x128xf32>
      %93 = vector.extract_strided_slice %26 {offsets = [0, 11], sizes = [104, 1], strides = [1, 1]} : vector<104x16xf32> to vector<104x1xf32>
      %94 = vector.extract_strided_slice %23 {offsets = [11, 0], sizes = [1, 128], strides = [1, 1]} : vector<16x128xf32> to vector<1x128xf32>
      %95 = vector.broadcast %93 : vector<104x1xf32> to vector<104x128xf32>
      %96 = vector.broadcast %94 : vector<1x128xf32> to vector<104x128xf32>
      %97 = arith.addf %95, %96 : vector<104x128xf32>
      %98 = arith.maximumf %92, %97 : vector<104x128xf32>
      %99 = vector.extract_strided_slice %26 {offsets = [0, 12], sizes = [104, 1], strides = [1, 1]} : vector<104x16xf32> to vector<104x1xf32>
      %100 = vector.extract_strided_slice %23 {offsets = [12, 0], sizes = [1, 128], strides = [1, 1]} : vector<16x128xf32> to vector<1x128xf32>
      %101 = vector.broadcast %99 : vector<104x1xf32> to vector<104x128xf32>
      %102 = vector.broadcast %100 : vector<1x128xf32> to vector<104x128xf32>
      %103 = arith.addf %101, %102 : vector<104x128xf32>
      %104 = arith.maximumf %98, %103 : vector<104x128xf32>
      %105 = vector.extract_strided_slice %26 {offsets = [0, 13], sizes = [104, 1], strides = [1, 1]} : vector<104x16xf32> to vector<104x1xf32>
      %106 = vector.extract_strided_slice %23 {offsets = [13, 0], sizes = [1, 128], strides = [1, 1]} : vector<16x128xf32> to vector<1x128xf32>
      %107 = vector.broadcast %105 : vector<104x1xf32> to vector<104x128xf32>
      %108 = vector.broadcast %106 : vector<1x128xf32> to vector<104x128xf32>
      %109 = arith.addf %107, %108 : vector<104x128xf32>
      %110 = arith.maximumf %104, %109 : vector<104x128xf32>
      %111 = vector.extract_strided_slice %26 {offsets = [0, 14], sizes = [104, 1], strides = [1, 1]} : vector<104x16xf32> to vector<104x1xf32>
      %112 = vector.extract_strided_slice %23 {offsets = [14, 0], sizes = [1, 128], strides = [1, 1]} : vector<16x128xf32> to vector<1x128xf32>
      %113 = vector.broadcast %111 : vector<104x1xf32> to vector<104x128xf32>
      %114 = vector.broadcast %112 : vector<1x128xf32> to vector<104x128xf32>
      %115 = arith.addf %113, %114 : vector<104x128xf32>
      %116 = arith.maximumf %110, %115 : vector<104x128xf32>
      %117 = vector.extract_strided_slice %26 {offsets = [0, 15], sizes = [104, 1], strides = [1, 1]} : vector<104x16xf32> to vector<104x1xf32>
      %118 = vector.extract_strided_slice %23 {offsets = [15, 0], sizes = [1, 128], strides = [1, 1]} : vector<16x128xf32> to vector<1x128xf32>
      %119 = vector.broadcast %117 : vector<104x1xf32> to vector<104x128xf32>
      %120 = vector.broadcast %118 : vector<1x128xf32> to vector<104x128xf32>
      %121 = arith.addf %119, %120 : vector<104x128xf32>
      %122 = arith.maximumf %116, %121 : vector<104x128xf32>
      scf.yield %122 : vector<104x128xf32>
    }
    %c49_i32_6 = arith.constant 49 : i32
    %c104 = arith.constant 104 : index
    %c0_7 = arith.constant 0 : index
    %7 = vector.load %arg6[%c104, %c0_7] : memref<208x128xf32, #tpu.memory_space<vmem>>, vector<104x128xf32>
    tpu.vector_store %arg6[%c104, %c0_7], %6 {strides = array<i32>} : memref<208x128xf32, #tpu.memory_space<vmem>>, vector<104x128xf32>,
    %cst_8 = arith.constant -1.000000e+30 : f32
    %8 = vector.broadcast %cst_8 : f32 to vector<104x128xf32>
    %c0_i32_9 = arith.constant 0 : i32
    %c13_i32 = arith.constant 13 : i32
    %9 = arith.addi %c0_i32_9, %c13_i32 : i32
    %c1_i32_10 = arith.constant 1 : i32
    %10 = scf.for %arg8 = %c0_i32_9 to %9 step %c1_i32_10 iter_args(%arg9 = %8) -> (vector<104x128xf32>)  : i32 {
      %c16_i32 = arith.constant 16 : i32
      %20 = arith.muli %arg8, %c16_i32 : i32
      %21 = tpu.assume_multiple %20, 16 : i32
      %22 = arith.index_cast %21 : i32 to index
      %c0_28 = arith.constant 0 : index
      %23 = vector.load %arg6[%22, %c0_28] : memref<208x128xf32, #tpu.memory_space<vmem>>, vector<16x128xf32>
      %24 = arith.index_cast %arg8 : i32 to index
      %c0_29 = arith.constant 0 : index
      %c0_30 = arith.constant 0 : index
      %25 = vector.load %arg3[%24, %c0_29, %c0_30] : memref<13x208x16xf32, #tpu.memory_space<vmem>>, vector<1x104x16xf32>
      %26 = vector.shape_cast %25 : vector<1x104x16xf32> to vector<104x16xf32>
      %27 = vector.extract_strided_slice %26 {offsets = [0, 0], sizes = [104, 1], strides = [1, 1]} : vector<104x16xf32> to vector<104x1xf32>
      %28 = vector.extract_strided_slice %23 {offsets = [0, 0], sizes = [1, 128], strides = [1, 1]} : vector<16x128xf32> to vector<1x128xf32>
      %29 = vector.broadcast %27 : vector<104x1xf32> to vector<104x128xf32>
      %30 = vector.broadcast %28 : vector<1x128xf32> to vector<104x128xf32>
      %31 = arith.addf %29, %30 : vector<104x128xf32>
      %32 = arith.maximumf %arg9, %31 : vector<104x128xf32>
      %33 = vector.extract_strided_slice %26 {offsets = [0, 1], sizes = [104, 1], strides = [1, 1]} : vector<104x16xf32> to vector<104x1xf32>
      %34 = vector.extract_strided_slice %23 {offsets = [1, 0], sizes = [1, 128], strides = [1, 1]} : vector<16x128xf32> to vector<1x128xf32>
      %35 = vector.broadcast %33 : vector<104x1xf32> to vector<104x128xf32>
      %36 = vector.broadcast %34 : vector<1x128xf32> to vector<104x128xf32>
      %37 = arith.addf %35, %36 : vector<104x128xf32>
      %38 = arith.maximumf %32, %37 : vector<104x128xf32>
      %39 = vector.extract_strided_slice %26 {offsets = [0, 2], sizes = [104, 1], strides = [1, 1]} : vector<104x16xf32> to vector<104x1xf32>
      %40 = vector.extract_strided_slice %23 {offsets = [2, 0], sizes = [1, 128], strides = [1, 1]} : vector<16x128xf32> to vector<1x128xf32>
      %41 = vector.broadcast %39 : vector<104x1xf32> to vector<104x128xf32>
      %42 = vector.broadcast %40 : vector<1x128xf32> to vector<104x128xf32>
      %43 = arith.addf %41, %42 : vector<104x128xf32>
      %44 = arith.maximumf %38, %43 : vector<104x128xf32>
      %45 = vector.extract_strided_slice %26 {offsets = [0, 3], sizes = [104, 1], strides = [1, 1]} : vector<104x16xf32> to vector<104x1xf32>
      %46 = vector.extract_strided_slice %23 {offsets = [3, 0], sizes = [1, 128], strides = [1, 1]} : vector<16x128xf32> to vector<1x128xf32>
      %47 = vector.broadcast %45 : vector<104x1xf32> to vector<104x128xf32>
      %48 = vector.broadcast %46 : vector<1x128xf32> to vector<104x128xf32>
      %49 = arith.addf %47, %48 : vector<104x128xf32>
      %50 = arith.maximumf %44, %49 : vector<104x128xf32>
      %51 = vector.extract_strided_slice %26 {offsets = [0, 4], sizes = [104, 1], strides = [1, 1]} : vector<104x16xf32> to vector<104x1xf32>
      %52 = vector.extract_strided_slice %23 {offsets = [4, 0], sizes = [1, 128], strides = [1, 1]} : vector<16x128xf32> to vector<1x128xf32>
      %53 = vector.broadcast %51 : vector<104x1xf32> to vector<104x128xf32>
      %54 = vector.broadcast %52 : vector<1x128xf32> to vector<104x128xf32>
      %55 = arith.addf %53, %54 : vector<104x128xf32>
      %56 = arith.maximumf %50, %55 : vector<104x128xf32>
      %57 = vector.extract_strided_slice %26 {offsets = [0, 5], sizes = [104, 1], strides = [1, 1]} : vector<104x16xf32> to vector<104x1xf32>
      %58 = vector.extract_strided_slice %23 {offsets = [5, 0], sizes = [1, 128], strides = [1, 1]} : vector<16x128xf32> to vector<1x128xf32>
      %59 = vector.broadcast %57 : vector<104x1xf32> to vector<104x128xf32>
      %60 = vector.broadcast %58 : vector<1x128xf32> to vector<104x128xf32>
      %61 = arith.addf %59, %60 : vector<104x128xf32>
      %62 = arith.maximumf %56, %61 : vector<104x128xf32>
      %63 = vector.extract_strided_slice %26 {offsets = [0, 6], sizes = [104, 1], strides = [1, 1]} : vector<104x16xf32> to vector<104x1xf32>
      %64 = vector.extract_strided_slice %23 {offsets = [6, 0], sizes = [1, 128], strides = [1, 1]} : vector<16x128xf32> to vector<1x128xf32>
      %65 = vector.broadcast %63 : vector<104x1xf32> to vector<104x128xf32>
      %66 = vector.broadcast %64 : vector<1x128xf32> to vector<104x128xf32>
      %67 = arith.addf %65, %66 : vector<104x128xf32>
      %68 = arith.maximumf %62, %67 : vector<104x128xf32>
      %69 = vector.extract_strided_slice %26 {offsets = [0, 7], sizes = [104, 1], strides = [1, 1]} : vector<104x16xf32> to vector<104x1xf32>
      %70 = vector.extract_strided_slice %23 {offsets = [7, 0], sizes = [1, 128], strides = [1, 1]} : vector<16x128xf32> to vector<1x128xf32>
      %71 = vector.broadcast %69 : vector<104x1xf32> to vector<104x128xf32>
      %72 = vector.broadcast %70 : vector<1x128xf32> to vector<104x128xf32>
      %73 = arith.addf %71, %72 : vector<104x128xf32>
      %74 = arith.maximumf %68, %73 : vector<104x128xf32>
      %75 = vector.extract_strided_slice %26 {offsets = [0, 8], sizes = [104, 1], strides = [1, 1]} : vector<104x16xf32> to vector<104x1xf32>
      %76 = vector.extract_strided_slice %23 {offsets = [8, 0], sizes = [1, 128], strides = [1, 1]} : vector<16x128xf32> to vector<1x128xf32>
      %77 = vector.broadcast %75 : vector<104x1xf32> to vector<104x128xf32>
      %78 = vector.broadcast %76 : vector<1x128xf32> to vector<104x128xf32>
      %79 = arith.addf %77, %78 : vector<104x128xf32>
      %80 = arith.maximumf %74, %79 : vector<104x128xf32>
      %81 = vector.extract_strided_slice %26 {offsets = [0, 9], sizes = [104, 1], strides = [1, 1]} : vector<104x16xf32> to vector<104x1xf32>
      %82 = vector.extract_strided_slice %23 {offsets = [9, 0], sizes = [1, 128], strides = [1, 1]} : vector<16x128xf32> to vector<1x128xf32>
      %83 = vector.broadcast %81 : vector<104x1xf32> to vector<104x128xf32>
      %84 = vector.broadcast %82 : vector<1x128xf32> to vector<104x128xf32>
      %85 = arith.addf %83, %84 : vector<104x128xf32>
      %86 = arith.maximumf %80, %85 : vector<104x128xf32>
      %87 = vector.extract_strided_slice %26 {offsets = [0, 10], sizes = [104, 1], strides = [1, 1]} : vector<104x16xf32> to vector<104x1xf32>
      %88 = vector.extract_strided_slice %23 {offsets = [10, 0], sizes = [1, 128], strides = [1, 1]} : vector<16x128xf32> to vector<1x128xf32>
      %89 = vector.broadcast %87 : vector<104x1xf32> to vector<104x128xf32>
      %90 = vector.broadcast %88 : vector<1x128xf32> to vector<104x128xf32>
      %91 = arith.addf %89, %90 : vector<104x128xf32>
      %92 = arith.maximumf %86, %91 : vector<104x128xf32>
      %93 = vector.extract_strided_slice %26 {offsets = [0, 11], sizes = [104, 1], strides = [1, 1]} : vector<104x16xf32> to vector<104x1xf32>
      %94 = vector.extract_strided_slice %23 {offsets = [11, 0], sizes = [1, 128], strides = [1, 1]} : vector<16x128xf32> to vector<1x128xf32>
      %95 = vector.broadcast %93 : vector<104x1xf32> to vector<104x128xf32>
      %96 = vector.broadcast %94 : vector<1x128xf32> to vector<104x128xf32>
      %97 = arith.addf %95, %96 : vector<104x128xf32>
      %98 = arith.maximumf %92, %97 : vector<104x128xf32>
      %99 = vector.extract_strided_slice %26 {offsets = [0, 12], sizes = [104, 1], strides = [1, 1]} : vector<104x16xf32> to vector<104x1xf32>
      %100 = vector.extract_strided_slice %23 {offsets = [12, 0], sizes = [1, 128], strides = [1, 1]} : vector<16x128xf32> to vector<1x128xf32>
      %101 = vector.broadcast %99 : vector<104x1xf32> to vector<104x128xf32>
      %102 = vector.broadcast %100 : vector<1x128xf32> to vector<104x128xf32>
      %103 = arith.addf %101, %102 : vector<104x128xf32>
      %104 = arith.maximumf %98, %103 : vector<104x128xf32>
      %105 = vector.extract_strided_slice %26 {offsets = [0, 13], sizes = [104, 1], strides = [1, 1]} : vector<104x16xf32> to vector<104x1xf32>
      %106 = vector.extract_strided_slice %23 {offsets = [13, 0], sizes = [1, 128], strides = [1, 1]} : vector<16x128xf32> to vector<1x128xf32>
      %107 = vector.broadcast %105 : vector<104x1xf32> to vector<104x128xf32>
      %108 = vector.broadcast %106 : vector<1x128xf32> to vector<104x128xf32>
      %109 = arith.addf %107, %108 : vector<104x128xf32>
      %110 = arith.maximumf %104, %109 : vector<104x128xf32>
      %111 = vector.extract_strided_slice %26 {offsets = [0, 14], sizes = [104, 1], strides = [1, 1]} : vector<104x16xf32> to vector<104x1xf32>
      %112 = vector.extract_strided_slice %23 {offsets = [14, 0], sizes = [1, 128], strides = [1, 1]} : vector<16x128xf32> to vector<1x128xf32>
      %113 = vector.broadcast %111 : vector<104x1xf32> to vector<104x128xf32>
      %114 = vector.broadcast %112 : vector<1x128xf32> to vector<104x128xf32>
      %115 = arith.addf %113, %114 : vector<104x128xf32>
      %116 = arith.maximumf %110, %115 : vector<104x128xf32>
      %117 = vector.extract_strided_slice %26 {offsets = [0, 15], sizes = [104, 1], strides = [1, 1]} : vector<104x16xf32> to vector<104x1xf32>
      %118 = vector.extract_strided_slice %23 {offsets = [15, 0], sizes = [1, 128], strides = [1, 1]} : vector<16x128xf32> to vector<1x128xf32>
      %119 = vector.broadcast %117 : vector<104x1xf32> to vector<104x128xf32>
      %120 = vector.broadcast %118 : vector<1x128xf32> to vector<104x128xf32>
      %121 = arith.addf %119, %120 : vector<104x128xf32>
      %122 = arith.maximumf %116, %121 : vector<104x128xf32>
      scf.yield %122 : vector<104x128xf32>
    }
    %c13_i32_11 = arith.constant 13 : i32
    %c0_12 = arith.constant 0 : index
    %c0_13 = arith.constant 0 : index
    %11 = vector.load %arg7[%c0_12, %c0_13] : memref<208x128xf32, #tpu.memory_space<vmem>>, vector<104x128xf32>
    tpu.vector_store %arg7[%c0_12, %c0_13], %10 {strides = array<i32>} : memref<208x128xf32, #tpu.memory_space<vmem>>, vector<104x128xf32>,
    %cst_14 = arith.constant -1.000000e+30 : f32
    %12 = vector.broadcast %cst_14 : f32 to vector<104x128xf32>
    %c0_i32_15 = arith.constant 0 : i32
    %c13_i32_16 = arith.constant 13 : i32
    %13 = arith.addi %c0_i32_15, %c13_i32_16 : i32
    %c1_i32_17 = arith.constant 1 : i32
    %14 = scf.for %arg8 = %c0_i32_15 to %13 step %c1_i32_17 iter_args(%arg9 = %12) -> (vector<104x128xf32>)  : i32 {
      %c16_i32 = arith.constant 16 : i32
      %20 = arith.muli %arg8, %c16_i32 : i32
      %21 = tpu.assume_multiple %20, 16 : i32
      %22 = arith.index_cast %21 : i32 to index
      %c0_28 = arith.constant 0 : index
      %23 = vector.load %arg6[%22, %c0_28] : memref<208x128xf32, #tpu.memory_space<vmem>>, vector<16x128xf32>
      %24 = arith.index_cast %arg8 : i32 to index
      %c104_29 = arith.constant 104 : index
      %c0_30 = arith.constant 0 : index
      %25 = vector.load %arg3[%24, %c104_29, %c0_30] : memref<13x208x16xf32, #tpu.memory_space<vmem>>, vector<1x104x16xf32>
      %26 = vector.shape_cast %25 : vector<1x104x16xf32> to vector<104x16xf32>
      %27 = vector.extract_strided_slice %26 {offsets = [0, 0], sizes = [104, 1], strides = [1, 1]} : vector<104x16xf32> to vector<104x1xf32>
      %28 = vector.extract_strided_slice %23 {offsets = [0, 0], sizes = [1, 128], strides = [1, 1]} : vector<16x128xf32> to vector<1x128xf32>
      %29 = vector.broadcast %27 : vector<104x1xf32> to vector<104x128xf32>
      %30 = vector.broadcast %28 : vector<1x128xf32> to vector<104x128xf32>
      %31 = arith.addf %29, %30 : vector<104x128xf32>
      %32 = arith.maximumf %arg9, %31 : vector<104x128xf32>
      %33 = vector.extract_strided_slice %26 {offsets = [0, 1], sizes = [104, 1], strides = [1, 1]} : vector<104x16xf32> to vector<104x1xf32>
      %34 = vector.extract_strided_slice %23 {offsets = [1, 0], sizes = [1, 128], strides = [1, 1]} : vector<16x128xf32> to vector<1x128xf32>
      %35 = vector.broadcast %33 : vector<104x1xf32> to vector<104x128xf32>
      %36 = vector.broadcast %34 : vector<1x128xf32> to vector<104x128xf32>
      %37 = arith.addf %35, %36 : vector<104x128xf32>
      %38 = arith.maximumf %32, %37 : vector<104x128xf32>
      %39 = vector.extract_strided_slice %26 {offsets = [0, 2], sizes = [104, 1], strides = [1, 1]} : vector<104x16xf32> to vector<104x1xf32>
      %40 = vector.extract_strided_slice %23 {offsets = [2, 0], sizes = [1, 128], strides = [1, 1]} : vector<16x128xf32> to vector<1x128xf32>
      %41 = vector.broadcast %39 : vector<104x1xf32> to vector<104x128xf32>
      %42 = vector.broadcast %40 : vector<1x128xf32> to vector<104x128xf32>
      %43 = arith.addf %41, %42 : vector<104x128xf32>
      %44 = arith.maximumf %38, %43 : vector<104x128xf32>
      %45 = vector.extract_strided_slice %26 {offsets = [0, 3], sizes = [104, 1], strides = [1, 1]} : vector<104x16xf32> to vector<104x1xf32>
      %46 = vector.extract_strided_slice %23 {offsets = [3, 0], sizes = [1, 128], strides = [1, 1]} : vector<16x128xf32> to vector<1x128xf32>
      %47 = vector.broadcast %45 : vector<104x1xf32> to vector<104x128xf32>
      %48 = vector.broadcast %46 : vector<1x128xf32> to vector<104x128xf32>
      %49 = arith.addf %47, %48 : vector<104x128xf32>
      %50 = arith.maximumf %44, %49 : vector<104x128xf32>
      %51 = vector.extract_strided_slice %26 {offsets = [0, 4], sizes = [104, 1], strides = [1, 1]} : vector<104x16xf32> to vector<104x1xf32>
      %52 = vector.extract_strided_slice %23 {offsets = [4, 0], sizes = [1, 128], strides = [1, 1]} : vector<16x128xf32> to vector<1x128xf32>
      %53 = vector.broadcast %51 : vector<104x1xf32> to vector<104x128xf32>
      %54 = vector.broadcast %52 : vector<1x128xf32> to vector<104x128xf32>
      %55 = arith.addf %53, %54 : vector<104x128xf32>
      %56 = arith.maximumf %50, %55 : vector<104x128xf32>
      %57 = vector.extract_strided_slice %26 {offsets = [0, 5], sizes = [104, 1], strides = [1, 1]} : vector<104x16xf32> to vector<104x1xf32>
      %58 = vector.extract_strided_slice %23 {offsets = [5, 0], sizes = [1, 128], strides = [1, 1]} : vector<16x128xf32> to vector<1x128xf32>
      %59 = vector.broadcast %57 : vector<104x1xf32> to vector<104x128xf32>
      %60 = vector.broadcast %58 : vector<1x128xf32> to vector<104x128xf32>
      %61 = arith.addf %59, %60 : vector<104x128xf32>
      %62 = arith.maximumf %56, %61 : vector<104x128xf32>
      %63 = vector.extract_strided_slice %26 {offsets = [0, 6], sizes = [104, 1], strides = [1, 1]} : vector<104x16xf32> to vector<104x1xf32>
      %64 = vector.extract_strided_slice %23 {offsets = [6, 0], sizes = [1, 128], strides = [1, 1]} : vector<16x128xf32> to vector<1x128xf32>
      %65 = vector.broadcast %63 : vector<104x1xf32> to vector<104x128xf32>
      %66 = vector.broadcast %64 : vector<1x128xf32> to vector<104x128xf32>
      %67 = arith.addf %65, %66 : vector<104x128xf32>
      %68 = arith.maximumf %62, %67 : vector<104x128xf32>
      %69 = vector.extract_strided_slice %26 {offsets = [0, 7], sizes = [104, 1], strides = [1, 1]} : vector<104x16xf32> to vector<104x1xf32>
      %70 = vector.extract_strided_slice %23 {offsets = [7, 0], sizes = [1, 128], strides = [1, 1]} : vector<16x128xf32> to vector<1x128xf32>
      %71 = vector.broadcast %69 : vector<104x1xf32> to vector<104x128xf32>
      %72 = vector.broadcast %70 : vector<1x128xf32> to vector<104x128xf32>
      %73 = arith.addf %71, %72 : vector<104x128xf32>
      %74 = arith.maximumf %68, %73 : vector<104x128xf32>
      %75 = vector.extract_strided_slice %26 {offsets = [0, 8], sizes = [104, 1], strides = [1, 1]} : vector<104x16xf32> to vector<104x1xf32>
      %76 = vector.extract_strided_slice %23 {offsets = [8, 0], sizes = [1, 128], strides = [1, 1]} : vector<16x128xf32> to vector<1x128xf32>
      %77 = vector.broadcast %75 : vector<104x1xf32> to vector<104x128xf32>
      %78 = vector.broadcast %76 : vector<1x128xf32> to vector<104x128xf32>
      %79 = arith.addf %77, %78 : vector<104x128xf32>
      %80 = arith.maximumf %74, %79 : vector<104x128xf32>
      %81 = vector.extract_strided_slice %26 {offsets = [0, 9], sizes = [104, 1], strides = [1, 1]} : vector<104x16xf32> to vector<104x1xf32>
      %82 = vector.extract_strided_slice %23 {offsets = [9, 0], sizes = [1, 128], strides = [1, 1]} : vector<16x128xf32> to vector<1x128xf32>
      %83 = vector.broadcast %81 : vector<104x1xf32> to vector<104x128xf32>
      %84 = vector.broadcast %82 : vector<1x128xf32> to vector<104x128xf32>
      %85 = arith.addf %83, %84 : vector<104x128xf32>
      %86 = arith.maximumf %80, %85 : vector<104x128xf32>
      %87 = vector.extract_strided_slice %26 {offsets = [0, 10], sizes = [104, 1], strides = [1, 1]} : vector<104x16xf32> to vector<104x1xf32>
      %88 = vector.extract_strided_slice %23 {offsets = [10, 0], sizes = [1, 128], strides = [1, 1]} : vector<16x128xf32> to vector<1x128xf32>
      %89 = vector.broadcast %87 : vector<104x1xf32> to vector<104x128xf32>
      %90 = vector.broadcast %88 : vector<1x128xf32> to vector<104x128xf32>
      %91 = arith.addf %89, %90 : vector<104x128xf32>
      %92 = arith.maximumf %86, %91 : vector<104x128xf32>
      %93 = vector.extract_strided_slice %26 {offsets = [0, 11], sizes = [104, 1], strides = [1, 1]} : vector<104x16xf32> to vector<104x1xf32>
      %94 = vector.extract_strided_slice %23 {offsets = [11, 0], sizes = [1, 128], strides = [1, 1]} : vector<16x128xf32> to vector<1x128xf32>
      %95 = vector.broadcast %93 : vector<104x1xf32> to vector<104x128xf32>
      %96 = vector.broadcast %94 : vector<1x128xf32> to vector<104x128xf32>
      %97 = arith.addf %95, %96 : vector<104x128xf32>
      %98 = arith.maximumf %92, %97 : vector<104x128xf32>
      %99 = vector.extract_strided_slice %26 {offsets = [0, 12], sizes = [104, 1], strides = [1, 1]} : vector<104x16xf32> to vector<104x1xf32>
      %100 = vector.extract_strided_slice %23 {offsets = [12, 0], sizes = [1, 128], strides = [1, 1]} : vector<16x128xf32> to vector<1x128xf32>
      %101 = vector.broadcast %99 : vector<104x1xf32> to vector<104x128xf32>
      %102 = vector.broadcast %100 : vector<1x128xf32> to vector<104x128xf32>
      %103 = arith.addf %101, %102 : vector<104x128xf32>
      %104 = arith.maximumf %98, %103 : vector<104x128xf32>
      %105 = vector.extract_strided_slice %26 {offsets = [0, 13], sizes = [104, 1], strides = [1, 1]} : vector<104x16xf32> to vector<104x1xf32>
      %106 = vector.extract_strided_slice %23 {offsets = [13, 0], sizes = [1, 128], strides = [1, 1]} : vector<16x128xf32> to vector<1x128xf32>
      %107 = vector.broadcast %105 : vector<104x1xf32> to vector<104x128xf32>
      %108 = vector.broadcast %106 : vector<1x128xf32> to vector<104x128xf32>
      %109 = arith.addf %107, %108 : vector<104x128xf32>
      %110 = arith.maximumf %104, %109 : vector<104x128xf32>
      %111 = vector.extract_strided_slice %26 {offsets = [0, 14], sizes = [104, 1], strides = [1, 1]} : vector<104x16xf32> to vector<104x1xf32>
      %112 = vector.extract_strided_slice %23 {offsets = [14, 0], sizes = [1, 128], strides = [1, 1]} : vector<16x128xf32> to vector<1x128xf32>
      %113 = vector.broadcast %111 : vector<104x1xf32> to vector<104x128xf32>
      %114 = vector.broadcast %112 : vector<1x128xf32> to vector<104x128xf32>
      %115 = arith.addf %113, %114 : vector<104x128xf32>
      %116 = arith.maximumf %110, %115 : vector<104x128xf32>
      %117 = vector.extract_strided_slice %26 {offsets = [0, 15], sizes = [104, 1], strides = [1, 1]} : vector<104x16xf32> to vector<104x1xf32>
      %118 = vector.extract_strided_slice %23 {offsets = [15, 0], sizes = [1, 128], strides = [1, 1]} : vector<16x128xf32> to vector<1x128xf32>
      %119 = vector.broadcast %117 : vector<104x1xf32> to vector<104x128xf32>
      %120 = vector.broadcast %118 : vector<1x128xf32> to vector<104x128xf32>
      %121 = arith.addf %119, %120 : vector<104x128xf32>
      %122 = arith.maximumf %116, %121 : vector<104x128xf32>
      scf.yield %122 : vector<104x128xf32>
    }
    %c13_i32_18 = arith.constant 13 : i32
    %c104_19 = arith.constant 104 : index
    %c0_20 = arith.constant 0 : index
    %15 = vector.load %arg7[%c104_19, %c0_20] : memref<208x128xf32, #tpu.memory_space<vmem>>, vector<104x128xf32>
    tpu.vector_store %arg7[%c104_19, %c0_20], %14 {strides = array<i32>} : memref<208x128xf32, #tpu.memory_space<vmem>>, vector<104x128xf32>,
    %cst_21 = arith.constant -1.000000e+30 : f32
    %16 = vector.broadcast %cst_21 : f32 to vector<16x128xf32>
    %c0_i32_22 = arith.constant 0 : i32
    %c13_i32_23 = arith.constant 13 : i32
    %17 = arith.addi %c0_i32_22, %c13_i32_23 : i32
    %c1_i32_24 = arith.constant 1 : i32
    %18 = scf.for %arg8 = %c0_i32_22 to %17 step %c1_i32_24 iter_args(%arg9 = %16) -> (vector<16x128xf32>)  : i32 {
      %c16_i32 = arith.constant 16 : i32
      %20 = arith.muli %arg8, %c16_i32 : i32
      %21 = tpu.assume_multiple %20, 16 : i32
      %22 = arith.index_cast %21 : i32 to index
      %c0_28 = arith.constant 0 : index
      %23 = vector.load %arg7[%22, %c0_28] : memref<208x128xf32, #tpu.memory_space<vmem>>, vector<16x128xf32>
      %24 = arith.index_cast %arg8 : i32 to index
      %c0_29 = arith.constant 0 : index
      %c0_30 = arith.constant 0 : index
      %25 = vector.load %arg4[%24, %c0_29, %c0_30] : memref<13x16x16xf32, #tpu.memory_space<vmem>>, vector<1x16x16xf32>
      %26 = vector.shape_cast %25 : vector<1x16x16xf32> to vector<16x16xf32>
      %27 = vector.extract_strided_slice %26 {offsets = [0, 0], sizes = [16, 1], strides = [1, 1]} : vector<16x16xf32> to vector<16x1xf32>
      %28 = vector.extract_strided_slice %23 {offsets = [0, 0], sizes = [1, 128], strides = [1, 1]} : vector<16x128xf32> to vector<1x128xf32>
      %29 = vector.broadcast %27 : vector<16x1xf32> to vector<16x128xf32>
      %30 = vector.broadcast %28 : vector<1x128xf32> to vector<16x128xf32>
      %31 = arith.addf %29, %30 : vector<16x128xf32>
      %32 = arith.maximumf %arg9, %31 : vector<16x128xf32>
      %33 = vector.extract_strided_slice %26 {offsets = [0, 1], sizes = [16, 1], strides = [1, 1]} : vector<16x16xf32> to vector<16x1xf32>
      %34 = vector.extract_strided_slice %23 {offsets = [1, 0], sizes = [1, 128], strides = [1, 1]} : vector<16x128xf32> to vector<1x128xf32>
      %35 = vector.broadcast %33 : vector<16x1xf32> to vector<16x128xf32>
      %36 = vector.broadcast %34 : vector<1x128xf32> to vector<16x128xf32>
      %37 = arith.addf %35, %36 : vector<16x128xf32>
      %38 = arith.maximumf %32, %37 : vector<16x128xf32>
      %39 = vector.extract_strided_slice %26 {offsets = [0, 2], sizes = [16, 1], strides = [1, 1]} : vector<16x16xf32> to vector<16x1xf32>
      %40 = vector.extract_strided_slice %23 {offsets = [2, 0], sizes = [1, 128], strides = [1, 1]} : vector<16x128xf32> to vector<1x128xf32>
      %41 = vector.broadcast %39 : vector<16x1xf32> to vector<16x128xf32>
      %42 = vector.broadcast %40 : vector<1x128xf32> to vector<16x128xf32>
      %43 = arith.addf %41, %42 : vector<16x128xf32>
      %44 = arith.maximumf %38, %43 : vector<16x128xf32>
      %45 = vector.extract_strided_slice %26 {offsets = [0, 3], sizes = [16, 1], strides = [1, 1]} : vector<16x16xf32> to vector<16x1xf32>
      %46 = vector.extract_strided_slice %23 {offsets = [3, 0], sizes = [1, 128], strides = [1, 1]} : vector<16x128xf32> to vector<1x128xf32>
      %47 = vector.broadcast %45 : vector<16x1xf32> to vector<16x128xf32>
      %48 = vector.broadcast %46 : vector<1x128xf32> to vector<16x128xf32>
      %49 = arith.addf %47, %48 : vector<16x128xf32>
      %50 = arith.maximumf %44, %49 : vector<16x128xf32>
      %51 = vector.extract_strided_slice %26 {offsets = [0, 4], sizes = [16, 1], strides = [1, 1]} : vector<16x16xf32> to vector<16x1xf32>
      %52 = vector.extract_strided_slice %23 {offsets = [4, 0], sizes = [1, 128], strides = [1, 1]} : vector<16x128xf32> to vector<1x128xf32>
      %53 = vector.broadcast %51 : vector<16x1xf32> to vector<16x128xf32>
      %54 = vector.broadcast %52 : vector<1x128xf32> to vector<16x128xf32>
      %55 = arith.addf %53, %54 : vector<16x128xf32>
      %56 = arith.maximumf %50, %55 : vector<16x128xf32>
      %57 = vector.extract_strided_slice %26 {offsets = [0, 5], sizes = [16, 1], strides = [1, 1]} : vector<16x16xf32> to vector<16x1xf32>
      %58 = vector.extract_strided_slice %23 {offsets = [5, 0], sizes = [1, 128], strides = [1, 1]} : vector<16x128xf32> to vector<1x128xf32>
      %59 = vector.broadcast %57 : vector<16x1xf32> to vector<16x128xf32>
      %60 = vector.broadcast %58 : vector<1x128xf32> to vector<16x128xf32>
      %61 = arith.addf %59, %60 : vector<16x128xf32>
      %62 = arith.maximumf %56, %61 : vector<16x128xf32>
      %63 = vector.extract_strided_slice %26 {offsets = [0, 6], sizes = [16, 1], strides = [1, 1]} : vector<16x16xf32> to vector<16x1xf32>
      %64 = vector.extract_strided_slice %23 {offsets = [6, 0], sizes = [1, 128], strides = [1, 1]} : vector<16x128xf32> to vector<1x128xf32>
      %65 = vector.broadcast %63 : vector<16x1xf32> to vector<16x128xf32>
      %66 = vector.broadcast %64 : vector<1x128xf32> to vector<16x128xf32>
      %67 = arith.addf %65, %66 : vector<16x128xf32>
      %68 = arith.maximumf %62, %67 : vector<16x128xf32>
      %69 = vector.extract_strided_slice %26 {offsets = [0, 7], sizes = [16, 1], strides = [1, 1]} : vector<16x16xf32> to vector<16x1xf32>
      %70 = vector.extract_strided_slice %23 {offsets = [7, 0], sizes = [1, 128], strides = [1, 1]} : vector<16x128xf32> to vector<1x128xf32>
      %71 = vector.broadcast %69 : vector<16x1xf32> to vector<16x128xf32>
      %72 = vector.broadcast %70 : vector<1x128xf32> to vector<16x128xf32>
      %73 = arith.addf %71, %72 : vector<16x128xf32>
      %74 = arith.maximumf %68, %73 : vector<16x128xf32>
      %75 = vector.extract_strided_slice %26 {offsets = [0, 8], sizes = [16, 1], strides = [1, 1]} : vector<16x16xf32> to vector<16x1xf32>
      %76 = vector.extract_strided_slice %23 {offsets = [8, 0], sizes = [1, 128], strides = [1, 1]} : vector<16x128xf32> to vector<1x128xf32>
      %77 = vector.broadcast %75 : vector<16x1xf32> to vector<16x128xf32>
      %78 = vector.broadcast %76 : vector<1x128xf32> to vector<16x128xf32>
      %79 = arith.addf %77, %78 : vector<16x128xf32>
      %80 = arith.maximumf %74, %79 : vector<16x128xf32>
      %81 = vector.extract_strided_slice %26 {offsets = [0, 9], sizes = [16, 1], strides = [1, 1]} : vector<16x16xf32> to vector<16x1xf32>
      %82 = vector.extract_strided_slice %23 {offsets = [9, 0], sizes = [1, 128], strides = [1, 1]} : vector<16x128xf32> to vector<1x128xf32>
      %83 = vector.broadcast %81 : vector<16x1xf32> to vector<16x128xf32>
      %84 = vector.broadcast %82 : vector<1x128xf32> to vector<16x128xf32>
      %85 = arith.addf %83, %84 : vector<16x128xf32>
      %86 = arith.maximumf %80, %85 : vector<16x128xf32>
      %87 = vector.extract_strided_slice %26 {offsets = [0, 10], sizes = [16, 1], strides = [1, 1]} : vector<16x16xf32> to vector<16x1xf32>
      %88 = vector.extract_strided_slice %23 {offsets = [10, 0], sizes = [1, 128], strides = [1, 1]} : vector<16x128xf32> to vector<1x128xf32>
      %89 = vector.broadcast %87 : vector<16x1xf32> to vector<16x128xf32>
      %90 = vector.broadcast %88 : vector<1x128xf32> to vector<16x128xf32>
      %91 = arith.addf %89, %90 : vector<16x128xf32>
      %92 = arith.maximumf %86, %91 : vector<16x128xf32>
      %93 = vector.extract_strided_slice %26 {offsets = [0, 11], sizes = [16, 1], strides = [1, 1]} : vector<16x16xf32> to vector<16x1xf32>
      %94 = vector.extract_strided_slice %23 {offsets = [11, 0], sizes = [1, 128], strides = [1, 1]} : vector<16x128xf32> to vector<1x128xf32>
      %95 = vector.broadcast %93 : vector<16x1xf32> to vector<16x128xf32>
      %96 = vector.broadcast %94 : vector<1x128xf32> to vector<16x128xf32>
      %97 = arith.addf %95, %96 : vector<16x128xf32>
      %98 = arith.maximumf %92, %97 : vector<16x128xf32>
      %99 = vector.extract_strided_slice %26 {offsets = [0, 12], sizes = [16, 1], strides = [1, 1]} : vector<16x16xf32> to vector<16x1xf32>
      %100 = vector.extract_strided_slice %23 {offsets = [12, 0], sizes = [1, 128], strides = [1, 1]} : vector<16x128xf32> to vector<1x128xf32>
      %101 = vector.broadcast %99 : vector<16x1xf32> to vector<16x128xf32>
      %102 = vector.broadcast %100 : vector<1x128xf32> to vector<16x128xf32>
      %103 = arith.addf %101, %102 : vector<16x128xf32>
      %104 = arith.maximumf %98, %103 : vector<16x128xf32>
      %105 = vector.extract_strided_slice %26 {offsets = [0, 13], sizes = [16, 1], strides = [1, 1]} : vector<16x16xf32> to vector<16x1xf32>
      %106 = vector.extract_strided_slice %23 {offsets = [13, 0], sizes = [1, 128], strides = [1, 1]} : vector<16x128xf32> to vector<1x128xf32>
      %107 = vector.broadcast %105 : vector<16x1xf32> to vector<16x128xf32>
      %108 = vector.broadcast %106 : vector<1x128xf32> to vector<16x128xf32>
      %109 = arith.addf %107, %108 : vector<16x128xf32>
      %110 = arith.maximumf %104, %109 : vector<16x128xf32>
      %111 = vector.extract_strided_slice %26 {offsets = [0, 14], sizes = [16, 1], strides = [1, 1]} : vector<16x16xf32> to vector<16x1xf32>
      %112 = vector.extract_strided_slice %23 {offsets = [14, 0], sizes = [1, 128], strides = [1, 1]} : vector<16x128xf32> to vector<1x128xf32>
      %113 = vector.broadcast %111 : vector<16x1xf32> to vector<16x128xf32>
      %114 = vector.broadcast %112 : vector<1x128xf32> to vector<16x128xf32>
      %115 = arith.addf %113, %114 : vector<16x128xf32>
      %116 = arith.maximumf %110, %115 : vector<16x128xf32>
      %117 = vector.extract_strided_slice %26 {offsets = [0, 15], sizes = [16, 1], strides = [1, 1]} : vector<16x16xf32> to vector<16x1xf32>
      %118 = vector.extract_strided_slice %23 {offsets = [15, 0], sizes = [1, 128], strides = [1, 1]} : vector<16x128xf32> to vector<1x128xf32>
      %119 = vector.broadcast %117 : vector<16x1xf32> to vector<16x128xf32>
      %120 = vector.broadcast %118 : vector<1x128xf32> to vector<16x128xf32>
      %121 = arith.addf %119, %120 : vector<16x128xf32>
      %122 = arith.maximumf %116, %121 : vector<16x128xf32>
      scf.yield %122 : vector<16x128xf32>
    }
    %c13_i32_25 = arith.constant 13 : i32
    %c0_26 = arith.constant 0 : index
    %c0_27 = arith.constant 0 : index
    %19 = vector.load %arg5[%c0_26, %c0_27] : memref<16x128xf32, #tpu.memory_space<vmem>>, vector<16x128xf32>
    tpu.vector_store %arg5[%c0_26, %c0_27], %18 {strides = array<i32>} : memref<16x128xf32, #tpu.memory_space<vmem>>, vector<16x128xf32>,
    return
  }
  func.func @transform_0(%arg0: i32) -> (i32, i32) {
    %c0_i32 = arith.constant 0 : i32
    %c0_i32_0 = arith.constant 0 : i32
    return %c0_i32, %arg0 : i32, i32
  }
  func.func @transform_1(%arg0: i32) -> (i32, i32, i32) {
    %c0_i32 = arith.constant 0 : i32
    %c0_i32_0 = arith.constant 0 : i32
    %c0_i32_1 = arith.constant 0 : i32
    %c0_i32_2 = arith.constant 0 : i32
    return %c0_i32, %c0_i32_0, %c0_i32_1 : i32, i32, i32
  }
  func.func @transform_2(%arg0: i32) -> (i32, i32, i32) {
    %c0_i32 = arith.constant 0 : i32
    %c0_i32_0 = arith.constant 0 : i32
    %c0_i32_1 = arith.constant 0 : i32
    %c0_i32_2 = arith.constant 0 : i32
    return %c0_i32, %c0_i32_0, %c0_i32_1 : i32, i32, i32
  }
  func.func @transform_3(%arg0: i32) -> (i32, i32, i32) {
    %c0_i32 = arith.constant 0 : i32
    %c0_i32_0 = arith.constant 0 : i32
    %c0_i32_1 = arith.constant 0 : i32
    %c0_i32_2 = arith.constant 0 : i32
    return %c0_i32, %c0_i32_0, %c0_i32_1 : i32, i32, i32
  }
  func.func @transform_4(%arg0: i32) -> (i32, i32) {
    %c0_i32 = arith.constant 0 : i32
    %c0_i32_0 = arith.constant 0 : i32
    return %c0_i32, %arg0 : i32, i32
  }
}

</mosaic_0001>

<bundles_post_ra>
// kernel: morphological_network.1
= control target key start
LH: loop header
LB: loop body
LE: loop exit
PB: predicated region body
PF: predicated region fallthrough
CT: control target
= control target key end

     0   :  { %v7347_v0 = vmov -1e+30   ;;  %v7349_v1 = vmov -1e+30   ;;  %v7351_v2 = vmov -1e+30   ;;  %s12410_s0 = inlined_call_operand.vmem [shape: f32[784,128], index: 0, kind: input, shape index: {}]   ;;  %s12411_s1 = inlined_call_operand.vmem [shape: f32[49,208,16], index: 1, kind: input, shape index: {}]   ;;  %s12412_s2 = inlined_call_operand.vmem [shape: f32[13,208,16], index: 2, kind: input, shape index: {}]   ;;  %s12413_s3 = inlined_call_operand.vmem [shape: f32[13,16,16], index: 3, kind: input, shape index: {}]   ;;  %s12414_s4 = inlined_call_operand.vmem [shape: f32[16,128], index: 4, kind: output, shape index: {}]  }
   0x1   :  { %v7353_v3 = vmov -1e+30   ;;  %v7355_v4 = vmov -1e+30   ;;  %v7357_v5 = vmov -1e+30  }
   0x2   :  { %v7359_v6 = vmov -1e+30   ;;  %v7361_v7 = vmov -1e+30   ;;  %v7363_v8 = vmov -1e+30  }
   0x3   :  { %v7365_v9 = vmov -1e+30   ;;  %v7367_v10 = vmov -1e+30   ;;  %v7369_v11 = vmov -1e+30  }
   0x4   :  { %v7371_v12 = vmov -1e+30   ;;  %s7373_s15 = smov 0  }
   0x5 LB: > { %12495 = vst [vmem:[#allocation4_spill] sm:$0xff] %v7012_v1  ;;  %12496 = vst [vmem:[#allocation5_spill] sm:$0xff] %v7020_v3  ;;  %v7242_v13 = vmov 0   ;;  %s40_s16 = smul.u32 208, %s7060_s15  ;;  %v7243_v27 = vmov 1   ;;  %v7244_v28 = vmov 2   ;;  %s7060_s15 = sphi %s7373_s15, %s22_s15   ;;  %v7056_v12 = vphi %v7371_v12, %v12678_v12   ;;  %v7052_v11 = vphi %v7369_v11, %v12677_v11   ;;  %v7048_v10 = vphi %v7367_v10, %v12676_v10   ;;  %v7044_v9 = vphi %v7365_v9, %v12675_v9   ;;  %v7040_v8 = vphi %v7363_v8, %v12674_v8   ;;  %v7036_v7 = vphi %v7361_v7, %v12673_v7   ;;  %v7032_v6 = vphi %v7359_v6, %v12672_v6   ;;  %v7028_v5 = vphi %v7357_v5, %v12671_v5   ;;  %v7024_v4 = vphi %v7355_v4, %v12670_v4   ;;  %v7020_v3 = vphi %v7353_v3, %v12669_v3   ;;  %v7016_v2 = vphi %v7351_v2, %v12668_v2   ;;  %v7012_v1 = vphi %v7349_v1, %v12667_v1   ;;  %v7008_v0 = vphi %v7347_v0, %v12666_v0  }
   0x6   : > { %12497 = vst [vmem:[#allocation6_spill] sm:$0xff] %v7028_v5  ;;  %12498 = vst [vmem:[#allocation7_spill] sm:$0xff] %v7036_v7  ;;  %6565 = vset.pattern.permute.xlu1 %v7242_v13  ;;  %6564 = vset.pattern.permute.xlu0 %v7242_v13  ;;  %v7245_v29 = vmov 3   ;;  %v7246_v30 = vmov 4   ;;  %v7247_v33 = vmov 5   ;;  %v7248_v46 = vmov 6  }
   0x7   : > { %12499 = vst [vmem:[#allocation8_spill] sm:$0xff] %v7044_v9  ;;  %12500 = vst [vmem:[#allocation9_spill] sm:$0xff] %v7048_v10  ;;  %s7421_s19 = scalar_lea.vmem %s12411_s1, %s40_s16  ;;  %v7249_v59 = vmov 7   ;;  %s6007_s20 = sshll.u32 %s7060_s15, 4 }
   0x8   : > { %12501 = vst [vmem:[#allocation10_spill] sm:$0xff] %v7056_v12  ;;  %v7424_v14 = vld [vmem:[%s7421_s19 + $0x10] sm:$0xff]  ;;  %v7427_v15 = vld [vmem:[%s7421_s19] sm:$0xff]  ;;  %v7432_v16 = vld [vmem:[%s7421_s19 + $0x18] sm:$0xff]  ;;  %s7780_s23 = scalar_lea.vmem %s12410_s0, %s6007_s20  ;;  %s22_s15 = sadd.s32 1, %s7060_s15  }
   0x9   : > { %67 = vperm.xlu1 %6565, %v7424_v14   ;;  %57 = vperm.xlu0 %6564, %v7427_v15   ;;  %v7435_v17 = vld [vmem:[%s7421_s19 + $0x8] sm:$0xff]  ;;  %v7443_v19 = vld [vmem:[%s7421_s19 + $0x20] sm:$0xff]  ;;  %v7448_v20 = vld [vmem:[%s7421_s19 + $0x38] sm:$0xff]  ;;  %p8559_p0 = scmp.ge.s32.totalorder %s22_s15, 49  }
   0xa   : > { %v7440_v18 = vld [vmem:[%s7421_s19 + $0x28] sm:$0xff]  ;;  %12502 = vst [vmem:[#allocation11_spill] sm:$0xff] %v7443_v19  ;;  %12503 = vst [vmem:[#allocation12_spill] sm:$0xff] %v7448_v20  ;;  %v7451_v21 = vld [vmem:[%s7421_s19 + $0x30] sm:$0xff]  ;;  %s8631_s25 = smov (%p8559_p0), 0  }
   0xb   : > { %v7456_v22 = vld [vmem:[%s7421_s19 + $0x48] sm:$0xff]  ;;  %v7459_v23 = vld [vmem:[%s7421_s19 + $0x40] sm:$0xff]  ;;  %v7464_v24 = vld [vmem:[%s7421_s19 + $0x58] sm:$0xff] }
   0xc   : > { %12504 = vst [vmem:[#allocation13_spill] sm:$0xff] %v7456_v22  ;;  %12505 = vst [vmem:[#allocation14_spill] sm:$0xff] %v7464_v24  ;;  %v7467_v25 = vld [vmem:[%s7421_s19 + $0x50] sm:$0xff]  ;;  %v7472_v26 = vld [vmem:[%s7421_s19 + $0x60] sm:$0xff] }
   0xd   : > { %72 = vperm.xlu1 %6565, %v7432_v16   ;;  %62 = vperm.xlu0 %6564, %v7435_v17  }
  0x11   : > { %82 = vperm.xlu1 %6565, %v7440_v18   ;;  %77 = vperm.xlu0 %6564, %v7443_v19  }
  0x15   : > { %92 = vperm.xlu1 %6565, %v7448_v20   ;;  %87 = vperm.xlu0 %6564, %v7451_v21  }
  0x19   : > { %102 = vperm.xlu1 %6565, %v7456_v22   ;;  %97 = vperm.xlu0 %6564, %v7459_v23  }
  0x1d   : > { %112 = vperm.xlu1 %6565, %v7464_v24   ;;  %107 = vperm.xlu0 %6564, %v7467_v25  }
  0x21   : > { %6566 = vset.pattern.permute.xlu1 %v7243_v27  ;;  %117 = vperm.xlu0 %6564, %v7472_v26  }
  0x22   : > { %151 = vperm.xlu1 %6566, %v7427_v15  }
  0x25   : > { %6567 = vset.pattern.permute.xlu0 %v7243_v27 }
  0x26   : > { %159 = vperm.xlu1 %6566, %v7424_v14   ;;  %155 = vperm.xlu0 %6567, %v7435_v17  }
  0x2a   : > { %163 = vperm.xlu1 %6566, %v7432_v16   ;;  %167 = vperm.xlu0 %6567, %v7443_v19  }
  0x2e   : > { %171 = vperm.xlu1 %6566, %v7440_v18   ;;  %175 = vperm.xlu0 %6567, %v7451_v21  }
  0x32   : > { %179 = vperm.xlu1 %6566, %v7448_v20   ;;  %183 = vperm.xlu0 %6567, %v7459_v23  }
  0x36   : > { %187 = vperm.xlu1 %6566, %v7456_v22   ;;  %191 = vperm.xlu0 %6567, %v7467_v25  }
  0x3a   : > { %195 = vperm.xlu1 %6566, %v7464_v24   ;;  %199 = vperm.xlu0 %6567, %v7472_v26  }
  0x3e   : > { %6568 = vset.pattern.permute.xlu1 %v7244_v28  ;;  %6569 = vset.pattern.permute.xlu0 %v7244_v28 }
  0x3f   : > { %233 = vperm.xlu1 %6568, %v7427_v15   ;;  %237 = vperm.xlu0 %6569, %v7435_v17  }
  0x43   : > { %241 = vperm.xlu1 %6568, %v7424_v14   ;;  %249 = vperm.xlu0 %6569, %v7443_v19  }
  0x47   : > { %245 = vperm.xlu1 %6568, %v7432_v16   ;;  %257 = vperm.xlu0 %6569, %v7451_v21  }
  0x4b   : > { %253 = vperm.xlu1 %6568, %v7440_v18   ;;  %265 = vperm.xlu0 %6569, %v7459_v23  }
  0x4f   : > { %261 = vperm.xlu1 %6568, %v7448_v20   ;;  %273 = vperm.xlu0 %6569, %v7467_v25  }
  0x53   : > { %269 = vperm.xlu1 %6568, %v7456_v22   ;;  %281 = vperm.xlu0 %6569, %v7472_v26  }
  0x57   : > { %277 = vperm.xlu1 %6568, %v7464_v24   ;;  %6571 = vset.pattern.permute.xlu0 %v7245_v29 }
  0x58   : > { %319 = vperm.xlu0 %6571, %v7435_v17  }
  0x5b   : > { %6570 = vset.pattern.permute.xlu1 %v7245_v29 }
  0x5c   : > { %315 = vperm.xlu1 %6570, %v7427_v15   ;;  %331 = vperm.xlu0 %6571, %v7443_v19  }
  0x60   : > { %323 = vperm.xlu1 %6570, %v7424_v14   ;;  %339 = vperm.xlu0 %6571, %v7451_v21  }
  0x64   : > { %327 = vperm.xlu1 %6570, %v7432_v16   ;;  %347 = vperm.xlu0 %6571, %v7459_v23  }
  0x68   : > { %335 = vperm.xlu1 %6570, %v7440_v18   ;;  %355 = vperm.xlu0 %6571, %v7467_v25  }
  0x6c   : > { %343 = vperm.xlu1 %6570, %v7448_v20   ;;  %363 = vperm.xlu0 %6571, %v7472_v26  }
  0x70   : > { %351 = vperm.xlu1 %6570, %v7456_v22   ;;  %6573 = vset.pattern.permute.xlu0 %v7246_v30 }
  0x71   : > { %401 = vperm.xlu0 %6573, %v7435_v17  }
  0x74   : > { %359 = vperm.xlu1 %6570, %v7464_v24  }
  0x75   : > { %413 = vperm.xlu0 %6573, %v7443_v19  }
  0x78   : > { %6572 = vset.pattern.permute.xlu1 %v7246_v30 }
  0x79   : > { %397 = vperm.xlu1 %6572, %v7427_v15   ;;  %421 = vperm.xlu0 %6573, %v7451_v21  }
  0x7d   : > { %405 = vperm.xlu1 %6572, %v7424_v14   ;;  %429 = vperm.xlu0 %6573, %v7459_v23  }
  0x81   : > { %409 = vperm.xlu1 %6572, %v7432_v16   ;;  %437 = vperm.xlu0 %6573, %v7467_v25  }
  0x85   : > { %417 = vperm.xlu1 %6572, %v7440_v18   ;;  %445 = vperm.xlu0 %6573, %v7472_v26  }
  0x88   : > { %v7524_v31 = vpop.permute.xlu1 %67  ;;  %v7526_v32 = vpop.permute.xlu0 %57 }
  0x89   : > { %12506 = vst [vmem:[#allocation15_spill] sm:$0xff] %v7524_v31  ;;  %12507 = vst [vmem:[#allocation16_spill] sm:$0xff] %v7526_v32  ;;  %425 = vperm.xlu1 %6572, %v7448_v20   ;;  %6575 = vset.pattern.permute.xlu0 %v7247_v33 }
  0x8a   : > { %483 = vperm.xlu0 %6575, %v7435_v17  }
  0x8c   : > { %v7530_v34 = vpop.permute.xlu1 %72  ;;  %v7532_v35 = vpop.permute.xlu0 %62 }
  0x8d   : > { %12508 = vst [vmem:[#allocation17_spill] sm:$0xff] %v7530_v34  ;;  %433 = vperm.xlu1 %6572, %v7456_v22  }
  0x8e   : > { %495 = vperm.xlu0 %6575, %v7443_v19  }
  0x90   : > { %v7536_v36 = vpop.permute.xlu1 %82  ;;  %v7538_v37 = vpop.permute.xlu0 %77 }
  0x91   : > { %12509 = vst [vmem:[#allocation18_spill] sm:$0xff] %v7536_v36  ;;  %441 = vperm.xlu1 %6572, %v7464_v24  }
  0x92   : > { %503 = vperm.xlu0 %6575, %v7451_v21  }
  0x94   : > { %v7542_v38 = vpop.permute.xlu1 %92  ;;  %v7544_v39 = vpop.permute.xlu0 %87 }
  0x95   : > { %12510 = vst [vmem:[#allocation19_spill] sm:$0xff] %v7542_v38  ;;  %6574 = vset.pattern.permute.xlu1 %v7247_v33 }
  0x96   : > { %479 = vperm.xlu1 %6574, %v7427_v15   ;;  %511 = vperm.xlu0 %6575, %v7459_v23  }
  0x98   : > { %v7548_v40 = vpop.permute.xlu1 %102  ;;  %v7550_v41 = vpop.permute.xlu0 %97 }
  0x99   : > { %12511 = vst [vmem:[#allocation20_spill] sm:$0xff] %v7548_v40 }
  0x9a   : > { %487 = vperm.xlu1 %6574, %v7424_v14   ;;  %519 = vperm.xlu0 %6575, %v7467_v25  }
  0x9c   : > { %v7554_v42 = vpop.permute.xlu1 %112  ;;  %v7556_v43 = vpop.permute.xlu0 %107 }
  0x9d   : > { %12512 = vst [vmem:[#allocation21_spill] sm:$0xff] %v7554_v42 }
  0x9e   : > { %491 = vperm.xlu1 %6574, %v7432_v16   ;;  %527 = vperm.xlu0 %6575, %v7472_v26  }
  0xa0   : > { %v7560_v44 = vpop.permute.xlu0 %117 }
  0xa1   : > { %v7562_v45 = vpop.permute.xlu1 %151 }
  0xa2   : > { %12513 = vst [vmem:[#allocation22_spill] sm:$0xff] %v7562_v45  ;;  %499 = vperm.xlu1 %6574, %v7440_v18   ;;  %6577 = vset.pattern.permute.xlu0 %v7248_v46 }
  0xa3   : > { %565 = vperm.xlu0 %6577, %v7435_v17  }
  0xa5   : > { %v7566_v47 = vpop.permute.xlu1 %159  ;;  %v7568_v48 = vpop.permute.xlu0 %155 }
  0xa6   : > { %12514 = vst [vmem:[#allocation23_spill] sm:$0xff] %v7566_v47  ;;  %507 = vperm.xlu1 %6574, %v7448_v20  }
  0xa7   : > { %577 = vperm.xlu0 %6577, %v7443_v19  }
  0xa9   : > { %v7572_v49 = vpop.permute.xlu1 %163  ;;  %v7574_v50 = vpop.permute.xlu0 %167 }
  0xaa   : > { %12515 = vst [vmem:[#allocation24_spill] sm:$0xff] %v7572_v49  ;;  %515 = vperm.xlu1 %6574, %v7456_v22  }
  0xab   : > { %585 = vperm.xlu0 %6577, %v7451_v21  }
  0xad   : > { %v7578_v51 = vpop.permute.xlu1 %171  ;;  %v7580_v52 = vpop.permute.xlu0 %175 }
  0xae   : > { %12516 = vst [vmem:[#allocation25_spill] sm:$0xff] %v7578_v51  ;;  %523 = vperm.xlu1 %6574, %v7464_v24  }
  0xaf   : > { %593 = vperm.xlu0 %6577, %v7459_v23  }
  0xb1   : > { %v7584_v53 = vpop.permute.xlu1 %179  ;;  %v7586_v54 = vpop.permute.xlu0 %183 }
  0xb2   : > { %12517 = vst [vmem:[#allocation26_spill] sm:$0xff] %v7584_v53  ;;  %6576 = vset.pattern.permute.xlu1 %v7248_v46 }
  0xb3   : > { %561 = vperm.xlu1 %6576, %v7427_v15   ;;  %601 = vperm.xlu0 %6577, %v7467_v25  }
  0xb5   : > { %v7590_v55 = vpop.permute.xlu1 %187  ;;  %v7592_v56 = vpop.permute.xlu0 %191 }
  0xb6   : > { %12518 = vst [vmem:[#allocation27_spill] sm:$0xff] %v7590_v55 }
  0xb7   : > { %569 = vperm.xlu1 %6576, %v7424_v14   ;;  %609 = vperm.xlu0 %6577, %v7472_v26  }
  0xb9   : > { %v7596_v57 = vpop.permute.xlu1 %195  ;;  %v7598_v58 = vpop.permute.xlu0 %199 }
  0xba   : > { %12519 = vst [vmem:[#allocation28_spill] sm:$0xff] %v7596_v57 }
  0xbb   : > { %573 = vperm.xlu1 %6576, %v7432_v16   ;;  %6579 = vset.pattern.permute.xlu0 %v7249_v59 }
  0xbc   : > { %647 = vperm.xlu0 %6579, %v7435_v17  }
  0xbe   : > { %v7602_v60 = vpop.permute.xlu1 %233  ;;  %v7604_v61 = vpop.permute.xlu0 %237 }
  0xbf   : > { %12520 = vst [vmem:[#allocation29_spill] sm:$0xff] %v7602_v60  ;;  %581 = vperm.xlu1 %6576, %v7440_v18  }
  0xc0   : > { %659 = vperm.xlu0 %6579, %v7443_v19  }
  0xc2   : > { %v7608_v62 = vpop.permute.xlu1 %241  ;;  %v7610_v63 = vpop.permute.xlu0 %249 }
  0xc3   : > { %12521 = vst [vmem:[#allocation30_spill] sm:$0xff] %v7608_v62  ;;  %589 = vperm.xlu1 %6576, %v7448_v20  }
  0xc4   : > { %667 = vperm.xlu0 %6579, %v7451_v21  }
  0xc6   : > { %v7614_v13 = vpop.permute.xlu1 %245  ;;  %v7616_v27 = vpop.permute.xlu0 %257 }
  0xc7   : > { %12522 = vst [vmem:[#allocation31_spill] sm:$0xff] %v7614_v13  ;;  %597 = vperm.xlu1 %6576, %v7456_v22  }
  0xc8   : > { %675 = vperm.xlu0 %6579, %v7459_v23  }
  0xca   : > { %v7620_v28 = vpop.permute.xlu1 %253  ;;  %v7622_v29 = vpop.permute.xlu0 %265 }
  0xcb   : > { %12523 = vst [vmem:[#allocation32_spill] sm:$0xff] %v7620_v28  ;;  %605 = vperm.xlu1 %6576, %v7464_v24   ;;  %v7250_v28 = vmov 8  }
  0xcc   : > { %683 = vperm.xlu0 %6579, %v7467_v25  }
  0xce   : > { %v7626_v30 = vpop.permute.xlu1 %261  ;;  %v7628_v33 = vpop.permute.xlu0 %273 }
  0xcf   : > { %12524 = vst [vmem:[#allocation33_spill] sm:$0xff] %v7626_v30  ;;  %12525 = vst [vmem:[#allocation34_spill] sm:$0xff] %v7628_v33  ;;  %6578 = vset.pattern.permute.xlu1 %v7249_v59 }
  0xd0   : > { %643 = vperm.xlu1 %6578, %v7427_v15   ;;  %691 = vperm.xlu0 %6579, %v7472_v26  }
  0xd2   : > { %v7632_v46 = vpop.permute.xlu1 %269  ;;  %v7634_v13 = vpop.permute.xlu0 %281 }
  0xd3   : > { %12526 = vst [vmem:[#allocation35_spill] sm:$0xff] %v7632_v46 }
  0xd4   : > { %651 = vperm.xlu1 %6578, %v7424_v14   ;;  %6581 = vset.pattern.permute.xlu0 %v7250_v28 }
  0xd5   : > { %729 = vperm.xlu0 %6581, %v7435_v17  }
  0xd6   : > { %v7638_v1 = vpop.permute.xlu1 %277 }
  0xd7   : > { %12527 = vst [vmem:[#allocation36_spill] sm:$0xff] %v7638_v1  ;;  %v7640_v30 = vpop.permute.xlu0 %319 }
  0xd8   : > { %655 = vperm.xlu1 %6578, %v7432_v16  }
  0xd9   : > { %741 = vperm.xlu0 %6581, %v7443_v19  }
  0xdb   : > { %v7644_v59 = vpop.permute.xlu1 %315  ;;  %v7646_v62 = vpop.permute.xlu0 %331 }
  0xdc   : > { %12528 = vst [vmem:[#allocation37_spill] sm:$0xff] %v7644_v59  ;;  %663 = vperm.xlu1 %6578, %v7440_v18  }
  0xdd   : > { %749 = vperm.xlu0 %6581, %v7451_v21  }
  0xdf   : > { %v7650_v46 = vpop.permute.xlu1 %323  ;;  %v7652_v57 = vpop.permute.xlu0 %339 }
  0xe0   : > { %12529 = vst [vmem:[#allocation38_spill] sm:$0xff] %v7650_v46  ;;  %671 = vperm.xlu1 %6578, %v7448_v20  }
  0xe1   : > { %757 = vperm.xlu0 %6581, %v7459_v23  }
  0xe3   : > { %v7656_v1 = vpop.permute.xlu1 %327  ;;  %v7658_v55 = vpop.permute.xlu0 %347 }
  0xe4   : > { %12530 = vst [vmem:[#allocation39_spill] sm:$0xff] %v7656_v1  ;;  %679 = vperm.xlu1 %6578, %v7456_v22   ;;  %v7251_v1 = vmov 9  }
  0xe5   : > { %765 = vperm.xlu0 %6581, %v7467_v25  }
  0xe7   : > { %v7662_v59 = vpop.permute.xlu1 %335  ;;  %v7664_v3 = vpop.permute.xlu0 %355 }
  0xe8   : > { %12531 = vst [vmem:[#allocation40_spill] sm:$0xff] %v7662_v59  ;;  %12532 = vst [vmem:[#allocation41_spill] sm:$0xff] %v7664_v3  ;;  %687 = vperm.xlu1 %6578, %v7464_v24  }
  0xe9   : > { %773 = vperm.xlu0 %6581, %v7472_v26  }
  0xeb   : > { %v7668_v46 = vpop.permute.xlu1 %343  ;;  %v7670_v60 = vpop.permute.xlu0 %363 }
  0xec   : > { %12533 = vst [vmem:[#allocation42_spill] sm:$0xff] %v7668_v46  ;;  %6580 = vset.pattern.permute.xlu1 %v7250_v28 }
  0xed   : > { %725 = vperm.xlu1 %6580, %v7427_v15   ;;  %6583 = vset.pattern.permute.xlu0 %v7251_v1 }
  0xee   : > { %811 = vperm.xlu0 %6583, %v7435_v17  }
  0xef   : > { %v7674_v53 = vpop.permute.xlu1 %351 }
  0xf0   : > { %12534 = vst [vmem:[#allocation43_spill] sm:$0xff] %v7674_v53  ;;  %v7676_v59 = vpop.permute.xlu0 %401 }
  0xf1   : > { %733 = vperm.xlu1 %6580, %v7424_v14  }
  0xf2   : > { %823 = vperm.xlu0 %6583, %v7443_v19  }
  0xf3   : > { %v7680_v5 = vpop.permute.xlu1 %359 }
  0xf4   : > { %12535 = vst [vmem:[#allocation44_spill] sm:$0xff] %v7680_v5  ;;  %v7682_v46 = vpop.permute.xlu0 %413 }
  0xf5   : > { %737 = vperm.xlu1 %6580, %v7432_v16  }
  0xf6   : > { %831 = vperm.xlu0 %6583, %v7451_v21  }
  0xf8   : > { %v7686_v28 = vpop.permute.xlu1 %397  ;;  %v7688_v51 = vpop.permute.xlu0 %421 }
  0xf9   : > { %12536 = vst [vmem:[#allocation45_spill] sm:$0xff] %v7686_v28  ;;  %745 = vperm.xlu1 %6580, %v7440_v18  }
  0xfa   : > { %839 = vperm.xlu0 %6583, %v7459_v23  }
  0xfc   : > { %v7692_v53 = vpop.permute.xlu1 %405  ;;  %v7694_v49 = vpop.permute.xlu0 %429 }
  0xfd   : > { %12537 = vst [vmem:[#allocation46_spill] sm:$0xff] %v7692_v53  ;;  %12538 = vst [vmem:[#allocation47_spill] sm:$0xff] %v7694_v49  ;;  %753 = vperm.xlu1 %6580, %v7448_v20   ;;  %v7252_v53 = vmov 10  }
  0xfe   : > { %847 = vperm.xlu0 %6583, %v7467_v25  }
 0x100   : > { %v7698_v5 = vpop.permute.xlu1 %409  ;;  %v7700_v47 = vpop.permute.xlu0 %437 }
 0x101   : > { %12539 = vst [vmem:[#allocation48_spill] sm:$0xff] %v7698_v5  ;;  %12540 = vst [vmem:[#allocation49_spill] sm:$0xff] %v7700_v47  ;;  %761 = vperm.xlu1 %6580, %v7456_v22  }
 0x102   : > { %855 = vperm.xlu0 %6583, %v7472_v26  }
 0x104   : > { %v7704_v28 = vpop.permute.xlu1 %417  ;;  %v7706_v7 = vpop.permute.xlu0 %445 }
 0x105   : > { %12541 = vst [vmem:[#allocation50_spill] sm:$0xff] %v7704_v28  ;;  %769 = vperm.xlu1 %6580, %v7464_v24  }
 0x106   : > { %6585 = vset.pattern.permute.xlu0 %v7252_v53 }
 0x107   : > { %893 = vperm.xlu0 %6585, %v7435_v17  }
 0x108   : > { %v7710_v45 = vpop.permute.xlu1 %425 }
 0x109   : > { %12542 = vst [vmem:[#allocation51_spill] sm:$0xff] %v7710_v45  ;;  %6582 = vset.pattern.permute.xlu1 %v7251_v1  ;;  %v7712_v5 = vpop.permute.xlu0 %483 }
 0x10a   : > { %807 = vperm.xlu1 %6582, %v7427_v15  }
 0x10b   : > { %905 = vperm.xlu0 %6585, %v7443_v19  }
 0x10c   : > { %v7716_v42 = vpop.permute.xlu1 %433 }
 0x10d   : > { %12543 = vst [vmem:[#allocation52_spill] sm:$0xff] %v7716_v42  ;;  %v7718_v28 = vpop.permute.xlu0 %495 }
 0x10e   : > { %815 = vperm.xlu1 %6582, %v7424_v14  }
 0x10f   : > { %913 = vperm.xlu0 %6585, %v7451_v21  }
 0x110   : > { %v7722_v9 = vpop.permute.xlu1 %441 }
 0x111   : > { %12544 = vst [vmem:[#allocation53_spill] sm:$0xff] %v7722_v9  ;;  %v7724_v40 = vpop.permute.xlu0 %503 }
 0x112   : > { %12545 = vst [vmem:[#allocation54_spill] sm:$0xff] %v7724_v40  ;;  %819 = vperm.xlu1 %6582, %v7432_v16  }
 0x113   : > { %921 = vperm.xlu0 %6585, %v7459_v23  }
 0x115   : > { %v7728_v1 = vpop.permute.xlu1 %479  ;;  %v7730_v45 = vpop.permute.xlu0 %511 }
 0x116   : > { %12546 = vst [vmem:[#allocation55_spill] sm:$0xff] %v7728_v1  ;;  %12547 = vst [vmem:[#allocation56_spill] sm:$0xff] %v7730_v45  ;;  %827 = vperm.xlu1 %6582, %v7440_v18   ;;  %v7253_v1 = vmov 11  }
 0x117   : > { %929 = vperm.xlu0 %6585, %v7467_v25  }
 0x119   : > { %v7734_v42 = vpop.permute.xlu1 %487  ;;  %v7736_v12 = vpop.permute.xlu0 %519 }
 0x11a   : > { %12548 = vst [vmem:[#allocation57_spill] sm:$0xff] %v7734_v42  ;;  %12549 = vst [vmem:[#allocation58_spill] sm:$0xff] %v7736_v12  ;;  %835 = vperm.xlu1 %6582, %v7448_v20  }
 0x11b   : > { %937 = vperm.xlu0 %6585, %v7472_v26  }
 0x11d   : > { %v7740_v9 = vpop.permute.xlu1 %491  ;;  %v7742_v10 = vpop.permute.xlu0 %527 }
 0x11e   : > { %12550 = vst [vmem:[#allocation59_spill] sm:$0xff] %v7740_v9  ;;  %843 = vperm.xlu1 %6582, %v7456_v22  }
 0x11f   : > { %6587 = vset.pattern.permute.xlu0 %v7253_v1 }
 0x120   : > { %975 = vperm.xlu0 %6587, %v7435_v17  }
 0x121   : > { %v7746_v38 = vpop.permute.xlu1 %499 }
 0x122   : > { %12551 = vst [vmem:[#allocation60_spill] sm:$0xff] %v7746_v38  ;;  %851 = vperm.xlu1 %6582, %v7464_v24   ;;  %v7749_v42 = vpop.permute.xlu0 %565 }
 0x124   : > { %987 = vperm.xlu0 %6587, %v7443_v19  }
 0x125   : > { %v7752_v36 = vpop.permute.xlu1 %507 }
 0x126   : > { %12552 = vst [vmem:[#allocation61_spill] sm:$0xff] %v7752_v36  ;;  %6584 = vset.pattern.permute.xlu1 %v7252_v53  ;;  %v7754_v9 = vpop.permute.xlu0 %577  ;;  %v120_v53 = vlaneseq }
 0x127   : > { %889 = vperm.xlu1 %6584, %v7427_v15  }
 0x128   : > { %995 = vperm.xlu0 %6587, %v7451_v21  }
 0x129   : > { %v7758_v34 = vpop.permute.xlu1 %515 }
 0x12a   : > { %12553 = vst [vmem:[#allocation62_spill] sm:$0xff] %v7758_v34  ;;  %v7760_v32 = vpop.permute.xlu0 %585  ;;  %v121_v34 = vshrl.u32 %v120_v53, 7  ;;  %v7791_v53 = vld [vmem:[%s7780_s23] sm:$0xff] }
 0x12b   : > { %12554 = vst [vmem:[#allocation63_spill] sm:$0xff] %v7760_v32  ;;  %897 = vperm.xlu1 %6584, %v7424_v14  }
 0x12c   : > { %1003 = vperm.xlu0 %6587, %v7459_v23   ;;  %v7803_v3 = vsub.s32 1, %v121_v34  ;;  %v7808_v49 = vsub.s32 2, %v121_v34 }
 0x12d   : > { %v7764_v38 = vpop.permute.xlu1 %523 }
 0x12e   : > { %12555 = vst [vmem:[#allocation64_spill] sm:$0xff] %v7764_v38  ;;  %v7766_v31 = vpop.permute.xlu0 %593  ;;  %12562 = vst [vmem:[#allocation71_spill] sm:$0xff] %v7803_v3  ;;  %v12563_v32 = vmov %v7803_v3  ;;  %v7821_v3 = vsub.s32 3, %v121_v34 }
 0x12f   : > { %12556 = vst [vmem:[#allocation65_spill] sm:$0xff] %v7766_v31  ;;  %901 = vperm.xlu1 %6584, %v7432_v16   ;;  %12564 = vst [vmem:[#allocation72_spill] sm:$0xff] %v7808_v49  ;;  %v7819_v40 = vrot.slane %v7791_v53, %v12563_v32 }
 0x130   : > { %1011 = vperm.xlu0 %6587, %v7467_v25   ;;  %12567 = vst [vmem:[#allocation75_spill] sm:$0xff] %v7821_v3 }
 0x132   : > { %v7770_v36 = vpop.permute.xlu1 %561  ;;  %v7772_v12 = vpop.permute.xlu0 %601 }
 0x133   : > { %12557 = vst [vmem:[#allocation66_spill] sm:$0xff] %v7770_v36  ;;  %12558 = vst [vmem:[#allocation67_spill] sm:$0xff] %v7772_v12  ;;  %909 = vperm.xlu1 %6584, %v7440_v18   ;;  %v7787_v36 = vsub.s32 0, %v121_v34  ;;  %v12415_v12 = vmov 12  }
 0x134   : > { %1019 = vperm.xlu0 %6587, %v7472_v26  }
 0x135   : > { %12560 = vst [vmem:[#allocation69_spill] sm:$0xff] %v7787_v36 }
 0x136   : > { %v7782_v38 = vpop.permute.xlu1 %569  ;;  %v7784_v31 = vpop.permute.xlu0 %609 }
 0x137   : > { %12559 = vst [vmem:[#allocation68_spill] sm:$0xff] %v7782_v38  ;;  %917 = vperm.xlu1 %6584, %v7448_v20   ;;  %v7801_v38 = vrot.slane %v7791_v53, %v7787_v36  ;;  %v7840_v20 = vsub.s32 5, %v121_v34 }
 0x138   : > { %6589 = vset.pattern.permute.xlu0 %v12415_v12 }
 0x139   : > { %1057 = vperm.xlu0 %6589, %v7435_v17   ;;  %v136_v12 = vadd.f32 %v7801_v38, %v7560_v44  ;;  %v128_v44 = vadd.f32 %v7801_v38, %v7538_v37  ;;  %v207_v37 = vadd.f32 %v7819_v40, %v7568_v48 }
 0x13a   : > { %v7794_v47 = vpop.permute.xlu1 %573 }
 0x13b   : > { %12561 = vst [vmem:[#allocation70_spill] sm:$0xff] %v7794_v47  ;;  %925 = vperm.xlu1 %6584, %v7456_v22   ;;  %v7797_v45 = vpop.permute.xlu0 %647  ;;  %v125_v47 = vadd.f32 %v7801_v38, %v7532_v35  ;;  %v218_v35 = vadd.f32 %v7819_v40, %v7598_v58 }
 0x13d   : > { %1069 = vperm.xlu0 %6589, %v7443_v19   ;;  %v12568_v19 = vmov %v7821_v3  ;;  %v138_v3 = vmax.f32 %v7052_v11, %v125_v47  ;;  %v141_v11 = vmax.f32 %v7040_v8, %v128_v44  ;;  %v210_v47 = vadd.f32 %v7819_v40, %v7574_v50 }
 0x13e   : > { %v7810_v33 = vpop.permute.xlu1 %581  ;;  %v132_v8 = vadd.f32 %v7801_v38, %v7550_v41 }
 0x13f   : > { %12565 = vst [vmem:[#allocation73_spill] sm:$0xff] %v7810_v33  ;;  %933 = vperm.xlu1 %6584, %v7464_v24   ;;  %v7815_v22 = vpop.permute.xlu0 %659  ;;  %v149_v33 = vmax.f32 %v7008_v0, %v136_v12  ;;  %v7831_v24 = vrot.slane %v7791_v53, %v7808_v49  ;;  %v130_v12 = vadd.f32 %v7801_v38, %v7544_v39 }
 0x140   : > { %12566 = vst [vmem:[#allocation74_spill] sm:$0xff] %v7815_v22  ;;  %v7833_v22 = vsub.s32 4, %v121_v34  ;;  %v7850_v49 = vrot.slane %v7791_v53, %v12568_v19  ;;  %v220_v44 = vmax.f32 %v138_v3, %v207_v37  ;;  %v223_v41 = vmax.f32 %v141_v11, %v210_v47 }
 0x141   : > { %1077 = vperm.xlu0 %6589, %v7451_v21   ;;  %v300_v58 = vadd.f32 %v7831_v24, %v7634_v13  ;;  %v231_v48 = vmax.f32 %v149_v33, %v218_v35  ;;  %v289_v50 = vadd.f32 %v7831_v24, %v7604_v61  ;;  %v7873_v33 = vrot.slane %v7791_v53, %v7840_v20 }
 0x142   : > { %12569 = vst [vmem:[#allocation76_spill] sm:$0xff] %v7833_v22  ;;  %v7835_v32 = vpop.permute.xlu1 %589  ;;  %v382_v39 = vadd.f32 %v7850_v49, %v7670_v60  ;;  %v7861_v13 = vrot.slane %v7791_v53, %v7833_v22  ;;  %v143_v35 = vmax.f32 %v7032_v6, %v130_v12  ;;  %v292_v61 = vadd.f32 %v7831_v24, %v7610_v63 }
 0x143   : > { %12570 = vst [vmem:[#allocation77_spill] sm:$0xff] %v7835_v32  ;;  %6586 = vset.pattern.permute.xlu1 %v7253_v1  ;;  %v7842_v0 = vpop.permute.xlu0 %667  ;;  %v7863_v1 = vsub.s32 6, %v121_v34  ;;  %v313_v22 = vmax.f32 %v231_v48, %v300_v58  ;;  %v371_v3 = vadd.f32 %v7850_v49, %v7640_v30  ;;  %v7887_v37 = vsub.s32 7, %v121_v34 }
 0x144   : > { %971 = vperm.xlu1 %6586, %v7427_v15   ;;  %v145_v58 = vmax.f32 %v7024_v4, %v132_v8  ;;  %v302_v63 = vmax.f32 %v220_v44, %v289_v50  ;;  %v374_v30 = vadd.f32 %v7850_v49, %v7646_v62  ;;  %v453_v34 = vadd.f32 %v7861_v13, %v7676_v59  ;;  %v7922_v8 = vld [vmem:[%s7780_s23 + $0x8] sm:$0xff] }
 0x145   : > { %1085 = vperm.xlu0 %6589, %v7459_v23   ;;  %12571 = vst [vmem:[#allocation78_spill] sm:$0xff] %v7863_v1  ;;  %v12572_v19 = vmov %v7863_v1  ;;  %v212_v1 = vadd.f32 %v7819_v40, %v7580_v52  ;;  %12574 = vst [vmem:[#allocation80_spill] sm:$0xff] %v7887_v37  ;;  %v395_v6 = vmax.f32 %v313_v22, %v382_v39 }
 0x146   : > { %v7865_v32 = vpop.permute.xlu1 %597  ;;  %v546_v52 = vadd.f32 %v7873_v33, %v7742_v10  ;;  %v134_v10 = vadd.f32 %v7801_v38, %v7556_v43  ;;  %v305_v4 = vmax.f32 %v223_v41, %v292_v61  ;;  %v384_v39 = vmax.f32 %v302_v63, %v371_v3 }
 0x147   : > { %12573 = vst [vmem:[#allocation79_spill] sm:$0xff] %v7865_v32  ;;  %v7875_v60 = vpop.permute.xlu0 %675  ;;  %v464_v32 = vadd.f32 %v7861_v13, %v7706_v7  ;;  %v7894_v7 = vrot.slane %v7791_v53, %v12572_v19  ;;  %v225_v11 = vmax.f32 %v143_v35, %v212_v1  ;;  %v535_v62 = vadd.f32 %v7873_v33, %v7712_v5 }
 0x148   : > { %979 = vperm.xlu1 %6586, %v7424_v14   ;;  %v7914_v59 = vrot.slane %v7791_v53, %v7887_v37  ;;  %v294_v43 = vadd.f32 %v7831_v24, %v7616_v27  ;;  %v214_v44 = vadd.f32 %v7819_v40, %v7586_v54  ;;  %v387_v50 = vmax.f32 %v305_v4, %v374_v30  ;;  %v12632_v37 = vld [vmem:[#allocation48_spill] sm:$0xff] }
 0x149   : > { %1093 = vperm.xlu0 %6589, %v7467_v25   ;;  %v477_v47 = vmax.f32 %v395_v6, %v464_v32  ;;  %v628_v48 = vadd.f32 %v7894_v7, %v7784_v31  ;;  %v456_v32 = vadd.f32 %v7861_v13, %v7682_v46  ;;  %v466_v5 = vmax.f32 %v384_v39, %v453_v34  ;;  %v12575_v39 = vld [vmem:[#allocation12_spill] sm:$0xff] }
 0x14a   : > { %v7896_v12 = vpop.permute.xlu1 %605  ;;  %v617_v53 = vadd.f32 %v7894_v7, %v7749_v42  ;;  %v376_v27 = vadd.f32 %v7850_v49, %v7652_v57  ;;  %v538_v46 = vadd.f32 %v7873_v33, %v7718_v28  ;;  %v147_v54 = vmax.f32 %v7016_v2, %v134_v10 }
 0x14b   : > { %v7903_v22 = vpop.permute.xlu0 %683  ;;  %v559_v31 = vmax.f32 %v477_v47, %v546_v52  ;;  %v548_v3 = vmax.f32 %v466_v5, %v535_v62  ;;  %v699_v42 = vadd.f32 %v7914_v59, %v7797_v45  ;;  %v12445_v6 = vmov 13   ;;  %v12576_v62 = vld [vmem:[#allocation54_spill] sm:$0xff] }
 0x14c   : > { %983 = vperm.xlu1 %6586, %v7432_v16   ;;  %v7942_v57 = vrot.slane %v7922_v8, %v7787_v36  ;;  %v307_v52 = vmax.f32 %v225_v11, %v294_v43  ;;  %v296_v28 = vadd.f32 %v7831_v24, %v7622_v29  ;;  %v469_v63 = vmax.f32 %v387_v50, %v456_v32  ;;  %v12577_v32 = vld [vmem:[#allocation74_spill] sm:$0xff] }
 0x14d   : > { %1101 = vperm.xlu0 %6589, %v7472_v26   ;;  %v641_v41 = vmax.f32 %v559_v31, %v628_v48  ;;  %v227_v2 = vmax.f32 %v145_v58, %v214_v44  ;;  %v458_v45 = vadd.f32 %v7861_v13, %v7688_v51  ;;  %v630_v34 = vmax.f32 %v548_v3, %v617_v53  ;;  %v12578_v44 = vld [vmem:[#allocation34_spill] sm:$0xff]  ;;  %v12580_v53 = vld [vmem:[#allocation11_spill] sm:$0xff] }
 0x14e   : > { %v620_v10 = vadd.f32 %v7894_v7, %v7754_v9  ;;  %v216_v11 = vadd.f32 %v7819_v40, %v7592_v56  ;;  %v389_v48 = vmax.f32 %v307_v52, %v376_v27  ;;  %v378_v29 = vadd.f32 %v7850_v49, %v7658_v55  ;;  %v12579_v55 = vld [vmem:[#allocation47_spill] sm:$0xff] }
 0x14f   : > { %v7928_v35 = vpop.permute.xlu1 %643  ;;  %v692_v1 = vpop.permute.xlu0 %691  ;;  %v551_v4 = vmax.f32 %v469_v63, %v538_v46  ;;  %v540_v51 = vadd.f32 %v7873_v33, %v12576_v62  ;;  %v7962_v43 = vmax.f32 %v630_v34, %v699_v42  ;;  %v702_v9 = vadd.f32 %v7914_v59, %v12577_v32  ;;  %v12581_v46 = vld [vmem:[#allocation63_spill] sm:$0xff] }
 0x150   : > { %v710_v61 = vadd.f32 %v7914_v59, %v692_v1  ;;  %991 = vperm.xlu1 %6586, %v7440_v18   ;;  %v309_v56 = vmax.f32 %v227_v2, %v296_v28  ;;  %v298_v50 = vadd.f32 %v7831_v24, %v12578_v44  ;;  %v460_v5 = vadd.f32 %v7861_v13, %v12579_v55  ;;  %v12582_v28 = vld [vmem:[#allocation41_spill] sm:$0xff]  ;;  %v12583_v2 = vld [vmem:[#allocation56_spill] sm:$0xff] }
 0x151   : > { %6591 = vset.pattern.permute.xlu0 %v12445_v6  ;;  %v471_v1 = vmax.f32 %v389_v48, %v458_v45  ;;  %v633_v27 = vmax.f32 %v551_v4, %v620_v10  ;;  %v229_v42 = vmax.f32 %v147_v54, %v216_v11  ;;  %v380_v63 = vadd.f32 %v7850_v49, %v12582_v28  ;;  %v12586_v44 = vld [vmem:[#allocation65_spill] sm:$0xff]  ;;  %v12616_v6 = vld [vmem:[#allocation31_spill] sm:$0xff] }
 0x152   : > { %v7946_v30 = vmax.f32 %v641_v41, %v710_v61  ;;  %1139 = vperm.xlu0 %6591, %v7435_v17   ;;  %v622_v41 = vadd.f32 %v7894_v7, %v12581_v46  ;;  %v391_v52 = vmax.f32 %v309_v56, %v378_v29  ;;  %v542_v34 = vadd.f32 %v7873_v33, %v12583_v2  ;;  %v12585_v29 = vld [vmem:[#allocation49_spill] sm:$0xff] }
 0x153   : > { %v7953_v47 = vpop.permute.xlu1 %651  ;;  %v553_v10 = vmax.f32 %v471_v1, %v540_v51  ;;  %v7985_v48 = vmax.f32 %v633_v27, %v702_v9  ;;  %v704_v4 = vadd.f32 %v7914_v59, %v7842_v0  ;;  %v311_v54 = vmax.f32 %v229_v42, %v298_v50  ;;  %v12587_v27 = vld [vmem:[#allocation14_spill] sm:$0xff] }
 0x154   : > { %999 = vperm.xlu1 %6586, %v12575_v39   ;;  %v730_v58 = vpop.permute.xlu0 %729  ;;  %v473_v11 = vmax.f32 %v391_v52, %v460_v5  ;;  %v462_v32 = vadd.f32 %v7861_v13, %v12585_v29  ;;  %v624_v55 = vadd.f32 %v7894_v7, %v12586_v44  ;;  %v12588_v5 = vld [vmem:[#allocation58_spill] sm:$0xff]  ;;  %v291_v36 = vadd.f32 %v7831_v24, %v12616_v6 }
 0x155   : > { %v7967_v31 = vadd.f32 %v7942_v57, %v730_v58  ;;  %v12584_v58 = vld [vmem:[#allocation13_spill] sm:$0xff]  ;;  %v635_v56 = vmax.f32 %v553_v10, %v622_v41  ;;  %v393_v0 = vmax.f32 %v311_v54, %v380_v63  ;;  %v544_v46 = vadd.f32 %v7873_v33, %v12588_v5  ;;  %v12591_v5 = vld [vmem:[#allocation71_spill] sm:$0xff] }
 0x156   : > { %1151 = vperm.xlu0 %6591, %v12580_v53   ;;  %v555_v1 = vmax.f32 %v473_v11, %v542_v34  ;;  %v706_v41 = vadd.f32 %v7914_v59, %v7875_v60  ;;  %v708_v60 = vadd.f32 %v7914_v59, %v7903_v22 }
 0x157   : > { %v794_v61 = vmax.f32 %v7962_v43, %v7967_v31  ;;  %v7978_v3 = vpop.permute.xlu1 %655  ;;  %v8004_v42 = vmax.f32 %v635_v56, %v704_v4  ;;  %v475_v28 = vmax.f32 %v393_v0, %v462_v32 }
 0x158   : > { %1007 = vperm.xlu1 %6586, %v12584_v58   ;;  %v742_v45 = vpop.permute.xlu0 %741  ;;  %v637_v2 = vmax.f32 %v555_v1, %v624_v55 }
 0x159   : > { %v7990_v62 = vadd.f32 %v7942_v57, %v742_v45  ;;  %v12589_v45 = vld [vmem:[#allocation67_spill] sm:$0xff] }
 0x15a   : > { %1159 = vperm.xlu0 %6591, %v7451_v21   ;;  %v626_v63 = vadd.f32 %v7894_v7, %v12589_v45  ;;  %v8016_v54 = vmax.f32 %v637_v2, %v706_v41  ;;  %v12592_v2 = vld [vmem:[#allocation15_spill] sm:$0xff]  ;;  %v12593_v45 = vld [vmem:[#allocation16_spill] sm:$0xff] }
 0x15b   : > { %v797_v51 = vmax.f32 %v7985_v48, %v7990_v62  ;;  %v7999_v9 = vpop.permute.xlu1 %663  ;;  %v12590_v48 = vmov 12   ;;  %v557_v62 = vmax.f32 %v475_v28, %v544_v46  ;;  %v8047_v46 = vrot.slane %v7922_v8, %v12591_v5 }
 0x15c   : > { %1015 = vperm.xlu1 %6586, %v12587_v27   ;;  %v750_v50 = vpop.permute.xlu0 %749 }
 0x15d   : > { %v786_v52 = vadd.f32 %v7942_v57, %v750_v50  ;;  %v639_v29 = vmax.f32 %v557_v62, %v626_v63  ;;  %v12444_v50 = vmov 14   ;;  %v124_v63 = vadd.f32 %v7801_v38, %v12593_v45  ;;  %v12596_v62 = vld [vmem:[#allocation19_spill] sm:$0xff] }
 0x15e   : > { %1167 = vperm.xlu0 %6591, %v7459_v23  }
 0x15f   : > { %v799_v34 = vmax.f32 %v8004_v42, %v786_v52  ;;  %v8013_v10 = vpop.permute.xlu1 %671  ;;  %v8029_v55 = vmax.f32 %v639_v29, %v708_v60  ;;  %v131_v60 = vadd.f32 %v7801_v38, %v12596_v62 }
 0x160   : > { %6588 = vset.pattern.permute.xlu1 %v12590_v48  ;;  %v758_v4 = vpop.permute.xlu0 %757  ;;  %v12595_v48 = vld [vmem:[#allocation18_spill] sm:$0xff] }
 0x161   : > { %v8021_v11 = vadd.f32 %v7942_v57, %v758_v4  ;;  %1053 = vperm.xlu1 %6588, %v7427_v15  }
 0x162   : > { %1175 = vperm.xlu0 %6591, %v7467_v25  }
 0x163   : > { %v801_v32 = vmax.f32 %v8016_v54, %v8021_v11  ;;  %v8027_v56 = vpop.permute.xlu1 %679 }
 0x164   : > { %v766_v44 = vpop.permute.xlu0 %765 }
 0x165   : > { %v8032_v0 = vadd.f32 %v7942_v57, %v766_v44  ;;  %1061 = vperm.xlu1 %6588, %v7424_v14   ;;  %v12597_v44 = vld [vmem:[#allocation9_spill] sm:$0xff]  ;;  %v12612_v14 = vld [vmem:[#allocation28_spill] sm:$0xff] }
 0x166   : > { %1183 = vperm.xlu0 %6591, %v7472_v26  }
 0x167   : > { %v8038_v25 = vpop.permute.xlu1 %687 }
 0x168   : > { %v774_v22 = vpop.permute.xlu0 %773 }
 0x169   : > { %v8041_v1 = vadd.f32 %v7942_v57, %v774_v22  ;;  %1065 = vperm.xlu1 %6588, %v7432_v16   ;;  %v12598_v22 = vld [vmem:[#allocation10_spill] sm:$0xff] }
 0x16a   : > { %6593 = vset.pattern.permute.xlu0 %v12444_v50  ;;  %v137_v5 = vmax.f32 %v12598_v22, %v124_v63  ;;  %v12611_v50 = vld [vmem:[#allocation27_spill] sm:$0xff] }
 0x16b   : > { %1221 = vperm.xlu0 %6593, %v7435_v17  }
 0x16c   : > { %v8052_v26 = vpop.permute.xlu1 %725 }
 0x16d   : > { %1073 = vperm.xlu1 %6588, %v7440_v18   ;;  %v812_v42 = vpop.permute.xlu0 %811  ;;  %v126_v18 = vadd.f32 %v7801_v38, %v12592_v2  ;;  %v12602_v2 = vld [vmem:[#allocation22_spill] sm:$0xff] }
 0x16e   : > { %v863_v41 = vadd.f32 %v8047_v46, %v812_v42  ;;  %v12599_v42 = vld [vmem:[#allocation20_spill] sm:$0xff]  ;;  %v206_v45 = vadd.f32 %v7819_v40, %v12602_v2 }
 0x16f   : > { %1233 = vperm.xlu0 %6593, %v12580_v53   ;;  %v12594_v53 = vld [vmem:[#allocation17_spill] sm:$0xff] }
 0x170   : > { %v8060_v16 = vmax.f32 %v794_v61, %v863_v41  ;;  %v8062_v52 = vpop.permute.xlu1 %733  ;;  %v127_v43 = vadd.f32 %v7801_v38, %v12594_v53  ;;  %v12600_v41 = vld [vmem:[#allocation8_spill] sm:$0xff] }
 0x171   : > { %1081 = vperm.xlu1 %6588, %v12575_v39   ;;  %v824_v28 = vpop.permute.xlu0 %823  ;;  %v129_v39 = vadd.f32 %v7801_v38, %v12595_v48 }
 0x172   : > { %v866_v17 = vadd.f32 %v8047_v46, %v824_v28  ;;  %v140_v28 = vmax.f32 %v12600_v41, %v127_v43  ;;  %v12606_v43 = vld [vmem:[#allocation25_spill] sm:$0xff] }
 0x173   : > { %1241 = vperm.xlu0 %6593, %v7451_v21   ;;  %v139_v21 = vmax.f32 %v12597_v44, %v126_v18  ;;  %v12603_v18 = vld [vmem:[#allocation7_spill] sm:$0xff]  ;;  %v12605_v44 = vld [vmem:[#allocation24_spill] sm:$0xff]  ;;  %v211_v22 = vadd.f32 %v7819_v40, %v12606_v43  ;;  %v217_v43 = vadd.f32 %v7819_v40, %v12612_v14 }
 0x174   : > { %v8073_v31 = vmax.f32 %v797_v51, %v866_v17  ;;  %v8075_v61 = vpop.permute.xlu1 %737  ;;  %v133_v51 = vadd.f32 %v7801_v38, %v12599_v42  ;;  %v12601_v17 = vld [vmem:[#allocation21_spill] sm:$0xff]  ;;  %v142_v63 = vmax.f32 %v12603_v18, %v129_v39  ;;  %v12607_v42 = vld [vmem:[#allocation6_spill] sm:$0xff] }
 0x175   : > { %1089 = vperm.xlu1 %6588, %v12584_v58   ;;  %v832_v4 = vpop.permute.xlu0 %831  ;;  %v135_v58 = vadd.f32 %v7801_v38, %v12601_v17  ;;  %v12609_v17 = vld [vmem:[#allocation29_spill] sm:$0xff] }
 0x176   : > { %v868_v29 = vadd.f32 %v8047_v46, %v832_v4  ;;  %v12604_v4 = vld [vmem:[#allocation23_spill] sm:$0xff]  ;;  %v288_v39 = vadd.f32 %v7831_v24, %v12609_v17  ;;  %v12610_v18 = vld [vmem:[#allocation5_spill] sm:$0xff]  ;;  %v219_v17 = vmax.f32 %v137_v5, %v206_v45 }
 0x177   : > { %1249 = vperm.xlu0 %6593, %v7459_v23   ;;  %v208_v62 = vadd.f32 %v7819_v40, %v12604_v4  ;;  %v209_v23 = vadd.f32 %v7819_v40, %v12605_v44  ;;  %v146_v4 = vmax.f32 %v12610_v18, %v133_v51  ;;  %v215_v44 = vadd.f32 %v7819_v40, %v12611_v50 }
 0x178   : > { %v8093_v53 = vmax.f32 %v799_v34, %v868_v29  ;;  %v8095_v48 = vpop.permute.xlu1 %745  ;;  %v144_v34 = vmax.f32 %v12607_v42, %v131_v60  ;;  %v12608_v29 = vld [vmem:[#allocation26_spill] sm:$0xff]  ;;  %v8119_v60 = vld [vmem:[%s7421_s19 + $0x50] sm:$0xff]  ;;  %v12614_v42 = vld [vmem:[#allocation4_spill] sm:$0xff] }
 0x179   : > { %1097 = vperm.xlu1 %6588, %v12587_v27   ;;  %v840_v38 = vpop.permute.xlu0 %839  ;;  %v213_v41 = vadd.f32 %v7819_v40, %v12608_v29  ;;  %v12613_v27 = vld [vmem:[#allocation30_spill] sm:$0xff]  ;;  %v148_v29 = vmax.f32 %v12614_v42, %v135_v58  ;;  %v221_v14 = vmax.f32 %v139_v21, %v208_v62  ;;  %v222_v18 = vmax.f32 %v140_v28, %v209_v23  ;;  %v8153_v23 = vld [vmem:[%s7421_s19 + $0x60] sm:$0xff] }
 0x17a   : > { %v870_v2 = vadd.f32 %v8047_v46, %v840_v38  ;;  %v290_v15 = vadd.f32 %v7831_v24, %v12613_v27  ;;  %v12615_v38 = vld [vmem:[#allocation37_spill] sm:$0xff]  ;;  %v8132_v27 = vmax.f32 %v142_v63, %v211_v22  ;;  %v12617_v58 = vmov 13   ;;  %v12619_v63 = vld [vmem:[#allocation38_spill] sm:$0xff] }
 0x17b   : > { %1257 = vperm.xlu0 %6593, %v8119_v60   ;;  %v370_v51 = vadd.f32 %v7850_v49, %v12615_v38  ;;  %v8137_v45 = vmax.f32 %v144_v34, %v213_v41  ;;  %v301_v42 = vmax.f32 %v219_v17, %v288_v39  ;;  %v12618_v38 = vld [vmem:[#allocation45_spill] sm:$0xff]  ;;  %v8146_v21 = vmax.f32 %v146_v4, %v215_v44  ;;  %v12620_v34 = vld [vmem:[#allocation55_spill] sm:$0xff]  ;;  %v12622_v44 = vld [vmem:[#allocation32_spill] sm:$0xff] }
 0x17c   : > { %v8128_v50 = vmax.f32 %v801_v32, %v870_v2  ;;  %v8130_v40 = vpop.permute.xlu1 %753  ;;  %v452_v54 = vadd.f32 %v7861_v13, %v12618_v38  ;;  %v8143_v32 = vld [vmem:[%s7421_s19] sm:$0xff]  ;;  %v8148_v28 = vmax.f32 %v148_v29, %v217_v43  ;;  %v303_v6 = vmax.f32 %v221_v14, %v290_v15  ;;  %v12624_v14 = vld [vmem:[#allocation46_spill] sm:$0xff]  ;;  %v8181_v38 = vld [vmem:[%s7421_s19 + $0x10] sm:$0xff] }
 0x17d   : > { %6590 = vset.pattern.permute.xlu1 %v12617_v58  ;;  %v848_v5 = vpop.permute.xlu0 %847  ;;  %v372_v62 = vadd.f32 %v7850_v49, %v12619_v63  ;;  %v383_v22 = vmax.f32 %v301_v42, %v370_v51  ;;  %v534_v41 = vadd.f32 %v7873_v33, %v12620_v34  ;;  %v12621_v39 = vmax.f32 %v8029_v55, %v8032_v0  ;;  %v12623_v29 = vld [vmem:[#allocation33_spill] sm:$0xff]  ;;  %v12626_v0 = vld [vmem:[#allocation66_spill] sm:$0xff]  ;;  %v12627_v63 = vld [vmem:[#allocation39_spill] sm:$0xff] }
 0x17e   : > { %v872_v11 = vadd.f32 %v8047_v46, %v848_v5  ;;  %1135 = vperm.xlu1 %6590, %v8143_v32   ;;  %v304_v15 = vmax.f32 %v222_v18, %v291_v36  ;;  %v293_v43 = vadd.f32 %v7831_v24, %v12622_v44  ;;  %v8169_v17 = vadd.f32 %v7831_v24, %v12623_v29  ;;  %v12625_v5 = vld [vmem:[#allocation35_spill] sm:$0xff] }
 0x17f   : > { %1265 = vperm.xlu0 %6593, %v8153_v23   ;;  %v454_v51 = vadd.f32 %v7861_v13, %v12624_v14  ;;  %v8175_v42 = vadd.f32 %v7831_v24, %v12625_v5  ;;  %v465_v55 = vmax.f32 %v383_v22, %v452_v54  ;;  %v616_v36 = vadd.f32 %v7894_v7, %v12626_v0  ;;  %v12629_v54 = vld [vmem:[#allocation72_spill] sm:$0xff]  ;;  %v12630_v14 = vld [vmem:[#allocation36_spill] sm:$0xff] }
 0x180   : > { %v8161_v2 = vmax.f32 %v12621_v39, %v872_v11  ;;  %v8163_v4 = vpop.permute.xlu1 %761  ;;  %v385_v11 = vmax.f32 %v303_v6, %v372_v62  ;;  %v373_v34 = vadd.f32 %v7850_v49, %v12627_v63  ;;  %v12628_v39 = vld [vmem:[#allocation57_spill] sm:$0xff]  ;;  %v12451_v29 = vmov 15  }
 0x181   : > { %v856_v58 = vpop.permute.xlu0 %855  ;;  %v536_v44 = vadd.f32 %v7873_v33, %v12628_v39  ;;  %v8191_v22 = vrot.slane %v7922_v8, %v12629_v54  ;;  %v547_v5 = vmax.f32 %v465_v55, %v534_v41  ;;  %v698_v6 = vadd.f32 %v7914_v59, %v7928_v35  ;;  %v6600_v39 = vld [vmem:[%s7421_s19 + $0x8] sm:$0xff] }
 0x182   : > { %v874_v18 = vadd.f32 %v8047_v46, %v856_v58  ;;  %1143 = vperm.xlu1 %6590, %v8181_v38   ;;  %v8195_v58 = vadd.f32 %v7831_v24, %v12630_v14  ;;  %v12631_v62 = vmax.f32 %v7946_v30, %v8041_v1  ;;  %v306_v54 = vmax.f32 %v8132_v27, %v293_v43  ;;  %v12633_v14 = vld [vmem:[#allocation68_spill] sm:$0xff]  ;;  %v12641_v30 = vld [vmem:[#allocation73_spill] sm:$0xff] }
 0x183   : > { %6595 = vset.pattern.permute.xlu0 %v12451_v29  ;;  %v467_v29 = vmax.f32 %v385_v11, %v454_v51  ;;  %v455_v24 = vadd.f32 %v7861_v13, %v12632_v37  ;;  %v618_v41 = vadd.f32 %v7894_v7, %v12633_v14  ;;  %v308_v35 = vmax.f32 %v8137_v45, %v8169_v17  ;;  %v12634_v43 = vld [vmem:[#allocation40_spill] sm:$0xff]  ;;  %v12635_v17 = vld [vmem:[#allocation59_spill] sm:$0xff] }
 0x184   : > { %v8202_v0 = vmax.f32 %v12631_v62, %v874_v18  ;;  %v8204_v63 = vpop.permute.xlu1 %769  ;;  %1303 = vperm.xlu0 %6595, %v6600_v39   ;;  %v629_v1 = vmax.f32 %v547_v5, %v616_v36  ;;  %v780_v55 = vadd.f32 %v7942_v57, %v8052_v26  ;;  %v8219_v18 = vld [vmem:[%s7421_s19 + $0x18] sm:$0xff]  ;;  %v386_v37 = vmax.f32 %v304_v15, %v373_v34  ;;  %v6602_v39 = vld [vmem:[%s7421_s19 + $0x20] sm:$0xff]  ;;  %v12636_v34 = vld [vmem:[#allocation50_spill] sm:$0xff] }
 0x185   : > { %v375_v51 = vadd.f32 %v7850_v49, %v12634_v43  ;;  %v549_v11 = vmax.f32 %v467_v29, %v536_v44  ;;  %v537_v26 = vadd.f32 %v7873_v33, %v12635_v17  ;;  %v700_v5 = vadd.f32 %v7914_v59, %v7953_v47  ;;  %v12637_v43 = vld [vmem:[#allocation70_spill] sm:$0xff]  ;;  %v6604_v14 = vld [vmem:[%s7421_s19 + $0x30] sm:$0xff] }
 0x186   : > { %1147 = vperm.xlu1 %6590, %v8219_v18   ;;  %v894_v27 = vpop.permute.xlu0 %893  ;;  %v711_v36 = vmax.f32 %v629_v1, %v698_v6  ;;  %v468_v15 = vmax.f32 %v386_v37, %v455_v24  ;;  %v457_v44 = vadd.f32 %v7861_v13, %v12636_v34  ;;  %v619_v45 = vadd.f32 %v7894_v7, %v12637_v43  ;;  %v8244_v1 = vld [vmem:[%s7421_s19 + $0x28] sm:$0xff] }
 0x187   : > { %v8225_v62 = vadd.f32 %v8191_v22, %v894_v27  ;;  %v631_v29 = vmax.f32 %v549_v11, %v618_v41  ;;  %v782_v6 = vadd.f32 %v7942_v57, %v8062_v52  ;;  %v388_v41 = vmax.f32 %v306_v54, %v375_v51  ;;  %v12638_v37 = vld [vmem:[#allocation42_spill] sm:$0xff]  ;;  %v12640_v51 = vld [vmem:[#allocation51_spill] sm:$0xff] }
 0x188   : > { %1315 = vperm.xlu0 %6595, %v6602_v39   ;;  %v793_v17 = vmax.f32 %v711_v36, %v780_v55  ;;  %v377_v11 = vadd.f32 %v7850_v49, %v12638_v37  ;;  %v12639_v39 = vld [vmem:[#allocation60_spill] sm:$0xff]  ;;  %v550_v55 = vmax.f32 %v468_v15, %v537_v26  ;;  %v701_v36 = vadd.f32 %v7914_v59, %v7978_v3 }
 0x189   : > { %v808_v27 = vpop.permute.xlu1 %807  ;;  %v539_v34 = vadd.f32 %v7873_v33, %v12639_v39  ;;  %v713_v52 = vmax.f32 %v631_v29, %v700_v5  ;;  %v470_v54 = vmax.f32 %v388_v41, %v457_v44  ;;  %v459_v37 = vadd.f32 %v7861_v13, %v12640_v51  ;;  %v8269_v29 = vld [vmem:[%s7421_s19 + $0x38] sm:$0xff] }
 0x18a   : > { %v862_v47 = vadd.f32 %v8047_v46, %v808_v27  ;;  %1155 = vperm.xlu1 %6590, %v8244_v1   ;;  %v906_v24 = vpop.permute.xlu0 %905  ;;  %v621_v39 = vadd.f32 %v7894_v7, %v12641_v30  ;;  %v632_v26 = vmax.f32 %v550_v55, %v619_v45  ;;  %v783_v3 = vadd.f32 %v7942_v57, %v8075_v61  ;;  %v12643_v45 = vld [vmem:[#allocation61_spill] sm:$0xff] }
 0x18b   : > { %v8252_v43 = vadd.f32 %v8191_v22, %v906_v24  ;;  %v795_v5 = vmax.f32 %v713_v52, %v782_v6  ;;  %v541_v6 = vadd.f32 %v7873_v33, %v12643_v45  ;;  %v6606_v52 = vld [vmem:[%s7421_s19 + $0x40] sm:$0xff] }
 0x18c   : > { %v8256_v27 = vmax.f32 %v793_v17, %v862_v47  ;;  %1323 = vperm.xlu0 %6595, %v6604_v14   ;;  %v390_v14 = vmax.f32 %v308_v35, %v377_v11  ;;  %v12642_v17 = vld [vmem:[#allocation43_spill] sm:$0xff]  ;;  %v552_v47 = vmax.f32 %v470_v54, %v539_v34  ;;  %v714_v61 = vmax.f32 %v632_v26, %v701_v36  ;;  %v12644_v11 = vld [vmem:[#allocation52_spill] sm:$0xff] }
 0x18d   : > { %v961_v24 = vmax.f32 %v8073_v31, %v8252_v43  ;;  %v816_v19 = vpop.permute.xlu1 %815  ;;  %v379_v30 = vadd.f32 %v7850_v49, %v12642_v17  ;;  %v461_v51 = vadd.f32 %v7861_v13, %v12644_v11  ;;  %v12645_v17 = vld [vmem:[#allocation77_spill] sm:$0xff] }
 0x18e   : > { %v864_v15 = vadd.f32 %v8047_v46, %v816_v19  ;;  %1163 = vperm.xlu1 %6590, %v8269_v29   ;;  %v914_v44 = vpop.permute.xlu0 %913  ;;  %v703_v19 = vadd.f32 %v7914_v59, %v7999_v9  ;;  %v472_v35 = vmax.f32 %v390_v14, %v459_v37  ;;  %v634_v34 = vmax.f32 %v552_v47, %v621_v39  ;;  %v12647_v14 = vld [vmem:[#allocation44_spill] sm:$0xff] }
 0x18f   : > { %v8275_v41 = vadd.f32 %v8191_v22, %v914_v44  ;;  %v623_v45 = vadd.f32 %v7894_v7, %v12645_v17  ;;  %v796_v36 = vmax.f32 %v714_v61, %v783_v3  ;;  %v785_v9 = vadd.f32 %v7942_v57, %v8095_v48 }
 0x190   : > { %v8281_v55 = vmax.f32 %v795_v5, %v864_v15  ;;  %1331 = vperm.xlu0 %6595, %v6606_v52   ;;  %v8294_v5 = vld [vmem:[%s7421_s19 + $0x48] sm:$0xff]  ;;  %v12646_v39 = vmax.f32 %v8146_v21, %v8175_v42  ;;  %v381_v47 = vadd.f32 %v7850_v49, %v12647_v14  ;;  %v554_v61 = vmax.f32 %v472_v35, %v541_v6  ;;  %v12649_v42 = vld [vmem:[#allocation53_spill] sm:$0xff] }
 0x191   : > { %v963_v54 = vmax.f32 %v8093_v53, %v8275_v41  ;;  %v820_v44 = vpop.permute.xlu1 %819  ;;  %v12648_v52 = vld [vmem:[#allocation62_spill] sm:$0xff]  ;;  %v716_v11 = vmax.f32 %v634_v34, %v703_v19  ;;  %v463_v49 = vadd.f32 %v7861_v13, %v12649_v42  ;;  %v8322_v34 = vld [vmem:[%s7421_s19 + $0x58] sm:$0xff]  ;;  %v12651_v13 = vmax.f32 %v8148_v28, %v8195_v58 }
 0x192   : > { %v865_v26 = vadd.f32 %v8047_v46, %v820_v44  ;;  %1171 = vperm.xlu1 %6590, %v8294_v5   ;;  %v922_v37 = vpop.permute.xlu0 %921  ;;  %v392_v15 = vmax.f32 %v12646_v39, %v379_v30  ;;  %v543_v3 = vadd.f32 %v7873_v33, %v12648_v52  ;;  %v705_v44 = vadd.f32 %v7914_v59, %v8013_v10  ;;  %v12650_v30 = vld [vmem:[#allocation79_spill] sm:$0xff]  ;;  %v12654_v42 = vld [vmem:[#allocation75_spill] sm:$0xff] }
 0x193   : > { %v8305_v48 = vadd.f32 %v8191_v22, %v922_v37  ;;  %v625_v39 = vadd.f32 %v7894_v7, %v12650_v30  ;;  %v636_v6 = vmax.f32 %v554_v61, %v623_v45  ;;  %v798_v19 = vmax.f32 %v716_v11, %v785_v9  ;;  %v12652_v45 = vld [vmem:[#allocation64_spill] sm:$0xff] }
 0x194   : > { %v8309_v17 = vmax.f32 %v796_v36, %v865_v26  ;;  %1339 = vperm.xlu0 %6595, %v8119_v60   ;;  %v474_v21 = vmax.f32 %v392_v15, %v461_v51  ;;  %v787_v10 = vadd.f32 %v7942_v57, %v8130_v40  ;;  %v394_v51 = vmax.f32 %v12651_v13, %v381_v47 }
 0x195   : > { %v965_v37 = vmax.f32 %v8128_v50, %v8305_v48  ;;  %v828_v14 = vpop.permute.xlu1 %827  ;;  %v545_v9 = vadd.f32 %v7873_v33, %v12652_v45  ;;  %v718_v15 = vmax.f32 %v636_v6, %v705_v44  ;;  %v707_v40 = vadd.f32 %v7914_v59, %v8027_v56 }
 0x196   : > { %v867_v35 = vadd.f32 %v8047_v46, %v828_v14  ;;  %1179 = vperm.xlu1 %6590, %v8322_v34   ;;  %v930_v60 = vpop.permute.xlu0 %929  ;;  %v556_v36 = vmax.f32 %v474_v21, %v543_v3  ;;  %v476_v61 = vmax.f32 %v394_v51, %v463_v49  ;;  %v627_v47 = vadd.f32 %v7894_v7, %v7896_v12 }
 0x197   : > { %v8329_v26 = vadd.f32 %v8191_v22, %v930_v60  ;;  %v800_v3 = vmax.f32 %v718_v15, %v787_v10  ;;  %v789_v33 = vadd.f32 %v7942_v57, %v8163_v4  ;;  %v12653_v56 = vmov 14  }
 0x198   : > { %v8335_v52 = vmax.f32 %v798_v19, %v867_v35  ;;  %1347 = vperm.xlu0 %6595, %v8153_v23   ;;  %v638_v11 = vmax.f32 %v556_v36, %v625_v39  ;;  %v558_v49 = vmax.f32 %v476_v61, %v545_v9  ;;  %v709_v7 = vadd.f32 %v7914_v59, %v8038_v25 }
 0x199   : > { %v967_v28 = vmax.f32 %v8161_v2, %v8329_v26  ;;  %v836_v58 = vpop.permute.xlu1 %835  ;;  %v8350_v2 = vrot.slane %v7922_v8, %v12654_v42  ;;  %v791_v19 = vadd.f32 %v7942_v57, %v8204_v63 }
 0x19a   : > { %v869_v44 = vadd.f32 %v8047_v46, %v836_v58  ;;  %6592 = vset.pattern.permute.xlu1 %v12653_v56  ;;  %v938_v21 = vpop.permute.xlu0 %937  ;;  %v720_v30 = vmax.f32 %v638_v11, %v707_v40  ;;  %v640_v14 = vmax.f32 %v558_v49, %v627_v47  ;;  %v12656_v56 = vld [vmem:[#allocation76_spill] sm:$0xff] }
 0x19b   : > { %v956_v23 = vadd.f32 %v8191_v22, %v938_v21  ;;  %1217 = vperm.xlu1 %6592, %v8143_v32   ;;  %v8409_v21 = vrot.slane %v7922_v8, %v12656_v56 }
 0x19c   : > { %v8354_v12 = vmax.f32 %v800_v3, %v869_v44  ;;  %v802_v6 = vmax.f32 %v720_v30, %v789_v33  ;;  %v722_v60 = vmax.f32 %v640_v14, %v709_v7 }
 0x19d   : > { %v969_v4 = vmax.f32 %v8202_v0, %v956_v23  ;;  %v844_v39 = vpop.permute.xlu1 %843  ;;  %v12655_v0 = vmax.f32 %v8060_v16, %v8225_v62 }
 0x19e   : > { %v871_v10 = vadd.f32 %v8047_v46, %v844_v39  ;;  %v804_v51 = vmax.f32 %v722_v60, %v791_v19 }
 0x19f   : > { %1225 = vperm.xlu1 %6592, %v8181_v38   ;;  %v976_v35 = vpop.permute.xlu0 %975 }
 0x1a0   : > { %v8361_v13 = vmax.f32 %v802_v6, %v871_v10  ;;  %v1027_v59 = vadd.f32 %v8350_v2, %v976_v35 }
 0x1a1   : > { %v852_v25 = vpop.permute.xlu1 %851 }
 0x1a2   : > { %v8367_v36 = vmax.f32 %v12655_v0, %v1027_v59  ;;  %v873_v26 = vadd.f32 %v8047_v46, %v852_v25 }
 0x1a3   : > { %1229 = vperm.xlu1 %6592, %v8219_v18   ;;  %v988_v57 = vpop.permute.xlu0 %987 }
 0x1a4   : > { %v8371_v63 = vmax.f32 %v804_v51, %v873_v26  ;;  %v1030_v45 = vadd.f32 %v8350_v2, %v988_v57 }
 0x1a6   : > { %v8377_v9 = vmax.f32 %v961_v24, %v1030_v45  ;;  %v890_v15 = vpop.permute.xlu1 %889 }
 0x1a7   : > { %v944_v40 = vadd.f32 %v8191_v22, %v890_v15  ;;  %1237 = vperm.xlu1 %6592, %v8244_v1   ;;  %v996_v16 = vpop.permute.xlu0 %995 }
 0x1a8   : > { %v1032_v46 = vadd.f32 %v8350_v2, %v996_v16 }
 0x1a9   : > { %v957_v62 = vmax.f32 %v8256_v27, %v944_v40 }
 0x1aa   : > { %v8386_v61 = vmax.f32 %v963_v54, %v1032_v46  ;;  %v898_v11 = vpop.permute.xlu1 %897 }
 0x1ab   : > { %v946_v31 = vadd.f32 %v8191_v22, %v898_v11  ;;  %1245 = vperm.xlu1 %6592, %v8269_v29   ;;  %v1004_v43 = vpop.permute.xlu0 %1003 }
 0x1ac   : > { %v1034_v24 = vadd.f32 %v8350_v2, %v1004_v43 }
 0x1ad   : > { %v959_v58 = vmax.f32 %v8281_v55, %v946_v31 }
 0x1ae   : > { %v8395_v47 = vmax.f32 %v965_v37, %v1034_v24  ;;  %v902_v27 = vpop.permute.xlu1 %901 }
 0x1af   : > { %v947_v53 = vadd.f32 %v8191_v22, %v902_v27  ;;  %1253 = vperm.xlu1 %6592, %v8294_v5   ;;  %v1012_v41 = vpop.permute.xlu0 %1011 }
 0x1b0   : > { %v1036_v54 = vadd.f32 %v8350_v2, %v1012_v41 }
 0x1b1   : > { %v960_v3 = vmax.f32 %v8309_v17, %v947_v53 }
 0x1b2   : > { %v8401_v33 = vmax.f32 %v967_v28, %v1036_v54  ;;  %v910_v44 = vpop.permute.xlu1 %909  ;;  %v12657_v28 = vmov 15  }
 0x1b3   : > { %v949_v55 = vadd.f32 %v8191_v22, %v910_v44  ;;  %1261 = vperm.xlu1 %6592, %v8322_v34   ;;  %v1020_v50 = vpop.permute.xlu0 %1019 }
 0x1b4   : > { %v1038_v48 = vadd.f32 %v8350_v2, %v1020_v50 }
 0x1b5   : > { %v962_v37 = vmax.f32 %v8335_v52, %v949_v55 }
 0x1b6   : > { %v8411_v23 = vmax.f32 %v969_v4, %v1038_v48  ;;  %v918_v42 = vpop.permute.xlu1 %917 }
 0x1b7   : > { %v951_v17 = vadd.f32 %v8191_v22, %v918_v42  ;;  %6594 = vset.pattern.permute.xlu1 %v12657_v28 }
 0x1b8   : > { %1299 = vperm.xlu1 %6594, %v8143_v32   ;;  %v1058_v49 = vpop.permute.xlu0 %1057 }
 0x1b9   : > { %v964_v30 = vmax.f32 %v8354_v12, %v951_v17  ;;  %v1109_v7 = vadd.f32 %v8409_v21, %v1058_v49 }
 0x1ba   : > { %v926_v39 = vpop.permute.xlu1 %925 }
 0x1bb   : > { %v1122_v52 = vmax.f32 %v8367_v36, %v1109_v7  ;;  %v953_v14 = vadd.f32 %v8191_v22, %v926_v39 }
 0x1bc   : > { %1307 = vperm.xlu1 %6594, %v8181_v38   ;;  %v1070_v4 = vpop.permute.xlu0 %1069 }
 0x1bd   : > { %v966_v6 = vmax.f32 %v8361_v13, %v953_v14  ;;  %v1112_v19 = vadd.f32 %v8409_v21, %v1070_v4 }
 0x1be   : > { %v934_v10 = vpop.permute.xlu1 %933 }
 0x1bf   : > { %v1125_v32 = vmax.f32 %v8377_v9, %v1112_v19  ;;  %v955_v35 = vadd.f32 %v8191_v22, %v934_v10  ;;  %v12658_v10 = vld [vmem:[#allocation78_spill] sm:$0xff] }
 0x1c0   : > { %1311 = vperm.xlu1 %6594, %v8219_v18   ;;  %v1078_v12 = vpop.permute.xlu0 %1077 }
 0x1c1   : > { %v968_v60 = vmax.f32 %v8371_v63, %v955_v35  ;;  %v1114_v59 = vadd.f32 %v8409_v21, %v1078_v12 }
 0x1c3   : > { %v1127_v25 = vmax.f32 %v8386_v61, %v1114_v59  ;;  %v972_v38 = vpop.permute.xlu1 %971 }
 0x1c4   : > { %v1026_v51 = vadd.f32 %v8350_v2, %v972_v38  ;;  %1319 = vperm.xlu1 %6594, %v8244_v1   ;;  %v1086_v13 = vpop.permute.xlu0 %1085 }
 0x1c5   : > { %v1116_v0 = vadd.f32 %v8409_v21, %v1086_v13 }
 0x1c6   : > { %v8432_v36 = vmax.f32 %v957_v62, %v1026_v51 }
 0x1c7   : > { %v1129_v22 = vmax.f32 %v8395_v47, %v1116_v0  ;;  %v980_v18 = vpop.permute.xlu1 %979 }
 0x1c8   : > { %v1028_v26 = vadd.f32 %v8350_v2, %v980_v18  ;;  %1327 = vperm.xlu1 %6594, %v8269_v29   ;;  %v1094_v57 = vpop.permute.xlu0 %1093  ;;  %v8448_v29 = vrot.slane %v7922_v8, %v7840_v20 }
 0x1c9   : > { %v1118_v63 = vadd.f32 %v8409_v21, %v1094_v57 }
 0x1ca   : > { %v8438_v45 = vmax.f32 %v959_v58, %v1028_v26 }
 0x1cb   : > { %v1131_v9 = vmax.f32 %v8401_v33, %v1118_v63  ;;  %v984_v1 = vpop.permute.xlu1 %983 }
 0x1cc   : > { %v1029_v15 = vadd.f32 %v8350_v2, %v984_v1  ;;  %1335 = vperm.xlu1 %6594, %v8294_v5   ;;  %v1102_v40 = vpop.permute.xlu0 %1101 }
 0x1cd   : > { %v1120_v16 = vadd.f32 %v8409_v21, %v1102_v40 }
 0x1ce   : > { %v8444_v46 = vmax.f32 %v960_v3, %v1029_v15 }
 0x1cf   : > { %v1133_v62 = vmax.f32 %v8411_v23, %v1120_v16  ;;  %v992_v61 = vpop.permute.xlu1 %991 }
 0x1d0   : > { %v1031_v11 = vadd.f32 %v8350_v2, %v992_v61  ;;  %1343 = vperm.xlu1 %6594, %v8322_v34  }
 0x1d1   : > { %v1140_v31 = vpop.permute.xlu0 %1139 }
 0x1d2   : > { %v8453_v43 = vmax.f32 %v962_v37, %v1031_v11  ;;  %v1191_v5 = vadd.f32 %v8448_v29, %v1140_v31 }
 0x1d3   : > { %v1000_v24 = vpop.permute.xlu1 %999 }
 0x1d4   : > { %v8456_v58 = vmax.f32 %v1122_v52, %v1191_v5  ;;  %v1033_v47 = vadd.f32 %v8350_v2, %v1000_v24 }
 0x1d5   : > { %v1152_v27 = vpop.permute.xlu0 %1151 }
 0x1d6   : > { %v8459_v53 = vmax.f32 %v964_v30, %v1033_v47  ;;  %v1194_v41 = vadd.f32 %v8448_v29, %v1152_v27 }
 0x1d7   : > { %v1008_v54 = vpop.permute.xlu1 %1007 }
 0x1d8   : > { %v8462_v3 = vmax.f32 %v1125_v32, %v1194_v41  ;;  %v1035_v34 = vadd.f32 %v8350_v2, %v1008_v54  ;;  %v8486_v32 = vrot.slane %v7922_v8, %v12658_v10 }
 0x1d9   : > { %v1160_v33 = vpop.permute.xlu0 %1159 }
 0x1da   : > { %v8465_v44 = vmax.f32 %v966_v6, %v1035_v34  ;;  %v1196_v55 = vadd.f32 %v8448_v29, %v1160_v33  ;;  %v12659_v34 = vld [vmem:[#allocation80_spill] sm:$0xff] }
 0x1db   : > { %v1016_v50 = vpop.permute.xlu1 %1015  ;;  %v8516_v33 = vrot.slane %v7922_v8, %v12659_v34 }
 0x1dc   : > { %v8468_v48 = vmax.f32 %v1127_v25, %v1196_v55  ;;  %v1037_v37 = vadd.f32 %v8350_v2, %v1016_v50 }
 0x1dd   : > { %v1168_v56 = vpop.permute.xlu0 %1167 }
 0x1de   : > { %v8471_v23 = vmax.f32 %v968_v60, %v1037_v37  ;;  %v1198_v42 = vadd.f32 %v8448_v29, %v1168_v56 }
 0x1e0   : > { %v8474_v17 = vmax.f32 %v1129_v22, %v1198_v42  ;;  %v1054_v28 = vpop.permute.xlu1 %1053 }
 0x1e1   : > { %v1108_v49 = vadd.f32 %v8409_v21, %v1054_v28  ;;  %v1176_v30 = vpop.permute.xlu0 %1175 }
 0x1e2   : > { %v1200_v7 = vadd.f32 %v8448_v29, %v1176_v30 }
 0x1e3   : > { %v1121_v39 = vmax.f32 %v8432_v36, %v1108_v49 }
 0x1e4   : > { %v8479_v52 = vmax.f32 %v1131_v9, %v1200_v7  ;;  %v1062_v14 = vpop.permute.xlu1 %1061 }
 0x1e5   : > { %v1110_v2 = vadd.f32 %v8409_v21, %v1062_v14  ;;  %v1184_v4 = vpop.permute.xlu0 %1183 }
 0x1e6   : > { %v1202_v6 = vadd.f32 %v8448_v29, %v1184_v4 }
 0x1e7   : > { %v1123_v19 = vmax.f32 %v8438_v45, %v1110_v2 }
 0x1e8   : > { %v8488_v35 = vmax.f32 %v1133_v62, %v1202_v6  ;;  %v1066_v12 = vpop.permute.xlu1 %1065 }
 0x1e9   : > { %v1111_v60 = vadd.f32 %v8409_v21, %v1066_v12 }
 0x1ea   : > { %v1222_v59 = vpop.permute.xlu0 %1221 }
 0x1eb   : > { %v1124_v25 = vmax.f32 %v8444_v46, %v1111_v60  ;;  %v1273_v38 = vadd.f32 %v8486_v32, %v1222_v59 }
 0x1ec   : > { %v1074_v51 = vpop.permute.xlu1 %1073 }
 0x1ed   : > { %v1286_v13 = vmax.f32 %v8456_v58, %v1273_v38  ;;  %v1113_v0 = vadd.f32 %v8409_v21, %v1074_v51 }
 0x1ee   : > { %v1234_v36 = vpop.permute.xlu0 %1233 }
 0x1ef   : > { %v1126_v22 = vmax.f32 %v8453_v43, %v1113_v0  ;;  %v1276_v18 = vadd.f32 %v8486_v32, %v1234_v36 }
 0x1f0   : > { %v1082_v26 = vpop.permute.xlu1 %1081 }
 0x1f1   : > { %v1289_v57 = vmax.f32 %v8462_v3, %v1276_v18  ;;  %v1115_v63 = vadd.f32 %v8409_v21, %v1082_v26 }
 0x1f2   : > { %v1242_v45 = vpop.permute.xlu0 %1241 }
 0x1f3   : > { %v1128_v9 = vmax.f32 %v8459_v53, %v1115_v63  ;;  %v1278_v1 = vadd.f32 %v8486_v32, %v1242_v45 }
 0x1f4   : > { %v1090_v15 = vpop.permute.xlu1 %1089 }
 0x1f5   : > { %v1291_v40 = vmax.f32 %v8468_v48, %v1278_v1  ;;  %v1117_v16 = vadd.f32 %v8409_v21, %v1090_v15 }
 0x1f6   : > { %v1250_v46 = vpop.permute.xlu0 %1249 }
 0x1f7   : > { %v1130_v62 = vmax.f32 %v8465_v44, %v1117_v16  ;;  %v1280_v61 = vadd.f32 %v8486_v32, %v1250_v46 }
 0x1f8   : > { %v1098_v11 = vpop.permute.xlu1 %1097 }
 0x1f9   : > { %v1293_v31 = vmax.f32 %v8474_v17, %v1280_v61  ;;  %v1119_v43 = vadd.f32 %v8409_v21, %v1098_v11 }
 0x1fa   : > { %v1258_v5 = vpop.permute.xlu0 %1257 }
 0x1fb   : > { %v1132_v24 = vmax.f32 %v8471_v23, %v1119_v43  ;;  %v1282_v58 = vadd.f32 %v8486_v32, %v1258_v5 }
 0x1fd   : > { %v1295_v47 = vmax.f32 %v8479_v52, %v1282_v58  ;;  %v1136_v27 = vpop.permute.xlu1 %1135 }
 0x1fe   : > { %v1190_v53 = vadd.f32 %v8448_v29, %v1136_v27  ;;  %v1266_v41 = vpop.permute.xlu0 %1265 }
 0x1ff   : > { %v1284_v54 = vadd.f32 %v8486_v32, %v1266_v41 }
 0x200   : > { %v8512_v3 = vmax.f32 %v1121_v39, %v1190_v53 }
 0x201   : > { %v1297_v21 = vmax.f32 %v8488_v35, %v1284_v54  ;;  %v1144_v44 = vpop.permute.xlu1 %1143 }
 0x202   : > { %v1192_v55 = vadd.f32 %v8448_v29, %v1144_v44 }
 0x203   : > { %v1304_v50 = vpop.permute.xlu0 %1303 }
 0x204   : > { %v1205_v48 = vmax.f32 %v1123_v19, %v1192_v55  ;;  %v1355_v37 = vadd.f32 %v8516_v33, %v1304_v50 }
 0x205   : > { %v1148_v56 = vpop.permute.xlu1 %1147 }
 0x206   : > { %v8521_v11 = vmax.f32 %v1286_v13, %v1355_v37   ;;  %v1193_v42 = vadd.f32 %v8448_v29, %v1148_v56 }
 0x207   : > { %v1316_v17 = vpop.permute.xlu0 %1315 }
 0x208   : > { %v12660_v23 = vmov %v8521_v11  ;;  %v1206_v28 = vmax.f32 %v1124_v25, %v1193_v42  ;;  %v1358_v49 = vadd.f32 %v8516_v33, %v1316_v17 }
 0x209   : > { %v1156_v8 = vpop.permute.xlu1 %1155  ;;  %1381 = vst [vmem:[#allocation2 + $0x8] sm:$0xff] (%p8559_p0), %v12660_v23 }
 0x20a   : > { %v8525_v30 = vmax.f32 %v1289_v57, %v1358_v49   ;;  %v1195_v7 = vadd.f32 %v8448_v29, %v1156_v8 }
 0x20b   : > { %v1324_v39 = vpop.permute.xlu0 %1323 }
 0x20c   : > { %v1208_v52 = vmax.f32 %v1126_v22, %v1195_v7  ;;  %v1360_v14 = vadd.f32 %v8516_v33, %v1324_v39  ;;  %1384 = vst [vmem:[#allocation2 + $0x20] sm:$0xff] (%p8559_p0), %v8525_v30 }
 0x20d   : > { %v1164_v2 = vpop.permute.xlu1 %1163 }
 0x20e   : > { %v8529_v6 = vmax.f32 %v1291_v40, %v1360_v14   ;;  %v1197_v4 = vadd.f32 %v8448_v29, %v1164_v2 }
 0x20f   : > { %v1332_v10 = vpop.permute.xlu0 %1331 }
 0x210   : > { %v12661_v19 = vmov %v8529_v6  ;;  %v1210_v35 = vmax.f32 %v1128_v9, %v1197_v4  ;;  %v1362_v12 = vadd.f32 %v8516_v33, %v1332_v10 }
 0x211   : > { %v1172_v60 = vpop.permute.xlu1 %1171  ;;  %1386 = vst [vmem:[#allocation2 + $0x30] sm:$0xff] (%p8559_p0), %v12661_v19 }
 0x212   : > { %v8533_v4 = vmax.f32 %v1293_v31, %v1362_v12   ;;  %v1199_v25 = vadd.f32 %v8448_v29, %v1172_v60  ;;  %v8621_v60 = vmov (%p8559_p0), -1e+30  }
 0x213   : > { %v1340_v38 = vpop.permute.xlu0 %1339 }
 0x214   : > { %v12662_v59 = vmov %v8533_v4  ;;  %v1212_v51 = vmax.f32 %v1130_v62, %v1199_v25  ;;  %v1364_v13 = vadd.f32 %v8516_v33, %v1340_v38  ;;  %v8625_v25 = vmov (%p8559_p0), -1e+30  }
 0x215   : > { %v1180_v0 = vpop.permute.xlu1 %1179  ;;  %v12670_v4 = vmov %v12662_v59  ;;  %1388 = vst [vmem:[#allocation2 + $0x40] sm:$0xff] (%p8559_p0), %v12662_v59  ;;  %v8623_v59 = vmov (%p8559_p0), -1e+30   ;;  %v8627_v38 = vmov (%p8559_p0), -1e+30  }
 0x216   : > { %v8537_v2 = vmax.f32 %v1295_v47, %v1364_v13   ;;  %v1201_v6 = vadd.f32 %v8448_v29, %v1180_v0  ;;  %v8611_v4 = vmov (%p8559_p0), -1e+30  }
 0x217   : > { %v1348_v22 = vpop.permute.xlu0 %1347 }
 0x218   : > { %v12663_v36 = vmov %v8537_v2  ;;  %v1214_v18 = vmax.f32 %v1132_v24, %v1201_v6  ;;  %v1366_v26 = vadd.f32 %v8516_v33, %v1348_v22  ;;  %v12672_v6 = vmov %v12661_v19 }
 0x219   : > { %v12668_v2 = vmov %v12663_v36  ;;  %1390 = vst [vmem:[#allocation2 + $0x50] sm:$0xff] (%p8559_p0), %v12663_v36  ;;  %v8615_v19 = vmov (%p8559_p0), -1e+30  }
 0x21a   : > { %v8541_v0 = vmax.f32 %v1297_v21, %v1366_v26   ;;  %v1218_v63 = vpop.permute.xlu1 %1217  ;;  %v8607_v2 = vmov (%p8559_p0), -1e+30  }
 0x21b   : > { %v1272_v45 = vadd.f32 %v8486_v32, %v1218_v63 }
 0x21c   : > { %v12664_v57 = vmov %v8541_v0 }
 0x21d   : > { %v1285_v9 = vmax.f32 %v8512_v3, %v1272_v45  ;;  %v12666_v0 = vmov %v12664_v57  ;;  %1392 = vst [vmem:[#allocation2 + $0x60] sm:$0xff] (%p8559_p0), %v12664_v57 }
 0x21e   : > { %v1226_v1 = vpop.permute.xlu1 %1225 }
 0x21f   : > { %v1274_v15 = vadd.f32 %v8486_v32, %v1226_v1 }
 0x221   : > { %v1287_v40 = vmax.f32 %v1205_v48, %v1274_v15 }
 0x222   : > { %v1230_v16 = vpop.permute.xlu1 %1229 }
 0x223   : > { %v1275_v46 = vadd.f32 %v8486_v32, %v1230_v16 }
 0x225   : > { %v1288_v62 = vmax.f32 %v1206_v28, %v1275_v46 }
 0x226   : > { %v1238_v29 = vpop.permute.xlu1 %1237 }
 0x227   : > { %v1277_v61 = vadd.f32 %v8486_v32, %v1238_v29 }
 0x229   : > { %v1290_v11 = vmax.f32 %v1208_v52, %v1277_v61 }
 0x22a   : > { %v1246_v31 = vpop.permute.xlu1 %1245 }
 0x22b   : > { %v1279_v43 = vadd.f32 %v8486_v32, %v1246_v31 }
 0x22d   : > { %v1292_v5 = vmax.f32 %v1210_v35, %v1279_v43 }
 0x22e   : > { %v1254_v24 = vpop.permute.xlu1 %1253 }
 0x22f   : > { %v1281_v58 = vadd.f32 %v8486_v32, %v1254_v24 }
 0x231   : > { %v1294_v47 = vmax.f32 %v1212_v51, %v1281_v58  ;;  %v8629_v51 = vmov (%p8559_p0), -1e+30  }
 0x232   : > { %v1262_v27 = vpop.permute.xlu1 %1261 }
 0x233   : > { %v1283_v53 = vadd.f32 %v8486_v32, %v1262_v27 }
 0x235   : > { %v1296_v41 = vmax.f32 %v1214_v18, %v1283_v53 }
 0x237   : > { %v1300_v54 = vpop.permute.xlu1 %1299 }
 0x238   : > { %v1354_v3 = vadd.f32 %v8516_v33, %v1300_v54 }
 0x23a   : > { %v1367_v34 = vmax.f32 %v1285_v9, %v1354_v3  }
 0x23b   : > { %v1308_v21 = vpop.permute.xlu1 %1307 }
 0x23c   : > { %v1356_v44 = vadd.f32 %v8516_v33, %v1308_v21  ;;  %v12678_v12 = vmov %v1367_v34  ;;  %1380 = vst [vmem:[#allocation2] sm:$0xff] (%p8559_p0), %v1367_v34 }
 0x23d   :  { %v8619_v12 = vmov (%p8559_p0), -1e+30  }
 0x23e   : > { %v1369_v55 = vmax.f32 %v1287_v40, %v1356_v44  }
 0x23f   : > { %v1312_v50 = vpop.permute.xlu1 %1311 }
 0x240   : > { %v1357_v48 = vadd.f32 %v8516_v33, %v1312_v50  ;;  %v12676_v10 = vmov %v1369_v55  ;;  %1382 = vst [vmem:[#allocation2 + $0x10] sm:$0xff] (%p8559_p0), %v1369_v55 }
 0x241   :  { %v8617_v10 = vmov (%p8559_p0), -1e+30  }
 0x242   : > { %v1370_v37 = vmax.f32 %v1288_v62, %v1357_v48  }
 0x243   : > { %v1320_v56 = vpop.permute.xlu1 %1319 }
 0x244   : > { %v1359_v42 = vadd.f32 %v8516_v33, %v1320_v56  ;;  %v12675_v9 = vmov %v1370_v37  ;;  %1383 = vst [vmem:[#allocation2 + $0x18] sm:$0xff] (%p8559_p0), %v1370_v37 }
 0x246   : > { %v1372_v17 = vmax.f32 %v1290_v11, %v1359_v42   ;;  %v12677_v11 = vmov %v12660_v23  ;;  %v8609_v23 = vmov (%p8559_p0), -1e+30  }
 0x247   : > { %v1328_v28 = vpop.permute.xlu1 %1327 }
 0x248   : > { %v1361_v32 = vadd.f32 %v8516_v33, %v1328_v28  ;;  %1385 = vst [vmem:[#allocation2 + $0x28] sm:$0xff] (%p8559_p0), %v1372_v17 }
 0x24a   : > { %v1374_v49 = vmax.f32 %v1292_v5, %v1361_v32  }
 0x24b   : > { %v1336_v8 = vpop.permute.xlu1 %1335 }
 0x24c   : > { %v1363_v7 = vadd.f32 %v8516_v33, %v1336_v8  ;;  %v12671_v5 = vmov %v1374_v49  ;;  %v12674_v8 = vmov %v8525_v30  ;;  %1387 = vst [vmem:[#allocation2 + $0x38] sm:$0xff] (%p8559_p0), %v1374_v49  ;;  %v8613_v30 = vmov (%p8559_p0), -1e+30  }
 0x24e   : > { %v1376_v39 = vmax.f32 %v1294_v47, %v1363_v7   ;;  %v12673_v7 = vmov %v1372_v17  ;;  %21 = sbr.rel (!%p8559_p0) target bundleno = 5 (0x5), region = 81 }
 0x24f   : > { %v1344_v52 = vpop.permute.xlu1 %1343 }
 0x250   : > { %v1365_v14 = vadd.f32 %v8516_v33, %v1344_v52  ;;  %v12669_v3 = vmov %v1376_v39  ;;  %1389 = vst [vmem:[#allocation2 + $0x48] sm:$0xff] (%p8559_p0), %v1376_v39  ;;  %v8605_v33 = vmov (%p8559_p0), -1e+30  }
 0x252   : > { %v1378_v35 = vmax.f32 %v1296_v41, %v1365_v14  }
 0x254   : > { %v12667_v1 = vmov %v1378_v35  ;;  %1391 = vst [vmem:[#allocation2 + $0x58] sm:$0xff] (%p8559_p0), %v1378_v35 }
 0x255 LB: > { %12679 = vst [vmem:[#allocation81_spill] sm:$0xff] %v7068_v2  ;;  %12680 = vst [vmem:[#allocation82_spill] sm:$0xff] %v7076_v4  ;;  %v7258_v13 = vmov 0   ;;  %s1416_s26 = smul.u32 208, %s7116_s25  ;;  %v7259_v16 = vmov 1   ;;  %v7260_v46 = vmov 2   ;;  %s7116_s25 = sphi %s8631_s25, %s1398_s25   ;;  %v7112_v51 = vphi %v8629_v51, %v12857_v51   ;;  %v7108_v38 = vphi %v8627_v38, %v12856_v38   ;;  %v7104_v25 = vphi %v8625_v25, %v12855_v25   ;;  %v7100_v59 = vphi %v8623_v59, %v12854_v59   ;;  %v7096_v60 = vphi %v8621_v60, %v12853_v60   ;;  %v7092_v12 = vphi %v8619_v12, %v12852_v12   ;;  %v7088_v10 = vphi %v8617_v10, %v12851_v10   ;;  %v7084_v19 = vphi %v8615_v19, %v12850_v19   ;;  %v7080_v30 = vphi %v8613_v30, %v12849_v30   ;;  %v7076_v4 = vphi %v8611_v4, %v12848_v4   ;;  %v7072_v23 = vphi %v8609_v23, %v12847_v23   ;;  %v7068_v2 = vphi %v8607_v2, %v12846_v2   ;;  %v7064_v33 = vphi %v8605_v33, %v12845_v33  }
 0x256   : > { %12681 = vst [vmem:[#allocation83_spill] sm:$0xff] %v7084_v19  ;;  %12682 = vst [vmem:[#allocation84_spill] sm:$0xff] %v7092_v12  ;;  %6610 = vset.pattern.permute.xlu1 %v7258_v13  ;;  %6609 = vset.pattern.permute.xlu0 %v7258_v13  ;;  %v7261_v62 = vmov 3   ;;  %v7262_v29 = vmov 4   ;;  %v7263_v31 = vmov 5   ;;  %v7264_v44 = vmov 6  }
 0x257   : > { %12683 = vst [vmem:[#allocation85_spill] sm:$0xff] %v7100_v59  ;;  %12684 = vst [vmem:[#allocation86_spill] sm:$0xff] %v7104_v25  ;;  %s8679_s29 = scalar_lea.vmem %s12411_s1, %s1416_s26  ;;  %v7265_v39 = vmov 7   ;;  %s6008_s30 = sshll.u32 %s7116_s25, 4 }
 0x258   : > { %12685 = vst [vmem:[#allocation87_spill] sm:$0xff] %v7112_v51  ;;  %v8682_v0 = vld [vmem:[%s8679_s29 + $0x78] sm:$0xff]  ;;  %v8685_v36 = vld [vmem:[%s8679_s29 + $0x68] sm:$0xff]  ;;  %v8690_v6 = vld [vmem:[%s8679_s29 + $0x80] sm:$0xff]  ;;  %s9038_s7 = scalar_lea.vmem %s12410_s0, %s6008_s30  ;;  %s1398_s25 = sadd.s32 1, %s7116_s25  }
 0x259   : > { %12686 = vst [vmem:[#allocation88_spill] sm:$0xff] %v8685_v36  ;;  %1443 = vperm.xlu1 %6610, %v8682_v0   ;;  %1433 = vperm.xlu0 %6609, %v8685_v36   ;;  %v8693_v22 = vld [vmem:[%s8679_s29 + $0x70] sm:$0xff]  ;;  %v8701_v26 = vld [vmem:[%s8679_s29 + $0x88] sm:$0xff]  ;;  %v8706_v57 = vld [vmem:[%s8679_s29 + $0xa0] sm:$0xff]  ;;  %p9798_p1 = scmp.ge.s32.totalorder %s1398_s25, 49  }
 0x25a   : > { %v8698_v18 = vld [vmem:[%s8679_s29 + $0x90] sm:$0xff]  ;;  %12687 = vst [vmem:[#allocation89_spill] sm:$0xff] %v8701_v26  ;;  %v8709_v63 = vld [vmem:[%s8679_s29 + $0x98] sm:$0xff]  ;;  %v8717_v9 = vld [vmem:[%s8679_s29 + $0xa8] sm:$0xff]  ;;  %s9870_s0 = smov (%p9798_p1), 0  }
 0x25b   : > { %v8714_v45 = vld [vmem:[%s8679_s29 + $0xb0] sm:$0xff]  ;;  %v8722_v1 = vld [vmem:[%s8679_s29 + $0xc0] sm:$0xff]  ;;  %v8725_v15 = vld [vmem:[%s8679_s29 + $0xb8] sm:$0xff] }
 0x25c   : > { %12688 = vst [vmem:[#allocation90_spill] sm:$0xff] %v8714_v45  ;;  %12689 = vst [vmem:[#allocation91_spill] sm:$0xff] %v8722_v1  ;;  %v8730_v40 = vld [vmem:[%s8679_s29 + $0xc8] sm:$0xff] }
 0x25d   : > { %1448 = vperm.xlu1 %6610, %v8690_v6   ;;  %1438 = vperm.xlu0 %6609, %v8693_v22  }
 0x261   : > { %1458 = vperm.xlu1 %6610, %v8698_v18   ;;  %1453 = vperm.xlu0 %6609, %v8701_v26  }
 0x265   : > { %1468 = vperm.xlu1 %6610, %v8706_v57   ;;  %1463 = vperm.xlu0 %6609, %v8709_v63  }
 0x269   : > { %1478 = vperm.xlu1 %6610, %v8714_v45   ;;  %1473 = vperm.xlu0 %6609, %v8717_v9  }
 0x26d   : > { %1488 = vperm.xlu1 %6610, %v8722_v1   ;;  %1483 = vperm.xlu0 %6609, %v8725_v15  }
 0x271   : > { %6611 = vset.pattern.permute.xlu1 %v7259_v16  ;;  %1493 = vperm.xlu0 %6609, %v8730_v40  }
 0x272   : > { %1527 = vperm.xlu1 %6611, %v8685_v36  }
 0x275   : > { %6612 = vset.pattern.permute.xlu0 %v7259_v16 }
 0x276   : > { %1535 = vperm.xlu1 %6611, %v8682_v0   ;;  %1531 = vperm.xlu0 %6612, %v8693_v22  }
 0x27a   : > { %1539 = vperm.xlu1 %6611, %v8690_v6   ;;  %1543 = vperm.xlu0 %6612, %v8701_v26  }
 0x27e   : > { %1547 = vperm.xlu1 %6611, %v8698_v18   ;;  %1551 = vperm.xlu0 %6612, %v8709_v63  }
 0x282   : > { %1555 = vperm.xlu1 %6611, %v8706_v57   ;;  %1559 = vperm.xlu0 %6612, %v8717_v9  }
 0x286   : > { %1563 = vperm.xlu1 %6611, %v8714_v45   ;;  %1567 = vperm.xlu0 %6612, %v8725_v15  }
 0x28a   : > { %1571 = vperm.xlu1 %6611, %v8722_v1   ;;  %1575 = vperm.xlu0 %6612, %v8730_v40  }
 0x28e   : > { %6613 = vset.pattern.permute.xlu1 %v7260_v46  ;;  %6614 = vset.pattern.permute.xlu0 %v7260_v46 }
 0x28f   : > { %1609 = vperm.xlu1 %6613, %v8685_v36   ;;  %1613 = vperm.xlu0 %6614, %v8693_v22  }
 0x293   : > { %1617 = vperm.xlu1 %6613, %v8682_v0   ;;  %1625 = vperm.xlu0 %6614, %v8701_v26  }
 0x297   : > { %1621 = vperm.xlu1 %6613, %v8690_v6   ;;  %1633 = vperm.xlu0 %6614, %v8709_v63  }
 0x29b   : > { %1629 = vperm.xlu1 %6613, %v8698_v18   ;;  %1641 = vperm.xlu0 %6614, %v8717_v9  }
 0x29f   : > { %1637 = vperm.xlu1 %6613, %v8706_v57   ;;  %1649 = vperm.xlu0 %6614, %v8725_v15  }
 0x2a3   : > { %1645 = vperm.xlu1 %6613, %v8714_v45   ;;  %1657 = vperm.xlu0 %6614, %v8730_v40  }
 0x2a7   : > { %1653 = vperm.xlu1 %6613, %v8722_v1   ;;  %6616 = vset.pattern.permute.xlu0 %v7261_v62 }
 0x2a8   : > { %1695 = vperm.xlu0 %6616, %v8693_v22  }
 0x2ab   : > { %6615 = vset.pattern.permute.xlu1 %v7261_v62 }
 0x2ac   : > { %1691 = vperm.xlu1 %6615, %v8685_v36   ;;  %1707 = vperm.xlu0 %6616, %v8701_v26  }
 0x2b0   : > { %1699 = vperm.xlu1 %6615, %v8682_v0   ;;  %1715 = vperm.xlu0 %6616, %v8709_v63  }
 0x2b4   : > { %1703 = vperm.xlu1 %6615, %v8690_v6   ;;  %1723 = vperm.xlu0 %6616, %v8717_v9  }
 0x2b8   : > { %1711 = vperm.xlu1 %6615, %v8698_v18   ;;  %1731 = vperm.xlu0 %6616, %v8725_v15  }
 0x2bc   : > { %1719 = vperm.xlu1 %6615, %v8706_v57   ;;  %1739 = vperm.xlu0 %6616, %v8730_v40  }
 0x2c0   : > { %1727 = vperm.xlu1 %6615, %v8714_v45   ;;  %6618 = vset.pattern.permute.xlu0 %v7262_v29 }
 0x2c1   : > { %1777 = vperm.xlu0 %6618, %v8693_v22  }
 0x2c4   : > { %1735 = vperm.xlu1 %6615, %v8722_v1  }
 0x2c5   : > { %1789 = vperm.xlu0 %6618, %v8701_v26  }
 0x2c8   : > { %6617 = vset.pattern.permute.xlu1 %v7262_v29 }
 0x2c9   : > { %1773 = vperm.xlu1 %6617, %v8685_v36   ;;  %1797 = vperm.xlu0 %6618, %v8709_v63  }
 0x2cd   : > { %1781 = vperm.xlu1 %6617, %v8682_v0   ;;  %1805 = vperm.xlu0 %6618, %v8717_v9  }
 0x2d1   : > { %1785 = vperm.xlu1 %6617, %v8690_v6   ;;  %1813 = vperm.xlu0 %6618, %v8725_v15  }
 0x2d5   : > { %1793 = vperm.xlu1 %6617, %v8698_v18   ;;  %1821 = vperm.xlu0 %6618, %v8730_v40  }
 0x2d8   : > { %v8782_v61 = vpop.permute.xlu1 %1443  ;;  %v8784_v11 = vpop.permute.xlu0 %1433 }
 0x2d9   : > { %12690 = vst [vmem:[#allocation92_spill] sm:$0xff] %v8782_v61  ;;  %12691 = vst [vmem:[#allocation93_spill] sm:$0xff] %v8784_v11  ;;  %1801 = vperm.xlu1 %6617, %v8706_v57   ;;  %6620 = vset.pattern.permute.xlu0 %v7263_v31 }
 0x2da   : > { %1859 = vperm.xlu0 %6620, %v8693_v22  }
 0x2dc   : > { %v8788_v43 = vpop.permute.xlu1 %1448  ;;  %v8790_v5 = vpop.permute.xlu0 %1438 }
 0x2dd   : > { %12692 = vst [vmem:[#allocation94_spill] sm:$0xff] %v8788_v43  ;;  %1809 = vperm.xlu1 %6617, %v8714_v45  }
 0x2de   : > { %1871 = vperm.xlu0 %6620, %v8701_v26  }
 0x2e0   : > { %v8794_v24 = vpop.permute.xlu1 %1458  ;;  %v8796_v58 = vpop.permute.xlu0 %1453 }
 0x2e1   : > { %12693 = vst [vmem:[#allocation95_spill] sm:$0xff] %v8794_v24  ;;  %1817 = vperm.xlu1 %6617, %v8722_v1  }
 0x2e2   : > { %1879 = vperm.xlu0 %6620, %v8709_v63  }
 0x2e4   : > { %v8800_v47 = vpop.permute.xlu1 %1468  ;;  %v8802_v27 = vpop.permute.xlu0 %1463 }
 0x2e5   : > { %12694 = vst [vmem:[#allocation96_spill] sm:$0xff] %v8800_v47  ;;  %6619 = vset.pattern.permute.xlu1 %v7263_v31 }
 0x2e6   : > { %1855 = vperm.xlu1 %6619, %v8685_v36   ;;  %1887 = vperm.xlu0 %6620, %v8717_v9  }
 0x2e8   : > { %v8806_v53 = vpop.permute.xlu1 %1478  ;;  %v8808_v41 = vpop.permute.xlu0 %1473 }
 0x2e9   : > { %12695 = vst [vmem:[#allocation97_spill] sm:$0xff] %v8806_v53 }
 0x2ea   : > { %1863 = vperm.xlu1 %6619, %v8682_v0   ;;  %1895 = vperm.xlu0 %6620, %v8725_v15  }
 0x2ec   : > { %v8812_v54 = vpop.permute.xlu1 %1488  ;;  %v8814_v3 = vpop.permute.xlu0 %1483 }
 0x2ed   : > { %12696 = vst [vmem:[#allocation98_spill] sm:$0xff] %v8812_v54 }
 0x2ee   : > { %1867 = vperm.xlu1 %6619, %v8690_v6   ;;  %1903 = vperm.xlu0 %6620, %v8730_v40  }
 0x2f0   : > { %v8818_v34 = vpop.permute.xlu0 %1493 }
 0x2f1   : > { %v8820_v21 = vpop.permute.xlu1 %1527 }
 0x2f2   : > { %12697 = vst [vmem:[#allocation99_spill] sm:$0xff] %v8820_v21  ;;  %1875 = vperm.xlu1 %6619, %v8698_v18   ;;  %6622 = vset.pattern.permute.xlu0 %v7264_v44 }
 0x2f3   : > { %1941 = vperm.xlu0 %6622, %v8693_v22  }
 0x2f5   : > { %v8824_v55 = vpop.permute.xlu1 %1535  ;;  %v8826_v50 = vpop.permute.xlu0 %1531 }
 0x2f6   : > { %12698 = vst [vmem:[#allocation100_spill] sm:$0xff] %v8824_v55  ;;  %1883 = vperm.xlu1 %6619, %v8706_v57  }
 0x2f7   : > { %1953 = vperm.xlu0 %6622, %v8701_v26  }
 0x2f9   : > { %v8830_v48 = vpop.permute.xlu1 %1539  ;;  %v8832_v37 = vpop.permute.xlu0 %1543 }
 0x2fa   : > { %12699 = vst [vmem:[#allocation101_spill] sm:$0xff] %v8830_v48  ;;  %1891 = vperm.xlu1 %6619, %v8714_v45  }
 0x2fb   : > { %1961 = vperm.xlu0 %6622, %v8709_v63  }
 0x2fd   : > { %v8836_v56 = vpop.permute.xlu1 %1547  ;;  %v8838_v42 = vpop.permute.xlu0 %1551 }
 0x2fe   : > { %12700 = vst [vmem:[#allocation102_spill] sm:$0xff] %v8836_v56  ;;  %1899 = vperm.xlu1 %6619, %v8722_v1  }
 0x2ff   : > { %1969 = vperm.xlu0 %6622, %v8717_v9  }
 0x301   : > { %v8842_v17 = vpop.permute.xlu1 %1555  ;;  %v8844_v28 = vpop.permute.xlu0 %1559 }
 0x302   : > { %12701 = vst [vmem:[#allocation103_spill] sm:$0xff] %v8842_v17  ;;  %6621 = vset.pattern.permute.xlu1 %v7264_v44 }
 0x303   : > { %1937 = vperm.xlu1 %6621, %v8685_v36   ;;  %1977 = vperm.xlu0 %6622, %v8725_v15  }
 0x305   : > { %v8848_v32 = vpop.permute.xlu1 %1563  ;;  %v8850_v49 = vpop.permute.xlu0 %1567 }
 0x306   : > { %12702 = vst [vmem:[#allocation104_spill] sm:$0xff] %v8848_v32 }
 0x307   : > { %1945 = vperm.xlu1 %6621, %v8682_v0   ;;  %1985 = vperm.xlu0 %6622, %v8730_v40  }
 0x309   : > { %v8854_v8 = vpop.permute.xlu1 %1571  ;;  %v8856_v7 = vpop.permute.xlu0 %1575 }
 0x30a   : > { %12703 = vst [vmem:[#allocation105_spill] sm:$0xff] %v8854_v8 }
 0x30b   : > { %1949 = vperm.xlu1 %6621, %v8690_v6   ;;  %6624 = vset.pattern.permute.xlu0 %v7265_v39 }
 0x30c   : > { %2023 = vperm.xlu0 %6624, %v8693_v22  }
 0x30e   : > { %v8860_v52 = vpop.permute.xlu1 %1609  ;;  %v8862_v14 = vpop.permute.xlu0 %1613 }
 0x30f   : > { %12704 = vst [vmem:[#allocation106_spill] sm:$0xff] %v8860_v52  ;;  %1957 = vperm.xlu1 %6621, %v8698_v18  }
 0x310   : > { %2035 = vperm.xlu0 %6624, %v8701_v26  }
 0x312   : > { %v8866_v35 = vpop.permute.xlu1 %1617  ;;  %v8868_v13 = vpop.permute.xlu0 %1625 }
 0x313   : > { %12705 = vst [vmem:[#allocation107_spill] sm:$0xff] %v8866_v35  ;;  %1965 = vperm.xlu1 %6621, %v8706_v57  }
 0x314   : > { %2043 = vperm.xlu0 %6624, %v8709_v63  }
 0x316   : > { %v8872_v16 = vpop.permute.xlu1 %1621  ;;  %v8874_v46 = vpop.permute.xlu0 %1633 }
 0x317   : > { %12706 = vst [vmem:[#allocation108_spill] sm:$0xff] %v8872_v16  ;;  %1973 = vperm.xlu1 %6621, %v8714_v45  }
 0x318   : > { %2051 = vperm.xlu0 %6624, %v8717_v9  }
 0x31a   : > { %v8878_v62 = vpop.permute.xlu1 %1629  ;;  %v8880_v29 = vpop.permute.xlu0 %1641 }
 0x31b   : > { %12707 = vst [vmem:[#allocation109_spill] sm:$0xff] %v8878_v62  ;;  %1981 = vperm.xlu1 %6621, %v8722_v1   ;;  %v7266_v62 = vmov 8  }
 0x31c   : > { %2059 = vperm.xlu0 %6624, %v8725_v15  }
 0x31e   : > { %v8884_v31 = vpop.permute.xlu1 %1637  ;;  %v8886_v44 = vpop.permute.xlu0 %1649 }
 0x31f   : > { %12708 = vst [vmem:[#allocation110_spill] sm:$0xff] %v8884_v31  ;;  %12709 = vst [vmem:[#allocation111_spill] sm:$0xff] %v8886_v44  ;;  %6623 = vset.pattern.permute.xlu1 %v7265_v39 }
 0x320   : > { %2019 = vperm.xlu1 %6623, %v8685_v36   ;;  %2067 = vperm.xlu0 %6624, %v8730_v40  }
 0x322   : > { %v8890_v16 = vpop.permute.xlu1 %1645  ;;  %v8892_v2 = vpop.permute.xlu0 %1657 }
 0x323   : > { %12710 = vst [vmem:[#allocation112_spill] sm:$0xff] %v8890_v16 }
 0x324   : > { %2027 = vperm.xlu1 %6623, %v8682_v0   ;;  %6626 = vset.pattern.permute.xlu0 %v7266_v62 }
 0x325   : > { %2105 = vperm.xlu0 %6626, %v8693_v22  }
 0x326   : > { %v8896_v35 = vpop.permute.xlu1 %1653 }
 0x327   : > { %12711 = vst [vmem:[#allocation113_spill] sm:$0xff] %v8896_v35  ;;  %v8898_v31 = vpop.permute.xlu0 %1695 }
 0x328   : > { %2031 = vperm.xlu1 %6623, %v8690_v6  }
 0x329   : > { %2117 = vperm.xlu0 %6626, %v8701_v26  }
 0x32b   : > { %v8902_v39 = vpop.permute.xlu1 %1691  ;;  %v8904_v8 = vpop.permute.xlu0 %1707 }
 0x32c   : > { %12712 = vst [vmem:[#allocation114_spill] sm:$0xff] %v8902_v39  ;;  %2039 = vperm.xlu1 %6623, %v8698_v18  }
 0x32d   : > { %2125 = vperm.xlu0 %6626, %v8709_v63  }
 0x32f   : > { %v8908_v16 = vpop.permute.xlu1 %1699  ;;  %v8910_v32 = vpop.permute.xlu0 %1715 }
 0x330   : > { %12713 = vst [vmem:[#allocation115_spill] sm:$0xff] %v8908_v16  ;;  %2047 = vperm.xlu1 %6623, %v8706_v57  }
 0x331   : > { %2133 = vperm.xlu0 %6626, %v8717_v9  }
 0x333   : > { %v8914_v35 = vpop.permute.xlu1 %1703  ;;  %v8916_v4 = vpop.permute.xlu0 %1723 }
 0x334   : > { %12714 = vst [vmem:[#allocation116_spill] sm:$0xff] %v8914_v35  ;;  %2055 = vperm.xlu1 %6623, %v8714_v45   ;;  %v7267_v35 = vmov 9  }
 0x335   : > { %2141 = vperm.xlu0 %6626, %v8725_v15  }
 0x337   : > { %v8920_v39 = vpop.permute.xlu1 %1711  ;;  %v8922_v52 = vpop.permute.xlu0 %1731 }
 0x338   : > { %12715 = vst [vmem:[#allocation117_spill] sm:$0xff] %v8920_v39  ;;  %12716 = vst [vmem:[#allocation118_spill] sm:$0xff] %v8922_v52  ;;  %2063 = vperm.xlu1 %6623, %v8722_v1  }
 0x339   : > { %2149 = vperm.xlu0 %6626, %v8730_v40  }
 0x33b   : > { %v8926_v16 = vpop.permute.xlu1 %1719  ;;  %v8928_v17 = vpop.permute.xlu0 %1739 }
 0x33c   : > { %12717 = vst [vmem:[#allocation119_spill] sm:$0xff] %v8926_v16  ;;  %6625 = vset.pattern.permute.xlu1 %v7266_v62 }
 0x33d   : > { %2101 = vperm.xlu1 %6625, %v8685_v36   ;;  %6628 = vset.pattern.permute.xlu0 %v7267_v35 }
 0x33e   : > { %2187 = vperm.xlu0 %6628, %v8693_v22  }
 0x33f   : > { %v8932_v19 = vpop.permute.xlu1 %1727 }
 0x340   : > { %12718 = vst [vmem:[#allocation120_spill] sm:$0xff] %v8932_v19  ;;  %v8934_v39 = vpop.permute.xlu0 %1777 }
 0x341   : > { %2109 = vperm.xlu1 %6625, %v8682_v0  }
 0x342   : > { %2199 = vperm.xlu0 %6628, %v8701_v26  }
 0x343   : > { %v8938_v56 = vpop.permute.xlu1 %1735 }
 0x344   : > { %12719 = vst [vmem:[#allocation121_spill] sm:$0xff] %v8938_v56  ;;  %v8940_v16 = vpop.permute.xlu0 %1789 }
 0x345   : > { %2113 = vperm.xlu1 %6625, %v8690_v6  }
 0x346   : > { %2207 = vperm.xlu0 %6628, %v8709_v63  }
 0x348   : > { %v8944_v62 = vpop.permute.xlu1 %1773  ;;  %v8946_v48 = vpop.permute.xlu0 %1797 }
 0x349   : > { %12720 = vst [vmem:[#allocation122_spill] sm:$0xff] %v8944_v62  ;;  %2121 = vperm.xlu1 %6625, %v8698_v18  }
 0x34a   : > { %2215 = vperm.xlu0 %6628, %v8717_v9  }
 0x34c   : > { %v8950_v19 = vpop.permute.xlu1 %1781  ;;  %v8952_v55 = vpop.permute.xlu0 %1805 }
 0x34d   : > { %12721 = vst [vmem:[#allocation123_spill] sm:$0xff] %v8950_v19  ;;  %12722 = vst [vmem:[#allocation124_spill] sm:$0xff] %v8952_v55  ;;  %2129 = vperm.xlu1 %6625, %v8706_v57   ;;  %v7268_v19 = vmov 10  }
 0x34e   : > { %2223 = vperm.xlu0 %6628, %v8725_v15  }
 0x350   : > { %v8956_v56 = vpop.permute.xlu1 %1785  ;;  %v8958_v12 = vpop.permute.xlu0 %1813 }
 0x351   : > { %12723 = vst [vmem:[#allocation125_spill] sm:$0xff] %v8956_v56  ;;  %12724 = vst [vmem:[#allocation126_spill] sm:$0xff] %v8958_v12  ;;  %2137 = vperm.xlu1 %6625, %v8714_v45  }
 0x352   : > { %2231 = vperm.xlu0 %6628, %v8730_v40  }
 0x354   : > { %v8962_v62 = vpop.permute.xlu1 %1793  ;;  %v8964_v21 = vpop.permute.xlu0 %1821 }
 0x355   : > { %12725 = vst [vmem:[#allocation127_spill] sm:$0xff] %v8962_v62  ;;  %2145 = vperm.xlu1 %6625, %v8722_v1  }
 0x356   : > { %6630 = vset.pattern.permute.xlu0 %v7268_v19 }
 0x357   : > { %2269 = vperm.xlu0 %6630, %v8693_v22  }
 0x358   : > { %v8968_v54 = vpop.permute.xlu1 %1801 }
 0x359   : > { %12726 = vst [vmem:[#allocation128_spill] sm:$0xff] %v8968_v54  ;;  %6627 = vset.pattern.permute.xlu1 %v7267_v35  ;;  %v8970_v56 = vpop.permute.xlu0 %1859 }
 0x35a   : > { %2183 = vperm.xlu1 %6627, %v8685_v36  }
 0x35b   : > { %2281 = vperm.xlu0 %6630, %v8701_v26  }
 0x35c   : > { %v8974_v59 = vpop.permute.xlu1 %1809 }
 0x35d   : > { %12727 = vst [vmem:[#allocation129_spill] sm:$0xff] %v8974_v59  ;;  %v8976_v62 = vpop.permute.xlu0 %1871 }
 0x35e   : > { %2191 = vperm.xlu1 %6627, %v8682_v0  }
 0x35f   : > { %2289 = vperm.xlu0 %6630, %v8709_v63  }
 0x360   : > { %v8980_v53 = vpop.permute.xlu1 %1817 }
 0x361   : > { %12728 = vst [vmem:[#allocation130_spill] sm:$0xff] %v8980_v53  ;;  %v8982_v51 = vpop.permute.xlu0 %1879 }
 0x362   : > { %2195 = vperm.xlu1 %6627, %v8690_v6  }
 0x363   : > { %2297 = vperm.xlu0 %6630, %v8717_v9  }
 0x365   : > { %v8986_v35 = vpop.permute.xlu1 %1855  ;;  %v8988_v54 = vpop.permute.xlu0 %1887 }
 0x366   : > { %12729 = vst [vmem:[#allocation131_spill] sm:$0xff] %v8986_v35  ;;  %12730 = vst [vmem:[#allocation132_spill] sm:$0xff] %v8988_v54  ;;  %2203 = vperm.xlu1 %6627, %v8698_v18   ;;  %v7269_v35 = vmov 11   ;;  %v12744_v54 = vld [vmem:[#allocation69_spill] sm:$0xff] }
 0x367   : > { %2305 = vperm.xlu0 %6630, %v8725_v15  }
 0x369   : > { %v8992_v59 = vpop.permute.xlu1 %1863  ;;  %v8994_v25 = vpop.permute.xlu0 %1895 }
 0x36a   : > { %12731 = vst [vmem:[#allocation133_spill] sm:$0xff] %v8992_v59  ;;  %12732 = vst [vmem:[#allocation134_spill] sm:$0xff] %v8994_v25  ;;  %2211 = vperm.xlu1 %6627, %v8706_v57  }
 0x36b   : > { %2313 = vperm.xlu0 %6630, %v8730_v40  }
 0x36d   : > { %v8998_v53 = vpop.permute.xlu1 %1867  ;;  %v9000_v47 = vpop.permute.xlu0 %1903 }
 0x36e   : > { %12733 = vst [vmem:[#allocation135_spill] sm:$0xff] %v8998_v53  ;;  %2219 = vperm.xlu1 %6627, %v8714_v45  }
 0x36f   : > { %6632 = vset.pattern.permute.xlu0 %v7269_v35 }
 0x370   : > { %2351 = vperm.xlu0 %6632, %v8693_v22  }
 0x371   : > { %v9004_v24 = vpop.permute.xlu1 %1875 }
 0x372   : > { %12734 = vst [vmem:[#allocation136_spill] sm:$0xff] %v9004_v24  ;;  %2227 = vperm.xlu1 %6627, %v8722_v1   ;;  %v9007_v59 = vpop.permute.xlu0 %1941 }
 0x374   : > { %2363 = vperm.xlu0 %6632, %v8701_v26  }
 0x375   : > { %v9010_v43 = vpop.permute.xlu1 %1883 }
 0x376   : > { %12735 = vst [vmem:[#allocation137_spill] sm:$0xff] %v9010_v43  ;;  %6629 = vset.pattern.permute.xlu1 %v7268_v19  ;;  %v9012_v53 = vpop.permute.xlu0 %1953 }
 0x377   : > { %2265 = vperm.xlu1 %6629, %v8685_v36  }
 0x378   : > { %2371 = vperm.xlu0 %6632, %v8709_v63  }
 0x379   : > { %v9016_v11 = vpop.permute.xlu1 %1891 }
 0x37a   : > { %12736 = vst [vmem:[#allocation138_spill] sm:$0xff] %v9016_v11  ;;  %v9018_v61 = vpop.permute.xlu0 %1961 }
 0x37b   : > { %12737 = vst [vmem:[#allocation139_spill] sm:$0xff] %v9018_v61  ;;  %2273 = vperm.xlu1 %6629, %v8682_v0  }
 0x37c   : > { %2379 = vperm.xlu0 %6632, %v8717_v9  }
 0x37d   : > { %v9022_v24 = vpop.permute.xlu1 %1899 }
 0x37e   : > { %12738 = vst [vmem:[#allocation140_spill] sm:$0xff] %v9022_v24  ;;  %v9024_v25 = vpop.permute.xlu0 %1969 }
 0x37f   : > { %12739 = vst [vmem:[#allocation141_spill] sm:$0xff] %v9024_v25  ;;  %2277 = vperm.xlu1 %6629, %v8690_v6  }
 0x380   : > { %2387 = vperm.xlu0 %6632, %v8725_v15  }
 0x382   : > { %v9028_v19 = vpop.permute.xlu1 %1937  ;;  %v9030_v43 = vpop.permute.xlu0 %1977 }
 0x383   : > { %12740 = vst [vmem:[#allocation142_spill] sm:$0xff] %v9028_v19  ;;  %12741 = vst [vmem:[#allocation143_spill] sm:$0xff] %v9030_v43  ;;  %2285 = vperm.xlu1 %6629, %v8698_v18   ;;  %v12462_v19 = vmov 12   ;;  %v9047_v43 = vld [vmem:[%s9038_s7] sm:$0xff] }
 0x384   : > { %2395 = vperm.xlu0 %6632, %v8730_v40  }
 0x386   : > { %v9040_v24 = vpop.permute.xlu1 %1945  ;;  %v9042_v11 = vpop.permute.xlu0 %1985 }
 0x387   : > { %12742 = vst [vmem:[#allocation144_spill] sm:$0xff] %v9040_v24  ;;  %2293 = vperm.xlu1 %6629, %v8706_v57   ;;  %v9057_v24 = vrot.slane %v9047_v43, %v12744_v54 }
 0x388   : > { %6634 = vset.pattern.permute.xlu0 %v12462_v19 }
 0x389   : > { %2433 = vperm.xlu0 %6634, %v8693_v22   ;;  %v1512_v52 = vadd.f32 %v9057_v24, %v8818_v34  ;;  %v1501_v61 = vadd.f32 %v9057_v24, %v8790_v5  ;;  %v1504_v44 = vadd.f32 %v9057_v24, %v8796_v58 }
 0x38a   : > { %v9050_v25 = vpop.permute.xlu1 %1949 }
 0x38b   : > { %12743 = vst [vmem:[#allocation145_spill] sm:$0xff] %v9050_v25  ;;  %2301 = vperm.xlu1 %6629, %v8714_v45   ;;  %v9053_v12 = vpop.permute.xlu0 %2023  ;;  %v12747_v45 = vld [vmem:[#allocation71_spill] sm:$0xff]  ;;  %v1525_v34 = vmax.f32 %v7064_v33, %v1512_v52  ;;  %v1506_v33 = vadd.f32 %v9057_v24, %v8802_v27  ;;  %v12750_v52 = vld [vmem:[#allocation75_spill] sm:$0xff] }
 0x38c   : > { %v9071_v55 = vrot.slane %v9047_v43, %v12747_v45 }
 0x38d   : > { %2445 = vperm.xlu0 %6634, %v8701_v26   ;;  %v12748_v26 = vld [vmem:[#allocation72_spill] sm:$0xff] }
 0x38e   : > { %v9062_v19 = vpop.permute.xlu1 %1957  ;;  %v9081_v5 = vrot.slane %v9047_v43, %v12748_v26  ;;  %v1583_v45 = vadd.f32 %v9071_v55, %v8826_v50  ;;  %v9096_v26 = vrot.slane %v9047_v43, %v12750_v52  ;;  %v1508_v52 = vadd.f32 %v9057_v24, %v8808_v41 }
 0x38f   : > { %12745 = vst [vmem:[#allocation146_spill] sm:$0xff] %v9062_v19  ;;  %2309 = vperm.xlu1 %6629, %v8722_v1   ;;  %v9067_v25 = vpop.permute.xlu0 %2035  ;;  %v1594_v19 = vadd.f32 %v9071_v55, %v8856_v7 }
 0x390   : > { %12746 = vst [vmem:[#allocation147_spill] sm:$0xff] %v9067_v25  ;;  %v1514_v25 = vmax.f32 %v7108_v38, %v1501_v61  ;;  %v1676_v7 = vadd.f32 %v9081_v5, %v8892_v2  ;;  %v1517_v38 = vmax.f32 %v7096_v60, %v1504_v44  ;;  %v1586_v61 = vadd.f32 %v9071_v55, %v8832_v37 }
 0x391   : > { %2453 = vperm.xlu0 %6634, %v8709_v63   ;;  %v1607_v50 = vmax.f32 %v1525_v34, %v1594_v19  ;;  %v1758_v27 = vadd.f32 %v9096_v26, %v8928_v17  ;;  %v1665_v60 = vadd.f32 %v9081_v5, %v8862_v14  ;;  %v9117_v37 = vrot.slane %v9047_v43, %v7840_v20 }
 0x392   : > { %v9083_v1 = vpop.permute.xlu1 %1965  ;;  %v1519_v17 = vmax.f32 %v7088_v10, %v1506_v33  ;;  %v1588_v19 = vadd.f32 %v9071_v55, %v8838_v42  ;;  %v1747_v41 = vadd.f32 %v9096_v26, %v8898_v31  ;;  %v12752_v42 = vld [vmem:[#allocation78_spill] sm:$0xff] }
 0x393   : > { %12749 = vst [vmem:[#allocation148_spill] sm:$0xff] %v9083_v1  ;;  %6631 = vset.pattern.permute.xlu1 %v7269_v35  ;;  %v9088_v58 = vpop.permute.xlu0 %2043  ;;  %v12751_v35 = vld [vmem:[#allocation76_spill] sm:$0xff]  ;;  %v1689_v34 = vmax.f32 %v1607_v50, %v1676_v7  ;;  %v1922_v10 = vadd.f32 %v9117_v37, %v9000_v47  ;;  %v9136_v33 = vrot.slane %v9047_v43, %v12752_v42 }
 0x394   : > { %2347 = vperm.xlu1 %6631, %v8685_v36   ;;  %v9107_v2 = vrot.slane %v9047_v43, %v12751_v35  ;;  %v1596_v36 = vmax.f32 %v1514_v25, %v1583_v45  ;;  %v1599_v25 = vmax.f32 %v1517_v38, %v1586_v61  ;;  %v1668_v45 = vadd.f32 %v9081_v5, %v8868_v13 }
 0x395   : > { %2461 = vperm.xlu0 %6634, %v8717_v9   ;;  %v1771_v14 = vmax.f32 %v1689_v34, %v1758_v27  ;;  %v1521_v7 = vmax.f32 %v7080_v30, %v1508_v52  ;;  %v1750_v13 = vadd.f32 %v9096_v26, %v8904_v8  ;;  %v1510_v47 = vadd.f32 %v9057_v24, %v8814_v3  ;;  %v12753_v52 = vld [vmem:[#allocation80_spill] sm:$0xff] }
 0x396   : > { %v9109_v1 = vpop.permute.xlu1 %1973  ;;  %v1840_v35 = vadd.f32 %v9107_v2, %v8964_v21  ;;  %v1678_v38 = vmax.f32 %v1596_v36, %v1665_v60  ;;  %v1829_v31 = vadd.f32 %v9107_v2, %v8934_v39  ;;  %v1601_v50 = vmax.f32 %v1519_v17, %v1588_v19  ;;  %v9164_v60 = vld [vmem:[%s9038_s7 + $0x8] sm:$0xff] }
 0x397   : > { %v9119_v44 = vpop.permute.xlu0 %2051  ;;  %v2004_v34 = vadd.f32 %v9136_v33, %v9042_v11  ;;  %v1681_v30 = vmax.f32 %v1599_v25, %v1668_v45  ;;  %v1911_v8 = vadd.f32 %v9117_v37, %v8970_v56  ;;  %v9156_v39 = vrot.slane %v9047_v43, %v12753_v52  ;;  %v12810_v52 = vld [vmem:[#allocation125_spill] sm:$0xff] }
 0x398   : > { %2355 = vperm.xlu1 %6631, %v8682_v0   ;;  %v1853_v27 = vmax.f32 %v1771_v14, %v1840_v35  ;;  %v1760_v36 = vmax.f32 %v1678_v38, %v1747_v41  ;;  %v1670_v3 = vadd.f32 %v9081_v5, %v8874_v46  ;;  %v1832_v35 = vadd.f32 %v9107_v2, %v8940_v16 }
 0x399   : > { %2469 = vperm.xlu0 %6634, %v8725_v15   ;;  %v1590_v17 = vadd.f32 %v9071_v55, %v8844_v28  ;;  %v1763_v19 = vmax.f32 %v1681_v30, %v1750_v13  ;;  %v1993_v43 = vadd.f32 %v9136_v33, %v9007_v59  ;;  %v1752_v46 = vadd.f32 %v9096_v26, %v8910_v32 }
 0x39a   : > { %v9138_v21 = vpop.permute.xlu1 %1981  ;;  %v1935_v11 = vmax.f32 %v1853_v27, %v1922_v10  ;;  %v1842_v56 = vmax.f32 %v1760_v36, %v1829_v31  ;;  %v1914_v16 = vadd.f32 %v9117_v37, %v8976_v62  ;;  %v1523_v28 = vmax.f32 %v7072_v23, %v1510_v47 }
 0x39b   : > { %v9145_v61 = vpop.permute.xlu0 %2059  ;;  %v2075_v59 = vadd.f32 %v9156_v39, %v9053_v12  ;;  %v12471_v38 = vmov 13   ;;  %v9184_v32 = vrot.slane %v9164_v60, %v12744_v54  ;;  %v1683_v13 = vmax.f32 %v1601_v50, %v1670_v3  ;;  %v12754_v3 = vld [vmem:[#allocation147_spill] sm:$0xff] }
 0x39c   : > { %2359 = vperm.xlu1 %6631, %v8690_v6   ;;  %v2017_v41 = vmax.f32 %v1935_v11, %v2004_v34  ;;  %v1924_v10 = vmax.f32 %v1842_v56, %v1911_v8  ;;  %v1672_v62 = vadd.f32 %v9081_v5, %v8880_v29  ;;  %v1845_v31 = vmax.f32 %v1763_v19, %v1832_v35  ;;  %v12755_v11 = vld [vmem:[#allocation111_spill] sm:$0xff]  ;;  %v12757_v56 = vld [vmem:[#allocation89_spill] sm:$0xff] }
 0x39d   : > { %2477 = vperm.xlu0 %6634, %v8730_v40   ;;  %v1603_v23 = vmax.f32 %v1521_v7, %v1590_v17  ;;  %v1834_v12 = vadd.f32 %v9107_v2, %v8946_v48  ;;  %v1996_v34 = vadd.f32 %v9136_v33, %v9012_v53  ;;  %v1592_v54 = vadd.f32 %v9071_v55, %v8850_v49 }
 0x39e   : > { %v2006_v47 = vmax.f32 %v1924_v10, %v1993_v43  ;;  %v1765_v50 = vmax.f32 %v1683_v13, %v1752_v46  ;;  %v1754_v29 = vadd.f32 %v9096_v26, %v8916_v4  ;;  %v1927_v36 = vmax.f32 %v1845_v31, %v1914_v16  ;;  %v12756_v4 = vld [vmem:[#allocation124_spill] sm:$0xff] }
 0x39f   : > { %v9170_v25 = vpop.permute.xlu1 %2019  ;;  %v2068_v45 = vpop.permute.xlu0 %2067  ;;  %v1916_v48 = vadd.f32 %v9117_v37, %v8982_v51  ;;  %v2078_v53 = vadd.f32 %v9156_v39, %v12754_v3  ;;  %v1685_v49 = vmax.f32 %v1603_v23, %v1672_v62  ;;  %v1674_v17 = vadd.f32 %v9081_v5, %v12755_v11  ;;  %v12758_v51 = vld [vmem:[#allocation139_spill] sm:$0xff]  ;;  %v12760_v62 = vld [vmem:[#allocation132_spill] sm:$0xff]  ;;  %v12761_v23 = vld [vmem:[#allocation90_spill] sm:$0xff] }
 0x3a0   : > { %v2086_v14 = vadd.f32 %v9156_v39, %v2068_v45  ;;  %2367 = vperm.xlu1 %6631, %v8698_v18   ;;  %v9204_v8 = vmax.f32 %v2006_v47, %v2075_v59  ;;  %v1836_v19 = vadd.f32 %v9107_v2, %v12756_v4  ;;  %v1847_v43 = vmax.f32 %v1765_v50, %v1834_v12  ;;  %v12759_v59 = vld [vmem:[#allocation118_spill] sm:$0xff] }
 0x3a1   : > { %6636 = vset.pattern.permute.xlu0 %v12471_v38  ;;  %v2009_v45 = vmax.f32 %v1927_v36, %v1996_v34  ;;  %v1998_v46 = vadd.f32 %v9136_v33, %v12758_v51  ;;  %v1767_v10 = vmax.f32 %v1685_v49, %v1754_v29  ;;  %v1756_v13 = vadd.f32 %v9096_v26, %v12759_v59  ;;  %v12762_v29 = vld [vmem:[#allocation126_spill] sm:$0xff]  ;;  %v12763_v49 = vld [vmem:[#allocation141_spill] sm:$0xff] }
 0x3a2   : > { %v9188_v27 = vmax.f32 %v2017_v41, %v2086_v14  ;;  %2515 = vperm.xlu0 %6636, %v8693_v22   ;;  %v1605_v14 = vmax.f32 %v1523_v28, %v1592_v54  ;;  %v1918_v31 = vadd.f32 %v9117_v37, %v12760_v62  ;;  %v1929_v47 = vmax.f32 %v1847_v43, %v1916_v48  ;;  %v12764_v43 = vld [vmem:[#allocation91_spill] sm:$0xff] }
 0x3a3   : > { %v9195_v30 = vpop.permute.xlu1 %2027  ;;  %v9227_v34 = vmax.f32 %v2009_v45, %v2078_v53  ;;  %v2080_v50 = vadd.f32 %v9156_v39, %v9088_v58  ;;  %v1849_v54 = vmax.f32 %v1767_v10, %v1836_v19  ;;  %v2000_v11 = vadd.f32 %v9136_v33, %v12763_v49  ;;  %v12765_v19 = vld [vmem:[#allocation134_spill] sm:$0xff]  ;;  %v12766_v62 = vld [vmem:[#allocation143_spill] sm:$0xff] }
 0x3a4   : > { %2375 = vperm.xlu1 %6631, %v8706_v57   ;;  %v2106_v7 = vpop.permute.xlu0 %2105  ;;  %v1687_v28 = vmax.f32 %v1605_v14, %v1674_v17  ;;  %v2011_v3 = vmax.f32 %v1929_v47, %v1998_v46  ;;  %v1920_v45 = vadd.f32 %v9117_v37, %v12765_v19  ;;  %v2082_v46 = vadd.f32 %v9156_v39, %v9119_v44 }
 0x3a5   : > { %v9209_v35 = vadd.f32 %v9184_v32, %v2106_v7  ;;  %v1838_v7 = vadd.f32 %v9107_v2, %v12762_v29  ;;  %v1931_v4 = vmax.f32 %v1849_v54, %v1918_v31  ;;  %v12767_v47 = vmov 12   ;;  %v12768_v54 = vld [vmem:[#allocation88_spill] sm:$0xff] }
 0x3a6   : > { %2527 = vperm.xlu0 %6636, %v12757_v56   ;;  %v1769_v58 = vmax.f32 %v1687_v28, %v1756_v13  ;;  %v9246_v51 = vmax.f32 %v2011_v3, %v2080_v50  ;;  %v2002_v13 = vadd.f32 %v9136_v33, %v12766_v62  ;;  %v2084_v44 = vadd.f32 %v9156_v39, %v9145_v61  ;;  %v12790_v61 = vld [vmem:[#allocation105_spill] sm:$0xff] }
 0x3a7   : > { %v2170_v16 = vmax.f32 %v9204_v8, %v9209_v35  ;;  %v9220_v41 = vpop.permute.xlu1 %2031  ;;  %v2013_v59 = vmax.f32 %v1931_v4, %v2000_v11 }
 0x3a8   : > { %2383 = vperm.xlu1 %6631, %v12761_v23   ;;  %v2118_v12 = vpop.permute.xlu0 %2117  ;;  %v1851_v10 = vmax.f32 %v1769_v58, %v1838_v7 }
 0x3a9   : > { %v9232_v36 = vadd.f32 %v9184_v32, %v2118_v12 }
 0x3aa   : > { %2535 = vperm.xlu0 %6636, %v8709_v63   ;;  %v1933_v50 = vmax.f32 %v1851_v10, %v1920_v45  ;;  %v12470_v45 = vmov 14  }
 0x3ab   : > { %v2173_v48 = vmax.f32 %v9227_v34, %v9232_v36  ;;  %v9241_v53 = vpop.permute.xlu1 %2039  ;;  %v9258_v36 = vmax.f32 %v2013_v59, %v2082_v46 }
 0x3ac   : > { %2391 = vperm.xlu1 %6631, %v12764_v43   ;;  %v2126_v17 = vpop.permute.xlu0 %2125  ;;  %v2015_v29 = vmax.f32 %v1933_v50, %v2002_v13  ;;  %v12770_v13 = vld [vmem:[#allocation92_spill] sm:$0xff]  ;;  %v12773_v50 = vld [vmem:[#allocation95_spill] sm:$0xff] }
 0x3ad   : > { %v2162_v14 = vadd.f32 %v9184_v32, %v2126_v17 }
 0x3ae   : > { %2543 = vperm.xlu0 %6636, %v8717_v9   ;;  %v9271_v11 = vmax.f32 %v2015_v29, %v2084_v44 }
 0x3af   : > { %v2175_v31 = vmax.f32 %v9246_v51, %v2162_v14  ;;  %v9255_v12 = vpop.permute.xlu1 %2047  ;;  %v12769_v51 = vld [vmem:[#allocation71_spill] sm:$0xff] }
 0x3b0   : > { %6633 = vset.pattern.permute.xlu1 %v12767_v47  ;;  %v2134_v34 = vpop.permute.xlu0 %2133  ;;  %v9289_v46 = vrot.slane %v9164_v60, %v12769_v51  ;;  %v12771_v47 = vld [vmem:[#allocation93_spill] sm:$0xff]  ;;  %v12776_v51 = vld [vmem:[#allocation87_spill] sm:$0xff] }
 0x3b1   : > { %v9263_v28 = vadd.f32 %v9184_v32, %v2134_v34  ;;  %2429 = vperm.xlu1 %6633, %v12768_v54   ;;  %v1500_v34 = vadd.f32 %v9057_v24, %v12771_v47  ;;  %v12774_v54 = vld [vmem:[#allocation96_spill] sm:$0xff]  ;;  %v12780_v47 = vld [vmem:[#allocation99_spill] sm:$0xff] }
 0x3b2   : > { %2551 = vperm.xlu0 %6636, %v8725_v15   ;;  %v1507_v29 = vadd.f32 %v9057_v24, %v12774_v54 }
 0x3b3   : > { %v2177_v7 = vmax.f32 %v9258_v36, %v9263_v28  ;;  %v9269_v3 = vpop.permute.xlu1 %2055 }
 0x3b4   : > { %v2142_v49 = vpop.permute.xlu0 %2141 }
 0x3b5   : > { %v9274_v58 = vadd.f32 %v9184_v32, %v2142_v49  ;;  %2437 = vperm.xlu1 %6633, %v8682_v0   ;;  %v12789_v0 = vld [vmem:[#allocation104_spill] sm:$0xff] }
 0x3b6   : > { %2559 = vperm.xlu0 %6636, %v8730_v40  }
 0x3b7   : > { %v9280_v4 = vpop.permute.xlu1 %2063 }
 0x3b8   : > { %v2150_v17 = vpop.permute.xlu0 %2149 }
 0x3b9   : > { %v9283_v19 = vadd.f32 %v9184_v32, %v2150_v17  ;;  %2441 = vperm.xlu1 %6633, %v8690_v6   ;;  %v12775_v17 = vld [vmem:[#allocation86_spill] sm:$0xff] }
 0x3ba   : > { %6638 = vset.pattern.permute.xlu0 %v12470_v45 }
 0x3bb   : > { %2597 = vperm.xlu0 %6638, %v8693_v22  }
 0x3bc   : > { %v9294_v40 = vpop.permute.xlu1 %2101 }
 0x3bd   : > { %2449 = vperm.xlu1 %6633, %v8698_v18   ;;  %v2188_v14 = vpop.permute.xlu0 %2187  ;;  %v1502_v18 = vadd.f32 %v9057_v24, %v12770_v13  ;;  %v12779_v13 = vld [vmem:[#allocation98_spill] sm:$0xff] }
 0x3be   : > { %v2239_v10 = vadd.f32 %v9289_v46, %v2188_v14  ;;  %v1513_v14 = vmax.f32 %v12776_v51, %v1500_v34  ;;  %v12782_v34 = vld [vmem:[#allocation100_spill] sm:$0xff]  ;;  %v12783_v51 = vld [vmem:[#allocation101_spill] sm:$0xff] }
 0x3bf   : > { %2609 = vperm.xlu0 %6638, %v12757_v56   ;;  %v12772_v56 = vld [vmem:[#allocation94_spill] sm:$0xff] }
 0x3c0   : > { %v9302_v6 = vmax.f32 %v2170_v16, %v2239_v10  ;;  %v9304_v59 = vpop.permute.xlu1 %2109  ;;  %v1503_v8 = vadd.f32 %v9057_v24, %v12772_v56  ;;  %v12777_v10 = vld [vmem:[#allocation97_spill] sm:$0xff]  ;;  %v1582_v56 = vadd.f32 %v9071_v55, %v12780_v47  ;;  %v12787_v47 = vld [vmem:[#allocation106_spill] sm:$0xff] }
 0x3c1   : > { %2457 = vperm.xlu1 %6633, %v8706_v57   ;;  %v2200_v62 = vpop.permute.xlu0 %2199  ;;  %v1505_v57 = vadd.f32 %v9057_v24, %v12773_v50 }
 0x3c2   : > { %v2242_v22 = vadd.f32 %v9289_v46, %v2200_v62  ;;  %v12778_v62 = vld [vmem:[#allocation85_spill] sm:$0xff] }
 0x3c3   : > { %2617 = vperm.xlu0 %6638, %v8709_v63   ;;  %v1515_v63 = vmax.f32 %v12775_v17, %v1502_v18  ;;  %v12781_v18 = vld [vmem:[#allocation84_spill] sm:$0xff]  ;;  %v1584_v17 = vadd.f32 %v9071_v55, %v12782_v34  ;;  %v12788_v34 = vld [vmem:[#allocation82_spill] sm:$0xff] }
 0x3c4   : > { %v9315_v35 = vmax.f32 %v2173_v48, %v2242_v22  ;;  %v9317_v16 = vpop.permute.xlu1 %2113  ;;  %v1509_v48 = vadd.f32 %v9057_v24, %v12777_v10  ;;  %v1516_v22 = vmax.f32 %v12778_v62, %v1503_v8  ;;  %v1518_v54 = vmax.f32 %v12781_v18, %v1505_v57  ;;  %v12784_v10 = vld [vmem:[#allocation102_spill] sm:$0xff]  ;;  %v12785_v62 = vld [vmem:[#allocation83_spill] sm:$0xff] }
 0x3c5   : > { %2465 = vperm.xlu1 %6633, %v12761_v23   ;;  %v2208_v44 = vpop.permute.xlu0 %2207  ;;  %v1511_v23 = vadd.f32 %v9057_v24, %v12779_v13  ;;  %v1587_v8 = vadd.f32 %v9071_v55, %v12784_v10  ;;  %v1520_v13 = vmax.f32 %v12785_v62, %v1507_v29  ;;  %v1664_v57 = vadd.f32 %v9081_v5, %v12787_v47  ;;  %v12792_v29 = vld [vmem:[#allocation81_spill] sm:$0xff]  ;;  %v12793_v47 = vld [vmem:[#allocation114_spill] sm:$0xff] }
 0x3c6   : > { %v2244_v49 = vadd.f32 %v9289_v46, %v2208_v44  ;;  %v1522_v45 = vmax.f32 %v12788_v34, %v1509_v48  ;;  %v1593_v10 = vadd.f32 %v9071_v55, %v12790_v61 }
 0x3c7   : > { %2625 = vperm.xlu0 %6638, %v8717_v9   ;;  %v1585_v9 = vadd.f32 %v9071_v55, %v12783_v51  ;;  %v1591_v51 = vadd.f32 %v9071_v55, %v12789_v0  ;;  %v1524_v62 = vmax.f32 %v12792_v29, %v1511_v23  ;;  %v9371_v34 = vmax.f32 %v1518_v54, %v1587_v8  ;;  %v9392_v8 = vld [vmem:[%s8679_s29 + $0xc8] sm:$0xff] }
 0x3c8   : > { %v9335_v50 = vmax.f32 %v2175_v31, %v2244_v49  ;;  %v9337_v44 = vpop.permute.xlu1 %2121  ;;  %v12786_v31 = vld [vmem:[#allocation103_spill] sm:$0xff]  ;;  %v12795_v23 = vmov 13  }
 0x3c9   : > { %2473 = vperm.xlu1 %6633, %v12764_v43   ;;  %v2216_v24 = vpop.permute.xlu0 %2215  ;;  %v1589_v49 = vadd.f32 %v9071_v55, %v12786_v31  ;;  %v12791_v43 = vld [vmem:[#allocation107_spill] sm:$0xff]  ;;  %v1595_v31 = vmax.f32 %v1513_v14, %v1582_v56  ;;  %v1597_v55 = vmax.f32 %v1515_v63, %v1584_v17  ;;  %v1598_v61 = vmax.f32 %v1516_v22, %v1585_v9 }
 0x3ca   : > { %v2246_v18 = vadd.f32 %v9289_v46, %v2216_v24  ;;  %v1666_v38 = vadd.f32 %v9081_v5, %v12791_v43  ;;  %v1746_v24 = vadd.f32 %v9096_v26, %v12793_v47  ;;  %v12796_v47 = vld [vmem:[#allocation122_spill] sm:$0xff]  ;;  %v9385_v63 = vmax.f32 %v1522_v45, %v1591_v51  ;;  %v12797_v17 = vld [vmem:[#allocation115_spill] sm:$0xff] }
 0x3cb   : > { %2633 = vperm.xlu0 %6638, %v8725_v15   ;;  %v12794_v15 = vld [vmem:[#allocation108_spill] sm:$0xff]  ;;  %v9376_v56 = vmax.f32 %v1520_v13, %v1589_v49  ;;  %v1677_v29 = vmax.f32 %v1595_v31, %v1664_v57  ;;  %v1828_v36 = vadd.f32 %v9107_v2, %v12796_v47  ;;  %v9387_v22 = vmax.f32 %v1524_v62, %v1593_v10  ;;  %v12798_v49 = vld [vmem:[#allocation131_spill] sm:$0xff]  ;;  %v12800_v10 = vld [vmem:[#allocation109_spill] sm:$0xff] }
 0x3cc   : > { %v9367_v48 = vmax.f32 %v2177_v7, %v2246_v18  ;;  %v9369_v0 = vpop.permute.xlu1 %2129  ;;  %v1667_v43 = vadd.f32 %v9081_v5, %v12794_v15  ;;  %v9382_v7 = vld [vmem:[%s8679_s29 + $0x68] sm:$0xff]  ;;  %v1679_v54 = vmax.f32 %v1597_v55, %v1666_v38  ;;  %v1748_v9 = vadd.f32 %v9096_v26, %v12797_v17  ;;  %v12801_v31 = vld [vmem:[#allocation110_spill] sm:$0xff]  ;;  %v9420_v47 = vld [vmem:[%s8679_s29 + $0x78] sm:$0xff] }
 0x3cd   : > { %6635 = vset.pattern.permute.xlu1 %v12795_v23  ;;  %v2224_v14 = vpop.permute.xlu0 %2223  ;;  %v1759_v13 = vmax.f32 %v1677_v29, %v1746_v24  ;;  %v1910_v57 = vadd.f32 %v9117_v37, %v12798_v49  ;;  %v12799_v18 = vmax.f32 %v9271_v11, %v9274_v58  ;;  %v1669_v62 = vadd.f32 %v9081_v5, %v12800_v10  ;;  %v12802_v15 = vld [vmem:[#allocation123_spill] sm:$0xff]  ;;  %v12804_v58 = vld [vmem:[#allocation142_spill] sm:$0xff]  ;;  %v12805_v17 = vld [vmem:[#allocation116_spill] sm:$0xff] }
 0x3ce   : > { %v2248_v28 = vadd.f32 %v9289_v46, %v2224_v14  ;;  %2511 = vperm.xlu1 %6635, %v9382_v7   ;;  %v1680_v38 = vmax.f32 %v1598_v61, %v1667_v43  ;;  %v9408_v55 = vadd.f32 %v9081_v5, %v12801_v31  ;;  %v1830_v24 = vadd.f32 %v9107_v2, %v12802_v15  ;;  %v12803_v14 = vld [vmem:[#allocation112_spill] sm:$0xff]  ;;  %v12808_v15 = vld [vmem:[#allocation113_spill] sm:$0xff] }
 0x3cf   : > { %2641 = vperm.xlu0 %6638, %v9392_v8   ;;  %v9414_v29 = vadd.f32 %v9081_v5, %v12803_v14  ;;  %v1841_v11 = vmax.f32 %v1759_v13, %v1828_v36  ;;  %v1992_v61 = vadd.f32 %v9136_v33, %v12804_v58  ;;  %v1749_v49 = vadd.f32 %v9096_v26, %v12805_v17  ;;  %v12807_v36 = vld [vmem:[#allocation72_spill] sm:$0xff] }
 0x3d0   : > { %v9400_v45 = vmax.f32 %v12799_v18, %v2248_v28  ;;  %v9402_v51 = vpop.permute.xlu1 %2137  ;;  %v1761_v28 = vmax.f32 %v1679_v54, %v1748_v9  ;;  %v12806_v18 = vld [vmem:[#allocation133_spill] sm:$0xff]  ;;  %v12472_v31 = vmov 15   ;;  %v9430_v13 = vrot.slane %v9164_v60, %v12807_v36 }
 0x3d1   : > { %v2232_v23 = vpop.permute.xlu0 %2231  ;;  %v1912_v10 = vadd.f32 %v9117_v37, %v12806_v18  ;;  %v1923_v14 = vmax.f32 %v1841_v11, %v1910_v57  ;;  %v2074_v54 = vadd.f32 %v9156_v39, %v9170_v25  ;;  %v12809_v9 = vmax.f32 %v9188_v27, %v9283_v19  ;;  %v6644_v18 = vld [vmem:[%s8679_s29 + $0x70] sm:$0xff]  ;;  %v12819_v27 = vld [vmem:[#allocation146_spill] sm:$0xff] }
 0x3d2   : > { %v2250_v43 = vadd.f32 %v9289_v46, %v2232_v23  ;;  %2519 = vperm.xlu1 %6635, %v9420_v47   ;;  %v9434_v23 = vadd.f32 %v9081_v5, %v12808_v15  ;;  %v1682_v36 = vmax.f32 %v9371_v34, %v1669_v62  ;;  %v1831_v5 = vadd.f32 %v9107_v2, %v12810_v52  ;;  %v12811_v15 = vld [vmem:[#allocation144_spill] sm:$0xff]  ;;  %v12812_v62 = vld [vmem:[#allocation117_spill] sm:$0xff] }
 0x3d3   : > { %6640 = vset.pattern.permute.xlu0 %v12472_v31  ;;  %v1843_v31 = vmax.f32 %v1761_v28, %v1830_v24  ;;  %v1994_v57 = vadd.f32 %v9136_v33, %v12811_v15  ;;  %v1684_v25 = vmax.f32 %v9376_v56, %v9408_v55  ;;  %v2005_v19 = vmax.f32 %v1923_v14, %v1992_v61  ;;  %v12813_v55 = vld [vmem:[#allocation135_spill] sm:$0xff]  ;;  %v6648_v15 = vld [vmem:[%s8679_s29 + $0x98] sm:$0xff] }
 0x3d4   : > { %v9441_v58 = vmax.f32 %v12809_v9, %v2250_v43  ;;  %v9443_v17 = vpop.permute.xlu1 %2145  ;;  %2679 = vperm.xlu0 %6640, %v6644_v18   ;;  %v2156_v11 = vadd.f32 %v9184_v32, %v9294_v40  ;;  %v9458_v43 = vld [vmem:[%s8679_s29 + $0x80] sm:$0xff]  ;;  %v1762_v52 = vmax.f32 %v1680_v38, %v1749_v49  ;;  %v1751_v24 = vadd.f32 %v9096_v26, %v12812_v62  ;;  %v6646_v18 = vld [vmem:[%s8679_s29 + $0x88] sm:$0xff]  ;;  %v12815_v62 = vld [vmem:[#allocation145_spill] sm:$0xff] }
 0x3d5   : > { %v1925_v28 = vmax.f32 %v1843_v31, %v1912_v10  ;;  %v1913_v40 = vadd.f32 %v9117_v37, %v12813_v55  ;;  %v2087_v61 = vmax.f32 %v2005_v19, %v2074_v54  ;;  %v2076_v14 = vadd.f32 %v9156_v39, %v9195_v30  ;;  %v12814_v49 = vld [vmem:[#allocation127_spill] sm:$0xff]  ;;  %v9483_v19 = vld [vmem:[%s8679_s29 + $0x90] sm:$0xff] }
 0x3d6   : > { %2523 = vperm.xlu1 %6635, %v9458_v43   ;;  %v2270_v34 = vpop.permute.xlu0 %2269  ;;  %v1844_v38 = vmax.f32 %v1762_v52, %v1831_v5  ;;  %v1833_v10 = vadd.f32 %v9107_v2, %v12814_v49  ;;  %v1995_v56 = vadd.f32 %v9136_v33, %v12815_v62  ;;  %v2158_v54 = vadd.f32 %v9184_v32, %v9304_v59  ;;  %v12816_v52 = vld [vmem:[#allocation119_spill] sm:$0xff] }
 0x3d7   : > { %v9464_v9 = vadd.f32 %v9430_v13, %v2270_v34  ;;  %v2007_v31 = vmax.f32 %v1925_v28, %v1994_v57  ;;  %v2169_v55 = vmax.f32 %v2087_v61, %v2156_v11  ;;  %v1764_v57 = vmax.f32 %v1682_v36, %v1751_v24  ;;  %v12818_v24 = vld [vmem:[#allocation128_spill] sm:$0xff] }
 0x3d8   : > { %2691 = vperm.xlu0 %6640, %v6646_v18   ;;  %v1753_v28 = vadd.f32 %v9096_v26, %v12816_v52  ;;  %v12817_v18 = vld [vmem:[#allocation136_spill] sm:$0xff]  ;;  %v1926_v11 = vmax.f32 %v1844_v38, %v1913_v40  ;;  %v2077_v61 = vadd.f32 %v9156_v39, %v9220_v41  ;;  %v1835_v52 = vadd.f32 %v9107_v2, %v12818_v24 }
 0x3d9   : > { %v2184_v34 = vpop.permute.xlu1 %2183  ;;  %v1915_v49 = vadd.f32 %v9117_v37, %v12817_v18  ;;  %v2089_v59 = vmax.f32 %v2007_v31, %v2076_v14  ;;  %v1846_v36 = vmax.f32 %v1764_v57, %v1833_v10  ;;  %v1997_v18 = vadd.f32 %v9136_v33, %v12819_v27  ;;  %v9508_v31 = vld [vmem:[%s8679_s29 + $0xa0] sm:$0xff] }
 0x3da   : > { %v2238_v30 = vadd.f32 %v9289_v46, %v2184_v34  ;;  %2531 = vperm.xlu1 %6635, %v9483_v19   ;;  %v2282_v5 = vpop.permute.xlu0 %2281  ;;  %v2008_v40 = vmax.f32 %v1926_v11, %v1995_v56  ;;  %v2159_v41 = vadd.f32 %v9184_v32, %v9317_v16  ;;  %v12821_v56 = vld [vmem:[#allocation137_spill] sm:$0xff] }
 0x3db   : > { %v9491_v62 = vadd.f32 %v9430_v13, %v2282_v5  ;;  %v2171_v14 = vmax.f32 %v2089_v59, %v2158_v54  ;;  %v1917_v54 = vadd.f32 %v9117_v37, %v12821_v56  ;;  %v6650_v59 = vld [vmem:[%s8679_s29 + $0xa8] sm:$0xff] }
 0x3dc   : > { %v9495_v34 = vmax.f32 %v2169_v55, %v2238_v30  ;;  %2699 = vperm.xlu0 %6640, %v6648_v15   ;;  %v1766_v15 = vmax.f32 %v1684_v25, %v1753_v28  ;;  %v12820_v55 = vld [vmem:[#allocation120_spill] sm:$0xff]  ;;  %v1928_v30 = vmax.f32 %v1846_v36, %v1915_v49  ;;  %v2090_v16 = vmax.f32 %v2008_v40, %v2077_v61  ;;  %v12822_v28 = vld [vmem:[#allocation129_spill] sm:$0xff] }
 0x3dd   : > { %v2337_v5 = vmax.f32 %v9315_v35, %v9491_v62  ;;  %v2192_v42 = vpop.permute.xlu1 %2191  ;;  %v1755_v27 = vadd.f32 %v9096_v26, %v12820_v55  ;;  %v1837_v24 = vadd.f32 %v9107_v2, %v12822_v28  ;;  %v12823_v55 = vld [vmem:[#allocation148_spill] sm:$0xff]  ;;  %v6652_v36 = vld [vmem:[%s8679_s29 + $0xb8] sm:$0xff] }
 0x3de   : > { %v2240_v38 = vadd.f32 %v9289_v46, %v2192_v42  ;;  %2539 = vperm.xlu1 %6635, %v9508_v31   ;;  %v2290_v10 = vpop.permute.xlu0 %2289  ;;  %v2079_v42 = vadd.f32 %v9156_v39, %v9241_v53  ;;  %v1848_v25 = vmax.f32 %v1766_v15, %v1835_v52  ;;  %v2010_v49 = vmax.f32 %v1928_v30, %v1997_v18  ;;  %v12825_v30 = vld [vmem:[#allocation121_spill] sm:$0xff] }
 0x3df   : > { %v9514_v57 = vadd.f32 %v9430_v13, %v2290_v10  ;;  %v1999_v61 = vadd.f32 %v9136_v33, %v12823_v55  ;;  %v2172_v40 = vmax.f32 %v2090_v16, %v2159_v41  ;;  %v2161_v53 = vadd.f32 %v9184_v32, %v9337_v44 }
 0x3e0   : > { %v9520_v11 = vmax.f32 %v2171_v14, %v2240_v38  ;;  %2707 = vperm.xlu0 %6640, %v6650_v59   ;;  %v9533_v38 = vld [vmem:[%s8679_s29 + $0xb0] sm:$0xff]  ;;  %v12824_v18 = vmax.f32 %v9385_v63, %v9414_v29  ;;  %v1757_v56 = vadd.f32 %v9096_v26, %v12825_v30  ;;  %v12826_v59 = vld [vmem:[#allocation138_spill] sm:$0xff]  ;;  %v1930_v44 = vmax.f32 %v1848_v25, %v1917_v54 }
 0x3e1   : > { %v2196_v10 = vpop.permute.xlu1 %2195  ;;  %v1919_v41 = vadd.f32 %v9117_v37, %v12826_v59  ;;  %v2092_v28 = vmax.f32 %v2010_v49, %v2079_v42  ;;  %v12827_v29 = vld [vmem:[#allocation130_spill] sm:$0xff] }
 0x3e2   : > { %v2241_v14 = vadd.f32 %v9289_v46, %v2196_v10  ;;  %2547 = vperm.xlu1 %6635, %v9533_v38   ;;  %v2298_v52 = vpop.permute.xlu0 %2297  ;;  %v1768_v15 = vmax.f32 %v12824_v18, %v1755_v27  ;;  %v2081_v10 = vadd.f32 %v9156_v39, %v9255_v12  ;;  %v1839_v26 = vadd.f32 %v9107_v2, %v12827_v29  ;;  %v9561_v49 = vld [vmem:[%s8679_s29 + $0xc0] sm:$0xff] }
 0x3e3   : > { %v9544_v16 = vadd.f32 %v9430_v13, %v2298_v52  ;;  %v2001_v27 = vadd.f32 %v9136_v33, %v9109_v1  ;;  %v2012_v54 = vmax.f32 %v1930_v44, %v1999_v61  ;;  %v2174_v42 = vmax.f32 %v2092_v28, %v2161_v53  ;;  %v12829_v61 = vld [vmem:[#allocation140_spill] sm:$0xff] }
 0x3e4   : > { %v9548_v55 = vmax.f32 %v2172_v40, %v2241_v14  ;;  %2715 = vperm.xlu0 %6640, %v6652_v36   ;;  %v1850_v63 = vmax.f32 %v1768_v15, %v1837_v24  ;;  %v2163_v12 = vadd.f32 %v9184_v32, %v9369_v0  ;;  %v12828_v2 = vmax.f32 %v9387_v22, %v9434_v23 }
 0x3e5   : > { %v2341_v52 = vmax.f32 %v9367_v48, %v9544_v16  ;;  %v2204_v18 = vpop.permute.xlu1 %2203  ;;  %v1921_v53 = vadd.f32 %v9117_v37, %v12829_v61  ;;  %v2094_v14 = vmax.f32 %v2012_v54, %v2081_v10  ;;  %v2083_v0 = vadd.f32 %v9156_v39, %v9269_v3  ;;  %v12831_v10 = vld [vmem:[#allocation75_spill] sm:$0xff] }
 0x3e6   : > { %v2243_v25 = vadd.f32 %v9289_v46, %v2204_v18  ;;  %2555 = vperm.xlu1 %6635, %v9561_v49   ;;  %v2306_v24 = vpop.permute.xlu0 %2305  ;;  %v1770_v1 = vmax.f32 %v12828_v2, %v1757_v56  ;;  %v1932_v36 = vmax.f32 %v1850_v63, %v1919_v41  ;;  %v2003_v56 = vadd.f32 %v9136_v33, %v9138_v21 }
 0x3e7   : > { %v9568_v40 = vadd.f32 %v9430_v13, %v2306_v24  ;;  %v2176_v41 = vmax.f32 %v2094_v14, %v2163_v12  ;;  %v2165_v37 = vadd.f32 %v9184_v32, %v9402_v51  ;;  %v12830_v3 = vmov 14  }
 0x3e8   : > { %v9574_v15 = vmax.f32 %v2174_v42, %v2243_v25  ;;  %2723 = vperm.xlu0 %6640, %v9392_v8   ;;  %v1852_v30 = vmax.f32 %v1770_v1, %v1839_v26  ;;  %v2014_v59 = vmax.f32 %v1932_v36, %v2001_v27  ;;  %v2085_v33 = vadd.f32 %v9156_v39, %v9280_v4 }
 0x3e9   : > { %v2343_v22 = vmax.f32 %v9400_v45, %v9568_v40  ;;  %v2212_v23 = vpop.permute.xlu1 %2211  ;;  %v9589_v45 = vrot.slane %v9164_v60, %v12831_v10  ;;  %v2167_v54 = vadd.f32 %v9184_v32, %v9443_v17 }
 0x3ea   : > { %v2245_v44 = vadd.f32 %v9289_v46, %v2212_v23  ;;  %6637 = vset.pattern.permute.xlu1 %v12830_v3  ;;  %v2314_v28 = vpop.permute.xlu0 %2313  ;;  %v1934_v63 = vmax.f32 %v1852_v30, %v1921_v53  ;;  %v2096_v29 = vmax.f32 %v2014_v59, %v2083_v0  ;;  %v12833_v0 = vmax.f32 %v9335_v50, %v9514_v57 }
 0x3eb   : > { %v2332_v8 = vadd.f32 %v9430_v13, %v2314_v28  ;;  %2593 = vperm.xlu1 %6637, %v9382_v7   ;;  %v12834_v28 = vld [vmem:[#allocation76_spill] sm:$0xff] }
 0x3ec   : > { %v9593_v21 = vmax.f32 %v2176_v41, %v2245_v44  ;;  %v2016_v27 = vmax.f32 %v1934_v63, %v2003_v56  ;;  %v2178_v18 = vmax.f32 %v2096_v29, %v2165_v37 }
 0x3ed   : > { %v2345_v51 = vmax.f32 %v9441_v58, %v2332_v8  ;;  %v2220_v26 = vpop.permute.xlu1 %2219  ;;  %v12832_v58 = vmax.f32 %v9302_v6, %v9464_v9  ;;  %v9648_v8 = vrot.slane %v9164_v60, %v12834_v28 }
 0x3ee   : > { %v2247_v42 = vadd.f32 %v9289_v46, %v2220_v26  ;;  %v2098_v25 = vmax.f32 %v2016_v27, %v2085_v33 }
 0x3ef   : > { %2601 = vperm.xlu1 %6637, %v9420_v47   ;;  %v2352_v12 = vpop.permute.xlu0 %2351 }
 0x3f0   : > { %v9600_v24 = vmax.f32 %v2178_v18, %v2247_v42  ;;  %v2403_v39 = vadd.f32 %v9589_v45, %v2352_v12  ;;  %v2180_v2 = vmax.f32 %v2098_v25, %v2167_v54 }
 0x3f1   : > { %v2228_v4 = vpop.permute.xlu1 %2227 }
 0x3f2   : > { %v9606_v1 = vmax.f32 %v12832_v58, %v2403_v39  ;;  %v2249_v36 = vadd.f32 %v9289_v46, %v2228_v4 }
 0x3f3   : > { %2605 = vperm.xlu1 %6637, %v9458_v43   ;;  %v2364_v32 = vpop.permute.xlu0 %2363 }
 0x3f4   : > { %v9610_v17 = vmax.f32 %v2180_v2, %v2249_v36  ;;  %v2406_v40 = vadd.f32 %v9589_v45, %v2364_v32 }
 0x3f6   : > { %v9616_v61 = vmax.f32 %v2337_v5, %v2406_v40  ;;  %v2266_v53 = vpop.permute.xlu1 %2265 }
 0x3f7   : > { %v2320_v14 = vadd.f32 %v9430_v13, %v2266_v53  ;;  %2613 = vperm.xlu1 %6637, %v9483_v19   ;;  %v2372_v6 = vpop.permute.xlu0 %2371 }
 0x3f8   : > { %v2408_v46 = vadd.f32 %v9589_v45, %v2372_v6 }
 0x3f9   : > { %v2333_v9 = vmax.f32 %v9495_v34, %v2320_v14 }
 0x3fa   : > { %v9625_v30 = vmax.f32 %v12833_v0, %v2408_v46  ;;  %v2274_v59 = vpop.permute.xlu1 %2273 }
 0x3fb   : > { %v2322_v35 = vadd.f32 %v9430_v13, %v2274_v59  ;;  %2621 = vperm.xlu1 %6637, %v9508_v31   ;;  %v2380_v62 = vpop.permute.xlu0 %2379 }
 0x3fc   : > { %v2410_v5 = vadd.f32 %v9589_v45, %v2380_v62 }
 0x3fd   : > { %v2335_v23 = vmax.f32 %v9520_v11, %v2322_v35 }
 0x3fe   : > { %v9634_v56 = vmax.f32 %v2341_v52, %v2410_v5  ;;  %v2278_v34 = vpop.permute.xlu1 %2277 }
 0x3ff   : > { %v2323_v50 = vadd.f32 %v9430_v13, %v2278_v34  ;;  %2629 = vperm.xlu1 %6637, %v9533_v38   ;;  %v2388_v57 = vpop.permute.xlu0 %2387 }
 0x400   : > { %v2412_v41 = vadd.f32 %v9589_v45, %v2388_v57 }
 0x401   : > { %v2336_v37 = vmax.f32 %v9548_v55, %v2323_v50 }
 0x402   : > { %v9640_v44 = vmax.f32 %v2343_v22, %v2412_v41  ;;  %v2286_v3 = vpop.permute.xlu1 %2285  ;;  %v12835_v22 = vmov 15  }
 0x403   : > { %v2325_v11 = vadd.f32 %v9430_v13, %v2286_v3  ;;  %2637 = vperm.xlu1 %6637, %v9561_v49   ;;  %v2396_v48 = vpop.permute.xlu0 %2395 }
 0x404   : > { %v2414_v16 = vadd.f32 %v9589_v45, %v2396_v48 }
 0x405   : > { %v2338_v52 = vmax.f32 %v9574_v15, %v2325_v11 }
 0x406   : > { %v9650_v10 = vmax.f32 %v2345_v51, %v2414_v16  ;;  %v2294_v63 = vpop.permute.xlu1 %2293 }
 0x407   : > { %v2327_v55 = vadd.f32 %v9430_v13, %v2294_v63  ;;  %6639 = vset.pattern.permute.xlu1 %v12835_v22 }
 0x408   : > { %2675 = vperm.xlu1 %6639, %v9382_v7   ;;  %v2434_v29 = vpop.permute.xlu0 %2433 }
 0x409   : > { %v2340_v33 = vmax.f32 %v9593_v21, %v2327_v55  ;;  %v2485_v26 = vadd.f32 %v9648_v8, %v2434_v29 }
 0x40a   : > { %v2302_v27 = vpop.permute.xlu1 %2301 }
 0x40b   : > { %v2498_v15 = vmax.f32 %v9606_v1, %v2485_v26  ;;  %v2329_v18 = vadd.f32 %v9430_v13, %v2302_v27 }
 0x40c   : > { %2683 = vperm.xlu1 %6639, %v9420_v47   ;;  %v2446_v51 = vpop.permute.xlu0 %2445 }
 0x40d   : > { %v2342_v54 = vmax.f32 %v9600_v24, %v2329_v18  ;;  %v2488_v42 = vadd.f32 %v9648_v8, %v2446_v51 }
 0x40e   : > { %v2310_v12 = vpop.permute.xlu1 %2309 }
 0x40f   : > { %v2501_v7 = vmax.f32 %v9616_v61, %v2488_v42  ;;  %v2331_v25 = vadd.f32 %v9430_v13, %v2310_v12  ;;  %v12836_v12 = vld [vmem:[#allocation78_spill] sm:$0xff] }
 0x410   : > { %2687 = vperm.xlu1 %6639, %v9458_v43   ;;  %v2454_v21 = vpop.permute.xlu0 %2453 }
 0x411   : > { %v2344_v39 = vmax.f32 %v9610_v17, %v2331_v25  ;;  %v2490_v4 = vadd.f32 %v9648_v8, %v2454_v21 }
 0x413   : > { %v2503_v2 = vmax.f32 %v9625_v30, %v2490_v4  ;;  %v2348_v47 = vpop.permute.xlu1 %2347 }
 0x414   : > { %v2402_v58 = vadd.f32 %v9589_v45, %v2348_v47  ;;  %2695 = vperm.xlu1 %6639, %v9483_v19   ;;  %v2462_v24 = vpop.permute.xlu0 %2461 }
 0x415   : > { %v2492_v1 = vadd.f32 %v9648_v8, %v2462_v24 }
 0x416   : > { %v9671_v36 = vmax.f32 %v2333_v9, %v2402_v58 }
 0x417   : > { %v2505_v13 = vmax.f32 %v9634_v56, %v2492_v1  ;;  %v2356_v43 = vpop.permute.xlu1 %2355 }
 0x418   : > { %v2404_v32 = vadd.f32 %v9589_v45, %v2356_v43  ;;  %2703 = vperm.xlu1 %6639, %v9508_v31   ;;  %v2470_v17 = vpop.permute.xlu0 %2469  ;;  %v9687_v31 = vrot.slane %v9164_v60, %v7840_v20 }
 0x419   : > { %v2494_v40 = vadd.f32 %v9648_v8, %v2470_v17 }
 0x41a   : > { %v9677_v61 = vmax.f32 %v2335_v23, %v2404_v32 }
 0x41b   : > { %v2507_v53 = vmax.f32 %v9640_v44, %v2494_v40  ;;  %v2360_v19 = vpop.permute.xlu1 %2359 }
 0x41c   : > { %v2405_v14 = vadd.f32 %v9589_v45, %v2360_v19  ;;  %2711 = vperm.xlu1 %6639, %v9533_v38   ;;  %v2478_v6 = vpop.permute.xlu0 %2477 }
 0x41d   : > { %v2496_v46 = vadd.f32 %v9648_v8, %v2478_v6 }
 0x41e   : > { %v9683_v9 = vmax.f32 %v2336_v37, %v2405_v14 }
 0x41f   : > { %v2509_v0 = vmax.f32 %v9650_v10, %v2496_v46  ;;  %v2368_v30 = vpop.permute.xlu1 %2367 }
 0x420   : > { %v2407_v59 = vadd.f32 %v9589_v45, %v2368_v30  ;;  %2719 = vperm.xlu1 %6639, %v9561_v49  }
 0x421   : > { %v2516_v35 = vpop.permute.xlu0 %2515 }
 0x422   : > { %v9692_v62 = vmax.f32 %v2338_v52, %v2407_v59  ;;  %v2567_v38 = vadd.f32 %v9687_v31, %v2516_v35 }
 0x423   : > { %v2376_v5 = vpop.permute.xlu1 %2375 }
 0x424   : > { %v9695_v23 = vmax.f32 %v2498_v15, %v2567_v38  ;;  %v2409_v56 = vadd.f32 %v9589_v45, %v2376_v5 }
 0x425   : > { %v2528_v34 = vpop.permute.xlu0 %2527 }
 0x426   : > { %v9698_v50 = vmax.f32 %v2340_v33, %v2409_v56  ;;  %v2570_v57 = vadd.f32 %v9687_v31, %v2528_v34 }
 0x427   : > { %v2384_v41 = vpop.permute.xlu1 %2383 }
 0x428   : > { %v9701_v37 = vmax.f32 %v2501_v7, %v2570_v57  ;;  %v2411_v49 = vadd.f32 %v9589_v45, %v2384_v41  ;;  %v9725_v7 = vrot.slane %v9164_v60, %v12836_v12 }
 0x429   : > { %v2536_v44 = vpop.permute.xlu0 %2535 }
 0x42a   : > { %v9704_v3 = vmax.f32 %v2342_v54, %v2411_v49  ;;  %v2572_v11 = vadd.f32 %v9687_v31, %v2536_v44  ;;  %v12837_v49 = vld [vmem:[#allocation80_spill] sm:$0xff] }
 0x42b   : > { %v2392_v48 = vpop.permute.xlu1 %2391  ;;  %v9755_v44 = vrot.slane %v9164_v60, %v12837_v49 }
 0x42c   : > { %v9707_v16 = vmax.f32 %v2503_v2, %v2572_v11  ;;  %v2413_v52 = vadd.f32 %v9589_v45, %v2392_v48 }
 0x42d   : > { %v2544_v28 = vpop.permute.xlu0 %2543 }
 0x42e   : > { %v9710_v10 = vmax.f32 %v2344_v39, %v2413_v52  ;;  %v2574_v63 = vadd.f32 %v9687_v31, %v2544_v28 }
 0x430   : > { %v9713_v55 = vmax.f32 %v2505_v13, %v2574_v63  ;;  %v2430_v22 = vpop.permute.xlu1 %2429 }
 0x431   : > { %v2484_v29 = vadd.f32 %v9648_v8, %v2430_v22  ;;  %v2552_v33 = vpop.permute.xlu0 %2551 }
 0x432   : > { %v2576_v26 = vadd.f32 %v9687_v31, %v2552_v33 }
 0x433   : > { %v2497_v27 = vmax.f32 %v9671_v36, %v2484_v29 }
 0x434   : > { %v9718_v15 = vmax.f32 %v2507_v53, %v2576_v26  ;;  %v2438_v18 = vpop.permute.xlu1 %2437 }
 0x435   : > { %v2486_v45 = vadd.f32 %v9648_v8, %v2438_v18  ;;  %v2560_v51 = vpop.permute.xlu0 %2559 }
 0x436   : > { %v2578_v54 = vadd.f32 %v9687_v31, %v2560_v51 }
 0x437   : > { %v2499_v42 = vmax.f32 %v9677_v61, %v2486_v45 }
 0x438   : > { %v9727_v25 = vmax.f32 %v2509_v0, %v2578_v54  ;;  %v2442_v21 = vpop.permute.xlu1 %2441 }
 0x439   : > { %v2487_v39 = vadd.f32 %v9648_v8, %v2442_v21 }
 0x43a   : > { %v2598_v4 = vpop.permute.xlu0 %2597 }
 0x43b   : > { %v2500_v2 = vmax.f32 %v9683_v9, %v2487_v39  ;;  %v2649_v47 = vadd.f32 %v9725_v7, %v2598_v4 }
 0x43c   : > { %v2450_v58 = vpop.permute.xlu1 %2449 }
 0x43d   : > { %v2662_v24 = vmax.f32 %v9695_v23, %v2649_v47  ;;  %v2489_v1 = vadd.f32 %v9648_v8, %v2450_v58 }
 0x43e   : > { %v2610_v36 = vpop.permute.xlu0 %2609 }
 0x43f   : > { %v2502_v13 = vmax.f32 %v9692_v62, %v2489_v1  ;;  %v2652_v43 = vadd.f32 %v9725_v7, %v2610_v36 }
 0x440   : > { %v2458_v32 = vpop.permute.xlu1 %2457 }
 0x441   : > { %v2665_v17 = vmax.f32 %v9701_v37, %v2652_v43  ;;  %v2491_v40 = vadd.f32 %v9648_v8, %v2458_v32 }
 0x442   : > { %v2618_v61 = vpop.permute.xlu0 %2617 }
 0x443   : > { %v2504_v53 = vmax.f32 %v9698_v50, %v2491_v40  ;;  %v2654_v19 = vadd.f32 %v9725_v7, %v2618_v61 }
 0x444   : > { %v2466_v14 = vpop.permute.xlu1 %2465 }
 0x445   : > { %v2667_v6 = vmax.f32 %v9707_v16, %v2654_v19  ;;  %v2493_v46 = vadd.f32 %v9648_v8, %v2466_v14 }
 0x446   : > { %v2626_v9 = vpop.permute.xlu0 %2625 }
 0x447   : > { %v2506_v0 = vmax.f32 %v9704_v3, %v2493_v46  ;;  %v2656_v30 = vadd.f32 %v9725_v7, %v2626_v9 }
 0x448   : > { %v2474_v59 = vpop.permute.xlu1 %2473 }
 0x449   : > { %v2669_v35 = vmax.f32 %v9713_v55, %v2656_v30  ;;  %v2495_v62 = vadd.f32 %v9648_v8, %v2474_v59 }
 0x44a   : > { %v2634_v38 = vpop.permute.xlu0 %2633 }
 0x44b   : > { %v2508_v5 = vmax.f32 %v9710_v10, %v2495_v62  ;;  %v2658_v23 = vadd.f32 %v9725_v7, %v2634_v38 }
 0x44d   : > { %v2671_v56 = vmax.f32 %v9718_v15, %v2658_v23  ;;  %v2512_v34 = vpop.permute.xlu1 %2511 }
 0x44e   : > { %v2566_v50 = vadd.f32 %v9687_v31, %v2512_v34  ;;  %v2642_v57 = vpop.permute.xlu0 %2641 }
 0x44f   : > { %v2660_v41 = vadd.f32 %v9725_v7, %v2642_v57 }
 0x450   : > { %v9751_v37 = vmax.f32 %v2497_v27, %v2566_v50 }
 0x451   : > { %v2673_v8 = vmax.f32 %v9727_v25, %v2660_v41  ;;  %v2520_v3 = vpop.permute.xlu1 %2519 }
 0x452   : > { %v2568_v11 = vadd.f32 %v9687_v31, %v2520_v3 }
 0x453   : > { %v2680_v48 = vpop.permute.xlu0 %2679 }
 0x454   : > { %v2581_v16 = vmax.f32 %v2499_v42, %v2568_v11  ;;  %v2731_v52 = vadd.f32 %v9755_v44, %v2680_v48 }
 0x455   : > { %v2524_v28 = vpop.permute.xlu1 %2523 }
 0x456   : > { %v9760_v38 = vmax.f32 %v2662_v24, %v2731_v52   ;;  %v2569_v10 = vadd.f32 %v9687_v31, %v2524_v28 }
 0x457   : > { %v2692_v55 = vpop.permute.xlu0 %2691 }
 0x458   : > { %v12838_v63 = vmov %v9760_v38  ;;  %v2582_v22 = vmax.f32 %v2500_v2, %v2569_v10  ;;  %v2734_v29 = vadd.f32 %v9755_v44, %v2692_v55 }
 0x459   : > { %v2532_v60 = vpop.permute.xlu1 %2531  ;;  %2757 = vst [vmem:[#allocation2 + $0x70] sm:$0xff] (%p9798_p1), %v12838_v63 }
 0x45a   : > { %v9764_v33 = vmax.f32 %v2665_v17, %v2734_v29   ;;  %v2571_v27 = vadd.f32 %v9687_v31, %v2532_v60 }
 0x45b   : > { %v2700_v15 = vpop.permute.xlu0 %2699 }
 0x45c   : > { %v12839_v26 = vmov %v9764_v33  ;;  %v2584_v18 = vmax.f32 %v2502_v13, %v2571_v27  ;;  %v2736_v45 = vadd.f32 %v9755_v44, %v2700_v15 }
 0x45d   : > { %v2540_v51 = vpop.permute.xlu1 %2539  ;;  %2760 = vst [vmem:[#allocation2 + $0x88] sm:$0xff] (%p9798_p1), %v12839_v26 }
 0x45e   : > { %v9768_v10 = vmax.f32 %v2667_v6, %v2736_v45   ;;  %v2573_v42 = vadd.f32 %v9687_v31, %v2540_v51 }
 0x45f   : > { %v2708_v12 = vpop.permute.xlu0 %2707 }
 0x460   : > { %v12840_v54 = vmov %v9768_v10  ;;  %v2586_v25 = vmax.f32 %v2504_v53, %v2573_v42  ;;  %v2738_v21 = vadd.f32 %v9755_v44, %v2708_v12 }
 0x461   : > { %v2548_v39 = vpop.permute.xlu1 %2547  ;;  %2762 = vst [vmem:[#allocation2 + $0x98] sm:$0xff] (%p9798_p1), %v12840_v54 }
 0x462   : > { %v9772_v30 = vmax.f32 %v2669_v35, %v2738_v21   ;;  %v2575_v4 = vadd.f32 %v9687_v31, %v2548_v39  ;;  %v9858_v21 = vmov (%p9798_p1), -1e+30   ;;  %v9860_v39 = vmov (%p9798_p1), -1e+30  }
 0x463   : > { %v2716_v2 = vpop.permute.xlu0 %2715 }
 0x464   : > { %v12841_v47 = vmov %v9772_v30  ;;  %v2588_v58 = vmax.f32 %v2506_v0, %v2575_v4  ;;  %v2740_v24 = vadd.f32 %v9755_v44, %v2716_v2 }
 0x465   : > { %v2556_v1 = vpop.permute.xlu1 %2555  ;;  %2764 = vst [vmem:[#allocation2 + $0xa8] sm:$0xff] (%p9798_p1), %v12841_v47 }
 0x466   : > { %v9776_v23 = vmax.f32 %v2671_v56, %v2740_v24   ;;  %v2577_v13 = vadd.f32 %v9687_v31, %v2556_v1 }
 0x467   : > { %v2724_v43 = vpop.permute.xlu0 %2723 }
 0x468   : > { %v12842_v36 = vmov %v9776_v23  ;;  %v2590_v32 = vmax.f32 %v2508_v5, %v2577_v13  ;;  %v2742_v17 = vadd.f32 %v9755_v44, %v2724_v43 }
 0x469   :  { %2766 = vst [vmem:[#allocation2 + $0xb8] sm:$0xff] (%p9798_p1), %v12842_v36 }
 0x46a   : > { %v9780_v33 = vmax.f32 %v2673_v8, %v2742_v17   ;;  %v2594_v61 = vpop.permute.xlu1 %2593 }
 0x46b   : > { %v2648_v53 = vadd.f32 %v9725_v7, %v2594_v61 }
 0x46c   : > { %v12843_v40 = vmov %v9780_v33 }
 0x46d   : > { %v2661_v19 = vmax.f32 %v9751_v37, %v2648_v53  ;;  %2768 = vst [vmem:[#allocation2 + $0xc8] sm:$0xff] (%p9798_p1), %v12843_v40 }
 0x46e   : > { %v2602_v14 = vpop.permute.xlu1 %2601 }
 0x46f   : > { %v2650_v6 = vadd.f32 %v9725_v7, %v2602_v14 }
 0x471   : > { %v2663_v46 = vmax.f32 %v2581_v16, %v2650_v6 }
 0x472   : > { %v2606_v9 = vpop.permute.xlu1 %2605 }
 0x473   : > { %v2651_v0 = vadd.f32 %v9725_v7, %v2606_v9 }
 0x475   : > { %v2664_v30 = vmax.f32 %v2582_v22, %v2651_v0 }
 0x476   : > { %v2614_v31 = vpop.permute.xlu1 %2613 }
 0x477   : > { %v2653_v59 = vadd.f32 %v9725_v7, %v2614_v31 }
 0x479   : > { %v2666_v35 = vmax.f32 %v2584_v18, %v2653_v59 }
 0x47a   : > { %v2622_v62 = vpop.permute.xlu1 %2621 }
 0x47b   : > { %v2655_v38 = vadd.f32 %v9725_v7, %v2622_v62 }
 0x47d   : > { %v2668_v5 = vmax.f32 %v2586_v25, %v2655_v38  ;;  %v12856_v38 = vmov %v12838_v63  ;;  %v9848_v63 = vmov (%p9798_p1), -1e+30  }
 0x47e   : > { %v2630_v23 = vpop.permute.xlu1 %2629 }
 0x47f   : > { %v2657_v56 = vadd.f32 %v9725_v7, %v2630_v23  ;;  %v12847_v23 = vmov %v12842_v36 }
 0x481   : > { %v2670_v34 = vmax.f32 %v2588_v58, %v2657_v56  ;;  %v9868_v58 = vmov (%p9798_p1), -1e+30  }
 0x482   : > { %v2638_v50 = vpop.permute.xlu1 %2637 }
 0x483   : > { %v2659_v57 = vadd.f32 %v9725_v7, %v2638_v50 }
 0x485   : > { %v2672_v41 = vmax.f32 %v2590_v32, %v2659_v57 }
 0x487   : > { %v2676_v37 = vpop.permute.xlu1 %2675 }
 0x488   : > { %v2730_v49 = vadd.f32 %v9755_v44, %v2676_v37 }
 0x48a   : > { %v2743_v8 = vmax.f32 %v2661_v19, %v2730_v49  }
 0x48b   : > { %v2684_v3 = vpop.permute.xlu1 %2683 }
 0x48c   : > { %v2732_v11 = vadd.f32 %v9755_v44, %v2684_v3  ;;  %v12857_v51 = vmov %v2743_v8  ;;  %2756 = vst [vmem:[#allocation2 + $0x68] sm:$0xff] (%p9798_p1), %v2743_v8 }
 0x48d   :  { %v9846_v51 = vmov (%p9798_p1), -1e+30  }
 0x48e   : > { %v2745_v48 = vmax.f32 %v2663_v46, %v2732_v11  }
 0x48f   : > { %v2688_v16 = vpop.permute.xlu1 %2687 }
 0x490   : > { %v2733_v52 = vadd.f32 %v9755_v44, %v2688_v16  ;;  %v12855_v25 = vmov %v2745_v48  ;;  %2758 = vst [vmem:[#allocation2 + $0x78] sm:$0xff] (%p9798_p1), %v2745_v48 }
 0x491   :  { %v9856_v25 = vmov (%p9798_p1), -1e+30  }
 0x492   : > { %v2746_v28 = vmax.f32 %v2664_v30, %v2733_v52   ;;  %v12849_v30 = vmov %v12841_v47  ;;  %v9862_v47 = vmov (%p9798_p1), -1e+30  }
 0x493   : > { %v2696_v10 = vpop.permute.xlu1 %2695 }
 0x494   : > { %v2735_v55 = vadd.f32 %v9755_v44, %v2696_v10  ;;  %v12851_v10 = vmov %v12840_v54  ;;  %v12854_v59 = vmov %v2746_v28  ;;  %2759 = vst [vmem:[#allocation2 + $0x80] sm:$0xff] (%p9798_p1), %v2746_v28  ;;  %v9854_v54 = vmov (%p9798_p1), -1e+30  }
 0x496   : > { %v2748_v22 = vmax.f32 %v2666_v35, %v2735_v55  }
 0x497   : > { %v2704_v29 = vpop.permute.xlu1 %2703 }
 0x498   : > { %v2737_v7 = vadd.f32 %v9755_v44, %v2704_v29  ;;  %v12852_v12 = vmov %v2748_v22  ;;  %2761 = vst [vmem:[#allocation2 + $0x90] sm:$0xff] (%p9798_p1), %v2748_v22 }
 0x499   :  { %v9850_v12 = vmov (%p9798_p1), -1e+30  }
 0x49a   : > { %v2750_v27 = vmax.f32 %v2668_v5, %v2737_v7  }
 0x49b   : > { %v2712_v60 = vpop.permute.xlu1 %2711 }
 0x49c   : > { %v2739_v33 = vadd.f32 %v9755_v44, %v2712_v60  ;;  %v12850_v19 = vmov %v2750_v27  ;;  %v12853_v60 = vmov %v12839_v26  ;;  %2763 = vst [vmem:[#allocation2 + $0xa0] sm:$0xff] (%p9798_p1), %v2750_v27  ;;  %v9852_v26 = vmov (%p9798_p1), -1e+30  }
 0x49e   : > { %v2752_v15 = vmax.f32 %v2670_v34, %v2739_v33   ;;  %v12845_v33 = vmov %v12843_v40  ;;  %1397 = sbr.rel (!%p9798_p1) target bundleno = 597 (0x255), region = 92 }
 0x49f   : > { %v2720_v18 = vpop.permute.xlu1 %2719 }
 0x4a0   : > { %v2741_v45 = vadd.f32 %v9755_v44, %v2720_v18  ;;  %v12848_v4 = vmov %v2752_v15  ;;  %2765 = vst [vmem:[#allocation2 + $0xb0] sm:$0xff] (%p9798_p1), %v2752_v15  ;;  %v9844_v44 = vmov (%p9798_p1), -1e+30  }
 0x4a1   :  { %v9864_v4 = vmov (%p9798_p1), -1e+30  }
 0x4a2   : > { %v2754_v42 = vmax.f32 %v2672_v41, %v2741_v45  }
 0x4a4   : > { %v12846_v2 = vmov %v2754_v42  ;;  %2767 = vst [vmem:[#allocation2 + $0xc0] sm:$0xff] (%p9798_p1), %v2754_v42 }
 0x4a5   :  { %v9866_v2 = vmov -1e+30  }
 0x4a6 LB: > { %12858 = vst [vmem:[#allocation149_spill] sm:$0xff] %v7124_v51  ;;  %12859 = vst [vmem:[#allocation150_spill] sm:$0xff] %v7132_v12  ;;  %v7274_v24 = vmov 0   ;;  %s2792_s1 = smul.u32 208, %s7172_s0  ;;  %v7275_v9 = vmov 1   ;;  %v7276_v0 = vmov 2   ;;  %s7172_s0 = sphi %s9870_s0, %s2774_s0   ;;  %v7168_v58 = vphi %v9868_v58, %v13036_v58   ;;  %v7164_v2 = vphi %v9866_v2, %v13035_v2   ;;  %v7160_v4 = vphi %v9864_v4, %v13034_v4   ;;  %v7156_v47 = vphi %v9862_v47, %v13033_v47   ;;  %v7152_v39 = vphi %v9860_v39, %v13032_v39   ;;  %v7148_v21 = vphi %v9858_v21, %v13031_v21   ;;  %v7144_v25 = vphi %v9856_v25, %v13030_v25   ;;  %v7140_v54 = vphi %v9854_v54, %v13029_v54   ;;  %v7136_v26 = vphi %v9852_v26, %v13028_v26   ;;  %v7132_v12 = vphi %v9850_v12, %v13027_v12   ;;  %v7128_v63 = vphi %v9848_v63, %v13026_v63   ;;  %v7124_v51 = vphi %v9846_v51, %v13025_v51   ;;  %v7120_v44 = vphi %v9844_v44, %v13024_v44  }
 0x4a7   : > { %12860 = vst [vmem:[#allocation151_spill] sm:$0xff] %v7140_v54  ;;  %12861 = vst [vmem:[#allocation152_spill] sm:$0xff] %v7148_v21  ;;  %6655 = vset.pattern.permute.xlu1 %v7274_v24  ;;  %6654 = vset.pattern.permute.xlu0 %v7274_v24  ;;  %v7277_v30 = vmov 3   ;;  %v7278_v31 = vmov 4   ;;  %v7279_v62 = vmov 5   ;;  %v7280_v11 = vmov 6  }
 0x4a8   : > { %12862 = vst [vmem:[#allocation153_spill] sm:$0xff] %v7156_v47  ;;  %12863 = vst [vmem:[#allocation154_spill] sm:$0xff] %v7160_v4  ;;  %s9918_s11 = scalar_lea.vmem %s12412_s2, %s2792_s1  ;;  %v7281_v15 = vmov 7   ;;  %s6009_s12 = sshll.u32 %s7172_s0, 4 }
 0x4a9   : > { %12864 = vst [vmem:[#allocation155_spill] sm:$0xff] %v7168_v58  ;;  %v9921_v1 = vld [vmem:[%s9918_s11 + $0x10] sm:$0xff]  ;;  %v9924_v36 = vld [vmem:[%s9918_s11] sm:$0xff]  ;;  %v9929_v13 = vld [vmem:[%s9918_s11 + $0x18] sm:$0xff]  ;;  %s10280_s13 = scalar_lea.vmem [#allocation2], %s6009_s12  ;;  %s2774_s0 = sadd.s32 1, %s7172_s0  }
 0x4aa   : > { %12865 = vst [vmem:[#allocation156_spill] sm:$0xff] %v9924_v36  ;;  %2819 = vperm.xlu1 %6655, %v9921_v1   ;;  %2809 = vperm.xlu0 %6654, %v9924_v36   ;;  %v9932_v43 = vld [vmem:[%s9918_s11 + $0x8] sm:$0xff]  ;;  %v9940_v17 = vld [vmem:[%s9918_s11 + $0x20] sm:$0xff]  ;;  %v9945_v40 = vld [vmem:[%s9918_s11 + $0x38] sm:$0xff]  ;;  %p11034_p2 = scmp.ge.s32.totalorder %s2774_s0, 13  }
 0x4ab   : > { %v9937_v32 = vld [vmem:[%s9918_s11 + $0x28] sm:$0xff]  ;;  %12866 = vst [vmem:[#allocation157_spill] sm:$0xff] %v9940_v17  ;;  %v9948_v61 = vld [vmem:[%s9918_s11 + $0x30] sm:$0xff]  ;;  %v9956_v19 = vld [vmem:[%s9918_s11 + $0x40] sm:$0xff]  ;;  %s11106_s15 = smov (%p11034_p2), 0  }
 0x4ac   : > { %v9953_v53 = vld [vmem:[%s9918_s11 + $0x48] sm:$0xff]  ;;  %v9961_v14 = vld [vmem:[%s9918_s11 + $0x58] sm:$0xff]  ;;  %v9964_v6 = vld [vmem:[%s9918_s11 + $0x50] sm:$0xff] }
 0x4ad   : > { %12867 = vst [vmem:[#allocation158_spill] sm:$0xff] %v9953_v53  ;;  %12868 = vst [vmem:[#allocation159_spill] sm:$0xff] %v9961_v14  ;;  %v9969_v46 = vld [vmem:[%s9918_s11 + $0x60] sm:$0xff] }
 0x4ae   : > { %2824 = vperm.xlu1 %6655, %v9929_v13   ;;  %2814 = vperm.xlu0 %6654, %v9932_v43  }
 0x4b2   : > { %2834 = vperm.xlu1 %6655, %v9937_v32   ;;  %2829 = vperm.xlu0 %6654, %v9940_v17  }
 0x4b6   : > { %2844 = vperm.xlu1 %6655, %v9945_v40   ;;  %2839 = vperm.xlu0 %6654, %v9948_v61  }
 0x4ba   : > { %2854 = vperm.xlu1 %6655, %v9953_v53   ;;  %2849 = vperm.xlu0 %6654, %v9956_v19  }
 0x4be   : > { %2864 = vperm.xlu1 %6655, %v9961_v14   ;;  %2859 = vperm.xlu0 %6654, %v9964_v6  }
 0x4c2   : > { %6656 = vset.pattern.permute.xlu1 %v7275_v9  ;;  %2869 = vperm.xlu0 %6654, %v9969_v46  }
 0x4c3   : > { %2903 = vperm.xlu1 %6656, %v9924_v36  }
 0x4c6   : > { %6657 = vset.pattern.permute.xlu0 %v7275_v9 }
 0x4c7   : > { %2911 = vperm.xlu1 %6656, %v9921_v1   ;;  %2907 = vperm.xlu0 %6657, %v9932_v43  }
 0x4cb   : > { %2915 = vperm.xlu1 %6656, %v9929_v13   ;;  %2919 = vperm.xlu0 %6657, %v9940_v17  }
 0x4cf   : > { %2923 = vperm.xlu1 %6656, %v9937_v32   ;;  %2927 = vperm.xlu0 %6657, %v9948_v61  }
 0x4d3   : > { %2931 = vperm.xlu1 %6656, %v9945_v40   ;;  %2935 = vperm.xlu0 %6657, %v9956_v19  }
 0x4d7   : > { %2939 = vperm.xlu1 %6656, %v9953_v53   ;;  %2943 = vperm.xlu0 %6657, %v9964_v6  }
 0x4db   : > { %2947 = vperm.xlu1 %6656, %v9961_v14   ;;  %2951 = vperm.xlu0 %6657, %v9969_v46  }
 0x4df   : > { %6658 = vset.pattern.permute.xlu1 %v7276_v0  ;;  %6659 = vset.pattern.permute.xlu0 %v7276_v0 }
 0x4e0   : > { %2985 = vperm.xlu1 %6658, %v9924_v36   ;;  %2989 = vperm.xlu0 %6659, %v9932_v43  }
 0x4e4   : > { %2993 = vperm.xlu1 %6658, %v9921_v1   ;;  %3001 = vperm.xlu0 %6659, %v9940_v17  }
 0x4e8   : > { %2997 = vperm.xlu1 %6658, %v9929_v13   ;;  %3009 = vperm.xlu0 %6659, %v9948_v61  }
 0x4ec   : > { %3005 = vperm.xlu1 %6658, %v9937_v32   ;;  %3017 = vperm.xlu0 %6659, %v9956_v19  }
 0x4f0   : > { %3013 = vperm.xlu1 %6658, %v9945_v40   ;;  %3025 = vperm.xlu0 %6659, %v9964_v6  }
 0x4f4   : > { %3021 = vperm.xlu1 %6658, %v9953_v53   ;;  %3033 = vperm.xlu0 %6659, %v9969_v46  }
 0x4f8   : > { %3029 = vperm.xlu1 %6658, %v9961_v14   ;;  %6661 = vset.pattern.permute.xlu0 %v7277_v30 }
 0x4f9   : > { %3071 = vperm.xlu0 %6661, %v9932_v43  }
 0x4fc   : > { %6660 = vset.pattern.permute.xlu1 %v7277_v30 }
 0x4fd   : > { %3067 = vperm.xlu1 %6660, %v9924_v36   ;;  %3083 = vperm.xlu0 %6661, %v9940_v17  }
 0x501   : > { %3075 = vperm.xlu1 %6660, %v9921_v1   ;;  %3091 = vperm.xlu0 %6661, %v9948_v61  }
 0x505   : > { %3079 = vperm.xlu1 %6660, %v9929_v13   ;;  %3099 = vperm.xlu0 %6661, %v9956_v19  }
 0x509   : > { %3087 = vperm.xlu1 %6660, %v9937_v32   ;;  %3107 = vperm.xlu0 %6661, %v9964_v6  }
 0x50d   : > { %3095 = vperm.xlu1 %6660, %v9945_v40   ;;  %3115 = vperm.xlu0 %6661, %v9969_v46  }
 0x511   : > { %3103 = vperm.xlu1 %6660, %v9953_v53   ;;  %6663 = vset.pattern.permute.xlu0 %v7278_v31 }
 0x512   : > { %3153 = vperm.xlu0 %6663, %v9932_v43  }
 0x515   : > { %3111 = vperm.xlu1 %6660, %v9961_v14  }
 0x516   : > { %3165 = vperm.xlu0 %6663, %v9940_v17  }
 0x519   : > { %6662 = vset.pattern.permute.xlu1 %v7278_v31 }
 0x51a   : > { %3149 = vperm.xlu1 %6662, %v9924_v36   ;;  %3173 = vperm.xlu0 %6663, %v9948_v61  }
 0x51e   : > { %3157 = vperm.xlu1 %6662, %v9921_v1   ;;  %3181 = vperm.xlu0 %6663, %v9956_v19  }
 0x522   : > { %3161 = vperm.xlu1 %6662, %v9929_v13   ;;  %3189 = vperm.xlu0 %6663, %v9964_v6  }
 0x526   : > { %3169 = vperm.xlu1 %6662, %v9937_v32   ;;  %3197 = vperm.xlu0 %6663, %v9969_v46  }
 0x529   : > { %v10021_v59 = vpop.permute.xlu1 %2819  ;;  %v10023_v35 = vpop.permute.xlu0 %2809 }
 0x52a   : > { %12869 = vst [vmem:[#allocation160_spill] sm:$0xff] %v10021_v59  ;;  %12870 = vst [vmem:[#allocation161_spill] sm:$0xff] %v10023_v35  ;;  %3177 = vperm.xlu1 %6662, %v9945_v40   ;;  %6665 = vset.pattern.permute.xlu0 %v7279_v62 }
 0x52b   : > { %3235 = vperm.xlu0 %6665, %v9932_v43  }
 0x52d   : > { %v10027_v38 = vpop.permute.xlu1 %2824  ;;  %v10029_v5 = vpop.permute.xlu0 %2814 }
 0x52e   : > { %12871 = vst [vmem:[#allocation162_spill] sm:$0xff] %v10027_v38  ;;  %3185 = vperm.xlu1 %6662, %v9953_v53  }
 0x52f   : > { %3247 = vperm.xlu0 %6665, %v9940_v17  }
 0x531   : > { %v10033_v23 = vpop.permute.xlu1 %2834  ;;  %v10035_v56 = vpop.permute.xlu0 %2829 }
 0x532   : > { %12872 = vst [vmem:[#allocation163_spill] sm:$0xff] %v10033_v23  ;;  %3193 = vperm.xlu1 %6662, %v9961_v14  }
 0x533   : > { %3255 = vperm.xlu0 %6665, %v9948_v61  }
 0x535   : > { %v10039_v34 = vpop.permute.xlu1 %2844  ;;  %v10041_v50 = vpop.permute.xlu0 %2839 }
 0x536   : > { %12873 = vst [vmem:[#allocation164_spill] sm:$0xff] %v10039_v34  ;;  %6664 = vset.pattern.permute.xlu1 %v7279_v62 }
 0x537   : > { %3231 = vperm.xlu1 %6664, %v9924_v36   ;;  %3263 = vperm.xlu0 %6665, %v9956_v19  }
 0x539   : > { %v10045_v57 = vpop.permute.xlu1 %2854  ;;  %v10047_v41 = vpop.permute.xlu0 %2849 }
 0x53a   : > { %12874 = vst [vmem:[#allocation165_spill] sm:$0xff] %v10045_v57 }
 0x53b   : > { %3239 = vperm.xlu1 %6664, %v9921_v1   ;;  %3271 = vperm.xlu0 %6665, %v9964_v6  }
 0x53d   : > { %v10051_v37 = vpop.permute.xlu1 %2864  ;;  %v10053_v49 = vpop.permute.xlu0 %2859 }
 0x53e   : > { %12875 = vst [vmem:[#allocation166_spill] sm:$0xff] %v10051_v37 }
 0x53f   : > { %3243 = vperm.xlu1 %6664, %v9929_v13   ;;  %3279 = vperm.xlu0 %6665, %v9969_v46  }
 0x541   : > { %v10057_v8 = vpop.permute.xlu0 %2869 }
 0x542   : > { %v10059_v3 = vpop.permute.xlu1 %2903 }
 0x543   : > { %12876 = vst [vmem:[#allocation167_spill] sm:$0xff] %v10059_v3  ;;  %3251 = vperm.xlu1 %6664, %v9937_v32   ;;  %6667 = vset.pattern.permute.xlu0 %v7280_v11 }
 0x544   : > { %3317 = vperm.xlu0 %6667, %v9932_v43  }
 0x546   : > { %v10063_v48 = vpop.permute.xlu1 %2911  ;;  %v10065_v16 = vpop.permute.xlu0 %2907 }
 0x547   : > { %12877 = vst [vmem:[#allocation168_spill] sm:$0xff] %v10063_v48  ;;  %3259 = vperm.xlu1 %6664, %v9945_v40  }
 0x548   : > { %3329 = vperm.xlu0 %6667, %v9940_v17  }
 0x54a   : > { %v10069_v52 = vpop.permute.xlu1 %2915  ;;  %v10071_v28 = vpop.permute.xlu0 %2919 }
 0x54b   : > { %12878 = vst [vmem:[#allocation169_spill] sm:$0xff] %v10069_v52  ;;  %3267 = vperm.xlu1 %6664, %v9953_v53  }
 0x54c   : > { %3337 = vperm.xlu0 %6667, %v9948_v61  }
 0x54e   : > { %v10075_v10 = vpop.permute.xlu1 %2923  ;;  %v10077_v55 = vpop.permute.xlu0 %2927 }
 0x54f   : > { %12879 = vst [vmem:[#allocation170_spill] sm:$0xff] %v10075_v10  ;;  %3275 = vperm.xlu1 %6664, %v9961_v14  }
 0x550   : > { %3345 = vperm.xlu0 %6667, %v9956_v19  }
 0x552   : > { %v10081_v22 = vpop.permute.xlu1 %2931  ;;  %v10083_v29 = vpop.permute.xlu0 %2935 }
 0x553   : > { %12880 = vst [vmem:[#allocation171_spill] sm:$0xff] %v10081_v22  ;;  %6666 = vset.pattern.permute.xlu1 %v7280_v11 }
 0x554   : > { %3313 = vperm.xlu1 %6666, %v9924_v36   ;;  %3353 = vperm.xlu0 %6667, %v9964_v6  }
 0x556   : > { %v10087_v7 = vpop.permute.xlu1 %2939  ;;  %v10089_v27 = vpop.permute.xlu0 %2943 }
 0x557   : > { %12881 = vst [vmem:[#allocation172_spill] sm:$0xff] %v10087_v7 }
 0x558   : > { %3321 = vperm.xlu1 %6666, %v9921_v1   ;;  %3361 = vperm.xlu0 %6667, %v9969_v46  }
 0x55a   : > { %v10093_v60 = vpop.permute.xlu1 %2947  ;;  %v10095_v33 = vpop.permute.xlu0 %2951 }
 0x55b   : > { %12882 = vst [vmem:[#allocation173_spill] sm:$0xff] %v10093_v60 }
 0x55c   : > { %3325 = vperm.xlu1 %6666, %v9929_v13   ;;  %6669 = vset.pattern.permute.xlu0 %v7281_v15 }
 0x55d   : > { %3399 = vperm.xlu0 %6669, %v9932_v43  }
 0x55f   : > { %v10099_v18 = vpop.permute.xlu1 %2985  ;;  %v10101_v45 = vpop.permute.xlu0 %2989 }
 0x560   : > { %12883 = vst [vmem:[#allocation174_spill] sm:$0xff] %v10099_v18  ;;  %3333 = vperm.xlu1 %6666, %v9937_v32  }
 0x561   : > { %3411 = vperm.xlu0 %6669, %v9940_v17  }
 0x563   : > { %v10105_v42 = vpop.permute.xlu1 %2993  ;;  %v10107_v24 = vpop.permute.xlu0 %3001 }
 0x564   : > { %12884 = vst [vmem:[#allocation175_spill] sm:$0xff] %v10105_v42  ;;  %3341 = vperm.xlu1 %6666, %v9945_v40  }
 0x565   : > { %3419 = vperm.xlu0 %6669, %v9948_v61  }
 0x567   : > { %v10111_v9 = vpop.permute.xlu1 %2997  ;;  %v10113_v0 = vpop.permute.xlu0 %3009 }
 0x568   : > { %12885 = vst [vmem:[#allocation176_spill] sm:$0xff] %v10111_v9  ;;  %3349 = vperm.xlu1 %6666, %v9953_v53  }
 0x569   : > { %3427 = vperm.xlu0 %6669, %v9956_v19  }
 0x56b   : > { %v10117_v30 = vpop.permute.xlu1 %3005  ;;  %v10119_v31 = vpop.permute.xlu0 %3017 }
 0x56c   : > { %12886 = vst [vmem:[#allocation177_spill] sm:$0xff] %v10117_v30  ;;  %3357 = vperm.xlu1 %6666, %v9961_v14   ;;  %v7282_v30 = vmov 8  }
 0x56d   : > { %3435 = vperm.xlu0 %6669, %v9964_v6  }
 0x56f   : > { %v10123_v62 = vpop.permute.xlu1 %3013  ;;  %v10125_v11 = vpop.permute.xlu0 %3025 }
 0x570   : > { %12887 = vst [vmem:[#allocation178_spill] sm:$0xff] %v10123_v62  ;;  %12888 = vst [vmem:[#allocation179_spill] sm:$0xff] %v10125_v11  ;;  %6668 = vset.pattern.permute.xlu1 %v7281_v15 }
 0x571   : > { %3395 = vperm.xlu1 %6668, %v9924_v36   ;;  %3443 = vperm.xlu0 %6669, %v9969_v46  }
 0x573   : > { %v10129_v9 = vpop.permute.xlu1 %3021  ;;  %v10131_v51 = vpop.permute.xlu0 %3033 }
 0x574   : > { %12889 = vst [vmem:[#allocation180_spill] sm:$0xff] %v10129_v9 }
 0x575   : > { %3403 = vperm.xlu1 %6668, %v9921_v1   ;;  %6671 = vset.pattern.permute.xlu0 %v7282_v30 }
 0x576   : > { %3481 = vperm.xlu0 %6671, %v9932_v43  }
 0x577   : > { %v10135_v42 = vpop.permute.xlu1 %3029 }
 0x578   : > { %12890 = vst [vmem:[#allocation181_spill] sm:$0xff] %v10135_v42  ;;  %v10137_v62 = vpop.permute.xlu0 %3071 }
 0x579   : > { %3407 = vperm.xlu1 %6668, %v9929_v13  }
 0x57a   : > { %3493 = vperm.xlu0 %6671, %v9940_v17  }
 0x57c   : > { %v10141_v15 = vpop.permute.xlu1 %3067  ;;  %v10143_v60 = vpop.permute.xlu0 %3083 }
 0x57d   : > { %12891 = vst [vmem:[#allocation182_spill] sm:$0xff] %v10141_v15  ;;  %3415 = vperm.xlu1 %6668, %v9937_v32  }
 0x57e   : > { %3501 = vperm.xlu0 %6671, %v9948_v61  }
 0x580   : > { %v10147_v9 = vpop.permute.xlu1 %3075  ;;  %v10149_v7 = vpop.permute.xlu0 %3091 }
 0x581   : > { %12892 = vst [vmem:[#allocation183_spill] sm:$0xff] %v10147_v9  ;;  %3423 = vperm.xlu1 %6668, %v9945_v40  }
 0x582   : > { %3509 = vperm.xlu0 %6671, %v9956_v19  }
 0x584   : > { %v10153_v42 = vpop.permute.xlu1 %3079  ;;  %v10155_v12 = vpop.permute.xlu0 %3099 }
 0x585   : > { %12893 = vst [vmem:[#allocation184_spill] sm:$0xff] %v10153_v42  ;;  %3431 = vperm.xlu1 %6668, %v9953_v53   ;;  %v7283_v42 = vmov 9  }
 0x586   : > { %3517 = vperm.xlu0 %6671, %v9964_v6  }
 0x588   : > { %v10159_v15 = vpop.permute.xlu1 %3087  ;;  %v10161_v18 = vpop.permute.xlu0 %3107 }
 0x589   : > { %12894 = vst [vmem:[#allocation185_spill] sm:$0xff] %v10159_v15  ;;  %12895 = vst [vmem:[#allocation186_spill] sm:$0xff] %v10161_v18  ;;  %3439 = vperm.xlu1 %6668, %v9961_v14  }
 0x58a   : > { %3525 = vperm.xlu0 %6671, %v9969_v46  }
 0x58c   : > { %v10165_v9 = vpop.permute.xlu1 %3095  ;;  %v10167_v22 = vpop.permute.xlu0 %3115 }
 0x58d   : > { %12896 = vst [vmem:[#allocation187_spill] sm:$0xff] %v10165_v9  ;;  %6670 = vset.pattern.permute.xlu1 %v7282_v30 }
 0x58e   : > { %3477 = vperm.xlu1 %6670, %v9924_v36   ;;  %6673 = vset.pattern.permute.xlu0 %v7283_v42 }
 0x58f   : > { %3563 = vperm.xlu0 %6673, %v9932_v43  }
 0x590   : > { %v10171_v54 = vpop.permute.xlu1 %3103 }
 0x591   : > { %12897 = vst [vmem:[#allocation188_spill] sm:$0xff] %v10171_v54  ;;  %v10173_v15 = vpop.permute.xlu0 %3153 }
 0x592   : > { %3485 = vperm.xlu1 %6670, %v9921_v1  }
 0x593   : > { %3575 = vperm.xlu0 %6673, %v9940_v17  }
 0x594   : > { %v10177_v10 = vpop.permute.xlu1 %3111 }
 0x595   : > { %12898 = vst [vmem:[#allocation189_spill] sm:$0xff] %v10177_v10  ;;  %v10179_v9 = vpop.permute.xlu0 %3165 }
 0x596   : > { %3489 = vperm.xlu1 %6670, %v9929_v13  }
 0x597   : > { %3583 = vperm.xlu0 %6673, %v9948_v61  }
 0x599   : > { %v10183_v30 = vpop.permute.xlu1 %3149  ;;  %v10185_v52 = vpop.permute.xlu0 %3173 }
 0x59a   : > { %12899 = vst [vmem:[#allocation190_spill] sm:$0xff] %v10183_v30  ;;  %3497 = vperm.xlu1 %6670, %v9937_v32  }
 0x59b   : > { %3591 = vperm.xlu0 %6673, %v9956_v19  }
 0x59d   : > { %v10189_v54 = vpop.permute.xlu1 %3157  ;;  %v10191_v48 = vpop.permute.xlu0 %3181 }
 0x59e   : > { %12900 = vst [vmem:[#allocation191_spill] sm:$0xff] %v10189_v54  ;;  %12901 = vst [vmem:[#allocation192_spill] sm:$0xff] %v10191_v48  ;;  %3505 = vperm.xlu1 %6670, %v9945_v40   ;;  %v7284_v54 = vmov 10  }
 0x59f   : > { %3599 = vperm.xlu0 %6673, %v9964_v6  }
 0x5a1   : > { %v10195_v10 = vpop.permute.xlu1 %3161  ;;  %v10197_v21 = vpop.permute.xlu0 %3189 }
 0x5a2   : > { %12902 = vst [vmem:[#allocation193_spill] sm:$0xff] %v10195_v10  ;;  %12903 = vst [vmem:[#allocation194_spill] sm:$0xff] %v10197_v21  ;;  %3513 = vperm.xlu1 %6670, %v9953_v53  }
 0x5a3   : > { %3607 = vperm.xlu0 %6673, %v9969_v46  }
 0x5a5   : > { %v10201_v30 = vpop.permute.xlu1 %3169  ;;  %v10203_v3 = vpop.permute.xlu0 %3197 }
 0x5a6   : > { %12904 = vst [vmem:[#allocation195_spill] sm:$0xff] %v10201_v30  ;;  %3521 = vperm.xlu1 %6670, %v9961_v14  }
 0x5a7   : > { %6675 = vset.pattern.permute.xlu0 %v7284_v54 }
 0x5a8   : > { %3645 = vperm.xlu0 %6675, %v9932_v43  }
 0x5a9   : > { %v10207_v37 = vpop.permute.xlu1 %3177 }
 0x5aa   : > { %12905 = vst [vmem:[#allocation196_spill] sm:$0xff] %v10207_v37  ;;  %6672 = vset.pattern.permute.xlu1 %v7283_v42  ;;  %v10209_v10 = vpop.permute.xlu0 %3235 }
 0x5ab   : > { %3559 = vperm.xlu1 %6672, %v9924_v36  }
 0x5ac   : > { %3657 = vperm.xlu0 %6675, %v9940_v17  }
 0x5ad   : > { %v10213_v47 = vpop.permute.xlu1 %3185 }
 0x5ae   : > { %12906 = vst [vmem:[#allocation197_spill] sm:$0xff] %v10213_v47  ;;  %v10215_v30 = vpop.permute.xlu0 %3247 }
 0x5af   : > { %3567 = vperm.xlu1 %6672, %v9921_v1  }
 0x5b0   : > { %3665 = vperm.xlu0 %6675, %v9948_v61  }
 0x5b1   : > { %v10219_v57 = vpop.permute.xlu1 %3193 }
 0x5b2   : > { %12907 = vst [vmem:[#allocation198_spill] sm:$0xff] %v10219_v57  ;;  %v10221_v58 = vpop.permute.xlu0 %3255 }
 0x5b3   : > { %3571 = vperm.xlu1 %6672, %v9929_v13  }
 0x5b4   : > { %3673 = vperm.xlu0 %6675, %v9956_v19  }
 0x5b6   : > { %v10225_v42 = vpop.permute.xlu1 %3231  ;;  %v10227_v37 = vpop.permute.xlu0 %3263 }
 0x5b7   : > { %12908 = vst [vmem:[#allocation199_spill] sm:$0xff] %v10225_v42  ;;  %12909 = vst [vmem:[#allocation200_spill] sm:$0xff] %v10227_v37  ;;  %3579 = vperm.xlu1 %6672, %v9937_v32   ;;  %v7285_v42 = vmov 11  }
 0x5b8   : > { %3681 = vperm.xlu0 %6675, %v9964_v6  }
 0x5ba   : > { %v10231_v47 = vpop.permute.xlu1 %3239  ;;  %v10233_v4 = vpop.permute.xlu0 %3271 }
 0x5bb   : > { %12910 = vst [vmem:[#allocation201_spill] sm:$0xff] %v10231_v47  ;;  %12911 = vst [vmem:[#allocation202_spill] sm:$0xff] %v10233_v4  ;;  %3587 = vperm.xlu1 %6672, %v9945_v40  }
 0x5bc   : > { %3689 = vperm.xlu0 %6675, %v9969_v46  }
 0x5be   : > { %v10237_v57 = vpop.permute.xlu1 %3243  ;;  %v10239_v34 = vpop.permute.xlu0 %3279 }
 0x5bf   : > { %12912 = vst [vmem:[#allocation203_spill] sm:$0xff] %v10237_v57  ;;  %3595 = vperm.xlu1 %6672, %v9953_v53  }
 0x5c0   : > { %6677 = vset.pattern.permute.xlu0 %v7285_v42 }
 0x5c1   : > { %3727 = vperm.xlu0 %6677, %v9932_v43  }
 0x5c2   : > { %v10243_v23 = vpop.permute.xlu1 %3251 }
 0x5c3   : > { %12913 = vst [vmem:[#allocation204_spill] sm:$0xff] %v10243_v23  ;;  %3603 = vperm.xlu1 %6672, %v9961_v14   ;;  %v10246_v47 = vpop.permute.xlu0 %3317 }
 0x5c5   : > { %3739 = vperm.xlu0 %6677, %v9940_v17  }
 0x5c6   : > { %v10249_v38 = vpop.permute.xlu1 %3259 }
 0x5c7   : > { %12914 = vst [vmem:[#allocation205_spill] sm:$0xff] %v10249_v38  ;;  %6674 = vset.pattern.permute.xlu1 %v7284_v54  ;;  %v10251_v57 = vpop.permute.xlu0 %3329 }
 0x5c8   : > { %3641 = vperm.xlu1 %6674, %v9924_v36  }
 0x5c9   : > { %3747 = vperm.xlu0 %6677, %v9948_v61  }
 0x5ca   : > { %v10255_v35 = vpop.permute.xlu1 %3267 }
 0x5cb   : > { %12915 = vst [vmem:[#allocation206_spill] sm:$0xff] %v10255_v35  ;;  %v10257_v59 = vpop.permute.xlu0 %3337 }
 0x5cc   : > { %12916 = vst [vmem:[#allocation207_spill] sm:$0xff] %v10257_v59  ;;  %3649 = vperm.xlu1 %6674, %v9921_v1  }
 0x5cd   : > { %3755 = vperm.xlu0 %6677, %v9956_v19  }
 0x5ce   : > { %v10261_v23 = vpop.permute.xlu1 %3275 }
 0x5cf   : > { %12917 = vst [vmem:[#allocation208_spill] sm:$0xff] %v10261_v23  ;;  %v10263_v4 = vpop.permute.xlu0 %3345  ;;  %v12473_v23 = vmov 12  }
 0x5d0   : > { %12918 = vst [vmem:[#allocation209_spill] sm:$0xff] %v10263_v4  ;;  %3653 = vperm.xlu1 %6674, %v9929_v13  }
 0x5d1   : > { %3763 = vperm.xlu0 %6677, %v9964_v6  }
 0x5d3   : > { %v10267_v54 = vpop.permute.xlu1 %3313  ;;  %v10269_v38 = vpop.permute.xlu0 %3353 }
 0x5d4   : > { %12919 = vst [vmem:[#allocation210_spill] sm:$0xff] %v10267_v54  ;;  %12920 = vst [vmem:[#allocation211_spill] sm:$0xff] %v10269_v38  ;;  %3661 = vperm.xlu1 %6674, %v9937_v32   ;;  %v10283_v54 = vld [vmem:[%s10280_s13] sm:$0xff] }
 0x5d5   : > { %3771 = vperm.xlu0 %6677, %v9969_v46  }
 0x5d7   : > { %v10274_v35 = vpop.permute.xlu1 %3321  ;;  %v10276_v21 = vpop.permute.xlu0 %3361 }
 0x5d8   : > { %12921 = vst [vmem:[#allocation212_spill] sm:$0xff] %v10274_v35  ;;  %3669 = vperm.xlu1 %6674, %v9945_v40   ;;  %v12923_v35 = vld [vmem:[#allocation69_spill] sm:$0xff] }
 0x5d9   : > { %6679 = vset.pattern.permute.xlu0 %v12473_v23  ;;  %v10293_v37 = vrot.slane %v10283_v54, %v12923_v35 }
 0x5da   : > { %3809 = vperm.xlu0 %6679, %v9932_v43  }
 0x5db   : > { %v10286_v38 = vpop.permute.xlu1 %3325  ;;  %v2888_v23 = vadd.f32 %v10293_v37, %v10057_v8  ;;  %v2877_v59 = vadd.f32 %v10293_v37, %v10029_v5  ;;  %v2880_v11 = vadd.f32 %v10293_v37, %v10035_v56 }
 0x5dc   : > { %12922 = vst [vmem:[#allocation213_spill] sm:$0xff] %v10286_v38  ;;  %3677 = vperm.xlu1 %6674, %v9953_v53   ;;  %v10289_v4 = vpop.permute.xlu0 %3399  ;;  %v12926_v53 = vld [vmem:[#allocation71_spill] sm:$0xff] }
 0x5dd   : > { %v10307_v48 = vrot.slane %v10283_v54, %v12926_v53  ;;  %v2901_v8 = vmax.f32 %v7120_v44, %v2888_v23  ;;  %v2882_v44 = vadd.f32 %v10293_v37, %v10041_v50 }
 0x5de   : > { %3821 = vperm.xlu0 %6679, %v9940_v17   ;;  %v12927_v17 = vld [vmem:[#allocation72_spill] sm:$0xff] }
 0x5df   : > { %v10298_v18 = vpop.permute.xlu1 %3333  ;;  %v10317_v5 = vrot.slane %v10283_v54, %v12927_v17  ;;  %v2959_v53 = vadd.f32 %v10307_v48, %v10065_v16 }
 0x5e0   : > { %12924 = vst [vmem:[#allocation214_spill] sm:$0xff] %v10298_v18  ;;  %3685 = vperm.xlu1 %6674, %v9961_v14   ;;  %v10303_v38 = vpop.permute.xlu0 %3411  ;;  %v2970_v18 = vadd.f32 %v10307_v48, %v10095_v33  ;;  %v12929_v33 = vld [vmem:[#allocation75_spill] sm:$0xff] }
 0x5e1   : > { %12925 = vst [vmem:[#allocation215_spill] sm:$0xff] %v10303_v38  ;;  %v2890_v38 = vmax.f32 %v7164_v2, %v2877_v59  ;;  %v3052_v23 = vadd.f32 %v10317_v5, %v10131_v51  ;;  %v10332_v17 = vrot.slane %v10283_v54, %v12929_v33  ;;  %v2893_v2 = vmax.f32 %v7152_v39, %v2880_v11 }
 0x5e2   : > { %3829 = vperm.xlu0 %6679, %v9948_v61   ;;  %v2962_v59 = vadd.f32 %v10307_v48, %v10071_v28  ;;  %v2983_v16 = vmax.f32 %v2901_v8, %v2970_v18  ;;  %v2884_v33 = vadd.f32 %v10293_v37, %v10047_v41  ;;  %v3041_v39 = vadd.f32 %v10317_v5, %v10101_v45 }
 0x5e3   : > { %v10319_v14 = vpop.permute.xlu1 %3341  ;;  %v3134_v50 = vadd.f32 %v10332_v17, %v10167_v22  ;;  %v10353_v28 = vrot.slane %v10283_v54, %v7840_v20  ;;  %v2895_v22 = vmax.f32 %v7144_v25, %v2882_v44  ;;  %v2964_v11 = vadd.f32 %v10307_v48, %v10077_v55  ;;  %v12931_v55 = vld [vmem:[#allocation78_spill] sm:$0xff] }
 0x5e4   : > { %12928 = vst [vmem:[#allocation216_spill] sm:$0xff] %v10319_v14  ;;  %6676 = vset.pattern.permute.xlu1 %v7285_v42  ;;  %v10324_v56 = vpop.permute.xlu0 %3419  ;;  %v12930_v42 = vld [vmem:[#allocation76_spill] sm:$0xff]  ;;  %v3065_v8 = vmax.f32 %v2983_v16, %v3052_v23  ;;  %v3123_v41 = vadd.f32 %v10332_v17, %v10137_v62  ;;  %v10372_v44 = vrot.slane %v10283_v54, %v12931_v55 }
 0x5e5   : > { %3723 = vperm.xlu1 %6676, %v9924_v36   ;;  %v10343_v51 = vrot.slane %v10283_v54, %v12930_v42  ;;  %v2972_v36 = vmax.f32 %v2890_v38, %v2959_v53  ;;  %v2975_v53 = vmax.f32 %v2893_v2, %v2962_v59  ;;  %v3044_v38 = vadd.f32 %v10317_v5, %v10107_v24 }
 0x5e6   : > { %3837 = vperm.xlu0 %6679, %v9956_v19   ;;  %v3147_v45 = vmax.f32 %v3065_v8, %v3134_v50  ;;  %v3298_v25 = vadd.f32 %v10353_v28, %v10239_v34  ;;  %v2897_v23 = vmax.f32 %v7136_v26, %v2884_v33  ;;  %v3126_v24 = vadd.f32 %v10332_v17, %v10143_v60  ;;  %v12932_v33 = vld [vmem:[#allocation80_spill] sm:$0xff] }
 0x5e7   : > { %v10345_v14 = vpop.permute.xlu1 %3349  ;;  %v3216_v42 = vadd.f32 %v10343_v51, %v10203_v3  ;;  %v3054_v2 = vmax.f32 %v2972_v36, %v3041_v39  ;;  %v3205_v62 = vadd.f32 %v10343_v51, %v10173_v15  ;;  %v2886_v34 = vadd.f32 %v10293_v37, %v10053_v49  ;;  %v10400_v39 = vld [vmem:[%s10280_s13 + $0x8] sm:$0xff] }
 0x5e8   : > { %v10355_v18 = vpop.permute.xlu0 %3427  ;;  %v2977_v16 = vmax.f32 %v2895_v22, %v2964_v11  ;;  %v3380_v8 = vadd.f32 %v10372_v44, %v10276_v21  ;;  %v3057_v26 = vmax.f32 %v2975_v53, %v3044_v38  ;;  %v3287_v60 = vadd.f32 %v10353_v28, %v10209_v10 }
 0x5e9   : > { %3731 = vperm.xlu1 %6676, %v9921_v1   ;;  %v3229_v50 = vmax.f32 %v3147_v45, %v3216_v42  ;;  %v3136_v36 = vmax.f32 %v3054_v2, %v3123_v41  ;;  %v10392_v15 = vrot.slane %v10283_v54, %v12932_v33  ;;  %v3046_v49 = vadd.f32 %v10317_v5, %v10113_v0  ;;  %v12989_v33 = vld [vmem:[#allocation193_spill] sm:$0xff] }
 0x5ea   : > { %3845 = vperm.xlu0 %6679, %v9964_v6   ;;  %v3208_v42 = vadd.f32 %v10343_v51, %v10179_v9  ;;  %v2966_v22 = vadd.f32 %v10307_v48, %v10083_v29  ;;  %v3139_v11 = vmax.f32 %v3057_v26, %v3126_v24  ;;  %v3369_v54 = vadd.f32 %v10372_v44, %v10246_v47 }
 0x5eb   : > { %v10374_v3 = vpop.permute.xlu1 %3357  ;;  %v3311_v21 = vmax.f32 %v3229_v50, %v3298_v25  ;;  %v3218_v10 = vmax.f32 %v3136_v36, %v3205_v62  ;;  %v3128_v0 = vadd.f32 %v10332_v17, %v10149_v7  ;;  %v3290_v9 = vadd.f32 %v10353_v28, %v10215_v30 }
 0x5ec   : > { %v10381_v59 = vpop.permute.xlu0 %3435  ;;  %v2899_v29 = vmax.f32 %v7128_v63, %v2886_v34  ;;  %v3451_v47 = vadd.f32 %v10392_v15, %v10289_v4  ;;  %v12482_v2 = vmov 13   ;;  %v10420_v7 = vrot.slane %v10400_v39, %v12923_v35 }
 0x5ed   : > { %3735 = vperm.xlu1 %6676, %v9929_v13   ;;  %v3393_v41 = vmax.f32 %v3311_v21, %v3380_v8  ;;  %v3300_v25 = vmax.f32 %v3218_v10, %v3287_v60  ;;  %v3059_v24 = vmax.f32 %v2977_v16, %v3046_v49  ;;  %v3048_v30 = vadd.f32 %v10317_v5, %v10119_v31  ;;  %v12933_v49 = vld [vmem:[#allocation215_spill] sm:$0xff]  ;;  %v12936_v10 = vld [vmem:[#allocation157_spill] sm:$0xff] }
 0x5ee   : > { %3853 = vperm.xlu0 %6679, %v9969_v46   ;;  %v3221_v62 = vmax.f32 %v3139_v11, %v3208_v42  ;;  %v2979_v63 = vmax.f32 %v2897_v23, %v2966_v22  ;;  %v3210_v4 = vadd.f32 %v10343_v51, %v10185_v52  ;;  %v3372_v8 = vadd.f32 %v10372_v44, %v10251_v57  ;;  %v12934_v21 = vld [vmem:[#allocation179_spill] sm:$0xff] }
 0x5ef   : > { %v3382_v34 = vmax.f32 %v3300_v25, %v3369_v54  ;;  %v2968_v35 = vadd.f32 %v10307_v48, %v10089_v27  ;;  %v3141_v16 = vmax.f32 %v3059_v24, %v3128_v0  ;;  %v3130_v31 = vadd.f32 %v10332_v17, %v10155_v12  ;;  %v12935_v12 = vld [vmem:[#allocation192_spill] sm:$0xff] }
 0x5f0   : > { %v10406_v53 = vpop.permute.xlu1 %3395  ;;  %v3444_v38 = vpop.permute.xlu0 %3443  ;;  %v3303_v36 = vmax.f32 %v3221_v62, %v3290_v9  ;;  %v3292_v52 = vadd.f32 %v10353_v28, %v10221_v58  ;;  %v3454_v57 = vadd.f32 %v10392_v15, %v12933_v49  ;;  %v3061_v27 = vmax.f32 %v2979_v63, %v3048_v30  ;;  %v12937_v58 = vld [vmem:[#allocation207_spill] sm:$0xff]  ;;  %v12939_v30 = vld [vmem:[#allocation200_spill] sm:$0xff]  ;;  %v12940_v63 = vld [vmem:[#allocation158_spill] sm:$0xff] }
 0x5f1   : > { %v3462_v45 = vadd.f32 %v10392_v15, %v3444_v38  ;;  %3743 = vperm.xlu1 %6676, %v9937_v32   ;;  %v10440_v60 = vmax.f32 %v3382_v34, %v3451_v47  ;;  %v3050_v22 = vadd.f32 %v10317_v5, %v12934_v21  ;;  %v3212_v11 = vadd.f32 %v10343_v51, %v12935_v12  ;;  %v12938_v47 = vld [vmem:[#allocation186_spill] sm:$0xff] }
 0x5f2   : > { %6681 = vset.pattern.permute.xlu0 %v12482_v2  ;;  %v3223_v54 = vmax.f32 %v3141_v16, %v3210_v4  ;;  %v3385_v38 = vmax.f32 %v3303_v36, %v3372_v8  ;;  %v3374_v0 = vadd.f32 %v10372_v44, %v12937_v58  ;;  %v3143_v25 = vmax.f32 %v3061_v27, %v3130_v31  ;;  %v12941_v31 = vld [vmem:[#allocation194_spill] sm:$0xff]  ;;  %v12942_v27 = vld [vmem:[#allocation209_spill] sm:$0xff] }
 0x5f3   : > { %v10424_v50 = vmax.f32 %v3393_v41, %v3462_v45  ;;  %3891 = vperm.xlu0 %6681, %v9932_v43   ;;  %v2981_v45 = vmax.f32 %v2899_v29, %v2968_v35  ;;  %v3132_v24 = vadd.f32 %v10332_v17, %v12938_v47  ;;  %v3294_v62 = vadd.f32 %v10353_v28, %v12939_v30  ;;  %v12945_v30 = vld [vmem:[#allocation211_spill] sm:$0xff] }
 0x5f4   : > { %v10431_v26 = vpop.permute.xlu1 %3403  ;;  %v3305_v34 = vmax.f32 %v3223_v54, %v3292_v52  ;;  %v10463_v8 = vmax.f32 %v3385_v38, %v3454_v57  ;;  %v3456_v16 = vadd.f32 %v10392_v15, %v10324_v56  ;;  %v3225_v35 = vmax.f32 %v3143_v25, %v3212_v11  ;;  %v12943_v54 = vld [vmem:[#allocation159_spill] sm:$0xff]  ;;  %v12944_v11 = vld [vmem:[#allocation202_spill] sm:$0xff] }
 0x5f5   : > { %3751 = vperm.xlu1 %6676, %v9945_v40   ;;  %v3482_v23 = vpop.permute.xlu0 %3481  ;;  %v3063_v29 = vmax.f32 %v2981_v45, %v3050_v22  ;;  %v3376_v21 = vadd.f32 %v10372_v44, %v12942_v27  ;;  %v3296_v38 = vadd.f32 %v10353_v28, %v12944_v11 }
 0x5f6   : > { %v10445_v42 = vadd.f32 %v10420_v7, %v3482_v23  ;;  %v3214_v23 = vadd.f32 %v10343_v51, %v12941_v31  ;;  %v3387_v49 = vmax.f32 %v3305_v34, %v3374_v0  ;;  %v3307_v12 = vmax.f32 %v3225_v35, %v3294_v62  ;;  %v12947_v35 = vld [vmem:[#allocation156_spill] sm:$0xff] }
 0x5f7   : > { %3903 = vperm.xlu0 %6681, %v12936_v10   ;;  %v3145_v56 = vmax.f32 %v3063_v29, %v3132_v24  ;;  %v3458_v0 = vadd.f32 %v10392_v15, %v10355_v18  ;;  %v3378_v24 = vadd.f32 %v10372_v44, %v12945_v30  ;;  %v12946_v34 = vmov 12  }
 0x5f8   : > { %v3546_v9 = vmax.f32 %v10440_v60, %v10445_v42  ;;  %v10456_v41 = vpop.permute.xlu1 %3407  ;;  %v10482_v58 = vmax.f32 %v3387_v49, %v3456_v16  ;;  %v3389_v47 = vmax.f32 %v3307_v12, %v3376_v21  ;;  %v3460_v18 = vadd.f32 %v10392_v15, %v10381_v59  ;;  %v12969_v59 = vld [vmem:[#allocation173_spill] sm:$0xff] }
 0x5f9   : > { %3759 = vperm.xlu1 %6676, %v12940_v63   ;;  %v3494_v4 = vpop.permute.xlu0 %3493  ;;  %v3227_v25 = vmax.f32 %v3145_v56, %v3214_v23 }
 0x5fa   : > { %v10468_v36 = vadd.f32 %v10420_v7, %v3494_v4 }
 0x5fb   : > { %3911 = vperm.xlu0 %6681, %v9948_v61   ;;  %v3309_v16 = vmax.f32 %v3227_v25, %v3296_v38  ;;  %v12481_v38 = vmov 14  }
 0x5fc   : > { %v3549_v52 = vmax.f32 %v10463_v8, %v10468_v36  ;;  %v10477_v57 = vpop.permute.xlu1 %3415  ;;  %v10494_v36 = vmax.f32 %v3389_v47, %v3458_v0 }
 0x5fd   : > { %3767 = vperm.xlu1 %6676, %v12943_v54   ;;  %v3502_v22 = vpop.permute.xlu0 %3501  ;;  %v3391_v31 = vmax.f32 %v3309_v16, %v3378_v24  ;;  %v12949_v24 = vld [vmem:[#allocation160_spill] sm:$0xff]  ;;  %v12952_v16 = vld [vmem:[#allocation163_spill] sm:$0xff] }
 0x5fe   : > { %v3538_v45 = vadd.f32 %v10420_v7, %v3502_v22 }
 0x5ff   : > { %3919 = vperm.xlu0 %6681, %v9956_v19   ;;  %v10507_v21 = vmax.f32 %v3391_v31, %v3460_v18 }
 0x600   : > { %v3551_v62 = vmax.f32 %v10482_v58, %v3538_v45  ;;  %v10491_v4 = vpop.permute.xlu1 %3423  ;;  %v12948_v58 = vld [vmem:[#allocation71_spill] sm:$0xff] }
 0x601   : > { %6678 = vset.pattern.permute.xlu1 %v12946_v34  ;;  %v3510_v8 = vpop.permute.xlu0 %3509  ;;  %v10525_v0 = vrot.slane %v10400_v39, %v12948_v58  ;;  %v12950_v34 = vld [vmem:[#allocation161_spill] sm:$0xff]  ;;  %v12955_v58 = vld [vmem:[#allocation155_spill] sm:$0xff] }
 0x602   : > { %v10499_v29 = vadd.f32 %v10420_v7, %v3510_v8  ;;  %3805 = vperm.xlu1 %6678, %v12947_v35   ;;  %v2876_v8 = vadd.f32 %v10293_v37, %v12950_v34  ;;  %v12953_v35 = vld [vmem:[#allocation164_spill] sm:$0xff]  ;;  %v12959_v34 = vld [vmem:[#allocation167_spill] sm:$0xff] }
 0x603   : > { %3927 = vperm.xlu0 %6681, %v9964_v6   ;;  %v2883_v31 = vadd.f32 %v10293_v37, %v12953_v35 }
 0x604   : > { %v3553_v23 = vmax.f32 %v10494_v36, %v10499_v29  ;;  %v10505_v49 = vpop.permute.xlu1 %3431 }
 0x605   : > { %v3518_v27 = vpop.permute.xlu0 %3517 }
 0x606   : > { %v10510_v56 = vadd.f32 %v10420_v7, %v3518_v27  ;;  %3813 = vperm.xlu1 %6678, %v9921_v1   ;;  %v12968_v1 = vld [vmem:[#allocation172_spill] sm:$0xff] }
 0x607   : > { %3935 = vperm.xlu0 %6681, %v9969_v46  }
 0x608   : > { %v10516_v12 = vpop.permute.xlu1 %3439 }
 0x609   : > { %v3526_v22 = vpop.permute.xlu0 %3525 }
 0x60a   : > { %v10519_v11 = vadd.f32 %v10420_v7, %v3526_v22  ;;  %3817 = vperm.xlu1 %6678, %v9929_v13   ;;  %v12954_v22 = vld [vmem:[#allocation154_spill] sm:$0xff] }
 0x60b   : > { %6683 = vset.pattern.permute.xlu0 %v12481_v38 }
 0x60c   : > { %3973 = vperm.xlu0 %6683, %v9932_v43  }
 0x60d   : > { %v10530_v46 = vpop.permute.xlu1 %3477 }
 0x60e   : > { %3825 = vperm.xlu1 %6678, %v9937_v32   ;;  %v3564_v45 = vpop.permute.xlu0 %3563  ;;  %v2878_v32 = vadd.f32 %v10293_v37, %v12949_v24  ;;  %v12958_v24 = vld [vmem:[#allocation166_spill] sm:$0xff] }
 0x60f   : > { %v3615_v25 = vadd.f32 %v10525_v0, %v3564_v45  ;;  %v2889_v45 = vmax.f32 %v12955_v58, %v2876_v8  ;;  %v12961_v8 = vld [vmem:[#allocation168_spill] sm:$0xff]  ;;  %v12962_v58 = vld [vmem:[#allocation169_spill] sm:$0xff] }
 0x610   : > { %3985 = vperm.xlu0 %6683, %v12936_v10   ;;  %v12951_v10 = vld [vmem:[#allocation162_spill] sm:$0xff] }
 0x611   : > { %v10538_v13 = vmax.f32 %v3546_v9, %v3615_v25  ;;  %v10540_v47 = vpop.permute.xlu1 %3485  ;;  %v2879_v60 = vadd.f32 %v10293_v37, %v12951_v10  ;;  %v12956_v25 = vld [vmem:[#allocation165_spill] sm:$0xff]  ;;  %v2958_v10 = vadd.f32 %v10307_v48, %v12959_v34  ;;  %v12966_v34 = vld [vmem:[#allocation174_spill] sm:$0xff] }
 0x612   : > { %3833 = vperm.xlu1 %6678, %v9945_v40   ;;  %v3576_v30 = vpop.permute.xlu0 %3575  ;;  %v2881_v40 = vadd.f32 %v10293_v37, %v12952_v16 }
 0x613   : > { %v3618_v43 = vadd.f32 %v10525_v0, %v3576_v30  ;;  %v12957_v30 = vld [vmem:[#allocation153_spill] sm:$0xff] }
 0x614   : > { %3993 = vperm.xlu0 %6683, %v9948_v61   ;;  %v2891_v61 = vmax.f32 %v12954_v22, %v2878_v32  ;;  %v12960_v32 = vld [vmem:[#allocation152_spill] sm:$0xff]  ;;  %v2960_v22 = vadd.f32 %v10307_v48, %v12961_v8  ;;  %v12967_v8 = vld [vmem:[#allocation150_spill] sm:$0xff] }
 0x615   : > { %v10551_v42 = vmax.f32 %v3549_v52, %v3618_v43  ;;  %v10553_v9 = vpop.permute.xlu1 %3489  ;;  %v2885_v52 = vadd.f32 %v10293_v37, %v12956_v25  ;;  %v2892_v43 = vmax.f32 %v12957_v30, %v2879_v60  ;;  %v2894_v35 = vmax.f32 %v12960_v32, %v2881_v40  ;;  %v12963_v25 = vld [vmem:[#allocation170_spill] sm:$0xff]  ;;  %v12964_v30 = vld [vmem:[#allocation151_spill] sm:$0xff] }
 0x616   : > { %3841 = vperm.xlu1 %6678, %v12940_v63   ;;  %v3584_v18 = vpop.permute.xlu0 %3583  ;;  %v2887_v63 = vadd.f32 %v10293_v37, %v12958_v24  ;;  %v2963_v60 = vadd.f32 %v10307_v48, %v12963_v25  ;;  %v2896_v24 = vmax.f32 %v12964_v30, %v2883_v31  ;;  %v3040_v40 = vadd.f32 %v10317_v5, %v12966_v34  ;;  %v12971_v31 = vld [vmem:[#allocation149_spill] sm:$0xff]  ;;  %v12972_v34 = vld [vmem:[#allocation182_spill] sm:$0xff] }
 0x617   : > { %v3620_v27 = vadd.f32 %v10525_v0, %v3584_v18  ;;  %v2898_v38 = vmax.f32 %v12967_v8, %v2885_v52  ;;  %v2969_v25 = vadd.f32 %v10307_v48, %v12969_v59 }
 0x618   : > { %4001 = vperm.xlu0 %6683, %v9956_v19   ;;  %v2961_v19 = vadd.f32 %v10307_v48, %v12962_v58  ;;  %v2967_v58 = vadd.f32 %v10307_v48, %v12968_v1  ;;  %v2900_v30 = vmax.f32 %v12971_v31, %v2887_v63  ;;  %v10607_v8 = vmax.f32 %v2894_v35, %v2963_v60  ;;  %v10628_v60 = vld [vmem:[%s9918_s11 + $0x60] sm:$0xff] }
 0x619   : > { %v10571_v16 = vmax.f32 %v3551_v62, %v3620_v27  ;;  %v10573_v18 = vpop.permute.xlu1 %3497  ;;  %v12965_v62 = vld [vmem:[#allocation171_spill] sm:$0xff]  ;;  %v12974_v63 = vmov 13  }
 0x61a   : > { %3849 = vperm.xlu1 %6678, %v12943_v54   ;;  %v3592_v37 = vpop.permute.xlu0 %3591  ;;  %v2965_v27 = vadd.f32 %v10307_v48, %v12965_v62  ;;  %v12970_v54 = vld [vmem:[#allocation175_spill] sm:$0xff]  ;;  %v2971_v62 = vmax.f32 %v2889_v45, %v2958_v10  ;;  %v2973_v48 = vmax.f32 %v2891_v61, %v2960_v22  ;;  %v2974_v59 = vmax.f32 %v2892_v43, %v2961_v19 }
 0x61b   : > { %v3622_v32 = vadd.f32 %v10525_v0, %v3592_v37  ;;  %v3042_v2 = vadd.f32 %v10317_v5, %v12970_v54  ;;  %v3122_v37 = vadd.f32 %v10332_v17, %v12972_v34  ;;  %v12975_v34 = vld [vmem:[#allocation190_spill] sm:$0xff]  ;;  %v10621_v61 = vmax.f32 %v2898_v38, %v2967_v58  ;;  %v12976_v22 = vld [vmem:[#allocation183_spill] sm:$0xff] }
 0x61c   : > { %4009 = vperm.xlu0 %6683, %v9964_v6   ;;  %v12973_v6 = vld [vmem:[#allocation176_spill] sm:$0xff]  ;;  %v10612_v10 = vmax.f32 %v2896_v24, %v2965_v27  ;;  %v3053_v31 = vmax.f32 %v2971_v62, %v3040_v40  ;;  %v3204_v36 = vadd.f32 %v10343_v51, %v12975_v34  ;;  %v10623_v43 = vmax.f32 %v2900_v30, %v2969_v25  ;;  %v12977_v27 = vld [vmem:[#allocation199_spill] sm:$0xff]  ;;  %v12979_v25 = vld [vmem:[#allocation177_spill] sm:$0xff] }
 0x61d   : > { %v10603_v52 = vmax.f32 %v3553_v23, %v3622_v32  ;;  %v10605_v1 = vpop.permute.xlu1 %3505  ;;  %v3043_v54 = vadd.f32 %v10317_v5, %v12973_v6  ;;  %v10618_v23 = vld [vmem:[%s9918_s11] sm:$0xff]  ;;  %v3055_v35 = vmax.f32 %v2973_v48, %v3042_v2  ;;  %v3124_v19 = vadd.f32 %v10332_v17, %v12976_v22  ;;  %v12981_v6 = vld [vmem:[#allocation191_spill] sm:$0xff]  ;;  %v10656_v34 = vld [vmem:[%s9918_s11 + $0x10] sm:$0xff] }
 0x61e   : > { %6680 = vset.pattern.permute.xlu1 %v12974_v63  ;;  %v3600_v45 = vpop.permute.xlu0 %3599  ;;  %v3135_v24 = vmax.f32 %v3053_v31, %v3122_v37  ;;  %v3286_v40 = vadd.f32 %v10353_v28, %v12977_v27  ;;  %v12978_v32 = vmax.f32 %v10507_v21, %v10510_v56  ;;  %v3045_v30 = vadd.f32 %v10317_v5, %v12979_v25  ;;  %v12980_v62 = vld [vmem:[#allocation178_spill] sm:$0xff]  ;;  %v12984_v22 = vld [vmem:[#allocation184_spill] sm:$0xff] }
 0x61f   : > { %v3624_v29 = vadd.f32 %v10525_v0, %v3600_v45  ;;  %3887 = vperm.xlu1 %6680, %v10618_v23   ;;  %v3056_v2 = vmax.f32 %v2974_v59, %v3043_v54  ;;  %v10644_v48 = vadd.f32 %v10317_v5, %v12980_v62  ;;  %v3206_v37 = vadd.f32 %v10343_v51, %v12981_v6  ;;  %v12982_v45 = vld [vmem:[#allocation180_spill] sm:$0xff]  ;;  %v12983_v56 = vld [vmem:[#allocation210_spill] sm:$0xff]  ;;  %v12987_v6 = vld [vmem:[#allocation181_spill] sm:$0xff] }
 0x620   : > { %4017 = vperm.xlu0 %6683, %v10628_v60   ;;  %v10650_v31 = vadd.f32 %v10317_v5, %v12982_v45  ;;  %v3217_v21 = vmax.f32 %v3135_v24, %v3204_v36  ;;  %v3368_v59 = vadd.f32 %v10372_v44, %v12983_v56  ;;  %v3125_v27 = vadd.f32 %v10332_v17, %v12984_v22  ;;  %v12986_v36 = vld [vmem:[#allocation72_spill] sm:$0xff] }
 0x621   : > { %v10636_v38 = vmax.f32 %v12978_v32, %v3624_v29  ;;  %v10638_v58 = vpop.permute.xlu1 %3513  ;;  %v3137_v29 = vmax.f32 %v3055_v35, %v3124_v19  ;;  %v12985_v32 = vld [vmem:[#allocation201_spill] sm:$0xff]  ;;  %v12483_v62 = vmov 15   ;;  %v10666_v24 = vrot.slane %v10400_v39, %v12986_v36 }
 0x622   : > { %v3608_v63 = vpop.permute.xlu0 %3607  ;;  %v3288_v25 = vadd.f32 %v10353_v28, %v12985_v32  ;;  %v3299_v45 = vmax.f32 %v3217_v21, %v3286_v40  ;;  %v3450_v35 = vadd.f32 %v10392_v15, %v10406_v53  ;;  %v12988_v19 = vmax.f32 %v10424_v50, %v10519_v11  ;;  %v6689_v32 = vld [vmem:[%s9918_s11 + $0x8] sm:$0xff]  ;;  %v12998_v50 = vld [vmem:[#allocation214_spill] sm:$0xff] }
 0x623   : > { %v3626_v54 = vadd.f32 %v10525_v0, %v3608_v63  ;;  %3895 = vperm.xlu1 %6680, %v10656_v34   ;;  %v10670_v63 = vadd.f32 %v10317_v5, %v12987_v6  ;;  %v3058_v36 = vmax.f32 %v10607_v8, %v3045_v30  ;;  %v3207_v5 = vadd.f32 %v10343_v51, %v12989_v33  ;;  %v12990_v6 = vld [vmem:[#allocation212_spill] sm:$0xff]  ;;  %v12991_v30 = vld [vmem:[#allocation185_spill] sm:$0xff] }
 0x624   : > { %6685 = vset.pattern.permute.xlu0 %v12483_v62  ;;  %v3219_v62 = vmax.f32 %v3137_v29, %v3206_v37  ;;  %v3370_v40 = vadd.f32 %v10372_v44, %v12990_v6  ;;  %v3060_v53 = vmax.f32 %v10612_v10, %v10644_v48  ;;  %v3381_v11 = vmax.f32 %v3299_v45, %v3368_v59  ;;  %v12992_v48 = vld [vmem:[#allocation203_spill] sm:$0xff]  ;;  %v6693_v6 = vld [vmem:[%s9918_s11 + $0x30] sm:$0xff] }
 0x625   : > { %v10677_v56 = vmax.f32 %v12988_v19, %v3626_v54  ;;  %v10679_v22 = vpop.permute.xlu1 %3521  ;;  %4055 = vperm.xlu0 %6685, %v6689_v32   ;;  %v3532_v21 = vadd.f32 %v10420_v7, %v10530_v46  ;;  %v10694_v54 = vld [vmem:[%s9918_s11 + $0x18] sm:$0xff]  ;;  %v3138_v33 = vmax.f32 %v3056_v2, %v3125_v27  ;;  %v3127_v37 = vadd.f32 %v10332_v17, %v12991_v30  ;;  %v6691_v32 = vld [vmem:[%s9918_s11 + $0x20] sm:$0xff]  ;;  %v12993_v27 = vld [vmem:[#allocation195_spill] sm:$0xff] }
 0x626   : > { %v3301_v29 = vmax.f32 %v3219_v62, %v3288_v25  ;;  %v3289_v46 = vadd.f32 %v10353_v28, %v12992_v48  ;;  %v3463_v59 = vmax.f32 %v3381_v11, %v3450_v35  ;;  %v3452_v45 = vadd.f32 %v10392_v15, %v10431_v26  ;;  %v12994_v30 = vld [vmem:[#allocation213_spill] sm:$0xff]  ;;  %v10719_v11 = vld [vmem:[%s9918_s11 + $0x28] sm:$0xff] }
 0x627   : > { %3899 = vperm.xlu1 %6680, %v10694_v54   ;;  %v3646_v8 = vpop.permute.xlu0 %3645  ;;  %v3220_v2 = vmax.f32 %v3138_v33, %v3207_v5  ;;  %v3209_v25 = vadd.f32 %v10343_v51, %v12993_v27  ;;  %v3371_v10 = vadd.f32 %v10372_v44, %v12994_v30  ;;  %v3534_v35 = vadd.f32 %v10420_v7, %v10540_v47  ;;  %v12995_v33 = vld [vmem:[#allocation187_spill] sm:$0xff] }
 0x628   : > { %v10700_v19 = vadd.f32 %v10666_v24, %v3646_v8  ;;  %v3383_v62 = vmax.f32 %v3301_v29, %v3370_v40  ;;  %v3545_v48 = vmax.f32 %v3463_v59, %v3532_v21  ;;  %v3140_v40 = vmax.f32 %v3058_v36, %v3127_v37  ;;  %v12997_v37 = vld [vmem:[#allocation196_spill] sm:$0xff] }
 0x629   : > { %4067 = vperm.xlu0 %6685, %v6691_v32   ;;  %v3129_v29 = vadd.f32 %v10332_v17, %v12995_v33  ;;  %v12996_v32 = vld [vmem:[#allocation204_spill] sm:$0xff]  ;;  %v3302_v21 = vmax.f32 %v3220_v2, %v3289_v46  ;;  %v3453_v59 = vadd.f32 %v10392_v15, %v10456_v41  ;;  %v3211_v33 = vadd.f32 %v10343_v51, %v12997_v37 }
 0x62a   : > { %v3560_v8 = vpop.permute.xlu1 %3559  ;;  %v3291_v27 = vadd.f32 %v10353_v28, %v12996_v32  ;;  %v3465_v47 = vmax.f32 %v3383_v62, %v3452_v45  ;;  %v3222_v36 = vmax.f32 %v3140_v40, %v3209_v25  ;;  %v3373_v32 = vadd.f32 %v10372_v44, %v12998_v50  ;;  %v10744_v62 = vld [vmem:[%s9918_s11 + $0x38] sm:$0xff] }
 0x62b   : > { %v3614_v26 = vadd.f32 %v10525_v0, %v3560_v8  ;;  %3907 = vperm.xlu1 %6680, %v10719_v11   ;;  %v3658_v5 = vpop.permute.xlu0 %3657  ;;  %v3384_v46 = vmax.f32 %v3302_v21, %v3371_v10  ;;  %v3535_v41 = vadd.f32 %v10420_v7, %v10553_v9  ;;  %v13000_v10 = vld [vmem:[#allocation205_spill] sm:$0xff] }
 0x62c   : > { %v10727_v30 = vadd.f32 %v10666_v24, %v3658_v5  ;;  %v3547_v45 = vmax.f32 %v3465_v47, %v3534_v35  ;;  %v3293_v35 = vadd.f32 %v10353_v28, %v13000_v10  ;;  %v6695_v47 = vld [vmem:[%s9918_s11 + $0x40] sm:$0xff] }
 0x62d   : > { %v10731_v8 = vmax.f32 %v3545_v48, %v3614_v26  ;;  %4075 = vperm.xlu0 %6685, %v6693_v6   ;;  %v3142_v6 = vmax.f32 %v3060_v53, %v3129_v29  ;;  %v12999_v48 = vld [vmem:[#allocation188_spill] sm:$0xff]  ;;  %v3304_v26 = vmax.f32 %v3222_v36, %v3291_v27  ;;  %v3466_v9 = vmax.f32 %v3384_v46, %v3453_v59  ;;  %v13001_v29 = vld [vmem:[#allocation197_spill] sm:$0xff] }
 0x62e   : > { %v3713_v5 = vmax.f32 %v10551_v42, %v10727_v30  ;;  %v3568_v55 = vpop.permute.xlu1 %3567  ;;  %v3131_v50 = vadd.f32 %v10332_v17, %v12999_v48  ;;  %v3213_v37 = vadd.f32 %v10343_v51, %v13001_v29  ;;  %v13002_v48 = vld [vmem:[#allocation216_spill] sm:$0xff] }
 0x62f   : > { %v3616_v2 = vadd.f32 %v10525_v0, %v3568_v55  ;;  %3915 = vperm.xlu1 %6680, %v10744_v62   ;;  %v3666_v25 = vpop.permute.xlu0 %3665  ;;  %v3455_v55 = vadd.f32 %v10392_v15, %v10477_v57  ;;  %v3224_v53 = vmax.f32 %v3142_v6, %v3211_v33  ;;  %v3386_v27 = vmax.f32 %v3304_v26, %v3373_v32  ;;  %v13004_v26 = vld [vmem:[#allocation189_spill] sm:$0xff]  ;;  %v6697_v36 = vld [vmem:[%s9918_s11 + $0x50] sm:$0xff] }
 0x630   : > { %v10750_v40 = vadd.f32 %v10666_v24, %v3666_v25  ;;  %v3375_v59 = vadd.f32 %v10372_v44, %v13002_v48  ;;  %v3548_v46 = vmax.f32 %v3466_v9, %v3535_v41  ;;  %v3537_v57 = vadd.f32 %v10420_v7, %v10573_v18 }
 0x631   : > { %v10756_v21 = vmax.f32 %v3547_v45, %v3616_v2  ;;  %4083 = vperm.xlu0 %6685, %v6695_v47   ;;  %v10769_v2 = vld [vmem:[%s9918_s11 + $0x48] sm:$0xff]  ;;  %v13003_v32 = vmax.f32 %v10621_v61, %v10650_v31  ;;  %v3133_v10 = vadd.f32 %v10332_v17, %v13004_v26  ;;  %v13005_v47 = vld [vmem:[#allocation206_spill] sm:$0xff]  ;;  %v3306_v18 = vmax.f32 %v3224_v53, %v3293_v35 }
 0x632   : > { %v3572_v25 = vpop.permute.xlu1 %3571  ;;  %v3295_v41 = vadd.f32 %v10353_v28, %v13005_v47  ;;  %v3468_v29 = vmax.f32 %v3386_v27, %v3455_v55  ;;  %v13006_v31 = vld [vmem:[#allocation198_spill] sm:$0xff]  ;;  %v10797_v27 = vld [vmem:[%s9918_s11 + $0x58] sm:$0xff] }
 0x633   : > { %v3617_v45 = vadd.f32 %v10525_v0, %v3572_v25  ;;  %3923 = vperm.xlu1 %6680, %v10769_v2   ;;  %v3674_v33 = vpop.permute.xlu0 %3673  ;;  %v3144_v6 = vmax.f32 %v13003_v32, %v3131_v50  ;;  %v3457_v25 = vadd.f32 %v10392_v15, %v10491_v4  ;;  %v3215_v17 = vadd.f32 %v10343_v51, %v13006_v31 }
 0x634   : > { %v10780_v9 = vadd.f32 %v10666_v24, %v3674_v33  ;;  %v3377_v50 = vadd.f32 %v10372_v44, %v10345_v14  ;;  %v3388_v35 = vmax.f32 %v3306_v18, %v3375_v59  ;;  %v3550_v55 = vmax.f32 %v3468_v29, %v3537_v57  ;;  %v13008_v59 = vld [vmem:[#allocation208_spill] sm:$0xff] }
 0x635   : > { %v10784_v48 = vmax.f32 %v3548_v46, %v3617_v45  ;;  %4091 = vperm.xlu0 %6685, %v6697_v36   ;;  %v3226_v61 = vmax.f32 %v3144_v6, %v3213_v37  ;;  %v3539_v4 = vadd.f32 %v10420_v7, %v10605_v1  ;;  %v13007_v51 = vmax.f32 %v10623_v43, %v10670_v63 }
 0x636   : > { %v3717_v33 = vmax.f32 %v10603_v52, %v10780_v9  ;;  %v3580_v32 = vpop.permute.xlu1 %3579  ;;  %v3297_v57 = vadd.f32 %v10353_v28, %v13008_v59  ;;  %v3470_v45 = vmax.f32 %v3388_v35, %v3457_v25  ;;  %v3459_v1 = vadd.f32 %v10392_v15, %v10505_v49  ;;  %v13010_v25 = vld [vmem:[#allocation75_spill] sm:$0xff] }
 0x637   : > { %v3619_v53 = vadd.f32 %v10525_v0, %v3580_v32  ;;  %3931 = vperm.xlu1 %6680, %v10797_v27   ;;  %v3682_v37 = vpop.permute.xlu0 %3681  ;;  %v3146_v14 = vmax.f32 %v13007_v51, %v3133_v10  ;;  %v3308_v36 = vmax.f32 %v3226_v61, %v3295_v41  ;;  %v3379_v10 = vadd.f32 %v10372_v44, %v10374_v3 }
 0x638   : > { %v10804_v46 = vadd.f32 %v10666_v24, %v3682_v37  ;;  %v3552_v41 = vmax.f32 %v3470_v45, %v3539_v4  ;;  %v3541_v28 = vadd.f32 %v10420_v7, %v10638_v58  ;;  %v13009_v49 = vmov 14  }
 0x639   : > { %v10810_v6 = vmax.f32 %v3550_v55, %v3619_v53  ;;  %4099 = vperm.xlu0 %6685, %v10628_v60   ;;  %v3228_v26 = vmax.f32 %v3146_v14, %v3215_v17  ;;  %v3390_v47 = vmax.f32 %v3308_v36, %v3377_v50  ;;  %v3461_v44 = vadd.f32 %v10392_v15, %v10516_v12 }
 0x63a   : > { %v3719_v43 = vmax.f32 %v10636_v38, %v10804_v46  ;;  %v3588_v63 = vpop.permute.xlu1 %3587  ;;  %v10825_v38 = vrot.slane %v10400_v39, %v13010_v25  ;;  %v3543_v35 = vadd.f32 %v10420_v7, %v10679_v22 }
 0x63b   : > { %v3621_v18 = vadd.f32 %v10525_v0, %v3588_v63  ;;  %6682 = vset.pattern.permute.xlu1 %v13009_v49  ;;  %v3690_v29 = vpop.permute.xlu0 %3689  ;;  %v3310_v61 = vmax.f32 %v3228_v26, %v3297_v57  ;;  %v3472_v31 = vmax.f32 %v3390_v47, %v3459_v1  ;;  %v13012_v1 = vmax.f32 %v10571_v16, %v10750_v40 }
 0x63c   : > { %v3708_v60 = vadd.f32 %v10666_v24, %v3690_v29  ;;  %3969 = vperm.xlu1 %6682, %v10618_v23   ;;  %v13013_v29 = vld [vmem:[#allocation76_spill] sm:$0xff] }
 0x63d   : > { %v10829_v3 = vmax.f32 %v3552_v41, %v3621_v18  ;;  %v3392_v50 = vmax.f32 %v3310_v61, %v3379_v10  ;;  %v3554_v32 = vmax.f32 %v3472_v31, %v3541_v28 }
 0x63e   : > { %v3721_v58 = vmax.f32 %v10677_v56, %v3708_v60  ;;  %v3596_v17 = vpop.permute.xlu1 %3595  ;;  %v13011_v56 = vmax.f32 %v10538_v13, %v10700_v19  ;;  %v10884_v60 = vrot.slane %v10400_v39, %v13013_v29 }
 0x63f   : > { %v3623_v55 = vadd.f32 %v10525_v0, %v3596_v17  ;;  %v3474_v53 = vmax.f32 %v3392_v50, %v3461_v44 }
 0x640   : > { %3977 = vperm.xlu1 %6682, %v10656_v34   ;;  %v3728_v4 = vpop.permute.xlu0 %3727 }
 0x641   : > { %v10836_v37 = vmax.f32 %v3554_v32, %v3623_v55  ;;  %v3779_v15 = vadd.f32 %v10825_v38, %v3728_v4  ;;  %v3556_v51 = vmax.f32 %v3474_v53, %v3543_v35 }
 0x642   : > { %v3604_v12 = vpop.permute.xlu1 %3603 }
 0x643   : > { %v10842_v14 = vmax.f32 %v13011_v56, %v3779_v15  ;;  %v3625_v36 = vadd.f32 %v10525_v0, %v3604_v12 }
 0x644   : > { %3981 = vperm.xlu1 %6682, %v10694_v54   ;;  %v3740_v7 = vpop.permute.xlu0 %3739 }
 0x645   : > { %v10846_v22 = vmax.f32 %v3556_v51, %v3625_v36  ;;  %v3782_v46 = vadd.f32 %v10825_v38, %v3740_v7 }
 0x647   : > { %v10852_v59 = vmax.f32 %v3713_v5, %v3782_v46  ;;  %v3642_v57 = vpop.permute.xlu1 %3641 }
 0x648   : > { %v3696_v45 = vadd.f32 %v10666_v24, %v3642_v57  ;;  %3989 = vperm.xlu1 %6682, %v10719_v11   ;;  %v3748_v13 = vpop.permute.xlu0 %3747 }
 0x649   : > { %v3784_v0 = vadd.f32 %v10825_v38, %v3748_v13 }
 0x64a   : > { %v3709_v19 = vmax.f32 %v10731_v8, %v3696_v45 }
 0x64b   : > { %v10861_v26 = vmax.f32 %v13012_v1, %v3784_v0  ;;  %v3650_v47 = vpop.permute.xlu1 %3649 }
 0x64c   : > { %v3698_v42 = vadd.f32 %v10666_v24, %v3650_v47  ;;  %3997 = vperm.xlu1 %6682, %v10744_v62   ;;  %v3756_v30 = vpop.permute.xlu0 %3755 }
 0x64d   : > { %v3786_v5 = vadd.f32 %v10825_v38, %v3756_v30 }
 0x64e   : > { %v3711_v63 = vmax.f32 %v10756_v21, %v3698_v42 }
 0x64f   : > { %v10870_v10 = vmax.f32 %v3717_v33, %v3786_v5  ;;  %v3654_v8 = vpop.permute.xlu1 %3653 }
 0x650   : > { %v3699_v16 = vadd.f32 %v10666_v24, %v3654_v8  ;;  %4005 = vperm.xlu1 %6682, %v10769_v2   ;;  %v3764_v40 = vpop.permute.xlu0 %3763 }
 0x651   : > { %v3788_v41 = vadd.f32 %v10825_v38, %v3764_v40 }
 0x652   : > { %v3712_v28 = vmax.f32 %v10784_v48, %v3699_v16 }
 0x653   : > { %v10876_v18 = vmax.f32 %v3719_v43, %v3788_v41  ;;  %v3662_v49 = vpop.permute.xlu1 %3661  ;;  %v13014_v43 = vmov 15  }
 0x654   : > { %v3701_v21 = vadd.f32 %v10666_v24, %v3662_v49  ;;  %4013 = vperm.xlu1 %6682, %v10797_v27   ;;  %v3772_v52 = vpop.permute.xlu0 %3771 }
 0x655   : > { %v3790_v9 = vadd.f32 %v10825_v38, %v3772_v52 }
 0x656   : > { %v3714_v33 = vmax.f32 %v10810_v6, %v3701_v21 }
 0x657   : > { %v10886_v25 = vmax.f32 %v3721_v58, %v3790_v9  ;;  %v3670_v61 = vpop.permute.xlu1 %3669 }
 0x658   : > { %v3703_v48 = vadd.f32 %v10666_v24, %v3670_v61  ;;  %6684 = vset.pattern.permute.xlu1 %v13014_v43 }
 0x659   : > { %4051 = vperm.xlu1 %6684, %v10618_v23   ;;  %v3810_v31 = vpop.permute.xlu0 %3809 }
 0x65a   : > { %v3716_v44 = vmax.f32 %v10829_v3, %v3703_v48  ;;  %v3861_v17 = vadd.f32 %v10884_v60, %v3810_v31 }
 0x65b   : > { %v3678_v50 = vpop.permute.xlu1 %3677 }
 0x65c   : > { %v3874_v6 = vmax.f32 %v10842_v14, %v3861_v17  ;;  %v3705_v32 = vadd.f32 %v10666_v24, %v3678_v50 }
 0x65d   : > { %4059 = vperm.xlu1 %6684, %v10656_v34   ;;  %v3822_v58 = vpop.permute.xlu0 %3821 }
 0x65e   : > { %v3718_v35 = vmax.f32 %v10836_v37, %v3705_v32  ;;  %v3864_v55 = vadd.f32 %v10884_v60, %v3822_v58 }
 0x65f   : > { %v3686_v4 = vpop.permute.xlu1 %3685 }
 0x660   : > { %v3877_v23 = vmax.f32 %v10852_v59, %v3864_v55  ;;  %v3707_v53 = vadd.f32 %v10666_v24, %v3686_v4  ;;  %v13015_v4 = vld [vmem:[#allocation78_spill] sm:$0xff] }
 0x661   : > { %4063 = vperm.xlu1 %6684, %v10694_v54   ;;  %v3830_v3 = vpop.permute.xlu0 %3829 }
 0x662   : > { %v3720_v15 = vmax.f32 %v10846_v22, %v3707_v53  ;;  %v3866_v12 = vadd.f32 %v10884_v60, %v3830_v3 }
 0x664   : > { %v3879_v51 = vmax.f32 %v10861_v26, %v3866_v12  ;;  %v3724_v34 = vpop.permute.xlu1 %3723 }
 0x665   : > { %v3778_v56 = vadd.f32 %v10825_v38, %v3724_v34  ;;  %4071 = vperm.xlu1 %6684, %v10719_v11   ;;  %v3838_v37 = vpop.permute.xlu0 %3837 }
 0x666   : > { %v3868_v14 = vadd.f32 %v10884_v60, %v3838_v37 }
 0x667   : > { %v10907_v36 = vmax.f32 %v3709_v19, %v3778_v56 }
 0x668   : > { %v3881_v24 = vmax.f32 %v10870_v10, %v3868_v14  ;;  %v3732_v54 = vpop.permute.xlu1 %3731 }
 0x669   : > { %v3780_v7 = vadd.f32 %v10825_v38, %v3732_v54  ;;  %4079 = vperm.xlu1 %6684, %v10744_v62   ;;  %v3846_v22 = vpop.permute.xlu0 %3845  ;;  %v10923_v62 = vrot.slane %v10400_v39, %v7840_v20 }
 0x66a   : > { %v3870_v46 = vadd.f32 %v10884_v60, %v3846_v22 }
 0x66b   : > { %v10913_v59 = vmax.f32 %v3711_v63, %v3780_v7 }
 0x66c   : > { %v3883_v57 = vmax.f32 %v10876_v18, %v3870_v46  ;;  %v3736_v11 = vpop.permute.xlu1 %3735 }
 0x66d   : > { %v3781_v45 = vadd.f32 %v10825_v38, %v3736_v11  ;;  %4087 = vperm.xlu1 %6684, %v10769_v2   ;;  %v3854_v13 = vpop.permute.xlu0 %3853 }
 0x66e   : > { %v3872_v0 = vadd.f32 %v10884_v60, %v3854_v13 }
 0x66f   : > { %v10919_v19 = vmax.f32 %v3712_v28, %v3781_v45 }
 0x670   : > { %v3885_v1 = vmax.f32 %v10886_v25, %v3872_v0  ;;  %v3744_v26 = vpop.permute.xlu1 %3743 }
 0x671   : > { %v3783_v47 = vadd.f32 %v10825_v38, %v3744_v26  ;;  %4095 = vperm.xlu1 %6684, %v10797_v27  }
 0x672   : > { %v3892_v42 = vpop.permute.xlu0 %3891 }
 0x673   : > { %v10928_v30 = vmax.f32 %v3714_v33, %v3783_v47  ;;  %v3943_v2 = vadd.f32 %v10923_v62, %v3892_v42 }
 0x674   : > { %v3752_v5 = vpop.permute.xlu1 %3751 }
 0x675   : > { %v10931_v63 = vmax.f32 %v3874_v6, %v3943_v2  ;;  %v3785_v10 = vadd.f32 %v10825_v38, %v3752_v5 }
 0x676   : > { %v3904_v8 = vpop.permute.xlu0 %3903 }
 0x677   : > { %v10934_v16 = vmax.f32 %v3716_v44, %v3785_v10  ;;  %v3946_v40 = vadd.f32 %v10923_v62, %v3904_v8 }
 0x678   : > { %v3760_v41 = vpop.permute.xlu1 %3759 }
 0x679   : > { %v10937_v28 = vmax.f32 %v3877_v23, %v3946_v40  ;;  %v3787_v27 = vadd.f32 %v10825_v38, %v3760_v41  ;;  %v10961_v23 = vrot.slane %v10400_v39, %v13015_v4 }
 0x67a   : > { %v3912_v18 = vpop.permute.xlu0 %3911 }
 0x67b   : > { %v10940_v49 = vmax.f32 %v3718_v35, %v3787_v27  ;;  %v3948_v21 = vadd.f32 %v10923_v62, %v3912_v18  ;;  %v13016_v27 = vld [vmem:[#allocation80_spill] sm:$0xff] }
 0x67c   : > { %v3768_v52 = vpop.permute.xlu1 %3767  ;;  %v10991_v18 = vrot.slane %v10400_v39, %v13016_v27 }
 0x67d   : > { %v10943_v9 = vmax.f32 %v3879_v51, %v3948_v21  ;;  %v3789_v33 = vadd.f32 %v10825_v38, %v3768_v52 }
 0x67e   : > { %v3920_v29 = vpop.permute.xlu0 %3919 }
 0x67f   : > { %v10946_v25 = vmax.f32 %v3720_v15, %v3789_v33  ;;  %v3950_v61 = vadd.f32 %v10923_v62, %v3920_v29 }
 0x681   : > { %v10949_v48 = vmax.f32 %v3881_v24, %v3950_v61  ;;  %v3806_v43 = vpop.permute.xlu1 %3805 }
 0x682   : > { %v3860_v31 = vadd.f32 %v10884_v60, %v3806_v43  ;;  %v3928_v44 = vpop.permute.xlu0 %3927 }
 0x683   : > { %v3952_v17 = vadd.f32 %v10923_v62, %v3928_v44 }
 0x684   : > { %v3873_v50 = vmax.f32 %v10907_v36, %v3860_v31 }
 0x685   : > { %v10954_v6 = vmax.f32 %v3883_v57, %v3952_v17  ;;  %v3814_v32 = vpop.permute.xlu1 %3813 }
 0x686   : > { %v3862_v38 = vadd.f32 %v10884_v60, %v3814_v32  ;;  %v3936_v58 = vpop.permute.xlu0 %3935 }
 0x687   : > { %v3954_v35 = vadd.f32 %v10923_v62, %v3936_v58 }
 0x688   : > { %v3875_v55 = vmax.f32 %v10913_v59, %v3862_v38 }
 0x689   : > { %v10963_v53 = vmax.f32 %v3885_v1, %v3954_v35  ;;  %v3818_v3 = vpop.permute.xlu1 %3817 }
 0x68a   : > { %v3863_v15 = vadd.f32 %v10884_v60, %v3818_v3 }
 0x68b   : > { %v3974_v12 = vpop.permute.xlu0 %3973 }
 0x68c   : > { %v3876_v51 = vmax.f32 %v10919_v19, %v3863_v15  ;;  %v4025_v34 = vadd.f32 %v10961_v23, %v3974_v12 }
 0x68d   : > { %v3826_v56 = vpop.permute.xlu1 %3825 }
 0x68e   : > { %v4038_v37 = vmax.f32 %v10931_v63, %v4025_v34  ;;  %v3865_v14 = vadd.f32 %v10884_v60, %v3826_v56 }
 0x68f   : > { %v3986_v36 = vpop.permute.xlu0 %3985 }
 0x690   : > { %v3878_v24 = vmax.f32 %v10928_v30, %v3865_v14  ;;  %v4028_v54 = vadd.f32 %v10961_v23, %v3986_v36 }
 0x691   : > { %v3834_v7 = vpop.permute.xlu1 %3833 }
 0x692   : > { %v4041_v22 = vmax.f32 %v10937_v28, %v4028_v54  ;;  %v3867_v46 = vadd.f32 %v10884_v60, %v3834_v7 }
 0x693   : > { %v3994_v59 = vpop.permute.xlu0 %3993 }
 0x694   : > { %v3880_v57 = vmax.f32 %v10934_v16, %v3867_v46  ;;  %v4030_v11 = vadd.f32 %v10961_v23, %v3994_v59 }
 0x695   : > { %v3842_v45 = vpop.permute.xlu1 %3841 }
 0x696   : > { %v4043_v13 = vmax.f32 %v10943_v9, %v4030_v11  ;;  %v3869_v0 = vadd.f32 %v10884_v60, %v3842_v45 }
 0x697   : > { %v4002_v19 = vpop.permute.xlu0 %4001 }
 0x698   : > { %v3882_v1 = vmax.f32 %v10940_v49, %v3869_v0  ;;  %v4032_v26 = vadd.f32 %v10961_v23, %v4002_v19 }
 0x699   : > { %v3850_v47 = vpop.permute.xlu1 %3849 }
 0x69a   : > { %v4045_v42 = vmax.f32 %v10949_v48, %v4032_v26  ;;  %v3871_v30 = vadd.f32 %v10884_v60, %v3850_v47 }
 0x69b   : > { %v4010_v2 = vpop.permute.xlu0 %4009 }
 0x69c   : > { %v3884_v5 = vmax.f32 %v10946_v25, %v3871_v30  ;;  %v4034_v63 = vadd.f32 %v10961_v23, %v4010_v2 }
 0x69e   : > { %v4047_v10 = vmax.f32 %v10954_v6, %v4034_v63  ;;  %v3888_v8 = vpop.permute.xlu1 %3887 }
 0x69f   : > { %v3942_v16 = vadd.f32 %v10923_v62, %v3888_v8  ;;  %v4018_v40 = vpop.permute.xlu0 %4017 }
 0x6a0   : > { %v4036_v41 = vadd.f32 %v10961_v23, %v4018_v40 }
 0x6a1   : > { %v10987_v28 = vmax.f32 %v3873_v50, %v3942_v16 }
 0x6a2   : > { %v4049_v60 = vmax.f32 %v10963_v53, %v4036_v41  ;;  %v3896_v49 = vpop.permute.xlu1 %3895 }
 0x6a3   : > { %v3944_v21 = vadd.f32 %v10923_v62, %v3896_v49 }
 0x6a4   : > { %v4056_v52 = vpop.permute.xlu0 %4055 }
 0x6a5   : > { %v3957_v9 = vmax.f32 %v3875_v55, %v3944_v21  ;;  %v4107_v33 = vadd.f32 %v10991_v18, %v4056_v52 }
 0x6a6   : > { %v3900_v29 = vpop.permute.xlu1 %3899 }
 0x6a7   : > { %v10996_v2 = vmax.f32 %v4038_v37, %v4107_v33   ;;  %v3945_v25 = vadd.f32 %v10923_v62, %v3900_v29 }
 0x6a8   : > { %v4068_v48 = vpop.permute.xlu0 %4067 }
 0x6a9   : > { %v13017_v61 = vmov %v10996_v2  ;;  %v3958_v43 = vmax.f32 %v3876_v51, %v3945_v25  ;;  %v4110_v31 = vadd.f32 %v10991_v18, %v4068_v48 }
 0x6aa   : > { %v3908_v39 = vpop.permute.xlu1 %3907  ;;  %4133 = vst [vmem:[#allocation3 + $0x8] sm:$0xff] (%p11034_p2), %v13017_v61 }
 0x6ab   : > { %v11000_v44 = vmax.f32 %v4041_v22, %v4110_v31   ;;  %v3947_v50 = vadd.f32 %v10923_v62, %v3908_v39 }
 0x6ac   : > { %v4076_v6 = vpop.permute.xlu0 %4075 }
 0x6ad   : > { %v13018_v17 = vmov %v11000_v44  ;;  %v3960_v32 = vmax.f32 %v3878_v24, %v3947_v50  ;;  %v4112_v38 = vadd.f32 %v10991_v18, %v4076_v6 }
 0x6ae   : > { %v3916_v58 = vpop.permute.xlu1 %3915  ;;  %4136 = vst [vmem:[#allocation3 + $0x20] sm:$0xff] (%p11034_p2), %v13018_v17 }
 0x6af   : > { %v11004_v25 = vmax.f32 %v4043_v13, %v4112_v38   ;;  %v3949_v55 = vadd.f32 %v10923_v62, %v3916_v58 }
 0x6b0   : > { %v4084_v4 = vpop.permute.xlu0 %4083 }
 0x6b1   : > { %v13019_v35 = vmov %v11004_v25  ;;  %v3962_v53 = vmax.f32 %v3880_v57, %v3949_v55  ;;  %v4114_v3 = vadd.f32 %v10991_v18, %v4084_v4 }
 0x6b2   : > { %v3924_v15 = vpop.permute.xlu1 %3923  ;;  %4138 = vst [vmem:[#allocation3 + $0x30] sm:$0xff] (%p11034_p2), %v13019_v35 }
 0x6b3   : > { %v11008_v26 = vmax.f32 %v4045_v42, %v4114_v3   ;;  %v3951_v12 = vadd.f32 %v10923_v62, %v3924_v15  ;;  %v11094_v3 = vmov (%p11034_p2), -1e+30   ;;  %v11096_v15 = vmov (%p11034_p2), -1e+30  }
 0x6b4   : > { %v4092_v51 = vpop.permute.xlu0 %4091 }
 0x6b5   : > { %v13020_v34 = vmov %v11008_v26  ;;  %v3964_v56 = vmax.f32 %v3882_v1, %v3951_v12  ;;  %v4116_v37 = vadd.f32 %v10991_v18, %v4092_v51 }
 0x6b6   : > { %v3932_v14 = vpop.permute.xlu1 %3931  ;;  %4140 = vst [vmem:[#allocation3 + $0x40] sm:$0xff] (%p11034_p2), %v13020_v34 }
 0x6b7   : > { %v11012_v63 = vmax.f32 %v4047_v10, %v4116_v37   ;;  %v3953_v24 = vadd.f32 %v10923_v62, %v3932_v14 }
 0x6b8   : > { %v4100_v54 = vpop.permute.xlu0 %4099 }
 0x6b9   : > { %v13021_v36 = vmov %v11012_v63  ;;  %v3966_v7 = vmax.f32 %v3884_v5, %v3953_v24  ;;  %v4118_v22 = vadd.f32 %v10991_v18, %v4100_v54 }
 0x6ba   :  { %4142 = vst [vmem:[#allocation3 + $0x50] sm:$0xff] (%p11034_p2), %v13021_v36 }
 0x6bb   : > { %v11016_v44 = vmax.f32 %v4049_v60, %v4118_v22   ;;  %v3970_v59 = vpop.permute.xlu1 %3969 }
 0x6bc   : > { %v4024_v57 = vadd.f32 %v10961_v23, %v3970_v59 }
 0x6bd   : > { %v13022_v46 = vmov %v11016_v44 }
 0x6be   : > { %v4037_v11 = vmax.f32 %v10987_v28, %v4024_v57  ;;  %4144 = vst [vmem:[#allocation3 + $0x60] sm:$0xff] (%p11034_p2), %v13022_v46 }
 0x6bf   : > { %v3978_v45 = vpop.permute.xlu1 %3977 }
 0x6c0   : > { %v4026_v13 = vadd.f32 %v10961_v23, %v3978_v45 }
 0x6c2   : > { %v4039_v0 = vmax.f32 %v3957_v9, %v4026_v13 }
 0x6c3   : > { %v3982_v19 = vpop.permute.xlu1 %3981 }
 0x6c4   : > { %v4027_v1 = vadd.f32 %v10961_v23, %v3982_v19 }
 0x6c6   : > { %v4040_v26 = vmax.f32 %v3958_v43, %v4027_v1 }
 0x6c7   : > { %v3990_v62 = vpop.permute.xlu1 %3989 }
 0x6c8   : > { %v4029_v47 = vadd.f32 %v10961_v23, %v3990_v62 }
 0x6ca   : > { %v4042_v42 = vmax.f32 %v3960_v32, %v4029_v47 }
 0x6cb   : > { %v3998_v30 = vpop.permute.xlu1 %3997 }
 0x6cc   : > { %v4031_v2 = vadd.f32 %v10961_v23, %v3998_v30 }
 0x6ce   : > { %v4044_v5 = vmax.f32 %v3962_v53, %v4031_v2  ;;  %v13035_v2 = vmov %v13017_v61  ;;  %v11084_v61 = vmov (%p11034_p2), -1e+30   ;;  %v11092_v53 = vmov (%p11034_p2), -1e+30  }
 0x6cf   : > { %v4006_v63 = vpop.permute.xlu1 %4005 }
 0x6d0   : > { %v4033_v10 = vadd.f32 %v10961_v23, %v4006_v63  ;;  %v13026_v63 = vmov %v13021_v36 }
 0x6d2   : > { %v4046_v8 = vmax.f32 %v3964_v56, %v4033_v10  ;;  %v11104_v56 = vmov (%p11034_p2), -1e+30  }
 0x6d3   : > { %v4014_v16 = vpop.permute.xlu1 %4013 }
 0x6d4   : > { %v4035_v40 = vadd.f32 %v10961_v23, %v4014_v16 }
 0x6d6   : > { %v4048_v41 = vmax.f32 %v3966_v7, %v4035_v40 }
 0x6d8   : > { %v4052_v28 = vpop.permute.xlu1 %4051 }
 0x6d9   : > { %v4106_v27 = vadd.f32 %v10991_v18, %v4052_v28 }
 0x6db   : > { %v4119_v60 = vmax.f32 %v4037_v11, %v4106_v27  }
 0x6dc   : > { %v4060_v49 = vpop.permute.xlu1 %4059 }
 0x6dd   : > { %v4108_v21 = vadd.f32 %v10991_v18, %v4060_v49  ;;  %v13036_v58 = vmov %v4119_v60  ;;  %4132 = vst [vmem:[#allocation3] sm:$0xff] (%p11034_p2), %v4119_v60 }
 0x6de   :  { %v11082_v58 = vmov (%p11034_p2), -1e+30  }
 0x6df   : > { %v4121_v52 = vmax.f32 %v4039_v0, %v4108_v21  }
 0x6e0   : > { %v4064_v9 = vpop.permute.xlu1 %4063 }
 0x6e1   : > { %v4109_v33 = vadd.f32 %v10991_v18, %v4064_v9  ;;  %v13034_v4 = vmov %v4121_v52  ;;  %4134 = vst [vmem:[#allocation3 + $0x10] sm:$0xff] (%p11034_p2), %v4121_v52 }
 0x6e2   :  { %v11086_v4 = vmov (%p11034_p2), -1e+30  }
 0x6e3   : > { %v4122_v29 = vmax.f32 %v4040_v26, %v4109_v33   ;;  %v13028_v26 = vmov %v13020_v34  ;;  %v11098_v34 = vmov (%p11034_p2), -1e+30  }
 0x6e4   : > { %v4072_v25 = vpop.permute.xlu1 %4071 }
 0x6e5   : > { %v4111_v48 = vadd.f32 %v10991_v18, %v4072_v25  ;;  %v13030_v25 = vmov %v13019_v35  ;;  %v13033_v47 = vmov %v4122_v29  ;;  %4135 = vst [vmem:[#allocation3 + $0x18] sm:$0xff] (%p11034_p2), %v4122_v29  ;;  %v11090_v35 = vmov (%p11034_p2), -1e+30  }
 0x6e7   : > { %v4124_v43 = vmax.f32 %v4042_v42, %v4111_v48  }
 0x6e8   : > { %v4080_v31 = vpop.permute.xlu1 %4079 }
 0x6e9   : > { %v4113_v23 = vadd.f32 %v10991_v18, %v4080_v31  ;;  %v13031_v21 = vmov %v4124_v43  ;;  %4137 = vst [vmem:[#allocation3 + $0x28] sm:$0xff] (%p11034_p2), %v4124_v43 }
 0x6eb   : > { %v4126_v50 = vmax.f32 %v4044_v5, %v4113_v23  }
 0x6ec   : > { %v4088_v39 = vpop.permute.xlu1 %4087 }
 0x6ed   : > { %v4115_v44 = vadd.f32 %v10991_v18, %v4088_v39  ;;  %v13029_v54 = vmov %v4126_v50  ;;  %v13032_v39 = vmov %v13018_v17  ;;  %4139 = vst [vmem:[#allocation3 + $0x38] sm:$0xff] (%p11034_p2), %v4126_v50  ;;  %v11088_v17 = vmov (%p11034_p2), -1e+30  }
 0x6ef   : > { %v4128_v6 = vmax.f32 %v4046_v8, %v4115_v44   ;;  %v13024_v44 = vmov %v13022_v46  ;;  %2773 = sbr.rel (!%p11034_p2) target bundleno = 1190 (0x4a6), region = 103 }
 0x6f0   : > { %v4096_v32 = vpop.permute.xlu1 %4095 }
 0x6f1   : > { %v4117_v38 = vadd.f32 %v10991_v18, %v4096_v32  ;;  %v13027_v12 = vmov %v4128_v6  ;;  %4141 = vst [vmem:[#allocation3 + $0x48] sm:$0xff] (%p11034_p2), %v4128_v6  ;;  %v11080_v18 = vmov (%p11034_p2), -1e+30  }
 0x6f2   :  { %v11100_v12 = vmov (%p11034_p2), -1e+30  }
 0x6f3   : > { %v4130_v55 = vmax.f32 %v4048_v41, %v4117_v38  }
 0x6f5   : > { %v13025_v51 = vmov %v4130_v55  ;;  %4143 = vst [vmem:[#allocation3 + $0x58] sm:$0xff] (%p11034_p2), %v4130_v55 }
 0x6f6   :  { %v11102_v51 = vmov -1e+30  }
 0x6f7 LB: > { %13037 = vst [vmem:[#allocation217_spill] sm:$0xff] %v7180_v58  ;;  %13038 = vst [vmem:[#allocation218_spill] sm:$0xff] %v7188_v4  ;;  %v7290_v37 = vmov 0   ;;  %s4168_s16 = smul.u32 208, %s7228_s15  ;;  %v7291_v19 = vmov 1   ;;  %v7292_v1 = vmov 2   ;;  %s7228_s15 = sphi %s11106_s15, %s4150_s15   ;;  %v7224_v56 = vphi %v11104_v56, %v13215_v56   ;;  %v7220_v51 = vphi %v11102_v51, %v13214_v51   ;;  %v7216_v12 = vphi %v11100_v12, %v13213_v12   ;;  %v7212_v34 = vphi %v11098_v34, %v13212_v34   ;;  %v7208_v15 = vphi %v11096_v15, %v13211_v15   ;;  %v7204_v3 = vphi %v11094_v3, %v13210_v3   ;;  %v7200_v53 = vphi %v11092_v53, %v13209_v53   ;;  %v7196_v35 = vphi %v11090_v35, %v13208_v35   ;;  %v7192_v17 = vphi %v11088_v17, %v13207_v17   ;;  %v7188_v4 = vphi %v11086_v4, %v13206_v4   ;;  %v7184_v61 = vphi %v11084_v61, %v13205_v61   ;;  %v7180_v58 = vphi %v11082_v58, %v13204_v58   ;;  %v7176_v18 = vphi %v11080_v18, %v13203_v18  }
 0x6f8   : > { %13039 = vst [vmem:[#allocation219_spill] sm:$0xff] %v7196_v35  ;;  %13040 = vst [vmem:[#allocation220_spill] sm:$0xff] %v7204_v3  ;;  %6700 = vset.pattern.permute.xlu1 %v7290_v37  ;;  %6699 = vset.pattern.permute.xlu0 %v7290_v37  ;;  %v7293_v26 = vmov 3   ;;  %v7294_v62 = vmov 4   ;;  %v7295_v30 = vmov 5   ;;  %v7296_v21 = vmov 6  }
 0x6f9   : > { %13041 = vst [vmem:[#allocation221_spill] sm:$0xff] %v7212_v34  ;;  %13042 = vst [vmem:[#allocation222_spill] sm:$0xff] %v7216_v12  ;;  %s11154_s19 = scalar_lea.vmem %s12412_s2, %s4168_s16  ;;  %v7297_v6 = vmov 7   ;;  %s6010_s20 = sshll.u32 %s7228_s15, 4 }
 0x6fa   : > { %13043 = vst [vmem:[#allocation223_spill] sm:$0xff] %v7224_v56  ;;  %v11157_v14 = vld [vmem:[%s11154_s19 + $0x78] sm:$0xff]  ;;  %v11160_v36 = vld [vmem:[%s11154_s19 + $0x68] sm:$0xff]  ;;  %v11165_v24 = vld [vmem:[%s11154_s19 + $0x80] sm:$0xff]  ;;  %s11516_s21 = scalar_lea.vmem [#allocation2], %s6010_s20  ;;  %s4150_s15 = sadd.s32 1, %s7228_s15  }
 0x6fb   : > { %13044 = vst [vmem:[#allocation224_spill] sm:$0xff] %v11160_v36  ;;  %4195 = vperm.xlu1 %6700, %v11157_v14   ;;  %4185 = vperm.xlu0 %6699, %v11160_v36   ;;  %v11168_v54 = vld [vmem:[%s11154_s19 + $0x70] sm:$0xff]  ;;  %v11176_v22 = vld [vmem:[%s11154_s19 + $0x88] sm:$0xff]  ;;  %v11181_v46 = vld [vmem:[%s11154_s19 + $0xa0] sm:$0xff]  ;;  %p12270_p3 = scmp.ge.s32.totalorder %s4150_s15, 13  }
 0x6fc   : > { %v11173_v7 = vld [vmem:[%s11154_s19 + $0x90] sm:$0xff]  ;;  %13045 = vst [vmem:[#allocation225_spill] sm:$0xff] %v11176_v22  ;;  %v11184_v59 = vld [vmem:[%s11154_s19 + $0x98] sm:$0xff]  ;;  %v11192_v11 = vld [vmem:[%s11154_s19 + $0xa8] sm:$0xff]  ;;  %s12320_s2 = smov (%p12270_p3), 0  }
 0x6fd   : > { %v11189_v57 = vld [vmem:[%s11154_s19 + $0xb0] sm:$0xff]  ;;  %v11197_v45 = vld [vmem:[%s11154_s19 + $0xc0] sm:$0xff]  ;;  %v11200_v13 = vld [vmem:[%s11154_s19 + $0xb8] sm:$0xff] }
 0x6fe   : > { %13046 = vst [vmem:[#allocation226_spill] sm:$0xff] %v11189_v57  ;;  %13047 = vst [vmem:[#allocation227_spill] sm:$0xff] %v11197_v45  ;;  %v11205_v0 = vld [vmem:[%s11154_s19 + $0xc8] sm:$0xff] }
 0x6ff   : > { %4200 = vperm.xlu1 %6700, %v11165_v24   ;;  %4190 = vperm.xlu0 %6699, %v11168_v54  }
 0x703   : > { %4210 = vperm.xlu1 %6700, %v11173_v7   ;;  %4205 = vperm.xlu0 %6699, %v11176_v22  }
 0x707   : > { %4220 = vperm.xlu1 %6700, %v11181_v46   ;;  %4215 = vperm.xlu0 %6699, %v11184_v59  }
 0x70b   : > { %4230 = vperm.xlu1 %6700, %v11189_v57   ;;  %4225 = vperm.xlu0 %6699, %v11192_v11  }
 0x70f   : > { %4240 = vperm.xlu1 %6700, %v11197_v45   ;;  %4235 = vperm.xlu0 %6699, %v11200_v13  }
 0x713   : > { %6701 = vset.pattern.permute.xlu1 %v7291_v19  ;;  %4245 = vperm.xlu0 %6699, %v11205_v0  }
 0x714   : > { %4279 = vperm.xlu1 %6701, %v11160_v36  }
 0x717   : > { %6702 = vset.pattern.permute.xlu0 %v7291_v19 }
 0x718   : > { %4287 = vperm.xlu1 %6701, %v11157_v14   ;;  %4283 = vperm.xlu0 %6702, %v11168_v54  }
 0x71c   : > { %4291 = vperm.xlu1 %6701, %v11165_v24   ;;  %4295 = vperm.xlu0 %6702, %v11176_v22  }
 0x720   : > { %4299 = vperm.xlu1 %6701, %v11173_v7   ;;  %4303 = vperm.xlu0 %6702, %v11184_v59  }
 0x724   : > { %4307 = vperm.xlu1 %6701, %v11181_v46   ;;  %4311 = vperm.xlu0 %6702, %v11192_v11  }
 0x728   : > { %4315 = vperm.xlu1 %6701, %v11189_v57   ;;  %4319 = vperm.xlu0 %6702, %v11200_v13  }
 0x72c   : > { %4323 = vperm.xlu1 %6701, %v11197_v45   ;;  %4327 = vperm.xlu0 %6702, %v11205_v0  }
 0x730   : > { %6703 = vset.pattern.permute.xlu1 %v7292_v1  ;;  %6704 = vset.pattern.permute.xlu0 %v7292_v1 }
 0x731   : > { %4361 = vperm.xlu1 %6703, %v11160_v36   ;;  %4365 = vperm.xlu0 %6704, %v11168_v54  }
 0x735   : > { %4369 = vperm.xlu1 %6703, %v11157_v14   ;;  %4377 = vperm.xlu0 %6704, %v11176_v22  }
 0x739   : > { %4373 = vperm.xlu1 %6703, %v11165_v24   ;;  %4385 = vperm.xlu0 %6704, %v11184_v59  }
 0x73d   : > { %4381 = vperm.xlu1 %6703, %v11173_v7   ;;  %4393 = vperm.xlu0 %6704, %v11192_v11  }
 0x741   : > { %4389 = vperm.xlu1 %6703, %v11181_v46   ;;  %4401 = vperm.xlu0 %6704, %v11200_v13  }
 0x745   : > { %4397 = vperm.xlu1 %6703, %v11189_v57   ;;  %4409 = vperm.xlu0 %6704, %v11205_v0  }
 0x749   : > { %4405 = vperm.xlu1 %6703, %v11197_v45   ;;  %6706 = vset.pattern.permute.xlu0 %v7293_v26 }
 0x74a   : > { %4447 = vperm.xlu0 %6706, %v11168_v54  }
 0x74d   : > { %6705 = vset.pattern.permute.xlu1 %v7293_v26 }
 0x74e   : > { %4443 = vperm.xlu1 %6705, %v11160_v36   ;;  %4459 = vperm.xlu0 %6706, %v11176_v22  }
 0x752   : > { %4451 = vperm.xlu1 %6705, %v11157_v14   ;;  %4467 = vperm.xlu0 %6706, %v11184_v59  }
 0x756   : > { %4455 = vperm.xlu1 %6705, %v11165_v24   ;;  %4475 = vperm.xlu0 %6706, %v11192_v11  }
 0x75a   : > { %4463 = vperm.xlu1 %6705, %v11173_v7   ;;  %4483 = vperm.xlu0 %6706, %v11200_v13  }
 0x75e   : > { %4471 = vperm.xlu1 %6705, %v11181_v46   ;;  %4491 = vperm.xlu0 %6706, %v11205_v0  }
 0x762   : > { %4479 = vperm.xlu1 %6705, %v11189_v57   ;;  %6708 = vset.pattern.permute.xlu0 %v7294_v62 }
 0x763   : > { %4529 = vperm.xlu0 %6708, %v11168_v54  }
 0x766   : > { %4487 = vperm.xlu1 %6705, %v11197_v45  }
 0x767   : > { %4541 = vperm.xlu0 %6708, %v11176_v22  }
 0x76a   : > { %6707 = vset.pattern.permute.xlu1 %v7294_v62 }
 0x76b   : > { %4525 = vperm.xlu1 %6707, %v11160_v36   ;;  %4549 = vperm.xlu0 %6708, %v11184_v59  }
 0x76f   : > { %4533 = vperm.xlu1 %6707, %v11157_v14   ;;  %4557 = vperm.xlu0 %6708, %v11192_v11  }
 0x773   : > { %4537 = vperm.xlu1 %6707, %v11165_v24   ;;  %4565 = vperm.xlu0 %6708, %v11200_v13  }
 0x777   : > { %4545 = vperm.xlu1 %6707, %v11173_v7   ;;  %4573 = vperm.xlu0 %6708, %v11205_v0  }
 0x77a   : > { %v11257_v47 = vpop.permute.xlu1 %4195  ;;  %v11259_v42 = vpop.permute.xlu0 %4185 }
 0x77b   : > { %13048 = vst [vmem:[#allocation228_spill] sm:$0xff] %v11257_v47  ;;  %13049 = vst [vmem:[#allocation229_spill] sm:$0xff] %v11259_v42  ;;  %4553 = vperm.xlu1 %6707, %v11181_v46   ;;  %6710 = vset.pattern.permute.xlu0 %v7295_v30 }
 0x77c   : > { %4611 = vperm.xlu0 %6710, %v11168_v54  }
 0x77e   : > { %v11263_v2 = vpop.permute.xlu1 %4200  ;;  %v11265_v5 = vpop.permute.xlu0 %4190 }
 0x77f   : > { %13050 = vst [vmem:[#allocation230_spill] sm:$0xff] %v11263_v2  ;;  %4561 = vperm.xlu1 %6707, %v11189_v57  }
 0x780   : > { %4623 = vperm.xlu0 %6710, %v11176_v22  }
 0x782   : > { %v11269_v63 = vpop.permute.xlu1 %4210  ;;  %v11271_v10 = vpop.permute.xlu0 %4205 }
 0x783   : > { %13051 = vst [vmem:[#allocation231_spill] sm:$0xff] %v11269_v63  ;;  %4569 = vperm.xlu1 %6707, %v11197_v45  }
 0x784   : > { %4631 = vperm.xlu0 %6710, %v11184_v59  }
 0x786   : > { %v11275_v8 = vpop.permute.xlu1 %4220  ;;  %v11277_v16 = vpop.permute.xlu0 %4215 }
 0x787   : > { %13052 = vst [vmem:[#allocation232_spill] sm:$0xff] %v11275_v8  ;;  %6709 = vset.pattern.permute.xlu1 %v7295_v30 }
 0x788   : > { %4607 = vperm.xlu1 %6709, %v11160_v36   ;;  %4639 = vperm.xlu0 %6710, %v11192_v11  }
 0x78a   : > { %v11281_v40 = vpop.permute.xlu1 %4230  ;;  %v11283_v41 = vpop.permute.xlu0 %4225 }
 0x78b   : > { %13053 = vst [vmem:[#allocation233_spill] sm:$0xff] %v11281_v40 }
 0x78c   : > { %4615 = vperm.xlu1 %6709, %v11157_v14   ;;  %4647 = vperm.xlu0 %6710, %v11200_v13  }
 0x78e   : > { %v11287_v28 = vpop.permute.xlu1 %4240  ;;  %v11289_v27 = vpop.permute.xlu0 %4235 }
 0x78f   : > { %13054 = vst [vmem:[#allocation234_spill] sm:$0xff] %v11287_v28 }
 0x790   : > { %4619 = vperm.xlu1 %6709, %v11165_v24   ;;  %4655 = vperm.xlu0 %6710, %v11205_v0  }
 0x792   : > { %v11293_v60 = vpop.permute.xlu0 %4245 }
 0x793   : > { %v11295_v49 = vpop.permute.xlu1 %4279 }
 0x794   : > { %13055 = vst [vmem:[#allocation235_spill] sm:$0xff] %v11295_v49  ;;  %4627 = vperm.xlu1 %6709, %v11173_v7   ;;  %6712 = vset.pattern.permute.xlu0 %v7296_v21 }
 0x795   : > { %4693 = vperm.xlu0 %6712, %v11168_v54  }
 0x797   : > { %v11299_v52 = vpop.permute.xlu1 %4287  ;;  %v11301_v9 = vpop.permute.xlu0 %4283 }
 0x798   : > { %13056 = vst [vmem:[#allocation236_spill] sm:$0xff] %v11299_v52  ;;  %4635 = vperm.xlu1 %6709, %v11181_v46  }
 0x799   : > { %4705 = vperm.xlu0 %6712, %v11176_v22  }
 0x79b   : > { %v11305_v33 = vpop.permute.xlu1 %4291  ;;  %v11307_v29 = vpop.permute.xlu0 %4295 }
 0x79c   : > { %13057 = vst [vmem:[#allocation237_spill] sm:$0xff] %v11305_v33  ;;  %4643 = vperm.xlu1 %6709, %v11189_v57  }
 0x79d   : > { %4713 = vperm.xlu0 %6712, %v11184_v59  }
 0x79f   : > { %v11311_v25 = vpop.permute.xlu1 %4299  ;;  %v11313_v48 = vpop.permute.xlu0 %4303 }
 0x7a0   : > { %13058 = vst [vmem:[#allocation238_spill] sm:$0xff] %v11311_v25  ;;  %4651 = vperm.xlu1 %6709, %v11197_v45  }
 0x7a1   : > { %4721 = vperm.xlu0 %6712, %v11192_v11  }
 0x7a3   : > { %v11317_v43 = vpop.permute.xlu1 %4307  ;;  %v11319_v31 = vpop.permute.xlu0 %4311 }
 0x7a4   : > { %13059 = vst [vmem:[#allocation239_spill] sm:$0xff] %v11317_v43  ;;  %6711 = vset.pattern.permute.xlu1 %v7296_v21 }
 0x7a5   : > { %4689 = vperm.xlu1 %6711, %v11160_v36   ;;  %4729 = vperm.xlu0 %6712, %v11200_v13  }
 0x7a7   : > { %v11323_v23 = vpop.permute.xlu1 %4315  ;;  %v11325_v50 = vpop.permute.xlu0 %4319 }
 0x7a8   : > { %13060 = vst [vmem:[#allocation240_spill] sm:$0xff] %v11323_v23 }
 0x7a9   : > { %4697 = vperm.xlu1 %6711, %v11157_v14   ;;  %4737 = vperm.xlu0 %6712, %v11205_v0  }
 0x7ab   : > { %v11329_v39 = vpop.permute.xlu1 %4323  ;;  %v11331_v44 = vpop.permute.xlu0 %4327 }
 0x7ac   : > { %13061 = vst [vmem:[#allocation241_spill] sm:$0xff] %v11329_v39 }
 0x7ad   : > { %4701 = vperm.xlu1 %6711, %v11165_v24   ;;  %6714 = vset.pattern.permute.xlu0 %v7297_v6 }
 0x7ae   : > { %4775 = vperm.xlu0 %6714, %v11168_v54  }
 0x7b0   : > { %v11335_v32 = vpop.permute.xlu1 %4361  ;;  %v11337_v38 = vpop.permute.xlu0 %4365 }
 0x7b1   : > { %13062 = vst [vmem:[#allocation242_spill] sm:$0xff] %v11335_v32  ;;  %4709 = vperm.xlu1 %6711, %v11173_v7  }
 0x7b2   : > { %4787 = vperm.xlu0 %6714, %v11176_v22  }
 0x7b4   : > { %v11341_v55 = vpop.permute.xlu1 %4369  ;;  %v11343_v37 = vpop.permute.xlu0 %4377 }
 0x7b5   : > { %13063 = vst [vmem:[#allocation243_spill] sm:$0xff] %v11341_v55  ;;  %4717 = vperm.xlu1 %6711, %v11181_v46  }
 0x7b6   : > { %4795 = vperm.xlu0 %6714, %v11184_v59  }
 0x7b8   : > { %v11347_v19 = vpop.permute.xlu1 %4373  ;;  %v11349_v1 = vpop.permute.xlu0 %4385 }
 0x7b9   : > { %13064 = vst [vmem:[#allocation244_spill] sm:$0xff] %v11347_v19  ;;  %4725 = vperm.xlu1 %6711, %v11189_v57  }
 0x7ba   : > { %4803 = vperm.xlu0 %6714, %v11192_v11  }
 0x7bc   : > { %v11353_v26 = vpop.permute.xlu1 %4381  ;;  %v11355_v62 = vpop.permute.xlu0 %4393 }
 0x7bd   : > { %13065 = vst [vmem:[#allocation245_spill] sm:$0xff] %v11353_v26  ;;  %4733 = vperm.xlu1 %6711, %v11197_v45   ;;  %v7298_v26 = vmov 8  }
 0x7be   : > { %4811 = vperm.xlu0 %6714, %v11200_v13  }
 0x7c0   : > { %v11359_v30 = vpop.permute.xlu1 %4389  ;;  %v11361_v21 = vpop.permute.xlu0 %4401 }
 0x7c1   : > { %13066 = vst [vmem:[#allocation246_spill] sm:$0xff] %v11359_v30  ;;  %13067 = vst [vmem:[#allocation247_spill] sm:$0xff] %v11361_v21  ;;  %6713 = vset.pattern.permute.xlu1 %v7297_v6 }
 0x7c2   : > { %4771 = vperm.xlu1 %6713, %v11160_v36   ;;  %4819 = vperm.xlu0 %6714, %v11205_v0  }
 0x7c4   : > { %v11365_v19 = vpop.permute.xlu1 %4397  ;;  %v11367_v58 = vpop.permute.xlu0 %4409 }
 0x7c5   : > { %13068 = vst [vmem:[#allocation248_spill] sm:$0xff] %v11365_v19 }
 0x7c6   : > { %4779 = vperm.xlu1 %6713, %v11157_v14   ;;  %6716 = vset.pattern.permute.xlu0 %v7298_v26 }
 0x7c7   : > { %4857 = vperm.xlu0 %6716, %v11168_v54  }
 0x7c8   : > { %v11371_v55 = vpop.permute.xlu1 %4405 }
 0x7c9   : > { %13069 = vst [vmem:[#allocation249_spill] sm:$0xff] %v11371_v55  ;;  %v11373_v30 = vpop.permute.xlu0 %4447 }
 0x7ca   : > { %4783 = vperm.xlu1 %6713, %v11165_v24  }
 0x7cb   : > { %4869 = vperm.xlu0 %6716, %v11176_v22  }
 0x7cd   : > { %v11377_v6 = vpop.permute.xlu1 %4443  ;;  %v11379_v39 = vpop.permute.xlu0 %4459 }
 0x7ce   : > { %13070 = vst [vmem:[#allocation250_spill] sm:$0xff] %v11377_v6  ;;  %4791 = vperm.xlu1 %6713, %v11173_v7  }
 0x7cf   : > { %4877 = vperm.xlu0 %6716, %v11184_v59  }
 0x7d1   : > { %v11383_v19 = vpop.permute.xlu1 %4451  ;;  %v11385_v23 = vpop.permute.xlu0 %4467 }
 0x7d2   : > { %13071 = vst [vmem:[#allocation251_spill] sm:$0xff] %v11383_v19  ;;  %4799 = vperm.xlu1 %6713, %v11181_v46  }
 0x7d3   : > { %4885 = vperm.xlu0 %6716, %v11192_v11  }
 0x7d5   : > { %v11389_v55 = vpop.permute.xlu1 %4455  ;;  %v11391_v4 = vpop.permute.xlu0 %4475 }
 0x7d6   : > { %13072 = vst [vmem:[#allocation252_spill] sm:$0xff] %v11389_v55  ;;  %4807 = vperm.xlu1 %6713, %v11189_v57   ;;  %v7299_v55 = vmov 9  }
 0x7d7   : > { %4893 = vperm.xlu0 %6716, %v11200_v13  }
 0x7d9   : > { %v11395_v6 = vpop.permute.xlu1 %4463  ;;  %v11397_v32 = vpop.permute.xlu0 %4483 }
 0x7da   : > { %13073 = vst [vmem:[#allocation253_spill] sm:$0xff] %v11395_v6  ;;  %13074 = vst [vmem:[#allocation254_spill] sm:$0xff] %v11397_v32  ;;  %4815 = vperm.xlu1 %6713, %v11197_v45  }
 0x7db   : > { %4901 = vperm.xlu0 %6716, %v11205_v0  }
 0x7dd   : > { %v11401_v19 = vpop.permute.xlu1 %4471  ;;  %v11403_v43 = vpop.permute.xlu0 %4491 }
 0x7de   : > { %13075 = vst [vmem:[#allocation255_spill] sm:$0xff] %v11401_v19  ;;  %6715 = vset.pattern.permute.xlu1 %v7298_v26 }
 0x7df   : > { %4853 = vperm.xlu1 %6715, %v11160_v36   ;;  %6718 = vset.pattern.permute.xlu0 %v7299_v55 }
 0x7e0   : > { %4939 = vperm.xlu0 %6718, %v11168_v54  }
 0x7e1   : > { %v11407_v35 = vpop.permute.xlu1 %4479 }
 0x7e2   : > { %13076 = vst [vmem:[#allocation256_spill] sm:$0xff] %v11407_v35  ;;  %v11409_v6 = vpop.permute.xlu0 %4529 }
 0x7e3   : > { %4861 = vperm.xlu1 %6715, %v11157_v14  }
 0x7e4   : > { %4951 = vperm.xlu0 %6718, %v11176_v22  }
 0x7e5   : > { %v11413_v25 = vpop.permute.xlu1 %4487 }
 0x7e6   : > { %13077 = vst [vmem:[#allocation257_spill] sm:$0xff] %v11413_v25  ;;  %v11415_v19 = vpop.permute.xlu0 %4541 }
 0x7e7   : > { %4865 = vperm.xlu1 %6715, %v11165_v24  }
 0x7e8   : > { %4959 = vperm.xlu0 %6718, %v11184_v59  }
 0x7ea   : > { %v11419_v26 = vpop.permute.xlu1 %4525  ;;  %v11421_v33 = vpop.permute.xlu0 %4549 }
 0x7eb   : > { %13078 = vst [vmem:[#allocation258_spill] sm:$0xff] %v11419_v26  ;;  %4873 = vperm.xlu1 %6715, %v11173_v7  }
 0x7ec   : > { %4967 = vperm.xlu0 %6718, %v11192_v11  }
 0x7ee   : > { %v11425_v35 = vpop.permute.xlu1 %4533  ;;  %v11427_v52 = vpop.permute.xlu0 %4557 }
 0x7ef   : > { %13079 = vst [vmem:[#allocation259_spill] sm:$0xff] %v11425_v35  ;;  %13080 = vst [vmem:[#allocation260_spill] sm:$0xff] %v11427_v52  ;;  %4881 = vperm.xlu1 %6715, %v11181_v46   ;;  %v7300_v35 = vmov 10  }
 0x7f0   : > { %4975 = vperm.xlu0 %6718, %v11200_v13  }
 0x7f2   : > { %v11431_v25 = vpop.permute.xlu1 %4537  ;;  %v11433_v3 = vpop.permute.xlu0 %4565 }
 0x7f3   : > { %13081 = vst [vmem:[#allocation261_spill] sm:$0xff] %v11431_v25  ;;  %13082 = vst [vmem:[#allocation262_spill] sm:$0xff] %v11433_v3  ;;  %4889 = vperm.xlu1 %6715, %v11189_v57  }
 0x7f4   : > { %4983 = vperm.xlu0 %6718, %v11205_v0  }
 0x7f6   : > { %v11437_v26 = vpop.permute.xlu1 %4545  ;;  %v11439_v49 = vpop.permute.xlu0 %4573 }
 0x7f7   : > { %13083 = vst [vmem:[#allocation263_spill] sm:$0xff] %v11437_v26  ;;  %4897 = vperm.xlu1 %6715, %v11197_v45  }
 0x7f8   : > { %6720 = vset.pattern.permute.xlu0 %v7300_v35 }
 0x7f9   : > { %5021 = vperm.xlu0 %6720, %v11168_v54  }
 0x7fa   : > { %v11443_v28 = vpop.permute.xlu1 %4553 }
 0x7fb   : > { %13084 = vst [vmem:[#allocation264_spill] sm:$0xff] %v11443_v28  ;;  %6717 = vset.pattern.permute.xlu1 %v7299_v55  ;;  %v11445_v25 = vpop.permute.xlu0 %4611 }
 0x7fc   : > { %4935 = vperm.xlu1 %6717, %v11160_v36  }
 0x7fd   : > { %5033 = vperm.xlu0 %6720, %v11176_v22  }
 0x7fe   : > { %v11449_v34 = vpop.permute.xlu1 %4561 }
 0x7ff   : > { %13085 = vst [vmem:[#allocation265_spill] sm:$0xff] %v11449_v34  ;;  %v11451_v26 = vpop.permute.xlu0 %4623 }
 0x800   : > { %4943 = vperm.xlu1 %6717, %v11157_v14  }
 0x801   : > { %5041 = vperm.xlu0 %6720, %v11184_v59  }
 0x802   : > { %v11455_v40 = vpop.permute.xlu1 %4569 }
 0x803   : > { %13086 = vst [vmem:[#allocation266_spill] sm:$0xff] %v11455_v40  ;;  %v11457_v56 = vpop.permute.xlu0 %4631 }
 0x804   : > { %4947 = vperm.xlu1 %6717, %v11165_v24  }
 0x805   : > { %5049 = vperm.xlu0 %6720, %v11192_v11  }
 0x807   : > { %v11461_v55 = vpop.permute.xlu1 %4607  ;;  %v11463_v28 = vpop.permute.xlu0 %4639 }
 0x808   : > { %13087 = vst [vmem:[#allocation267_spill] sm:$0xff] %v11461_v55  ;;  %13088 = vst [vmem:[#allocation268_spill] sm:$0xff] %v11463_v28  ;;  %4955 = vperm.xlu1 %6717, %v11173_v7   ;;  %v7301_v55 = vmov 11  }
 0x809   : > { %5057 = vperm.xlu0 %6720, %v11200_v13  }
 0x80b   : > { %v11467_v34 = vpop.permute.xlu1 %4615  ;;  %v11469_v12 = vpop.permute.xlu0 %4647 }
 0x80c   : > { %13089 = vst [vmem:[#allocation269_spill] sm:$0xff] %v11467_v34  ;;  %13090 = vst [vmem:[#allocation270_spill] sm:$0xff] %v11469_v12  ;;  %4963 = vperm.xlu1 %6717, %v11181_v46  }
 0x80d   : > { %5065 = vperm.xlu0 %6720, %v11205_v0  }
 0x80f   : > { %v11473_v40 = vpop.permute.xlu1 %4619  ;;  %v11475_v8 = vpop.permute.xlu0 %4655 }
 0x810   : > { %13091 = vst [vmem:[#allocation271_spill] sm:$0xff] %v11473_v40  ;;  %4971 = vperm.xlu1 %6717, %v11189_v57  }
 0x811   : > { %6722 = vset.pattern.permute.xlu0 %v7301_v55 }
 0x812   : > { %5103 = vperm.xlu0 %6722, %v11168_v54  }
 0x813   : > { %v11479_v63 = vpop.permute.xlu1 %4627 }
 0x814   : > { %13092 = vst [vmem:[#allocation272_spill] sm:$0xff] %v11479_v63  ;;  %4979 = vperm.xlu1 %6717, %v11197_v45   ;;  %v11482_v34 = vpop.permute.xlu0 %4693 }
 0x816   : > { %5115 = vperm.xlu0 %6722, %v11176_v22  }
 0x817   : > { %v11485_v2 = vpop.permute.xlu1 %4635 }
 0x818   : > { %13093 = vst [vmem:[#allocation273_spill] sm:$0xff] %v11485_v2  ;;  %6719 = vset.pattern.permute.xlu1 %v7300_v35  ;;  %v11487_v40 = vpop.permute.xlu0 %4705 }
 0x819   : > { %5017 = vperm.xlu1 %6719, %v11160_v36  }
 0x81a   : > { %5123 = vperm.xlu0 %6722, %v11184_v59  }
 0x81b   : > { %v11491_v42 = vpop.permute.xlu1 %4643 }
 0x81c   : > { %13094 = vst [vmem:[#allocation274_spill] sm:$0xff] %v11491_v42  ;;  %v11493_v47 = vpop.permute.xlu0 %4713 }
 0x81d   : > { %13095 = vst [vmem:[#allocation275_spill] sm:$0xff] %v11493_v47  ;;  %5025 = vperm.xlu1 %6719, %v11157_v14  }
 0x81e   : > { %5131 = vperm.xlu0 %6722, %v11192_v11  }
 0x81f   : > { %v11497_v63 = vpop.permute.xlu1 %4651 }
 0x820   : > { %13096 = vst [vmem:[#allocation276_spill] sm:$0xff] %v11497_v63  ;;  %v11499_v12 = vpop.permute.xlu0 %4721  ;;  %v12484_v63 = vmov 12  }
 0x821   : > { %13097 = vst [vmem:[#allocation277_spill] sm:$0xff] %v11499_v12  ;;  %5029 = vperm.xlu1 %6719, %v11165_v24  }
 0x822   : > { %5139 = vperm.xlu0 %6722, %v11200_v13  }
 0x824   : > { %v11503_v35 = vpop.permute.xlu1 %4689  ;;  %v11505_v2 = vpop.permute.xlu0 %4729 }
 0x825   : > { %13098 = vst [vmem:[#allocation278_spill] sm:$0xff] %v11503_v35  ;;  %13099 = vst [vmem:[#allocation279_spill] sm:$0xff] %v11505_v2  ;;  %5037 = vperm.xlu1 %6719, %v11173_v7   ;;  %v11519_v35 = vld [vmem:[%s11516_s21] sm:$0xff] }
 0x826   : > { %5147 = vperm.xlu0 %6722, %v11205_v0  }
 0x828   : > { %v11510_v42 = vpop.permute.xlu1 %4697  ;;  %v11512_v3 = vpop.permute.xlu0 %4737 }
 0x829   : > { %13100 = vst [vmem:[#allocation280_spill] sm:$0xff] %v11510_v42  ;;  %5045 = vperm.xlu1 %6719, %v11181_v46   ;;  %v13102_v42 = vld [vmem:[#allocation69_spill] sm:$0xff] }
 0x82a   : > { %6724 = vset.pattern.permute.xlu0 %v12484_v63  ;;  %v11529_v28 = vrot.slane %v11519_v35, %v13102_v42 }
 0x82b   : > { %5185 = vperm.xlu0 %6724, %v11168_v54  }
 0x82c   : > { %v11522_v2 = vpop.permute.xlu1 %4701  ;;  %v4264_v63 = vadd.f32 %v11529_v28, %v11293_v60  ;;  %v4253_v47 = vadd.f32 %v11529_v28, %v11265_v5  ;;  %v4256_v21 = vadd.f32 %v11529_v28, %v11271_v10 }
 0x82d   : > { %13101 = vst [vmem:[#allocation281_spill] sm:$0xff] %v11522_v2  ;;  %5053 = vperm.xlu1 %6719, %v11189_v57   ;;  %v11525_v12 = vpop.permute.xlu0 %4775  ;;  %v13105_v57 = vld [vmem:[#allocation71_spill] sm:$0xff] }
 0x82e   : > { %v11543_v52 = vrot.slane %v11519_v35, %v13105_v57  ;;  %v4277_v60 = vmax.f32 %v7176_v18, %v4264_v63  ;;  %v4258_v18 = vadd.f32 %v11529_v28, %v11277_v16 }
 0x82f   : > { %5197 = vperm.xlu0 %6724, %v11176_v22   ;;  %v13106_v22 = vld [vmem:[#allocation72_spill] sm:$0xff] }
 0x830   : > { %v11534_v32 = vpop.permute.xlu1 %4709  ;;  %v11553_v5 = vrot.slane %v11519_v35, %v13106_v22  ;;  %v4335_v57 = vadd.f32 %v11543_v52, %v11301_v9 }
 0x831   : > { %13103 = vst [vmem:[#allocation282_spill] sm:$0xff] %v11534_v32  ;;  %5061 = vperm.xlu1 %6719, %v11197_v45   ;;  %v11539_v2 = vpop.permute.xlu0 %4787  ;;  %v4346_v32 = vadd.f32 %v11543_v52, %v11331_v44  ;;  %v13108_v44 = vld [vmem:[#allocation75_spill] sm:$0xff] }
 0x832   : > { %13104 = vst [vmem:[#allocation283_spill] sm:$0xff] %v11539_v2  ;;  %v4266_v2 = vmax.f32 %v7220_v51, %v4253_v47  ;;  %v4428_v63 = vadd.f32 %v11553_v5, %v11367_v58  ;;  %v11568_v22 = vrot.slane %v11519_v35, %v13108_v44  ;;  %v4269_v51 = vmax.f32 %v7208_v15, %v4256_v21 }
 0x833   : > { %5205 = vperm.xlu0 %6724, %v11184_v59   ;;  %v4338_v47 = vadd.f32 %v11543_v52, %v11307_v29  ;;  %v4359_v9 = vmax.f32 %v4277_v60, %v4346_v32  ;;  %v4260_v44 = vadd.f32 %v11529_v28, %v11283_v41  ;;  %v4417_v15 = vadd.f32 %v11553_v5, %v11337_v38 }
 0x834   : > { %v11555_v45 = vpop.permute.xlu1 %4717  ;;  %v4510_v16 = vadd.f32 %v11568_v22, %v11403_v43  ;;  %v11589_v29 = vrot.slane %v11519_v35, %v7840_v20  ;;  %v4271_v43 = vmax.f32 %v7200_v53, %v4258_v18  ;;  %v4340_v21 = vadd.f32 %v11543_v52, %v11313_v48  ;;  %v13110_v48 = vld [vmem:[#allocation78_spill] sm:$0xff] }
 0x835   : > { %13107 = vst [vmem:[#allocation284_spill] sm:$0xff] %v11555_v45  ;;  %6721 = vset.pattern.permute.xlu1 %v7301_v55  ;;  %v11560_v10 = vpop.permute.xlu0 %4795  ;;  %v13109_v55 = vld [vmem:[#allocation76_spill] sm:$0xff]  ;;  %v4441_v60 = vmax.f32 %v4359_v9, %v4428_v63  ;;  %v4499_v41 = vadd.f32 %v11568_v22, %v11373_v30  ;;  %v11608_v18 = vrot.slane %v11519_v35, %v13110_v48 }
 0x836   : > { %5099 = vperm.xlu1 %6721, %v11160_v36   ;;  %v11579_v58 = vrot.slane %v11519_v35, %v13109_v55  ;;  %v4348_v36 = vmax.f32 %v4266_v2, %v4335_v57  ;;  %v4351_v57 = vmax.f32 %v4269_v51, %v4338_v47  ;;  %v4420_v2 = vadd.f32 %v11553_v5, %v11343_v37 }
 0x837   : > { %5213 = vperm.xlu0 %6724, %v11192_v11   ;;  %v4523_v38 = vmax.f32 %v4441_v60, %v4510_v16  ;;  %v4674_v53 = vadd.f32 %v11589_v29, %v11475_v8  ;;  %v4273_v63 = vmax.f32 %v7192_v17, %v4260_v44  ;;  %v4502_v37 = vadd.f32 %v11568_v22, %v11379_v39  ;;  %v13111_v44 = vld [vmem:[#allocation80_spill] sm:$0xff] }
 0x838   : > { %v11581_v45 = vpop.permute.xlu1 %4725  ;;  %v4592_v55 = vadd.f32 %v11579_v58, %v11439_v49  ;;  %v4430_v51 = vmax.f32 %v4348_v36, %v4417_v15  ;;  %v4581_v30 = vadd.f32 %v11579_v58, %v11409_v6  ;;  %v4262_v8 = vadd.f32 %v11529_v28, %v11289_v27  ;;  %v11636_v15 = vld [vmem:[%s11516_s21 + $0x8] sm:$0xff] }
 0x839   : > { %v11591_v32 = vpop.permute.xlu0 %4803  ;;  %v4353_v9 = vmax.f32 %v4271_v43, %v4340_v21  ;;  %v4756_v60 = vadd.f32 %v11608_v18, %v11512_v3  ;;  %v4433_v17 = vmax.f32 %v4351_v57, %v4420_v2  ;;  %v4663_v39 = vadd.f32 %v11589_v29, %v11445_v25 }
 0x83a   : > { %5107 = vperm.xlu1 %6721, %v11157_v14   ;;  %v4605_v16 = vmax.f32 %v4523_v38, %v4592_v55  ;;  %v4512_v36 = vmax.f32 %v4430_v51, %v4499_v41  ;;  %v11628_v6 = vrot.slane %v11519_v35, %v13111_v44  ;;  %v4422_v27 = vadd.f32 %v11553_v5, %v11349_v1  ;;  %v13168_v44 = vld [vmem:[#allocation261_spill] sm:$0xff] }
 0x83b   : > { %5221 = vperm.xlu0 %6724, %v11200_v13   ;;  %v4584_v55 = vadd.f32 %v11579_v58, %v11415_v19  ;;  %v4342_v43 = vadd.f32 %v11543_v52, %v11319_v31  ;;  %v4515_v21 = vmax.f32 %v4433_v17, %v4502_v37  ;;  %v4745_v35 = vadd.f32 %v11608_v18, %v11482_v34 }
 0x83c   : > { %v11610_v49 = vpop.permute.xlu1 %4733  ;;  %v4687_v3 = vmax.f32 %v4605_v16, %v4674_v53  ;;  %v4594_v25 = vmax.f32 %v4512_v36, %v4581_v30  ;;  %v4504_v1 = vadd.f32 %v11568_v22, %v11385_v23  ;;  %v4666_v19 = vadd.f32 %v11589_v29, %v11451_v26 }
 0x83d   : > { %v11617_v47 = vpop.permute.xlu0 %4811  ;;  %v4275_v31 = vmax.f32 %v7184_v61, %v4262_v8  ;;  %v4827_v34 = vadd.f32 %v11628_v6, %v11525_v12  ;;  %v12493_v51 = vmov 13   ;;  %v11656_v23 = vrot.slane %v11636_v15, %v13102_v42 }
 0x83e   : > { %5111 = vperm.xlu1 %6721, %v11165_v24   ;;  %v4769_v41 = vmax.f32 %v4687_v3, %v4756_v60  ;;  %v4676_v53 = vmax.f32 %v4594_v25, %v4663_v39  ;;  %v4435_v37 = vmax.f32 %v4353_v9, %v4422_v27  ;;  %v4424_v26 = vadd.f32 %v11553_v5, %v11355_v62  ;;  %v13112_v27 = vld [vmem:[#allocation283_spill] sm:$0xff]  ;;  %v13115_v25 = vld [vmem:[#allocation225_spill] sm:$0xff] }
 0x83f   : > { %5229 = vperm.xlu0 %6724, %v11205_v0   ;;  %v4597_v30 = vmax.f32 %v4515_v21, %v4584_v55  ;;  %v4355_v61 = vmax.f32 %v4273_v63, %v4342_v43  ;;  %v4586_v12 = vadd.f32 %v11579_v58, %v11421_v33  ;;  %v4748_v60 = vadd.f32 %v11608_v18, %v11487_v40  ;;  %v13113_v3 = vld [vmem:[#allocation247_spill] sm:$0xff] }
 0x840   : > { %v4758_v8 = vmax.f32 %v4676_v53, %v4745_v35  ;;  %v4344_v42 = vadd.f32 %v11543_v52, %v11325_v50  ;;  %v4517_v9 = vmax.f32 %v4435_v37, %v4504_v1  ;;  %v4506_v62 = vadd.f32 %v11568_v22, %v11391_v4  ;;  %v13114_v4 = vld [vmem:[#allocation260_spill] sm:$0xff] }
 0x841   : > { %v11642_v57 = vpop.permute.xlu1 %4771  ;;  %v4820_v2 = vpop.permute.xlu0 %4819  ;;  %v4679_v36 = vmax.f32 %v4597_v30, %v4666_v19  ;;  %v4668_v33 = vadd.f32 %v11589_v29, %v11457_v56  ;;  %v4830_v40 = vadd.f32 %v11628_v6, %v13112_v27  ;;  %v4437_v50 = vmax.f32 %v4355_v61, %v4424_v26  ;;  %v13116_v56 = vld [vmem:[#allocation275_spill] sm:$0xff]  ;;  %v13118_v26 = vld [vmem:[#allocation268_spill] sm:$0xff]  ;;  %v13119_v61 = vld [vmem:[#allocation226_spill] sm:$0xff] }
 0x842   : > { %v4838_v38 = vadd.f32 %v11628_v6, %v4820_v2  ;;  %5119 = vperm.xlu1 %6721, %v11173_v7   ;;  %v11676_v39 = vmax.f32 %v4758_v8, %v4827_v34  ;;  %v4426_v43 = vadd.f32 %v11553_v5, %v13113_v3  ;;  %v4588_v21 = vadd.f32 %v11579_v58, %v13114_v4  ;;  %v13117_v34 = vld [vmem:[#allocation254_spill] sm:$0xff] }
 0x843   : > { %6726 = vset.pattern.permute.xlu0 %v12493_v51  ;;  %v4599_v35 = vmax.f32 %v4517_v9, %v4586_v12  ;;  %v4761_v2 = vmax.f32 %v4679_v36, %v4748_v60  ;;  %v4750_v1 = vadd.f32 %v11608_v18, %v13116_v56  ;;  %v4519_v53 = vmax.f32 %v4437_v50, %v4506_v62  ;;  %v13120_v62 = vld [vmem:[#allocation262_spill] sm:$0xff]  ;;  %v13121_v50 = vld [vmem:[#allocation277_spill] sm:$0xff] }
 0x844   : > { %v11660_v16 = vmax.f32 %v4769_v41, %v4838_v38  ;;  %5267 = vperm.xlu0 %6726, %v11168_v54   ;;  %v4357_v38 = vmax.f32 %v4275_v31, %v4344_v42  ;;  %v4508_v37 = vadd.f32 %v11568_v22, %v13117_v34  ;;  %v4670_v30 = vadd.f32 %v11589_v29, %v13118_v26  ;;  %v13124_v26 = vld [vmem:[#allocation279_spill] sm:$0xff] }
 0x845   : > { %v11667_v17 = vpop.permute.xlu1 %4779  ;;  %v4681_v8 = vmax.f32 %v4599_v35, %v4668_v33  ;;  %v11699_v60 = vmax.f32 %v4761_v2, %v4830_v40  ;;  %v4832_v9 = vadd.f32 %v11628_v6, %v11560_v10  ;;  %v4601_v42 = vmax.f32 %v4519_v53, %v4588_v21  ;;  %v13122_v35 = vld [vmem:[#allocation227_spill] sm:$0xff]  ;;  %v13123_v21 = vld [vmem:[#allocation270_spill] sm:$0xff] }
 0x846   : > { %5127 = vperm.xlu1 %6721, %v11181_v46   ;;  %v4858_v63 = vpop.permute.xlu0 %4857  ;;  %v4439_v31 = vmax.f32 %v4357_v38, %v4426_v43  ;;  %v4752_v3 = vadd.f32 %v11608_v18, %v13121_v50  ;;  %v4672_v2 = vadd.f32 %v11589_v29, %v13123_v21 }
 0x847   : > { %v11681_v55 = vadd.f32 %v11656_v23, %v4858_v63  ;;  %v4590_v63 = vadd.f32 %v11579_v58, %v13120_v62  ;;  %v4763_v27 = vmax.f32 %v4681_v8, %v4750_v1  ;;  %v4683_v4 = vmax.f32 %v4601_v42, %v4670_v30  ;;  %v13126_v42 = vld [vmem:[#allocation224_spill] sm:$0xff] }
 0x848   : > { %5279 = vperm.xlu0 %6726, %v13115_v25   ;;  %v4521_v10 = vmax.f32 %v4439_v31, %v4508_v37  ;;  %v4834_v1 = vadd.f32 %v11628_v6, %v11591_v32  ;;  %v4754_v37 = vadd.f32 %v11608_v18, %v13124_v26  ;;  %v13125_v8 = vmov 12  }
 0x849   : > { %v4922_v19 = vmax.f32 %v11676_v39, %v11681_v55  ;;  %v11692_v41 = vpop.permute.xlu1 %4783  ;;  %v11718_v56 = vmax.f32 %v4763_v27, %v4832_v9  ;;  %v4765_v34 = vmax.f32 %v4683_v4, %v4752_v3  ;;  %v4836_v32 = vadd.f32 %v11628_v6, %v11617_v47  ;;  %v13148_v47 = vld [vmem:[#allocation241_spill] sm:$0xff] }
 0x84a   : > { %5135 = vperm.xlu1 %6721, %v13119_v61   ;;  %v4870_v12 = vpop.permute.xlu0 %4869  ;;  %v4603_v53 = vmax.f32 %v4521_v10, %v4590_v63 }
 0x84b   : > { %v11704_v36 = vadd.f32 %v11656_v23, %v4870_v12 }
 0x84c   : > { %5287 = vperm.xlu0 %6726, %v11184_v59   ;;  %v4685_v9 = vmax.f32 %v4603_v53, %v4672_v2  ;;  %v12492_v2 = vmov 14  }
 0x84d   : > { %v4925_v33 = vmax.f32 %v11699_v60, %v11704_v36  ;;  %v11713_v40 = vpop.permute.xlu1 %4791  ;;  %v11730_v36 = vmax.f32 %v4765_v34, %v4834_v1 }
 0x84e   : > { %5143 = vperm.xlu1 %6721, %v13122_v35   ;;  %v4878_v43 = vpop.permute.xlu0 %4877  ;;  %v4767_v62 = vmax.f32 %v4685_v9, %v4754_v37  ;;  %v13128_v37 = vld [vmem:[#allocation228_spill] sm:$0xff]  ;;  %v13131_v9 = vld [vmem:[#allocation231_spill] sm:$0xff] }
 0x84f   : > { %v4914_v38 = vadd.f32 %v11656_v23, %v4878_v43 }
 0x850   : > { %5295 = vperm.xlu0 %6726, %v11192_v11   ;;  %v11743_v3 = vmax.f32 %v4767_v62, %v4836_v32 }
 0x851   : > { %v4927_v30 = vmax.f32 %v11718_v56, %v4914_v38  ;;  %v11727_v12 = vpop.permute.xlu1 %4799  ;;  %v13127_v56 = vld [vmem:[#allocation71_spill] sm:$0xff] }
 0x852   : > { %6723 = vset.pattern.permute.xlu1 %v13125_v8  ;;  %v4886_v60 = vpop.permute.xlu0 %4885  ;;  %v11761_v1 = vrot.slane %v11636_v15, %v13127_v56  ;;  %v13129_v8 = vld [vmem:[#allocation229_spill] sm:$0xff]  ;;  %v13134_v56 = vld [vmem:[#allocation223_spill] sm:$0xff] }
 0x853   : > { %v11735_v31 = vadd.f32 %v11656_v23, %v4886_v60  ;;  %5181 = vperm.xlu1 %6723, %v13126_v42   ;;  %v4252_v60 = vadd.f32 %v11529_v28, %v13129_v8  ;;  %v13132_v42 = vld [vmem:[#allocation232_spill] sm:$0xff]  ;;  %v13138_v8 = vld [vmem:[#allocation235_spill] sm:$0xff] }
 0x854   : > { %5303 = vperm.xlu0 %6726, %v11200_v13   ;;  %v4259_v62 = vadd.f32 %v11529_v28, %v13132_v42 }
 0x855   : > { %v4929_v63 = vmax.f32 %v11730_v36, %v11735_v31  ;;  %v11741_v27 = vpop.permute.xlu1 %4807 }
 0x856   : > { %v4894_v50 = vpop.permute.xlu0 %4893 }
 0x857   : > { %v11746_v10 = vadd.f32 %v11656_v23, %v4894_v50  ;;  %5189 = vperm.xlu1 %6723, %v11157_v14   ;;  %v13147_v14 = vld [vmem:[#allocation240_spill] sm:$0xff] }
 0x858   : > { %5311 = vperm.xlu0 %6726, %v11205_v0  }
 0x859   : > { %v11752_v4 = vpop.permute.xlu1 %4815 }
 0x85a   : > { %v4902_v43 = vpop.permute.xlu0 %4901 }
 0x85b   : > { %v11755_v21 = vadd.f32 %v11656_v23, %v4902_v43  ;;  %5193 = vperm.xlu1 %6723, %v11165_v24   ;;  %v13133_v43 = vld [vmem:[#allocation222_spill] sm:$0xff] }
 0x85c   : > { %6728 = vset.pattern.permute.xlu0 %v12492_v2 }
 0x85d   : > { %5349 = vperm.xlu0 %6728, %v11168_v54  }
 0x85e   : > { %v11766_v0 = vpop.permute.xlu1 %4853 }
 0x85f   : > { %5201 = vperm.xlu1 %6723, %v11173_v7   ;;  %v4940_v38 = vpop.permute.xlu0 %4939  ;;  %v4254_v7 = vadd.f32 %v11529_v28, %v13128_v37  ;;  %v13137_v37 = vld [vmem:[#allocation234_spill] sm:$0xff] }
 0x860   : > { %v4991_v53 = vadd.f32 %v11761_v1, %v4940_v38  ;;  %v4265_v38 = vmax.f32 %v13134_v56, %v4252_v60  ;;  %v13140_v60 = vld [vmem:[#allocation236_spill] sm:$0xff]  ;;  %v13141_v56 = vld [vmem:[#allocation237_spill] sm:$0xff] }
 0x861   : > { %5361 = vperm.xlu0 %6728, %v13115_v25   ;;  %v13130_v25 = vld [vmem:[#allocation230_spill] sm:$0xff] }
 0x862   : > { %v11774_v24 = vmax.f32 %v4922_v19, %v4991_v53  ;;  %v11776_v34 = vpop.permute.xlu1 %4861  ;;  %v4255_v39 = vadd.f32 %v11529_v28, %v13130_v25  ;;  %v13135_v53 = vld [vmem:[#allocation233_spill] sm:$0xff]  ;;  %v4334_v25 = vadd.f32 %v11543_v52, %v13138_v8  ;;  %v13145_v8 = vld [vmem:[#allocation242_spill] sm:$0xff] }
 0x863   : > { %5209 = vperm.xlu1 %6723, %v11181_v46   ;;  %v4952_v26 = vpop.permute.xlu0 %4951  ;;  %v4257_v46 = vadd.f32 %v11529_v28, %v13131_v9 }
 0x864   : > { %v4994_v54 = vadd.f32 %v11761_v1, %v4952_v26  ;;  %v13136_v26 = vld [vmem:[#allocation221_spill] sm:$0xff] }
 0x865   : > { %5369 = vperm.xlu0 %6728, %v11184_v59   ;;  %v4267_v59 = vmax.f32 %v13133_v43, %v4254_v7  ;;  %v13139_v7 = vld [vmem:[#allocation220_spill] sm:$0xff]  ;;  %v4336_v43 = vadd.f32 %v11543_v52, %v13140_v60  ;;  %v13146_v60 = vld [vmem:[#allocation218_spill] sm:$0xff] }
 0x866   : > { %v11787_v55 = vmax.f32 %v4925_v33, %v4994_v54  ;;  %v11789_v19 = vpop.permute.xlu1 %4865  ;;  %v4261_v33 = vadd.f32 %v11529_v28, %v13135_v53  ;;  %v4268_v54 = vmax.f32 %v13136_v26, %v4255_v39  ;;  %v4270_v42 = vmax.f32 %v13139_v7, %v4257_v46  ;;  %v13142_v53 = vld [vmem:[#allocation238_spill] sm:$0xff]  ;;  %v13143_v26 = vld [vmem:[#allocation219_spill] sm:$0xff] }
 0x867   : > { %5217 = vperm.xlu1 %6723, %v13119_v61   ;;  %v4960_v32 = vpop.permute.xlu0 %4959  ;;  %v4263_v61 = vadd.f32 %v11529_v28, %v13137_v37  ;;  %v4339_v39 = vadd.f32 %v11543_v52, %v13142_v53  ;;  %v4272_v37 = vmax.f32 %v13143_v26, %v4259_v62  ;;  %v4416_v46 = vadd.f32 %v11553_v5, %v13145_v8  ;;  %v13150_v62 = vld [vmem:[#allocation217_spill] sm:$0xff]  ;;  %v13151_v8 = vld [vmem:[#allocation250_spill] sm:$0xff] }
 0x868   : > { %v4996_v50 = vadd.f32 %v11761_v1, %v4960_v32  ;;  %v4274_v2 = vmax.f32 %v13146_v60, %v4261_v33  ;;  %v4345_v53 = vadd.f32 %v11543_v52, %v13148_v47 }
 0x869   : > { %5377 = vperm.xlu0 %6728, %v11192_v11   ;;  %v4337_v11 = vadd.f32 %v11543_v52, %v13141_v56  ;;  %v4343_v56 = vadd.f32 %v11543_v52, %v13147_v14  ;;  %v4276_v26 = vmax.f32 %v13150_v62, %v4263_v61  ;;  %v11843_v60 = vmax.f32 %v4270_v42, %v4339_v39  ;;  %v11864_v39 = vld [vmem:[%s11154_s19 + $0xc8] sm:$0xff] }
 0x86a   : > { %v11807_v9 = vmax.f32 %v4927_v30, %v4996_v50  ;;  %v11809_v32 = vpop.permute.xlu1 %4873  ;;  %v13144_v30 = vld [vmem:[#allocation239_spill] sm:$0xff]  ;;  %v13153_v61 = vmov 13  }
 0x86b   : > { %5225 = vperm.xlu1 %6723, %v13122_v35   ;;  %v4968_v28 = vpop.permute.xlu0 %4967  ;;  %v4341_v50 = vadd.f32 %v11543_v52, %v13144_v30  ;;  %v13149_v35 = vld [vmem:[#allocation243_spill] sm:$0xff]  ;;  %v4347_v30 = vmax.f32 %v4265_v38, %v4334_v25  ;;  %v4349_v52 = vmax.f32 %v4267_v59, %v4336_v43  ;;  %v4350_v47 = vmax.f32 %v4268_v54, %v4337_v11 }
 0x86c   : > { %v4998_v7 = vadd.f32 %v11761_v1, %v4968_v28  ;;  %v4418_v51 = vadd.f32 %v11553_v5, %v13149_v35  ;;  %v4498_v28 = vadd.f32 %v11568_v22, %v13151_v8  ;;  %v13154_v8 = vld [vmem:[#allocation258_spill] sm:$0xff]  ;;  %v11857_v59 = vmax.f32 %v4274_v2, %v4343_v56  ;;  %v13155_v43 = vld [vmem:[#allocation251_spill] sm:$0xff] }
 0x86d   : > { %5385 = vperm.xlu0 %6728, %v11200_v13   ;;  %v13152_v13 = vld [vmem:[#allocation244_spill] sm:$0xff]  ;;  %v11848_v25 = vmax.f32 %v4272_v37, %v4341_v50  ;;  %v4429_v62 = vmax.f32 %v4347_v30, %v4416_v46  ;;  %v4580_v36 = vadd.f32 %v11579_v58, %v13154_v8  ;;  %v11859_v54 = vmax.f32 %v4276_v26, %v4345_v53  ;;  %v13156_v50 = vld [vmem:[#allocation267_spill] sm:$0xff]  ;;  %v13158_v53 = vld [vmem:[#allocation245_spill] sm:$0xff] }
 0x86e   : > { %v11839_v33 = vmax.f32 %v4929_v63, %v4998_v7  ;;  %v11841_v14 = vpop.permute.xlu1 %4881  ;;  %v4419_v35 = vadd.f32 %v11553_v5, %v13152_v13  ;;  %v11854_v63 = vld [vmem:[%s11154_s19 + $0x68] sm:$0xff]  ;;  %v4431_v42 = vmax.f32 %v4349_v52, %v4418_v51  ;;  %v4500_v11 = vadd.f32 %v11568_v22, %v13155_v43  ;;  %v13159_v30 = vld [vmem:[#allocation246_spill] sm:$0xff]  ;;  %v11892_v8 = vld [vmem:[%s11154_s19 + $0x78] sm:$0xff] }
 0x86f   : > { %6725 = vset.pattern.permute.xlu1 %v13153_v61  ;;  %v4976_v38 = vpop.permute.xlu0 %4975  ;;  %v4511_v37 = vmax.f32 %v4429_v62, %v4498_v28  ;;  %v4662_v46 = vadd.f32 %v11589_v29, %v13156_v50  ;;  %v13157_v7 = vmax.f32 %v11743_v3, %v11746_v10  ;;  %v4421_v26 = vadd.f32 %v11553_v5, %v13158_v53  ;;  %v13160_v13 = vld [vmem:[#allocation259_spill] sm:$0xff]  ;;  %v13162_v10 = vld [vmem:[#allocation278_spill] sm:$0xff]  ;;  %v13163_v43 = vld [vmem:[#allocation252_spill] sm:$0xff] }
 0x870   : > { %v5000_v31 = vadd.f32 %v11761_v1, %v4976_v38  ;;  %5263 = vperm.xlu1 %6725, %v11854_v63   ;;  %v4432_v51 = vmax.f32 %v4350_v47, %v4419_v35  ;;  %v11880_v52 = vadd.f32 %v11553_v5, %v13159_v30  ;;  %v4582_v28 = vadd.f32 %v11579_v58, %v13160_v13  ;;  %v13161_v38 = vld [vmem:[#allocation248_spill] sm:$0xff]  ;;  %v13166_v13 = vld [vmem:[#allocation249_spill] sm:$0xff] }
 0x871   : > { %5393 = vperm.xlu0 %6728, %v11864_v39   ;;  %v11886_v62 = vadd.f32 %v11553_v5, %v13161_v38  ;;  %v4593_v3 = vmax.f32 %v4511_v37, %v4580_v36  ;;  %v4744_v47 = vadd.f32 %v11608_v18, %v13162_v10  ;;  %v4501_v50 = vadd.f32 %v11568_v22, %v13163_v43  ;;  %v13165_v36 = vld [vmem:[#allocation72_spill] sm:$0xff] }
 0x872   : > { %v11872_v2 = vmax.f32 %v13157_v7, %v5000_v31  ;;  %v11874_v56 = vpop.permute.xlu1 %4889  ;;  %v4513_v31 = vmax.f32 %v4431_v42, %v4500_v11  ;;  %v13164_v7 = vld [vmem:[#allocation269_spill] sm:$0xff]  ;;  %v12494_v30 = vmov 15   ;;  %v11902_v37 = vrot.slane %v11636_v15, %v13165_v36 }
 0x873   : > { %v4984_v61 = vpop.permute.xlu0 %4983  ;;  %v4664_v53 = vadd.f32 %v11589_v29, %v13164_v7  ;;  %v4675_v38 = vmax.f32 %v4593_v3, %v4662_v46  ;;  %v4826_v42 = vadd.f32 %v11628_v6, %v11642_v57  ;;  %v13167_v11 = vmax.f32 %v11660_v16, %v11755_v21  ;;  %v6734_v7 = vld [vmem:[%s11154_s19 + $0x70] sm:$0xff]  ;;  %v13177_v16 = vld [vmem:[#allocation282_spill] sm:$0xff] }
 0x874   : > { %v5002_v35 = vadd.f32 %v11761_v1, %v4984_v61  ;;  %5271 = vperm.xlu1 %6725, %v11892_v8   ;;  %v11906_v61 = vadd.f32 %v11553_v5, %v13166_v13  ;;  %v4434_v36 = vmax.f32 %v11843_v60, %v4421_v26  ;;  %v4583_v5 = vadd.f32 %v11579_v58, %v13168_v44  ;;  %v13169_v13 = vld [vmem:[#allocation280_spill] sm:$0xff]  ;;  %v13170_v26 = vld [vmem:[#allocation253_spill] sm:$0xff] }
 0x875   : > { %6730 = vset.pattern.permute.xlu0 %v12494_v30  ;;  %v4595_v30 = vmax.f32 %v4513_v31, %v4582_v28  ;;  %v4746_v46 = vadd.f32 %v11608_v18, %v13169_v13  ;;  %v4436_v57 = vmax.f32 %v11848_v25, %v11880_v52  ;;  %v4757_v21 = vmax.f32 %v4675_v38, %v4744_v47  ;;  %v13171_v52 = vld [vmem:[#allocation271_spill] sm:$0xff]  ;;  %v6738_v13 = vld [vmem:[%s11154_s19 + $0x98] sm:$0xff] }
 0x876   : > { %v11913_v10 = vmax.f32 %v13167_v11, %v5002_v35  ;;  %v11915_v43 = vpop.permute.xlu1 %4897  ;;  %5431 = vperm.xlu0 %6730, %v6734_v7   ;;  %v4908_v3 = vadd.f32 %v11656_v23, %v11766_v0  ;;  %v11930_v35 = vld [vmem:[%s11154_s19 + $0x80] sm:$0xff]  ;;  %v4514_v44 = vmax.f32 %v4432_v51, %v4501_v50  ;;  %v4503_v28 = vadd.f32 %v11568_v22, %v13170_v26  ;;  %v6736_v7 = vld [vmem:[%s11154_s19 + $0x88] sm:$0xff]  ;;  %v13173_v26 = vld [vmem:[#allocation281_spill] sm:$0xff] }
 0x877   : > { %v4677_v31 = vmax.f32 %v4595_v30, %v4664_v53  ;;  %v4665_v0 = vadd.f32 %v11589_v29, %v13171_v52  ;;  %v4839_v47 = vmax.f32 %v4757_v21, %v4826_v42  ;;  %v4828_v38 = vadd.f32 %v11628_v6, %v11667_v17  ;;  %v13172_v50 = vld [vmem:[#allocation263_spill] sm:$0xff]  ;;  %v11955_v21 = vld [vmem:[%s11154_s19 + $0x90] sm:$0xff] }
 0x878   : > { %5275 = vperm.xlu1 %6725, %v11930_v35   ;;  %v5022_v60 = vpop.permute.xlu0 %5021  ;;  %v4596_v51 = vmax.f32 %v4514_v44, %v4583_v5  ;;  %v4585_v53 = vadd.f32 %v11579_v58, %v13172_v50  ;;  %v4747_v25 = vadd.f32 %v11608_v18, %v13173_v26  ;;  %v4910_v42 = vadd.f32 %v11656_v23, %v11776_v34  ;;  %v13174_v44 = vld [vmem:[#allocation255_spill] sm:$0xff] }
 0x879   : > { %v11936_v11 = vadd.f32 %v11902_v37, %v5022_v60  ;;  %v4759_v30 = vmax.f32 %v4677_v31, %v4746_v46  ;;  %v4921_v52 = vmax.f32 %v4839_v47, %v4908_v3  ;;  %v4516_v46 = vmax.f32 %v4434_v36, %v4503_v28  ;;  %v13176_v28 = vld [vmem:[#allocation264_spill] sm:$0xff] }
 0x87a   : > { %5443 = vperm.xlu0 %6730, %v6736_v7   ;;  %v4505_v31 = vadd.f32 %v11568_v22, %v13174_v44  ;;  %v13175_v7 = vld [vmem:[#allocation272_spill] sm:$0xff]  ;;  %v4678_v3 = vmax.f32 %v4596_v51, %v4665_v0  ;;  %v4829_v47 = vadd.f32 %v11628_v6, %v11692_v41  ;;  %v4587_v44 = vadd.f32 %v11579_v58, %v13176_v28 }
 0x87b   : > { %v4936_v60 = vpop.permute.xlu1 %4935  ;;  %v4667_v50 = vadd.f32 %v11589_v29, %v13175_v7  ;;  %v4841_v34 = vmax.f32 %v4759_v30, %v4828_v38  ;;  %v4598_v36 = vmax.f32 %v4516_v46, %v4585_v53  ;;  %v4749_v7 = vadd.f32 %v11608_v18, %v13177_v16  ;;  %v11980_v30 = vld [vmem:[%s11154_s19 + $0xa0] sm:$0xff] }
 0x87c   : > { %v4990_v17 = vadd.f32 %v11761_v1, %v4936_v60  ;;  %5283 = vperm.xlu1 %6725, %v11955_v21   ;;  %v5034_v5 = vpop.permute.xlu0 %5033  ;;  %v4760_v0 = vmax.f32 %v4678_v3, %v4747_v25  ;;  %v4911_v41 = vadd.f32 %v11656_v23, %v11789_v19  ;;  %v13179_v25 = vld [vmem:[#allocation273_spill] sm:$0xff] }
 0x87d   : > { %v11963_v26 = vadd.f32 %v11902_v37, %v5034_v5  ;;  %v4923_v38 = vmax.f32 %v4841_v34, %v4910_v42  ;;  %v4669_v42 = vadd.f32 %v11589_v29, %v13179_v25  ;;  %v6740_v34 = vld [vmem:[%s11154_s19 + $0xa8] sm:$0xff] }
 0x87e   : > { %v11967_v60 = vmax.f32 %v4921_v52, %v4990_v17  ;;  %5451 = vperm.xlu0 %6730, %v6738_v13   ;;  %v4518_v13 = vmax.f32 %v4436_v57, %v4505_v31  ;;  %v13178_v52 = vld [vmem:[#allocation256_spill] sm:$0xff]  ;;  %v4680_v17 = vmax.f32 %v4598_v36, %v4667_v50  ;;  %v4842_v19 = vmax.f32 %v4760_v0, %v4829_v47  ;;  %v13180_v31 = vld [vmem:[#allocation265_spill] sm:$0xff] }
 0x87f   : > { %v5089_v5 = vmax.f32 %v11787_v55, %v11963_v26  ;;  %v4944_v48 = vpop.permute.xlu1 %4943  ;;  %v4507_v16 = vadd.f32 %v11568_v22, %v13178_v52  ;;  %v4589_v28 = vadd.f32 %v11579_v58, %v13180_v31  ;;  %v13181_v52 = vld [vmem:[#allocation284_spill] sm:$0xff]  ;;  %v6742_v36 = vld [vmem:[%s11154_s19 + $0xb8] sm:$0xff] }
 0x880   : > { %v4992_v51 = vadd.f32 %v11761_v1, %v4944_v48  ;;  %5291 = vperm.xlu1 %6725, %v11980_v30   ;;  %v5042_v53 = vpop.permute.xlu0 %5041  ;;  %v4831_v48 = vadd.f32 %v11628_v6, %v11713_v40  ;;  %v4600_v57 = vmax.f32 %v4518_v13, %v4587_v44  ;;  %v4762_v50 = vmax.f32 %v4680_v17, %v4749_v7  ;;  %v13183_v17 = vld [vmem:[#allocation257_spill] sm:$0xff] }
 0x881   : > { %v11986_v46 = vadd.f32 %v11902_v37, %v5042_v53  ;;  %v4751_v47 = vadd.f32 %v11608_v18, %v13181_v52  ;;  %v4924_v0 = vmax.f32 %v4842_v19, %v4911_v41  ;;  %v4913_v40 = vadd.f32 %v11656_v23, %v11809_v32 }
 0x882   : > { %v11992_v3 = vmax.f32 %v4923_v38, %v4992_v51  ;;  %5459 = vperm.xlu0 %6730, %v6740_v34   ;;  %v12005_v51 = vld [vmem:[%s11154_s19 + $0xb0] sm:$0xff]  ;;  %v13182_v7 = vmax.f32 %v11857_v59, %v11886_v62  ;;  %v4509_v25 = vadd.f32 %v11568_v22, %v13183_v17  ;;  %v13184_v34 = vld [vmem:[#allocation274_spill] sm:$0xff]  ;;  %v4682_v32 = vmax.f32 %v4600_v57, %v4669_v42 }
 0x883   : > { %v4948_v53 = vpop.permute.xlu1 %4947  ;;  %v4671_v41 = vadd.f32 %v11589_v29, %v13184_v34  ;;  %v4844_v31 = vmax.f32 %v4762_v50, %v4831_v48  ;;  %v13185_v62 = vld [vmem:[#allocation266_spill] sm:$0xff] }
 0x884   : > { %v4993_v38 = vadd.f32 %v11761_v1, %v4948_v53  ;;  %5299 = vperm.xlu1 %6725, %v12005_v51   ;;  %v5050_v44 = vpop.permute.xlu0 %5049  ;;  %v4520_v13 = vmax.f32 %v13182_v7, %v4507_v16  ;;  %v4833_v53 = vadd.f32 %v11628_v6, %v11727_v12  ;;  %v4591_v22 = vadd.f32 %v11579_v58, %v13185_v62  ;;  %v12033_v50 = vld [vmem:[%s11154_s19 + $0xc0] sm:$0xff] }
 0x885   : > { %v12016_v19 = vadd.f32 %v11902_v37, %v5050_v44  ;;  %v4753_v16 = vadd.f32 %v11608_v18, %v11581_v45  ;;  %v4764_v42 = vmax.f32 %v4682_v32, %v4751_v47  ;;  %v4926_v48 = vmax.f32 %v4844_v31, %v4913_v40  ;;  %v13187_v47 = vld [vmem:[#allocation276_spill] sm:$0xff] }
 0x886   : > { %v12020_v52 = vmax.f32 %v4924_v0, %v4993_v38  ;;  %5467 = vperm.xlu0 %6730, %v6742_v36   ;;  %v4602_v59 = vmax.f32 %v4520_v13, %v4589_v28  ;;  %v4915_v12 = vadd.f32 %v11656_v23, %v11841_v14  ;;  %v13186_v58 = vmax.f32 %v11859_v54, %v11906_v61 }
 0x887   : > { %v5093_v44 = vmax.f32 %v11839_v33, %v12016_v19  ;;  %v4956_v7 = vpop.permute.xlu1 %4955  ;;  %v4673_v40 = vadd.f32 %v11589_v29, %v13187_v47  ;;  %v4846_v38 = vmax.f32 %v4764_v42, %v4833_v53  ;;  %v4835_v14 = vadd.f32 %v11628_v6, %v11741_v27  ;;  %v13189_v53 = vld [vmem:[#allocation75_spill] sm:$0xff] }
 0x888   : > { %v4995_v57 = vadd.f32 %v11761_v1, %v4956_v7  ;;  %5307 = vperm.xlu1 %6725, %v12033_v50   ;;  %v5058_v28 = vpop.permute.xlu0 %5057  ;;  %v4522_v45 = vmax.f32 %v13186_v58, %v4509_v25  ;;  %v4684_v36 = vmax.f32 %v4602_v59, %v4671_v41  ;;  %v4755_v25 = vadd.f32 %v11608_v18, %v11610_v49 }
 0x889   : > { %v12040_v0 = vadd.f32 %v11902_v37, %v5058_v28  ;;  %v4928_v41 = vmax.f32 %v4846_v38, %v4915_v12  ;;  %v4917_v29 = vadd.f32 %v11656_v23, %v11874_v56  ;;  %v13188_v27 = vmov 14  }
 0x88a   : > { %v12046_v13 = vmax.f32 %v4926_v48, %v4995_v57  ;;  %5475 = vperm.xlu0 %6730, %v11864_v39   ;;  %v4604_v17 = vmax.f32 %v4522_v45, %v4591_v22  ;;  %v4766_v34 = vmax.f32 %v4684_v36, %v4753_v16  ;;  %v4837_v18 = vadd.f32 %v11628_v6, %v11752_v4 }
 0x88b   : > { %v5095_v54 = vmax.f32 %v11872_v2, %v12040_v0  ;;  %v4964_v61 = vpop.permute.xlu1 %4963  ;;  %v12061_v2 = vrot.slane %v11636_v15, %v13189_v53  ;;  %v4919_v42 = vadd.f32 %v11656_v23, %v11915_v43 }
 0x88c   : > { %v4997_v32 = vadd.f32 %v11761_v1, %v4964_v61  ;;  %6727 = vset.pattern.permute.xlu1 %v13188_v27  ;;  %v5066_v31 = vpop.permute.xlu0 %5065  ;;  %v4686_v59 = vmax.f32 %v4604_v17, %v4673_v40  ;;  %v4848_v62 = vmax.f32 %v4766_v34, %v4835_v14  ;;  %v13191_v14 = vmax.f32 %v11807_v9, %v11986_v46 }
 0x88d   : > { %v5084_v39 = vadd.f32 %v11902_v37, %v5066_v31  ;;  %5345 = vperm.xlu1 %6727, %v11854_v63   ;;  %v13192_v31 = vld [vmem:[#allocation76_spill] sm:$0xff] }
 0x88e   : > { %v12065_v49 = vmax.f32 %v4928_v41, %v4997_v32  ;;  %v4768_v16 = vmax.f32 %v4686_v59, %v4755_v25  ;;  %v4930_v7 = vmax.f32 %v4848_v62, %v4917_v29 }
 0x88f   : > { %v5097_v56 = vmax.f32 %v11913_v10, %v5084_v39  ;;  %v4972_v22 = vpop.permute.xlu1 %4971  ;;  %v13190_v10 = vmax.f32 %v11774_v24, %v11936_v11  ;;  %v12120_v39 = vrot.slane %v11636_v15, %v13192_v31 }
 0x890   : > { %v4999_v48 = vadd.f32 %v11761_v1, %v4972_v22  ;;  %v4850_v57 = vmax.f32 %v4768_v16, %v4837_v18 }
 0x891   : > { %5353 = vperm.xlu1 %6727, %v11892_v8   ;;  %v5104_v12 = vpop.permute.xlu0 %5103 }
 0x892   : > { %v12072_v28 = vmax.f32 %v4930_v7, %v4999_v48  ;;  %v5155_v6 = vadd.f32 %v12061_v2, %v5104_v12  ;;  %v4932_v58 = vmax.f32 %v4850_v57, %v4919_v42 }
 0x893   : > { %v4980_v4 = vpop.permute.xlu1 %4979 }
 0x894   : > { %v12078_v45 = vmax.f32 %v13190_v10, %v5155_v6  ;;  %v5001_v36 = vadd.f32 %v11761_v1, %v4980_v4 }
 0x895   : > { %5357 = vperm.xlu1 %6727, %v11930_v35   ;;  %v5116_v23 = vpop.permute.xlu0 %5115 }
 0x896   : > { %v12082_v43 = vmax.f32 %v4932_v58, %v5001_v36  ;;  %v5158_v0 = vadd.f32 %v12061_v2, %v5116_v23 }
 0x898   : > { %v12088_v47 = vmax.f32 %v5089_v5, %v5158_v0  ;;  %v5018_v40 = vpop.permute.xlu1 %5017 }
 0x899   : > { %v5072_v38 = vadd.f32 %v11902_v37, %v5018_v40  ;;  %5365 = vperm.xlu1 %6727, %v11955_v21   ;;  %v5124_v24 = vpop.permute.xlu0 %5123 }
 0x89a   : > { %v5160_v1 = vadd.f32 %v12061_v2, %v5124_v24 }
 0x89b   : > { %v5085_v11 = vmax.f32 %v11967_v60, %v5072_v38 }
 0x89c   : > { %v12097_v17 = vmax.f32 %v13191_v14, %v5160_v1  ;;  %v5026_v34 = vpop.permute.xlu1 %5025 }
 0x89d   : > { %v5074_v55 = vadd.f32 %v11902_v37, %v5026_v34  ;;  %5373 = vperm.xlu1 %6727, %v11980_v30   ;;  %v5132_v26 = vpop.permute.xlu0 %5131 }
 0x89e   : > { %v5162_v5 = vadd.f32 %v12061_v2, %v5132_v26 }
 0x89f   : > { %v5087_v61 = vmax.f32 %v11992_v3, %v5074_v55 }
 0x8a0   : > { %v12106_v25 = vmax.f32 %v5093_v44, %v5162_v5  ;;  %v5030_v60 = vpop.permute.xlu1 %5029 }
 0x8a1   : > { %v5075_v9 = vadd.f32 %v11902_v37, %v5030_v60  ;;  %5381 = vperm.xlu1 %6727, %v12005_v51   ;;  %v5140_v46 = vpop.permute.xlu0 %5139 }
 0x8a2   : > { %v5164_v41 = vadd.f32 %v12061_v2, %v5140_v46 }
 0x8a3   : > { %v5088_v29 = vmax.f32 %v12020_v52, %v5075_v9 }
 0x8a4   : > { %v12112_v32 = vmax.f32 %v5095_v54, %v5164_v41  ;;  %v5038_v27 = vpop.permute.xlu1 %5037  ;;  %v13193_v54 = vmov 15  }
 0x8a5   : > { %v5077_v3 = vadd.f32 %v11902_v37, %v5038_v27  ;;  %5389 = vperm.xlu1 %6727, %v12033_v50   ;;  %v5148_v33 = vpop.permute.xlu0 %5147 }
 0x8a6   : > { %v5166_v19 = vadd.f32 %v12061_v2, %v5148_v33 }
 0x8a7   : > { %v5090_v44 = vmax.f32 %v12046_v13, %v5077_v3 }
 0x8a8   : > { %v12122_v53 = vmax.f32 %v5097_v56, %v5166_v19  ;;  %v5046_v59 = vpop.permute.xlu1 %5045 }
 0x8a9   : > { %v5079_v52 = vadd.f32 %v11902_v37, %v5046_v59  ;;  %6729 = vset.pattern.permute.xlu1 %v13193_v54 }
 0x8aa   : > { %5427 = vperm.xlu1 %6729, %v11854_v63   ;;  %v5186_v62 = vpop.permute.xlu0 %5185 }
 0x8ab   : > { %v5092_v18 = vmax.f32 %v12065_v49, %v5079_v52  ;;  %v5237_v22 = vadd.f32 %v12120_v39, %v5186_v62 }
 0x8ac   : > { %v5054_v16 = vpop.permute.xlu1 %5053 }
 0x8ad   : > { %v5250_v13 = vmax.f32 %v12078_v45, %v5237_v22  ;;  %v5081_v7 = vadd.f32 %v11902_v37, %v5054_v16 }
 0x8ae   : > { %5435 = vperm.xlu1 %6729, %v11892_v8   ;;  %v5198_v56 = vpop.permute.xlu0 %5197 }
 0x8af   : > { %v5094_v42 = vmax.f32 %v12072_v28, %v5081_v7  ;;  %v5240_v48 = vadd.f32 %v12120_v39, %v5198_v56 }
 0x8b0   : > { %v5062_v12 = vpop.permute.xlu1 %5061 }
 0x8b1   : > { %v5253_v63 = vmax.f32 %v12088_v47, %v5240_v48  ;;  %v5083_v57 = vadd.f32 %v11902_v37, %v5062_v12  ;;  %v13194_v12 = vld [vmem:[#allocation78_spill] sm:$0xff] }
 0x8b2   : > { %5439 = vperm.xlu1 %6729, %v11930_v35   ;;  %v5206_v49 = vpop.permute.xlu0 %5205 }
 0x8b3   : > { %v5096_v6 = vmax.f32 %v12082_v43, %v5083_v57  ;;  %v5242_v4 = vadd.f32 %v12120_v39, %v5206_v49 }
 0x8b5   : > { %v5255_v58 = vmax.f32 %v12097_v17, %v5242_v4  ;;  %v5100_v8 = vpop.permute.xlu1 %5099 }
 0x8b6   : > { %v5154_v10 = vadd.f32 %v12061_v2, %v5100_v8  ;;  %5447 = vperm.xlu1 %6729, %v11955_v21   ;;  %v5214_v28 = vpop.permute.xlu0 %5213 }
 0x8b7   : > { %v5244_v45 = vadd.f32 %v12120_v39, %v5214_v28 }
 0x8b8   : > { %v12143_v36 = vmax.f32 %v5085_v11, %v5154_v10 }
 0x8b9   : > { %v5257_v37 = vmax.f32 %v12106_v25, %v5244_v45  ;;  %v5108_v35 = vpop.permute.xlu1 %5107 }
 0x8ba   : > { %v5156_v23 = vadd.f32 %v12061_v2, %v5108_v35  ;;  %5455 = vperm.xlu1 %6729, %v11980_v30   ;;  %v5222_v43 = vpop.permute.xlu0 %5221  ;;  %v12159_v30 = vrot.slane %v11636_v15, %v7840_v20 }
 0x8bb   : > { %v5246_v0 = vadd.f32 %v12120_v39, %v5222_v43 }
 0x8bc   : > { %v12149_v47 = vmax.f32 %v5087_v61, %v5156_v23 }
 0x8bd   : > { %v5259_v40 = vmax.f32 %v12112_v32, %v5246_v0  ;;  %v5112_v21 = vpop.permute.xlu1 %5111 }
 0x8be   : > { %v5157_v38 = vadd.f32 %v12061_v2, %v5112_v21  ;;  %5463 = vperm.xlu1 %6729, %v12005_v51   ;;  %v5230_v24 = vpop.permute.xlu0 %5229 }
 0x8bf   : > { %v5248_v1 = vadd.f32 %v12120_v39, %v5230_v24 }
 0x8c0   : > { %v12155_v11 = vmax.f32 %v5088_v29, %v5157_v38 }
 0x8c1   : > { %v5261_v14 = vmax.f32 %v12122_v53, %v5248_v1  ;;  %v5120_v17 = vpop.permute.xlu1 %5119 }
 0x8c2   : > { %v5159_v34 = vadd.f32 %v12061_v2, %v5120_v17  ;;  %5471 = vperm.xlu1 %6729, %v12033_v50  }
 0x8c3   : > { %v5268_v55 = vpop.permute.xlu0 %5267 }
 0x8c4   : > { %v12164_v26 = vmax.f32 %v5090_v44, %v5159_v34  ;;  %v5319_v51 = vadd.f32 %v12159_v30, %v5268_v55 }
 0x8c5   : > { %v5128_v5 = vpop.permute.xlu1 %5127 }
 0x8c6   : > { %v12167_v61 = vmax.f32 %v5250_v13, %v5319_v51  ;;  %v5161_v25 = vadd.f32 %v12061_v2, %v5128_v5 }
 0x8c7   : > { %v5280_v60 = vpop.permute.xlu0 %5279 }
 0x8c8   : > { %v12170_v9 = vmax.f32 %v5092_v18, %v5161_v25  ;;  %v5322_v46 = vadd.f32 %v12159_v30, %v5280_v60 }
 0x8c9   : > { %v5136_v41 = vpop.permute.xlu1 %5135 }
 0x8ca   : > { %v12173_v29 = vmax.f32 %v5253_v63, %v5322_v46  ;;  %v5163_v50 = vadd.f32 %v12061_v2, %v5136_v41  ;;  %v12197_v63 = vrot.slane %v11636_v15, %v13194_v12 }
 0x8cb   : > { %v5288_v32 = vpop.permute.xlu0 %5287 }
 0x8cc   : > { %v12176_v27 = vmax.f32 %v5094_v42, %v5163_v50  ;;  %v5324_v3 = vadd.f32 %v12159_v30, %v5288_v32  ;;  %v13195_v50 = vld [vmem:[#allocation80_spill] sm:$0xff] }
 0x8cd   : > { %v5144_v33 = vpop.permute.xlu1 %5143  ;;  %v12227_v32 = vrot.slane %v11636_v15, %v13195_v50 }
 0x8ce   : > { %v12179_v19 = vmax.f32 %v5255_v58, %v5324_v3  ;;  %v5165_v44 = vadd.f32 %v12061_v2, %v5144_v33 }
 0x8cf   : > { %v5296_v31 = vpop.permute.xlu0 %5295 }
 0x8d0   : > { %v12182_v53 = vmax.f32 %v5096_v6, %v5165_v44  ;;  %v5326_v59 = vadd.f32 %v12159_v30, %v5296_v31 }
 0x8d2   : > { %v12185_v52 = vmax.f32 %v5257_v37, %v5326_v59  ;;  %v5182_v54 = vpop.permute.xlu1 %5181 }
 0x8d3   : > { %v5236_v62 = vadd.f32 %v12120_v39, %v5182_v54  ;;  %v5304_v18 = vpop.permute.xlu0 %5303 }
 0x8d4   : > { %v5328_v22 = vadd.f32 %v12159_v30, %v5304_v18 }
 0x8d5   : > { %v5249_v16 = vmax.f32 %v12143_v36, %v5236_v62 }
 0x8d6   : > { %v12190_v13 = vmax.f32 %v5259_v40, %v5328_v22  ;;  %v5190_v7 = vpop.permute.xlu1 %5189 }
 0x8d7   : > { %v5238_v2 = vadd.f32 %v12120_v39, %v5190_v7  ;;  %v5312_v56 = vpop.permute.xlu0 %5311 }
 0x8d8   : > { %v5330_v42 = vadd.f32 %v12159_v30, %v5312_v56 }
 0x8d9   : > { %v5251_v48 = vmax.f32 %v12149_v47, %v5238_v2 }
 0x8da   : > { %v12199_v57 = vmax.f32 %v5261_v14, %v5330_v42  ;;  %v5194_v49 = vpop.permute.xlu1 %5193 }
 0x8db   : > { %v5239_v6 = vadd.f32 %v12120_v39, %v5194_v49 }
 0x8dc   : > { %v5350_v4 = vpop.permute.xlu0 %5349 }
 0x8dd   : > { %v5252_v58 = vmax.f32 %v12155_v11, %v5239_v6  ;;  %v5401_v8 = vadd.f32 %v12197_v63, %v5350_v4 }
 0x8de   : > { %v5202_v10 = vpop.permute.xlu1 %5201 }
 0x8df   : > { %v5414_v28 = vmax.f32 %v12167_v61, %v5401_v8  ;;  %v5241_v45 = vadd.f32 %v12120_v39, %v5202_v10 }
 0x8e0   : > { %v5362_v36 = vpop.permute.xlu0 %5361 }
 0x8e1   : > { %v5254_v37 = vmax.f32 %v12164_v26, %v5241_v45  ;;  %v5404_v35 = vadd.f32 %v12197_v63, %v5362_v36 }
 0x8e2   : > { %v5210_v23 = vpop.permute.xlu1 %5209 }
 0x8e3   : > { %v5417_v43 = vmax.f32 %v12173_v29, %v5404_v35  ;;  %v5243_v0 = vadd.f32 %v12120_v39, %v5210_v23 }
 0x8e4   : > { %v5370_v47 = vpop.permute.xlu0 %5369 }
 0x8e5   : > { %v5256_v40 = vmax.f32 %v12170_v9, %v5243_v0  ;;  %v5406_v21 = vadd.f32 %v12197_v63, %v5370_v47 }
 0x8e6   : > { %v5218_v38 = vpop.permute.xlu1 %5217 }
 0x8e7   : > { %v5419_v24 = vmax.f32 %v12179_v19, %v5406_v21  ;;  %v5245_v1 = vadd.f32 %v12120_v39, %v5218_v38 }
 0x8e8   : > { %v5378_v11 = vpop.permute.xlu0 %5377 }
 0x8e9   : > { %v5258_v14 = vmax.f32 %v12176_v27, %v5245_v1  ;;  %v5408_v17 = vadd.f32 %v12197_v63, %v5378_v11 }
 0x8ea   : > { %v5226_v34 = vpop.permute.xlu1 %5225 }
 0x8eb   : > { %v5421_v55 = vmax.f32 %v12185_v52, %v5408_v17  ;;  %v5247_v26 = vadd.f32 %v12120_v39, %v5226_v34 }
 0x8ec   : > { %v5386_v51 = vpop.permute.xlu0 %5385 }
 0x8ed   : > { %v5260_v5 = vmax.f32 %v12182_v53, %v5247_v26  ;;  %v5410_v61 = vadd.f32 %v12197_v63, %v5386_v51 }
 0x8ef   : > { %v5423_v25 = vmax.f32 %v12190_v13, %v5410_v61  ;;  %v5264_v60 = vpop.permute.xlu1 %5263 }
 0x8f0   : > { %v5318_v9 = vadd.f32 %v12159_v30, %v5264_v60  ;;  %v5394_v46 = vpop.permute.xlu0 %5393 }
 0x8f1   : > { %v5412_v41 = vadd.f32 %v12197_v63, %v5394_v46 }
 0x8f2   : > { %v12223_v29 = vmax.f32 %v5249_v16, %v5318_v9 }
 0x8f3   : > { %v5425_v39 = vmax.f32 %v12199_v57, %v5412_v41  ;;  %v5272_v27 = vpop.permute.xlu1 %5271 }
 0x8f4   : > { %v5320_v3 = vadd.f32 %v12159_v30, %v5272_v27 }
 0x8f5   : > { %v5432_v33 = vpop.permute.xlu0 %5431 }
 0x8f6   : > { %v5333_v19 = vmax.f32 %v5251_v48, %v5320_v3  ;;  %v5483_v44 = vadd.f32 %v12227_v32, %v5432_v33 }
 0x8f7   : > { %v5276_v31 = vpop.permute.xlu1 %5275 }
 0x8f8   : > { %v12232_v51 = vmax.f32 %v5414_v28, %v5483_v44   ;;  %v5321_v53 = vadd.f32 %v12159_v30, %v5276_v31 }
 0x8f9   : > { %v5444_v52 = vpop.permute.xlu0 %5443 }
 0x8fa   : > { %v13196_v59 = vmov %v12232_v51  ;;  %v5334_v54 = vmax.f32 %v5252_v58, %v5321_v53  ;;  %v5486_v62 = vadd.f32 %v12227_v32, %v5444_v52 }
 0x8fb   : > { %v5284_v15 = vpop.permute.xlu1 %5283  ;;  %5509 = vst [vmem:[#allocation3 + $0x70] sm:$0xff] (%p12270_p3), %v13196_v59 }
 0x8fc   : > { %v12236_v18 = vmax.f32 %v5417_v43, %v5486_v62   ;;  %v5323_v16 = vadd.f32 %v12159_v30, %v5284_v15 }
 0x8fd   : > { %v5452_v13 = vpop.permute.xlu0 %5451 }
 0x8fe   : > { %v13197_v22 = vmov %v12236_v18  ;;  %v5336_v7 = vmax.f32 %v5254_v37, %v5323_v16  ;;  %v5488_v2 = vadd.f32 %v12227_v32, %v5452_v13 }
 0x8ff   : > { %v5292_v56 = vpop.permute.xlu1 %5291  ;;  %5512 = vst [vmem:[#allocation3 + $0x88] sm:$0xff] (%p12270_p3), %v13197_v22 }
 0x900   : > { %v12240_v53 = vmax.f32 %v5419_v24, %v5488_v2   ;;  %v5325_v48 = vadd.f32 %v12159_v30, %v5292_v56 }
 0x901   : > { %v5460_v12 = vpop.permute.xlu0 %5459 }
 0x902   : > { %v13198_v42 = vmov %v12240_v53  ;;  %v5338_v57 = vmax.f32 %v5256_v40, %v5325_v48  ;;  %v5490_v49 = vadd.f32 %v12227_v32, %v5460_v12 }
 0x903   : > { %v5300_v6 = vpop.permute.xlu1 %5299  ;;  %5514 = vst [vmem:[#allocation3 + $0x98] sm:$0xff] (%p12270_p3), %v13198_v42 }
 0x904   : > { %v12244_v17 = vmax.f32 %v5421_v55, %v5490_v49   ;;  %v5327_v4 = vadd.f32 %v12159_v30, %v5300_v6 }
 0x905   : > { %v5468_v58 = vpop.permute.xlu0 %5467 }
 0x906   : > { %v13199_v8 = vmov %v12244_v17  ;;  %v5340_v10 = vmax.f32 %v5258_v14, %v5327_v4  ;;  %v5492_v28 = vadd.f32 %v12227_v32, %v5468_v58 }
 0x907   : > { %v5308_v45 = vpop.permute.xlu1 %5307  ;;  %5516 = vst [vmem:[#allocation3 + $0xa8] sm:$0xff] (%p12270_p3), %v13199_v8 }
 0x908   : > { %v12248_v61 = vmax.f32 %v5423_v25, %v5492_v28   ;;  %v5329_v37 = vadd.f32 %v12159_v30, %v5308_v45 }
 0x909   : > { %v5476_v35 = vpop.permute.xlu0 %5475 }
 0x90a   : > { %v13200_v36 = vmov %v12248_v61  ;;  %v5342_v23 = vmax.f32 %v5260_v5, %v5329_v37  ;;  %v5494_v43 = vadd.f32 %v12227_v32, %v5476_v35 }
 0x90b   :  { %5518 = vst [vmem:[#allocation3 + $0xb8] sm:$0xff] (%p12270_p3), %v13200_v36 }
 0x90c   : > { %v12252_v18 = vmax.f32 %v5425_v39, %v5494_v43   ;;  %v5346_v47 = vpop.permute.xlu1 %5345 }
 0x90d   : > { %v5400_v40 = vadd.f32 %v12197_v63, %v5346_v47 }
 0x90e   : > { %v13201_v0 = vmov %v12252_v18 }
 0x90f   : > { %v5413_v21 = vmax.f32 %v12223_v29, %v5400_v40  ;;  %5520 = vst [vmem:[#allocation3 + $0xc8] sm:$0xff] (%p12270_p3), %v13201_v0 }
 0x910   : > { %v5354_v38 = vpop.permute.xlu1 %5353 }
 0x911   : > { %v5402_v24 = vadd.f32 %v12197_v63, %v5354_v38 }
 0x913   : > { %v5415_v1 = vmax.f32 %v5333_v19, %v5402_v24 }
 0x914   : > { %v5358_v11 = vpop.permute.xlu1 %5357 }
 0x915   : > { %v5403_v14 = vadd.f32 %v12197_v63, %v5358_v11 }
 0x917   : > { %v5416_v17 = vmax.f32 %v5334_v54, %v5403_v14 }
 0x918   : > { %v5366_v30 = vpop.permute.xlu1 %5365 }
 0x919   : > { %v5405_v34 = vadd.f32 %v12197_v63, %v5366_v30 }
 0x91b   : > { %v5418_v55 = vmax.f32 %v5336_v7, %v5405_v34 }
 0x91c   : > { %v5374_v26 = vpop.permute.xlu1 %5373 }
 0x91d   : > { %v5407_v51 = vadd.f32 %v12197_v63, %v5374_v26 }
 0x91f   : > { %v5420_v5 = vmax.f32 %v5338_v57, %v5407_v51  ;;  %v13214_v51 = vmov %v13196_v59 }
 0x920   : > { %v5382_v61 = vpop.permute.xlu1 %5381 }
 0x921   : > { %v5409_v25 = vadd.f32 %v12197_v63, %v5382_v61  ;;  %v13205_v61 = vmov %v13200_v36 }
 0x923   : > { %v5422_v60 = vmax.f32 %v5340_v10, %v5409_v25 }
 0x924   : > { %v5390_v9 = vpop.permute.xlu1 %5389 }
 0x925   : > { %v5411_v46 = vadd.f32 %v12197_v63, %v5390_v9 }
 0x927   : > { %v5424_v41 = vmax.f32 %v5342_v23, %v5411_v46 }
 0x929   : > { %v5428_v29 = vpop.permute.xlu1 %5427 }
 0x92a   : > { %v5482_v50 = vadd.f32 %v12227_v32, %v5428_v29 }
 0x92c   : > { %v5495_v39 = vmax.f32 %v5413_v21, %v5482_v50  }
 0x92d   : > { %v5436_v27 = vpop.permute.xlu1 %5435 }
 0x92e   : > { %v5484_v3 = vadd.f32 %v12227_v32, %v5436_v27  ;;  %v13215_v56 = vmov %v5495_v39  ;;  %5508 = vst [vmem:[#allocation3 + $0x68] sm:$0xff] (%p12270_p3), %v5495_v39 }
 0x92f   :  { %v12318_v56 = vmov (%p12270_p3), -1e+30  }
 0x930   : > { %v5497_v33 = vmax.f32 %v5415_v1, %v5484_v3  }
 0x931   : > { %v5440_v19 = vpop.permute.xlu1 %5439 }
 0x932   : > { %v5485_v44 = vadd.f32 %v12227_v32, %v5440_v19  ;;  %v13213_v12 = vmov %v5497_v33  ;;  %5510 = vst [vmem:[#allocation3 + $0x78] sm:$0xff] (%p12270_p3), %v5497_v33 }
 0x934   : > { %v5498_v31 = vmax.f32 %v5416_v17, %v5485_v44   ;;  %v13207_v17 = vmov %v13199_v8 }
 0x935   : > { %v5448_v53 = vpop.permute.xlu1 %5447 }
 0x936   : > { %v5487_v52 = vadd.f32 %v12227_v32, %v5448_v53  ;;  %v13209_v53 = vmov %v13198_v42  ;;  %v13212_v34 = vmov %v5498_v31  ;;  %5511 = vst [vmem:[#allocation3 + $0x80] sm:$0xff] (%p12270_p3), %v5498_v31 }
 0x938   : > { %v5500_v54 = vmax.f32 %v5418_v55, %v5487_v52  }
 0x939   : > { %v5456_v62 = vpop.permute.xlu1 %5455 }
 0x93a   : > { %v5489_v63 = vadd.f32 %v12227_v32, %v5456_v62  ;;  %v13210_v3 = vmov %v5500_v54  ;;  %5513 = vst [vmem:[#allocation3 + $0x90] sm:$0xff] (%p12270_p3), %v5500_v54 }
 0x93c   : > { %v5502_v16 = vmax.f32 %v5420_v5, %v5489_v63  }
 0x93d   : > { %v5464_v15 = vpop.permute.xlu1 %5463 }
 0x93e   : > { %v5491_v18 = vadd.f32 %v12227_v32, %v5464_v15  ;;  %v13208_v35 = vmov %v5502_v16  ;;  %v13211_v15 = vmov %v13197_v22  ;;  %5515 = vst [vmem:[#allocation3 + $0xa0] sm:$0xff] (%p12270_p3), %v5502_v16 }
 0x940   : > { %v5504_v13 = vmax.f32 %v5422_v60, %v5491_v18   ;;  %v13203_v18 = vmov %v13201_v0  ;;  %4149 = sbr.rel (!%p12270_p3) target bundleno = 1783 (0x6f7), region = 114 }
 0x941   : > { %v5472_v7 = vpop.permute.xlu1 %5471 }
 0x942   : > { %v5493_v2 = vadd.f32 %v12227_v32, %v5472_v7  ;;  %v13206_v4 = vmov %v5504_v13  ;;  %5517 = vst [vmem:[#allocation3 + $0xb0] sm:$0xff] (%p12270_p3), %v5504_v13  ;;  %v12316_v32 = vmov (%p12270_p3), -1e+30  }
 0x944   : > { %v5506_v48 = vmax.f32 %v5424_v41, %v5493_v2  }
 0x946   : > { %v13204_v58 = vmov %v5506_v48  ;;  %5519 = vst [vmem:[#allocation3 + $0xc0] sm:$0xff] (%p12270_p3), %v5506_v48 }
 0x947 LB: > { %v7306_v59 = vmov 1   ;;  %v7307_v22 = vmov 0   ;;  %s6011_s23 = sshll.u32 %s7240_s2, 4  ;;  %v7308_v57 = vmov 2   ;;  %v7309_v49 = vmov 3   ;;  %v13216_v26 = vld [vmem:[#allocation69_spill] sm:$0xff]  ;;  %s7240_s2 = sphi %s12320_s2, %s5526_s2   ;;  %v7236_v56 = vphi %v12318_v56, %v13224_v56   ;;  %v7232_v32 = vphi %v12316_v32, %v13223_v32  }
 0x948   : > { %6745 = vset.pattern.permute.xlu1 %v7306_v59  ;;  %6744 = vset.pattern.permute.xlu0 %v7307_v22  ;;  %s5533_s26 = scalar_lea.vmem %s12413_s3, %s6011_s23  ;;  %v7310_v6 = vmov 4   ;;  %v7311_v8 = vmov 5   ;;  %v7312_v4 = vmov 6   ;;  %v7313_v58 = vmov 8   ;;  %s12375_s27 = scalar_lea.vmem [#allocation3], %s6011_s23  ;;  %v13217_v9 = vld [vmem:[#allocation71_spill] sm:$0xff] }
 0x949   : > { %v12337_v42 = vld [vmem:[%s5533_s26] sm:$0xff]  ;;  %v12341_v12 = vld [vmem:[%s5533_s26 + $0x8] sm:$0xff]  ;;  %v7314_v10 = vmov 9   ;;  %v7315_v28 = vmov 7   ;;  %v7316_v45 = vmov 11   ;;  %v7317_v36 = vmov 12  }
 0x94a   : > { %5555 = vperm.xlu1 %6745, %v12337_v42   ;;  %5538 = vperm.xlu0 %6744, %v12337_v42   ;;  %v7318_v37 = vmov 14   ;;  %v7319_v35 = vmov 15   ;;  %v7320_v23 = vmov 10   ;;  %v7321_v43 = vmov 13   ;;  %v13218_v29 = vld [vmem:[#allocation72_spill] sm:$0xff]  ;;  %v13219_v3 = vld [vmem:[#allocation75_spill] sm:$0xff] }
 0x94b   : > { %v13220_v62 = vld [vmem:[#allocation76_spill] sm:$0xff]  ;;  %s5526_s2 = sadd.s32 1, %s7240_s2  }
 0x94c   : > { %p5523_p4 = scmp.ge.s32.totalorder %s5526_s2, 13  }
 0x94d   : > { %v5531_v34 = vld [vmem:[%s12375_s27] sm:$0xff] }
 0x94e   : > { %5559 = vperm.xlu1 %6745, %v12341_v12   ;;  %5543 = vperm.xlu0 %6744, %v12341_v12   ;;  %v5549_v51 = vrot.slane %v5531_v34, %v13216_v26  ;;  %v5565_v46 = vrot.slane %v5531_v34, %v13217_v9  ;;  %v5581_v50 = vrot.slane %v5531_v34, %v13218_v29 }
 0x94f   : > { %v5597_v33 = vrot.slane %v5531_v34, %v13219_v3  ;;  %v5613_v63 = vrot.slane %v5531_v34, %v13220_v62  ;;  %v5629_v48 = vrot.slane %v5531_v34, %v7840_v20 }
 0x952   : > { %6747 = vset.pattern.permute.xlu1 %v7308_v57  ;;  %6746 = vset.pattern.permute.xlu0 %v7308_v57  ;;  %v13221_v57 = vld [vmem:[#allocation78_spill] sm:$0xff] }
 0x953   : > { %5575 = vperm.xlu1 %6747, %v12341_v12   ;;  %5571 = vperm.xlu0 %6746, %v12337_v42  }
 0x957   : > { %6748 = vset.pattern.permute.xlu1 %v7309_v49  ;;  %6749 = vset.pattern.permute.xlu0 %v7309_v49  ;;  %v5645_v49 = vrot.slane %v5531_v34, %v13221_v57 }
 0x958   : > { %5587 = vperm.xlu1 %6748, %v12337_v42   ;;  %5591 = vperm.xlu0 %6749, %v12341_v12  }
 0x95c   : > { %6750 = vset.pattern.permute.xlu1 %v7310_v6  ;;  %6751 = vset.pattern.permute.xlu0 %v7311_v8 }
 0x95d   : > { %5603 = vperm.xlu1 %6750, %v12337_v42   ;;  %5619 = vperm.xlu0 %6751, %v12337_v42  }
 0x961   : > { %5607 = vperm.xlu1 %6750, %v12341_v12   ;;  %6754 = vset.pattern.permute.xlu0 %v7312_v4 }
 0x962   : > { %5639 = vperm.xlu0 %6754, %v12341_v12  }
 0x965   : > { %6752 = vset.pattern.permute.xlu1 %v7311_v8 }
 0x966   : > { %5623 = vperm.xlu1 %6752, %v12341_v12   ;;  %6756 = vset.pattern.permute.xlu0 %v7313_v58 }
 0x967   : > { %5667 = vperm.xlu0 %6756, %v12337_v42  }
 0x96a   : > { %6753 = vset.pattern.permute.xlu1 %v7312_v4 }
 0x96b   : > { %5635 = vperm.xlu1 %6753, %v12337_v42   ;;  %6759 = vset.pattern.permute.xlu0 %v7314_v10 }
 0x96c   : > { %5687 = vperm.xlu0 %6759, %v12341_v12  }
 0x96f   : > { %6755 = vset.pattern.permute.xlu1 %v7315_v28  ;;  %v13222_v28 = vld [vmem:[#allocation80_spill] sm:$0xff] }
 0x970   : > { %5651 = vperm.xlu1 %6755, %v12337_v42   ;;  %6761 = vset.pattern.permute.xlu0 %v7316_v45 }
 0x971   : > { %5715 = vperm.xlu0 %6761, %v12337_v42  }
 0x974   : > { %5655 = vperm.xlu1 %6755, %v12341_v12  }
 0x975   : > { %6764 = vset.pattern.permute.xlu0 %v7317_v36 }
 0x976   : > { %5735 = vperm.xlu0 %6764, %v12341_v12  }
 0x978   : > { %6757 = vset.pattern.permute.xlu1 %v7313_v58 }
 0x979   : > { %5671 = vperm.xlu1 %6757, %v12341_v12  }
 0x97a   : > { %6766 = vset.pattern.permute.xlu0 %v7318_v37 }
 0x97b   : > { %5763 = vperm.xlu0 %6766, %v12337_v42  }
 0x97d   : > { %6758 = vset.pattern.permute.xlu1 %v7314_v10 }
 0x97e   : > { %5683 = vperm.xlu1 %6758, %v12337_v42  }
 0x97f   : > { %6769 = vset.pattern.permute.xlu0 %v7319_v35 }
 0x980   : > { %5783 = vperm.xlu0 %6769, %v12341_v12  }
 0x982   : > { %6760 = vset.pattern.permute.xlu1 %v7320_v23 }
 0x983   : > { %5699 = vperm.xlu1 %6760, %v12337_v42  }
 0x987   : > { %5703 = vperm.xlu1 %6760, %v12341_v12  }
 0x98b   : > { %6762 = vset.pattern.permute.xlu1 %v7316_v45  ;;  %v5661_v45 = vrot.slane %v5531_v34, %v13222_v28 }
 0x98c   : > { %5719 = vperm.xlu1 %6762, %v12341_v12  }
 0x990   : > { %6763 = vset.pattern.permute.xlu1 %v7317_v36 }
 0x991   : > { %5731 = vperm.xlu1 %6763, %v12337_v42  }
 0x995   : > { %6765 = vset.pattern.permute.xlu1 %v7321_v43 }
 0x996   : > { %5747 = vperm.xlu1 %6765, %v12337_v42  }
 0x99a   : > { %5751 = vperm.xlu1 %6765, %v12341_v12  }
 0x99e   : > { %6767 = vset.pattern.permute.xlu1 %v7318_v37  ;;  %v5532_v37 = vld [vmem:[%s12375_s27 + $0x8] sm:$0xff] }
 0x99f   : > { %5767 = vperm.xlu1 %6767, %v12341_v12  }
 0x9a3   : > { %6768 = vset.pattern.permute.xlu1 %v7319_v35 }
 0x9a4   : > { %5779 = vperm.xlu1 %6768, %v12337_v42  }
 0x9c9   : > { %v5556_v0 = vpop.permute.xlu1 %5555  ;;  %v5539_v11 = vpop.permute.xlu0 %5538 }
 0x9ca   : > { %v5550_v60 = vadd.f32 %v5549_v51, %v5539_v11  ;;  %v5566_v52 = vadd.f32 %v5565_v46, %v5556_v0  ;;  %v5677_v0 = vrot.slane %v5532_v37, %v13216_v26 }
 0x9cc   : > { %v5552_v44 = vmax.f32 %v7236_v56, %v5550_v60  ;;  %v5709_v60 = vrot.slane %v5532_v37, %v13218_v29 }
 0x9cd   : > { %v5560_v47 = vpop.permute.xlu1 %5559  ;;  %v5544_v30 = vpop.permute.xlu0 %5543 }
 0x9ce   : > { %v5551_v61 = vadd.f32 %v5549_v51, %v5544_v30  ;;  %v5567_v27 = vadd.f32 %v5565_v46, %v5560_v47  ;;  %v5568_v18 = vmax.f32 %v5552_v44, %v5566_v52  ;;  %v5693_v30 = vrot.slane %v5532_v37, %v13217_v9 }
 0x9cf   : > { %v5741_v9 = vrot.slane %v5532_v37, %v13220_v62 }
 0x9d0   : > { %v5553_v41 = vmax.f32 %v7232_v32, %v5551_v61 }
 0x9d2   : > { %v5576_v40 = vpop.permute.xlu1 %5575  ;;  %v5572_v5 = vpop.permute.xlu0 %5571  ;;  %v5569_v31 = vmax.f32 %v5553_v41, %v5567_v27 }
 0x9d3   : > { %v5583_v53 = vadd.f32 %v5581_v50, %v5576_v40  ;;  %v5582_v54 = vadd.f32 %v5581_v50, %v5572_v5 }
 0x9d5   : > { %v5585_v2 = vmax.f32 %v5569_v31, %v5583_v53  ;;  %v5584_v59 = vmax.f32 %v5568_v18, %v5582_v54 }
 0x9d7   : > { %v5588_v21 = vpop.permute.xlu1 %5587  ;;  %v5592_v39 = vpop.permute.xlu0 %5591 }
 0x9d8   : > { %v5599_v15 = vadd.f32 %v5597_v33, %v5592_v39  ;;  %v5598_v13 = vadd.f32 %v5597_v33, %v5588_v21 }
 0x9da   : > { %v5601_v56 = vmax.f32 %v5585_v2, %v5599_v15  ;;  %v5600_v6 = vmax.f32 %v5584_v59, %v5598_v13 }
 0x9dc   : > { %v5604_v38 = vpop.permute.xlu1 %5603  ;;  %v5620_v16 = vpop.permute.xlu0 %5619 }
 0x9dd   : > { %v5614_v22 = vadd.f32 %v5613_v63, %v5604_v38  ;;  %v5630_v10 = vadd.f32 %v5629_v48, %v5620_v16 }
 0x9df   : > { %v5616_v58 = vmax.f32 %v5600_v6, %v5614_v22 }
 0x9e0   : > { %v5608_v24 = vpop.permute.xlu1 %5607 }
 0x9e1   : > { %v5615_v32 = vadd.f32 %v5613_v63, %v5608_v24  ;;  %v5640_v42 = vpop.permute.xlu0 %5639  ;;  %v5632_v21 = vmax.f32 %v5616_v58, %v5630_v10  ;;  %v5757_v63 = vrot.slane %v5532_v37, %v7840_v20 }
 0x9e2   : > { %v5647_v23 = vadd.f32 %v5645_v49, %v5640_v42 }
 0x9e3   : > { %v5617_v4 = vmax.f32 %v5601_v56, %v5615_v32  ;;  %v5773_v32 = vrot.slane %v5532_v37, %v13221_v57 }
 0x9e5   : > { %v5624_v1 = vpop.permute.xlu1 %5623 }
 0x9e6   : > { %v5631_v12 = vadd.f32 %v5629_v48, %v5624_v1  ;;  %v5668_v36 = vpop.permute.xlu0 %5667 }
 0x9e7   : > { %v5678_v34 = vadd.f32 %v5677_v0, %v5668_v36 }
 0x9e8   : > { %v5633_v35 = vmax.f32 %v5617_v4, %v5631_v12 }
 0x9ea   : > { %v5636_v14 = vpop.permute.xlu1 %5635  ;;  %v5649_v1 = vmax.f32 %v5633_v35, %v5647_v23 }
 0x9eb   : > { %v5646_v43 = vadd.f32 %v5645_v49, %v5636_v14  ;;  %v5688_v24 = vpop.permute.xlu0 %5687 }
 0x9ec   : > { %v5695_v50 = vadd.f32 %v5693_v30, %v5688_v24 }
 0x9ed   : > { %v5648_v51 = vmax.f32 %v5632_v21, %v5646_v43 }
 0x9ef   : > { %v5652_v17 = vpop.permute.xlu1 %5651 }
 0x9f0   : > { %v5662_v38 = vadd.f32 %v5661_v45, %v5652_v17  ;;  %v5716_v46 = vpop.permute.xlu0 %5715 }
 0x9f2   : > { %v5664_v61 = vmax.f32 %v5648_v51, %v5662_v38 }
 0x9f3   : > { %v5656_v55 = vpop.permute.xlu1 %5655 }
 0x9f4   : > { %v5663_v47 = vadd.f32 %v5661_v45, %v5656_v55  ;;  %v5725_v55 = vrot.slane %v5532_v37, %v13219_v3  ;;  %v5680_v17 = vmax.f32 %v5664_v61, %v5678_v34 }
 0x9f5   : > { %v5736_v33 = vpop.permute.xlu0 %5735 }
 0x9f6   : > { %v5665_v5 = vmax.f32 %v5649_v1, %v5663_v47  ;;  %v5726_v29 = vadd.f32 %v5725_v55, %v5716_v46 }
 0x9f8   : > { %v5672_v25 = vpop.permute.xlu1 %5671 }
 0x9f9   : > { %v5679_v11 = vadd.f32 %v5677_v0, %v5672_v25 }
 0x9fa   : > { %v5764_v16 = vpop.permute.xlu0 %5763 }
 0x9fb   : > { %v5681_v14 = vmax.f32 %v5665_v5, %v5679_v11 }
 0x9fd   : > { %v5684_v19 = vpop.permute.xlu1 %5683  ;;  %v5697_v25 = vmax.f32 %v5681_v14, %v5695_v50 }
 0x9fe   : > { %v5694_v26 = vadd.f32 %v5693_v30, %v5684_v19  ;;  %v5743_v19 = vadd.f32 %v5741_v9, %v5736_v33 }
 0x9ff   : > { %v5784_v62 = vpop.permute.xlu0 %5783 }
 0xa00   : > { %v5696_v53 = vmax.f32 %v5680_v17, %v5694_v26 }
 0xa02   : > { %v5700_v7 = vpop.permute.xlu1 %5699 }
 0xa03   : > { %v5710_v27 = vadd.f32 %v5709_v60, %v5700_v7  ;;  %v5789_v7 = vrot.slane %v5532_v37, %v13222_v28 }
 0xa05   : > { %v5712_v54 = vmax.f32 %v5696_v53, %v5710_v27  ;;  %v5791_v49 = vadd.f32 %v5789_v7, %v5784_v62 }
 0xa06   : > { %v5704_v8 = vpop.permute.xlu1 %5703 }
 0xa07   : > { %v5711_v39 = vadd.f32 %v5709_v60, %v5704_v8  ;;  %v5728_v2 = vmax.f32 %v5712_v54, %v5726_v29  ;;  %v5774_v8 = vadd.f32 %v5773_v32, %v5764_v16 }
 0xa09   : > { %v5713_v52 = vmax.f32 %v5697_v25, %v5711_v39 }
 0xa0b   : > { %v5720_v40 = vpop.permute.xlu1 %5719 }
 0xa0c   : > { %v5727_v44 = vadd.f32 %v5725_v55, %v5720_v40 }
 0xa0e   : > { %v5729_v15 = vmax.f32 %v5713_v52, %v5727_v44 }
 0xa10   : > { %v5732_v41 = vpop.permute.xlu1 %5731  ;;  %v5745_v59 = vmax.f32 %v5729_v15, %v5743_v19 }
 0xa11   : > { %v5742_v3 = vadd.f32 %v5741_v9, %v5732_v41 }
 0xa13   : > { %v5744_v22 = vmax.f32 %v5728_v2, %v5742_v3 }
 0xa15   : > { %v5748_v31 = vpop.permute.xlu1 %5747 }
 0xa16   : > { %v5758_v48 = vadd.f32 %v5757_v63, %v5748_v31 }
 0xa18   : > { %v5760_v6 = vmax.f32 %v5744_v22, %v5758_v48 }
 0xa19   : > { %v5752_v18 = vpop.permute.xlu1 %5751 }
 0xa1a   : > { %v5759_v13 = vadd.f32 %v5757_v63, %v5752_v18  ;;  %v5776_v45 = vmax.f32 %v5760_v6, %v5774_v8 }
 0xa1c   : > { %v5761_v56 = vmax.f32 %v5745_v59, %v5759_v13 }
 0xa1e   : > { %v5768_v42 = vpop.permute.xlu1 %5767 }
 0xa1f   : > { %v5775_v12 = vadd.f32 %v5773_v32, %v5768_v42 }
 0xa21   : > { %v5777_v4 = vmax.f32 %v5761_v56, %v5775_v12 }
 0xa22   :  { %5525 = sbr.rel (!%p5523_p4) target bundleno = 2375 (0x947), region = 125 }
 0xa23   : > { %v5793_v58 = vmax.f32 %v5777_v4, %v5791_v49   ;;  %v5780_v10 = vpop.permute.xlu1 %5779 }
 0xa24   : > { %v5790_v36 = vadd.f32 %v5789_v7, %v5780_v10 }
 0xa25   : > { %v13223_v32 = vmov %v5793_v58  ;;  %5795 = vst [vmem:[%s12414_s4 + $0x8] sm:$0xff] (%p5523_p4), %v5793_v58 }
 0xa26   : > { %v5792_v35 = vmax.f32 %v5776_v45, %v5790_v36  }
 0xa28   : > { %v13224_v56 = vmov %v5792_v35  ;;  %5794 = vst [vmem:[%s12414_s4] sm:$0xff] (%p5523_p4), %v5792_v35 }

</bundles_post_ra>
